<compile_context>
chip_gen: v5e
topology: v5e:2x2
jax: 0.10.0
libtpu: 0.0.40
codegen_flags: <defaults>
</compile_context>

<pallas_src>
import functools
import math

import jax
import jax.numpy as jnp
from jax.experimental import pallas as pl
from jax.experimental.pallas import tpu as pltpu

_VMEM_LIMIT = 32 * 1024 * 1024  # explicit scoped-VMEM cap (safe on v5e/v6e/v7x)


# ----------------------------------------------------------------------------
# helpers
# ----------------------------------------------------------------------------
def _softmax(x, axis):
    m = jnp.max(x, axis=axis, keepdims=True)
    e = jnp.exp(x - m)
    return e / jnp.sum(e, axis=axis, keepdims=True)


def _l2norm(x):
    # F.normalize-style (see correctness note: differs only for ~zero vectors)
    return x * jax.lax.rsqrt(jnp.sum(x * x, axis=-1, keepdims=True) + 1e-12)


def _tile(n, target):
    """Largest divisor of n that is <= target and legal as a block dim
    (multiple of 8 or equal to n)."""
    if n <= target:
        return n
    for t in range(min(n, target), 0, -1):
        if n % t == 0 and (t % 8 == 0 or t == n):
            return t
    return n


def _cparams():
    return pltpu.CompilerParams(dimension_semantics=("parallel",),
                                vmem_limit_bytes=_VMEM_LIMIT)


# ----------------------------------------------------------------------------
# Pallas kernels
# ----------------------------------------------------------------------------
def gru_kernel(x_ref, wih_ref, whh_ref, bih_ref, bhh_ref, o_ref, *,
               residual, normalize_input):
    """Fused (optional L2-norm) + single-layer GRU + (optional residual).

    x_ref/o_ref are batch-first blocks [Bb, T, D]; the input projection is
    hoisted out of the recurrence as ONE [Bb*T, Din] x [Din, 3H] MXU matmul,
    so only the small [Bb, H] x [H, 3H] recurrent matmul stays serial.
    """
    Bb, T, Din = x_ref.shape
    H = whh_ref.shape[0]

    x = x_ref[...]
    if normalize_input:
        x = _l2norm(x)

    gi_all = (jnp.dot(x.reshape(Bb * T, Din), wih_ref[...],
                      preferred_element_type=jnp.float32)
              + bih_ref[...]).reshape(Bb, T, 3 * H)

    whh = whh_ref[...]
    bhh = bhh_ref[...]
    h = jnp.zeros((Bb, H), jnp.float32)

    # T is a static, small compile-time constant -> fully unrolled recurrence.
    for t in range(T):
        gi = gi_all[:, t, :]
        gh = jnp.dot(h, whh, preferred_element_type=jnp.float32) + bhh
        r = jax.nn.sigmoid(gi[:, :H] + gh[:, :H])
        z = jax.nn.sigmoid(gi[:, H:2 * H] + gh[:, H:2 * H])
        n = jnp.tanh(gi[:, 2 * H:] + r * gh[:, 2 * H:])
        h = (1.0 - z) * n + z * h
        out_t = h + x[:, t, :] if residual else h
        o_ref[:, t:t + 1, :] = out_t[:, None, :]


def bottomup_kernel(video_ref, audio_ref, wv_ref, bv_ref, wa_ref, ba_ref,
                    we_ref, o_ref):
    """Fused Normalization(video) + audio-guided additive attention.

    video block [n, R, Dv], audio block [n, Da] -> [n, Dv]."""
    n, R, Dv = video_ref.shape
    Hatt = wv_ref.shape[1]

    v = _l2norm(video_ref[...])                                        # [n,R,Dv]
    a = audio_ref[...]                                                 # [n,Da]

    vproj = jnp.dot(v.reshape(n * R, Dv), wv_ref[...],
                    preferred_element_type=jnp.float32) + bv_ref[...]  # [n*R,H]
    aproj = jnp.dot(a, wa_ref[...],
                    preferred_element_type=jnp.float32) + ba_ref[...]  # [n,H]

    e = jnp.tanh(vproj.reshape(n, R, Hatt) + aproj[:, None, :])        # [n,R,H]
    # H-contraction on the MXU (frees VPU/XLU slots for tanh / softmax).
    s = jnp.dot(e.reshape(n * R, Hatt), we_ref[...],
                preferred_element_type=jnp.float32).reshape(n, R, 1)   # [n,R,1]

    m = jnp.max(s, axis=1, keepdims=True)
    p = jnp.exp(s - m)
    alpha = p / jnp.sum(p, axis=1, keepdims=True)                      # [n,R,1]
    o_ref[...] = jnp.sum(alpha * v, axis=1)                            # [n,Dv]


def dcn_predict_kernel(v_ref, a_ref, wl_ref, wv1_ref, wv2_ref, bv_ref,
                       wa1_ref, wa2_ref, ba_ref, w1v_ref, w1a_ref, b1_ref,
                       w2_ref, b2_ref, o_ref):
    """Fused DCN dual co-attention + PredictLayer MLP.

    The Wl / output projections are computed with B*T folded into the matmul
    M dim; the concat(Linear) layers use pre-split top/bottom weight halves so
    no concatenated intermediates are materialized.  Only the tiny [T, T]
    affinity / softmax stays per-batch (batched einsums).
    """
    Bb, T, Dv = v_ref.shape
    Da = a_ref.shape[-1]
    Cp = w2_ref.shape[1]

    v = v_ref[...]
    a = a_ref[...]
    v2 = v.reshape(Bb * T, Dv)
    a2 = a.reshape(Bb * T, Da)

    vw = jnp.dot(v2, wl_ref[...],
                 preferred_element_type=jnp.float32).reshape(Bb, T, Da)
    L = jnp.tanh(jnp.einsum('btd,bsd->bts', vw, a,
                            preferred_element_type=jnp.float32))       # [Bb,Tv,Ta]
    Av = _softmax(L, axis=-1)                                          # video->audio
    Aa = _softmax(L, axis=1)                                           # audio->video

    vatt = jnp.einsum('bts,bsd->btd', Av, a,
                      preferred_element_type=jnp.float32)              # [Bb,Tv,Da]
    aatt = jnp.einsum('bts,btd->bsd', Aa, v,
                      preferred_element_type=jnp.float32)              # [Bb,Ta,Dv]

    # tanh(Linear(concat([x, att]))) without the concat: W split into halves.
    v_out = jnp.tanh(
        jnp.dot(v2, wv1_ref[...], preferred_element_type=jnp.float32)
        + jnp.dot(vatt.reshape(Bb * T, Da), wv2_ref[...],
                  preferred_element_type=jnp.float32)
        + bv_ref[...])                                                 # [Bb*T,Dv]
    a_out = jnp.tanh(
        jnp.dot(a2, wa1_ref[...], preferred_element_type=jnp.float32)
        + jnp.dot(aatt.reshape(Bb * T, Dv), wa2_ref[...],
                  preferred_element_type=jnp.float32)
        + ba_ref[...])                                                 # [Bb*T,Da]

    # PredictLayer 2-layer MLP, concat-free; W2/b2 are lane-dense (128 cols).
    h = jnp.maximum(
        jnp.dot(v_out, w1v_ref[...], preferred_element_type=jnp.float32)
        + jnp.dot(a_out, w1a_ref[...], preferred_element_type=jnp.float32)
        + b1_ref[...], 0.0)
    score = jnp.dot(h, w2_ref[...],
                    preferred_element_type=jnp.float32) + b2_ref[...]  # [Bb*T,Cp]
    o_ref[...] = score.reshape(Bb, T, Cp)


# ----------------------------------------------------------------------------
# wrappers
# ----------------------------------------------------------------------------
def gru_forward(x, p, *, residual=True, normalize_input=False, b_target=8):
    """x: [B, T, Din] -> [B, T, H] with optional fused l2norm / residual."""
    B, T, Din = x.shape
    H = p["whh"].shape[0]
    if residual:
        assert Din == H, "residual embeddings require Din == H"
    Bb = _tile(B, b_target)
    kern = functools.partial(gru_kernel, residual=residual,
                             normalize_input=normalize_input)
    return pl.pallas_call(
        kern,
        grid=(B // Bb,),
        out_shape=jax.ShapeDtypeStruct((B, T, H), jnp.float32),
        in_specs=[
            pl.BlockSpec((Bb, T, Din), lambda i: (i, 0, 0)),
            pl.BlockSpec((Din, 3 * H), lambda i: (0, 0)),
            pl.BlockSpec((H, 3 * H), lambda i: (0, 0)),
            pl.BlockSpec((1, 3 * H), lambda i: (0, 0)),
            pl.BlockSpec((1, 3 * H), lambda i: (0, 0)),
        ],
        out_specs=pl.BlockSpec((Bb, T, H), lambda i: (i, 0, 0)),
        compiler_params=_cparams(),
    )(x, p["wih"], p["whh"], p["bih"], p["bhh"])


def bottom_up_extract(video, audio, p, *, n_target=256):
    """video: [B, T, R, Dv] (raw), audio: [B, T, Da] -> [B, T, Dv]."""
    B, T, R, Dv = video.shape
    Da = audio.shape[-1]
    N = B * T
    Hatt = p["Wv"].shape[1]
    tn = _tile(N, n_target)
    out = pl.pallas_call(
        bottomup_kernel,
        grid=(N // tn,),
        out_shape=jax.ShapeDtypeStruct((N, Dv), jnp.float32),
        in_specs=[
            pl.BlockSpec((tn, R, Dv), lambda i: (i, 0, 0)),
            pl.BlockSpec((tn, Da), lambda i: (i, 0)),
            pl.BlockSpec((Dv, Hatt), lambda i: (0, 0)),
            pl.BlockSpec((1, Hatt), lambda i: (0, 0)),
            pl.BlockSpec((Da, Hatt), lambda i: (0, 0)),
            pl.BlockSpec((1, Hatt), lambda i: (0, 0)),
            pl.BlockSpec((Hatt, 1), lambda i: (0, 0)),
        ],
        out_specs=pl.BlockSpec((tn, Dv), lambda i: (i, 0)),
        compiler_params=_cparams(),
    )(video.reshape(N, R, Dv), audio.reshape(N, Da),
      p["Wv"], p["bv"], p["Wa"], p["ba"], p["we"])
    return out.reshape(B, T, Dv)


def dcn_predict(video, audio, pc, pp, *, num_classes, b_target=8):
    """video: [B, T, Dv], audio: [B, T, Da] -> score: [B, T, num_classes]."""
    B, T, Dv = video.shape
    Da = audio.shape[-1]
    Hm = pp["W1v"].shape[1]
    Cp = pp["W2p"].shape[1]
    Bb = _tile(B, b_target)
    score = pl.pallas_call(
        dcn_predict_kernel,
        grid=(B // Bb,),
        out_shape=jax.ShapeDtypeStruct((B, T, Cp), jnp.float32),
        in_specs=[
            pl.BlockSpec((Bb, T, Dv), lambda i: (i, 0, 0)),
            pl.BlockSpec((Bb, T, Da), lambda i: (i, 0, 0)),
            pl.BlockSpec((Dv, Da), lambda i: (0, 0)),
            pl.BlockSpec((Dv, Dv), lambda i: (0, 0)),
            pl.BlockSpec((Da, Dv), lambda i: (0, 0)),
            pl.BlockSpec((1, Dv), lambda i: (0, 0)),
            pl.BlockSpec((Da, Da), lambda i: (0, 0)),
            pl.BlockSpec((Dv, Da), lambda i: (0, 0)),
            pl.BlockSpec((1, Da), lambda i: (0, 0)),
            pl.BlockSpec((Dv, Hm), lambda i: (0, 0)),
            pl.BlockSpec((Da, Hm), lambda i: (0, 0)),
            pl.BlockSpec((1, Hm), lambda i: (0, 0)),
            pl.BlockSpec((Hm, Cp), lambda i: (0, 0)),
            pl.BlockSpec((1, Cp), lambda i: (0, 0)),
        ],
        out_specs=pl.BlockSpec((Bb, T, Cp), lambda i: (i, 0, 0)),
        compiler_params=_cparams(),
    )(video, audio,
      pc["Wl"], pc["Wv1"], pc["Wv2"], pc["bv"],
      pc["Wa1"], pc["Wa2"], pc["ba"],
      pp["W1v"], pp["W1a"], pp["b1"], pp["W2p"], pp["b2p"])
    return score[..., :num_classes]


def dcn_with_rcnn_forward(audio, video, params, num_classes):
    """audio: [B, T, 128], video: [B, T, R, Dv] -> score: [B, T, num_classes]."""
    # Normalization (audio) + audio_extract GRU (+residual), fused.
    audio = gru_forward(audio, params["audio_gru"],
                        residual=True, normalize_input=True)
    # Normalization (video) + video_attn (BottomUpExtract), fused.
    video = bottom_up_extract(video, audio, params["video_attn"])
    # video_extract GRU (+residual).
    video = gru_forward(video, params["video_gru"],
                        residual=True, normalize_input=False)
    # coattn (DCNLayer) + predict (PredictLayer), fused.
    return dcn_predict(video, audio, params["coattn"], params["predict"],
                       num_classes=num_classes)


# ----------------------------------------------------------------------------
# deterministic parameter init (xavier_uniform Linears over the FULL concat
# matrices then pre-split; PyTorch-default uniform GRU weights; zero biases)
# ----------------------------------------------------------------------------
def init_params(key, audio_raw, audio_size, video_size, h_att, mlp_hidden,
                num_classes):
    ks = jax.random.split(key, 12)
    Dv, Da, H = video_size, audio_size, h_att

    def xavier(k, fin, fout, gain=1.0):
        lim = gain * math.sqrt(6.0 / (fin + fout))
        return jax.random.uniform(k, (fin, fout), jnp.float32, -lim, lim)

    def gru_p(k, din, h):
        kk = jax.random.split(k, 4)
        lim = 1.0 / math.sqrt(h)
        u = lambda kx, shp: jax.random.uniform(kx, shp, jnp.float32, -lim, lim)
        return dict(wih=u(kk[0], (din, 3 * h)), whh=u(kk[1], (h, 3 * h)),
                    bih=u(kk[2], (1, 3 * h)), bhh=u(kk[3], (1, 3 * h)))

    z = lambda n: jnp.zeros((1, n), jnp.float32)

    Wv_full = xavier(ks[6], Dv + Da, Dv)          # applied to concat([v, vatt])
    Wa_full = xavier(ks[7], Da + Dv, Da)          # applied to concat([a, aatt])
    W1_full = xavier(ks[8], Dv + Da, mlp_hidden)  # applied to concat([v, a])
    W2 = xavier(ks[9], mlp_hidden, num_classes)
    c_pad = max(128, ((num_classes + 127) // 128) * 128)  # lane-dense output
    W2p = jnp.zeros((mlp_hidden, c_pad), jnp.float32).at[:, :num_classes].set(W2)
    b2p = jnp.zeros((1, c_pad), jnp.float32)

    return {
        "audio_gru": gru_p(ks[0], audio_raw, audio_size),
        "video_gru": gru_p(ks[1], video_size, video_size),
        "video_attn": dict(
            Wa=xavier(ks[2], Da, H), ba=z(H),
            Wv=xavier(ks[3], Dv, H), bv=z(H),
            we=xavier(ks[4], H, 1)),
        "coattn": dict(
            Wl=xavier(ks[5], Dv, Da),
            Wv1=Wv_full[:Dv], Wv2=Wv_full[Dv:], bv=z(Dv),
            Wa1=Wa_full[:Da], Wa2=Wa_full[Da:], ba=z(Da)),
        "predict": dict(
            W1v=W1_full[:Dv], W1a=W1_full[Dv:], b1=z(mlp_hidden),
            W2p=W2p, b2p=b2p),
    }


# ----------------------------------------------------------------------------
if __name__ == "__main__":
    B, T, R = 2, 8, 16
    AUDIO_RAW = 128        # module hard-codes GRU(128, audio_size)
    AUDIO_SIZE = 128       # == AUDIO_RAW so residual embeddings add cleanly
    VIDEO_SIZE = 128
    H_ATT = 128
    MLP_HIDDEN = 128
    NUM_CLASSES = 8

    key = jax.random.PRNGKey(0)
    k_a, k_v, k_p = jax.random.split(key, 3)
    audio = jax.random.normal(k_a, (B, T, AUDIO_RAW), jnp.float32)
    video = jax.random.normal(k_v, (B, T, R, VIDEO_SIZE), jnp.float32)
    params = init_params(k_p, AUDIO_RAW, AUDIO_SIZE, VIDEO_SIZE,
                         H_ATT, MLP_HIDDEN, NUM_CLASSES)

    fwd = jax.jit(dcn_with_rcnn_forward, static_argnames=("num_classes",))
    score = fwd(audio, video, params, num_classes=NUM_CLASSES)
    jax.block_until_ready(score)

    assert score.shape == (B, T, NUM_CLASSES), score.shape
    assert bool(jnp.all(jnp.isfinite(score)))
    print("KERNEL_OK")
</pallas_src>

<mosaic_0001>
module attributes {stable_mosaic.version = 11 : i64} {
  func.func @bottomup_kernel(%arg0: i32, %arg1: memref<16x16x128xf32, #tpu.memory_space<vmem>>, %arg2: memref<16x128xf32, #tpu.memory_space<vmem>>, %arg3: memref<128x128xf32, #tpu.memory_space<vmem>>, %arg4: memref<1x128xf32, #tpu.memory_space<vmem>>, %arg5: memref<128x128xf32, #tpu.memory_space<vmem>>, %arg6: memref<1x128xf32, #tpu.memory_space<vmem>>, %arg7: memref<128x1xf32, #tpu.memory_space<vmem>>, %arg8: memref<16x128xf32, #tpu.memory_space<vmem>>) attributes {dimension_semantics = [#tpu.dimension_semantics<parallel>], iteration_bounds = array<i64: 1>, scalar_prefetch = 0 : i64, scratch_operands = 0 : i64, tpu.core_type = #tpu.core_type<tc>, window_params = [{transform_indices = @transform_0, window_bounds = array<i64: 16, 16, 128>}, {transform_indices = @transform_1, window_bounds = array<i64: 16, 128>}, {pipeline_mode = #tpu.pipeline_mode<synchronous>, transform_indices = @transform_2, window_bounds = array<i64: 128, 128>}, {pipeline_mode = #tpu.pipeline_mode<synchronous>, transform_indices = @transform_3, window_bounds = array<i64: 1, 128>}, {pipeline_mode = #tpu.pipeline_mode<synchronous>, transform_indices = @transform_4, window_bounds = array<i64: 128, 128>}, {pipeline_mode = #tpu.pipeline_mode<synchronous>, transform_indices = @transform_5, window_bounds = array<i64: 1, 128>}, {pipeline_mode = #tpu.pipeline_mode<synchronous>, transform_indices = @transform_6, window_bounds = array<i64: 128, 1>}, {transform_indices = @transform_7, window_bounds = array<i64: 16, 128>}]} {
    %c0 = arith.constant 0 : index
    %c0_0 = arith.constant 0 : index
    %c0_1 = arith.constant 0 : index
    %0 = vector.load %arg1[%c0, %c0_0, %c0_1] : memref<16x16x128xf32, #tpu.memory_space<vmem>>, vector<16x16x128xf32>
    %1 = arith.mulf %0, %0 : vector<16x16x128xf32>
    %cst = arith.constant dense<0.000000e+00> : vector<16x16xf32>
    %2 = vector.multi_reduction <add>, %1, %cst [2] : vector<16x16x128xf32> to vector<16x16xf32>
    %3 = vector.shape_cast %2 : vector<16x16xf32> to vector<16x16x1xf32>
    %cst_2 = arith.constant 9.99999996E-13 : f32
    %4 = vector.broadcast %cst_2 : f32 to vector<16x16x1xf32>
    %5 = arith.addf %3, %4 : vector<16x16x1xf32>
    %6 = math.rsqrt %5 : vector<16x16x1xf32>
    %7 = vector.broadcast %6 : vector<16x16x1xf32> to vector<16x16x128xf32>
    %8 = arith.mulf %0, %7 : vector<16x16x128xf32>
    %c0_3 = arith.constant 0 : index
    %c0_4 = arith.constant 0 : index
    %9 = vector.load %arg2[%c0_3, %c0_4] : memref<16x128xf32, #tpu.memory_space<vmem>>, vector<16x128xf32>
    %10 = vector.shape_cast %8 : vector<16x16x128xf32> to vector<256x128xf32>
    %c0_5 = arith.constant 0 : index
    %c0_6 = arith.constant 0 : index
    %11 = vector.load %arg3[%c0_5, %c0_6] : memref<128x128xf32, #tpu.memory_space<vmem>>, vector<128x128xf32>
    %cst_7 = arith.constant dense<0.000000e+00> : vector<256x128xf32>
    %12 = tpu.matmul %10, %11, %cst_7 {dimension_numbers = #tpu.dot_dimension_numbers<[1], [0], [0], [1], [0, 0, 1, 1], [], []>} : vector<256x128xf32>, vector<128x128xf32>, vector<256x128xf32> -> vector<256x128xf32>
    %c0_8 = arith.constant 0 : index
    %c0_9 = arith.constant 0 : index
    %13 = vector.load %arg4[%c0_8, %c0_9] : memref<1x128xf32, #tpu.memory_space<vmem>>, vector<1x128xf32>
    %14 = vector.broadcast %13 : vector<1x128xf32> to vector<256x128xf32>
    %15 = arith.addf %12, %14 : vector<256x128xf32>
    %c0_10 = arith.constant 0 : index
    %c0_11 = arith.constant 0 : index
    %16 = vector.load %arg5[%c0_10, %c0_11] : memref<128x128xf32, #tpu.memory_space<vmem>>, vector<128x128xf32>
    %cst_12 = arith.constant dense<0.000000e+00> : vector<16x128xf32>
    %17 = tpu.matmul %9, %16, %cst_12 {dimension_numbers = #tpu.dot_dimension_numbers<[1], [0], [0], [1], [0, 0, 1, 1], [], []>} : vector<16x128xf32>, vector<128x128xf32>, vector<16x128xf32> -> vector<16x128xf32>
    %c0_13 = arith.constant 0 : index
    %c0_14 = arith.constant 0 : index
    %18 = vector.load %arg6[%c0_13, %c0_14] : memref<1x128xf32, #tpu.memory_space<vmem>>, vector<1x128xf32>
    %19 = vector.broadcast %18 : vector<1x128xf32> to vector<16x128xf32>
    %20 = arith.addf %17, %19 : vector<16x128xf32>
    %21 = vector.shape_cast %15 : vector<256x128xf32> to vector<16x16x128xf32>
    %22 = vector.shape_cast %20 : vector<16x128xf32> to vector<16x1x128xf32>
    %23 = vector.broadcast %22 : vector<16x1x128xf32> to vector<16x16x128xf32>
    %24 = arith.addf %21, %23 : vector<16x16x128xf32>
    %25 = math.tanh %24 : vector<16x16x128xf32>
    %26 = vector.shape_cast %25 : vector<16x16x128xf32> to vector<256x128xf32>
    %c0_15 = arith.constant 0 : index
    %c0_16 = arith.constant 0 : index
    %27 = vector.load %arg7[%c0_15, %c0_16] : memref<128x1xf32, #tpu.memory_space<vmem>>, vector<128x1xf32>
    %cst_17 = arith.constant dense<0.000000e+00> : vector<256x1xf32>
    %28 = tpu.matmul %26, %27, %cst_17 {dimension_numbers = #tpu.dot_dimension_numbers<[1], [0], [0], [1], [0, 0, 1, 1], [], []>} : vector<256x128xf32>, vector<128x1xf32>, vector<256x1xf32> -> vector<256x1xf32>
    %29 = vector.shape_cast %28 : vector<256x1xf32> to vector<16x16x1xf32>
    %cst_18 = arith.constant dense<0xFF800000> : vector<16x1xf32>
    %30 = vector.multi_reduction <maximumf>, %29, %cst_18 [1] : vector<16x16x1xf32> to vector<16x1xf32>
    %31 = vector.shape_cast %30 : vector<16x1xf32> to vector<16x1x1xf32>
    %32 = vector.broadcast %31 : vector<16x1x1xf32> to vector<16x16x1xf32>
    %33 = arith.subf %29, %32 : vector<16x16x1xf32>
    %34 = math.exp %33 : vector<16x16x1xf32>
    %cst_19 = arith.constant dense<0.000000e+00> : vector<16x1xf32>
    %35 = vector.multi_reduction <add>, %34, %cst_19 [1] : vector<16x16x1xf32> to vector<16x1xf32>
    %36 = vector.shape_cast %35 : vector<16x1xf32> to vector<16x1x1xf32>
    %37 = vector.broadcast %36 : vector<16x1x1xf32> to vector<16x16x1xf32>
    %38 = arith.divf %34, %37 : vector<16x16x1xf32>
    %39 = vector.broadcast %38 : vector<16x16x1xf32> to vector<16x16x128xf32>
    %40 = arith.mulf %39, %8 : vector<16x16x128xf32>
    %cst_20 = arith.constant dense<0.000000e+00> : vector<16x128xf32>
    %41 = vector.multi_reduction <add>, %40, %cst_20 [1] : vector<16x16x128xf32> to vector<16x128xf32>
    %c0_21 = arith.constant 0 : index
    %c0_22 = arith.constant 0 : index
    %42 = vector.load %arg8[%c0_21, %c0_22] : memref<16x128xf32, #tpu.memory_space<vmem>>, vector<16x128xf32>
    tpu.vector_store %arg8[%c0_21, %c0_22], %41 {strides = array<i32>} : memref<16x128xf32, #tpu.memory_space<vmem>>, vector<16x128xf32>,
    return
  }
  func.func @transform_0(%arg0: i32) -> (i32, i32, i32) {
    %c0_i32 = arith.constant 0 : i32
    %c0_i32_0 = arith.constant 0 : i32
    %c0_i32_1 = arith.constant 0 : i32
    return %arg0, %c0_i32, %c0_i32_0 : i32, i32, i32
  }
  func.func @transform_1(%arg0: i32) -> (i32, i32) {
    %c0_i32 = arith.constant 0 : i32
    %c0_i32_0 = arith.constant 0 : i32
    return %arg0, %c0_i32 : i32, i32
  }
  func.func @transform_2(%arg0: i32) -> (i32, i32) {
    %c0_i32 = arith.constant 0 : i32
    %c0_i32_0 = arith.constant 0 : i32
    %c0_i32_1 = arith.constant 0 : i32
    return %c0_i32, %c0_i32_0 : i32, i32
  }
  func.func @transform_3(%arg0: i32) -> (i32, i32) {
    %c0_i32 = arith.constant 0 : i32
    %c0_i32_0 = arith.constant 0 : i32
    %c0_i32_1 = arith.constant 0 : i32
    return %c0_i32, %c0_i32_0 : i32, i32
  }
  func.func @transform_4(%arg0: i32) -> (i32, i32) {
    %c0_i32 = arith.constant 0 : i32
    %c0_i32_0 = arith.constant 0 : i32
    %c0_i32_1 = arith.constant 0 : i32
    return %c0_i32, %c0_i32_0 : i32, i32
  }
  func.func @transform_5(%arg0: i32) -> (i32, i32) {
    %c0_i32 = arith.constant 0 : i32
    %c0_i32_0 = arith.constant 0 : i32
    %c0_i32_1 = arith.constant 0 : i32
    return %c0_i32, %c0_i32_0 : i32, i32
  }
  func.func @transform_6(%arg0: i32) -> (i32, i32) {
    %c0_i32 = arith.constant 0 : i32
    %c0_i32_0 = arith.constant 0 : i32
    %c0_i32_1 = arith.constant 0 : i32
    return %c0_i32, %c0_i32_0 : i32, i32
  }
  func.func @transform_7(%arg0: i32) -> (i32, i32) {
    %c0_i32 = arith.constant 0 : i32
    %c0_i32_0 = arith.constant 0 : i32
    return %arg0, %c0_i32 : i32, i32
  }
}

module attributes {stable_mosaic.version = 11 : i64} {
  func.func @gru_kernel(%arg0: i32, %arg1: memref<2x8x128xf32, #tpu.memory_space<vmem>>, %arg2: memref<128x384xf32, #tpu.memory_space<vmem>>, %arg3: memref<128x384xf32, #tpu.memory_space<vmem>>, %arg4: memref<1x384xf32, #tpu.memory_space<vmem>>, %arg5: memref<1x384xf32, #tpu.memory_space<vmem>>, %arg6: memref<2x8x128xf32, #tpu.memory_space<vmem>>) attributes {dimension_semantics = [#tpu.dimension_semantics<parallel>], iteration_bounds = array<i64: 1>, scalar_prefetch = 0 : i64, scratch_operands = 0 : i64, tpu.core_type = #tpu.core_type<tc>, window_params = [{transform_indices = @transform_0, window_bounds = array<i64: 2, 8, 128>}, {pipeline_mode = #tpu.pipeline_mode<synchronous>, transform_indices = @transform_1, window_bounds = array<i64: 128, 384>}, {pipeline_mode = #tpu.pipeline_mode<synchronous>, transform_indices = @transform_2, window_bounds = array<i64: 128, 384>}, {pipeline_mode = #tpu.pipeline_mode<synchronous>, transform_indices = @transform_3, window_bounds = array<i64: 1, 384>}, {pipeline_mode = #tpu.pipeline_mode<synchronous>, transform_indices = @transform_4, window_bounds = array<i64: 1, 384>}, {transform_indices = @transform_5, window_bounds = array<i64: 2, 8, 128>}]} {
    %c0 = arith.constant 0 : index
    %c0_0 = arith.constant 0 : index
    %c0_1 = arith.constant 0 : index
    %0 = vector.load %arg1[%c0, %c0_0, %c0_1] : memref<2x8x128xf32, #tpu.memory_space<vmem>>, vector<2x8x128xf32>
    %1 = vector.shape_cast %0 : vector<2x8x128xf32> to vector<16x128xf32>
    %c0_2 = arith.constant 0 : index
    %c0_3 = arith.constant 0 : index
    %2 = vector.load %arg2[%c0_2, %c0_3] : memref<128x384xf32, #tpu.memory_space<vmem>>, vector<128x384xf32>
    %cst = arith.constant dense<0.000000e+00> : vector<16x384xf32>
    %3 = tpu.matmul %1, %2, %cst {dimension_numbers = #tpu.dot_dimension_numbers<[1], [0], [0], [1], [0, 0, 1, 1], [], []>} : vector<16x128xf32>, vector<128x384xf32>, vector<16x384xf32> -> vector<16x384xf32>
    %c0_4 = arith.constant 0 : index
    %c0_5 = arith.constant 0 : index
    %4 = vector.load %arg4[%c0_4, %c0_5] : memref<1x384xf32, #tpu.memory_space<vmem>>, vector<1x384xf32>
    %5 = vector.broadcast %4 : vector<1x384xf32> to vector<16x384xf32>
    %6 = arith.addf %3, %5 : vector<16x384xf32>
    %7 = vector.shape_cast %6 : vector<16x384xf32> to vector<2x8x384xf32>
    %c0_6 = arith.constant 0 : index
    %c0_7 = arith.constant 0 : index
    %8 = vector.load %arg3[%c0_6, %c0_7] : memref<128x384xf32, #tpu.memory_space<vmem>>, vector<128x384xf32>
    %c0_8 = arith.constant 0 : index
    %c0_9 = arith.constant 0 : index
    %9 = vector.load %arg5[%c0_8, %c0_9] : memref<1x384xf32, #tpu.memory_space<vmem>>, vector<1x384xf32>
    %cst_10 = arith.constant 0.000000e+00 : f32
    %10 = vector.broadcast %cst_10 : f32 to vector<2x128xf32>
    %11 = vector.extract_strided_slice %7 {offsets = [0, 0, 0], sizes = [2, 1, 384], strides = [1, 1, 1]} : vector<2x8x384xf32> to vector<2x1x384xf32>
    %12 = vector.shape_cast %11 : vector<2x1x384xf32> to vector<2x384xf32>
    %cst_11 = arith.constant dense<0.000000e+00> : vector<2x384xf32>
    %13 = tpu.matmul %10, %8, %cst_11 {dimension_numbers = #tpu.dot_dimension_numbers<[1], [0], [0], [1], [0, 0, 1, 1], [], []>} : vector<2x128xf32>, vector<128x384xf32>, vector<2x384xf32> -> vector<2x384xf32>
    %14 = vector.broadcast %9 : vector<1x384xf32> to vector<2x384xf32>
    %15 = arith.addf %13, %14 : vector<2x384xf32>
    %16 = vector.extract_strided_slice %12 {offsets = [0, 0], sizes = [2, 128], strides = [1, 1]} : vector<2x384xf32> to vector<2x128xf32>
    %17 = vector.extract_strided_slice %15 {offsets = [0, 0], sizes = [2, 128], strides = [1, 1]} : vector<2x384xf32> to vector<2x128xf32>
    %18 = arith.addf %16, %17 : vector<2x128xf32>
    %19 = arith.negf %18 : vector<2x128xf32>
    %20 = math.exp %19 : vector<2x128xf32>
    %cst_12 = arith.constant 1.000000e+00 : f32
    %21 = vector.broadcast %cst_12 : f32 to vector<2x128xf32>
    %22 = arith.addf %21, %20 : vector<2x128xf32>
    %23 = arith.divf %21, %22 : vector<2x128xf32>
    %24 = vector.extract_strided_slice %12 {offsets = [0, 128], sizes = [2, 128], strides = [1, 1]} : vector<2x384xf32> to vector<2x128xf32>
    %25 = vector.extract_strided_slice %15 {offsets = [0, 128], sizes = [2, 128], strides = [1, 1]} : vector<2x384xf32> to vector<2x128xf32>
    %26 = arith.addf %24, %25 : vector<2x128xf32>
    %27 = arith.negf %26 : vector<2x128xf32>
    %28 = math.exp %27 : vector<2x128xf32>
    %cst_13 = arith.constant 1.000000e+00 : f32
    %29 = vector.broadcast %cst_13 : f32 to vector<2x128xf32>
    %30 = arith.addf %29, %28 : vector<2x128xf32>
    %31 = arith.divf %29, %30 : vector<2x128xf32>
    %32 = vector.extract_strided_slice %12 {offsets = [0, 256], sizes = [2, 128], strides = [1, 1]} : vector<2x384xf32> to vector<2x128xf32>
    %33 = vector.extract_strided_slice %15 {offsets = [0, 256], sizes = [2, 128], strides = [1, 1]} : vector<2x384xf32> to vector<2x128xf32>
    %34 = arith.mulf %23, %33 : vector<2x128xf32>
    %35 = arith.addf %32, %34 : vector<2x128xf32>
    %36 = math.tanh %35 : vector<2x128xf32>
    %cst_14 = arith.constant 1.000000e+00 : f32
    %37 = vector.broadcast %cst_14 : f32 to vector<2x128xf32>
    %38 = arith.subf %37, %31 : vector<2x128xf32>
    %39 = arith.mulf %38, %36 : vector<2x128xf32>
    %40 = arith.mulf %31, %10 : vector<2x128xf32>
    %41 = arith.addf %39, %40 : vector<2x128xf32>
    %42 = vector.extract_strided_slice %0 {offsets = [0, 0, 0], sizes = [2, 1, 128], strides = [1, 1, 1]} : vector<2x8x128xf32> to vector<2x1x128xf32>
    %43 = vector.shape_cast %42 : vector<2x1x128xf32> to vector<2x128xf32>
    %44 = arith.addf %41, %43 : vector<2x128xf32>
    %45 = vector.shape_cast %44 : vector<2x128xf32> to vector<2x1x128xf32>
    %c0_15 = arith.constant 0 : index
    %c0_16 = arith.constant 0 : index
    %c0_17 = arith.constant 0 : index
    %46 = vector.load %arg6[%c0_15, %c0_16, %c0_17] : memref<2x8x128xf32, #tpu.memory_space<vmem>>, vector<2x1x128xf32>
    tpu.vector_store %arg6[%c0_15, %c0_16, %c0_17], %45 {strides = array<i32>} : memref<2x8x128xf32, #tpu.memory_space<vmem>>, vector<2x1x128xf32>,
    %47 = vector.extract_strided_slice %7 {offsets = [0, 1, 0], sizes = [2, 1, 384], strides = [1, 1, 1]} : vector<2x8x384xf32> to vector<2x1x384xf32>
    %48 = vector.shape_cast %47 : vector<2x1x384xf32> to vector<2x384xf32>
    %cst_18 = arith.constant dense<0.000000e+00> : vector<2x384xf32>
    %49 = tpu.matmul %41, %8, %cst_18 {dimension_numbers = #tpu.dot_dimension_numbers<[1], [0], [0], [1], [0, 0, 1, 1], [], []>} : vector<2x128xf32>, vector<128x384xf32>, vector<2x384xf32> -> vector<2x384xf32>
    %50 = vector.broadcast %9 : vector<1x384xf32> to vector<2x384xf32>
    %51 = arith.addf %49, %50 : vector<2x384xf32>
    %52 = vector.extract_strided_slice %48 {offsets = [0, 0], sizes = [2, 128], strides = [1, 1]} : vector<2x384xf32> to vector<2x128xf32>
    %53 = vector.extract_strided_slice %51 {offsets = [0, 0], sizes = [2, 128], strides = [1, 1]} : vector<2x384xf32> to vector<2x128xf32>
    %54 = arith.addf %52, %53 : vector<2x128xf32>
    %55 = arith.negf %54 : vector<2x128xf32>
    %56 = math.exp %55 : vector<2x128xf32>
    %cst_19 = arith.constant 1.000000e+00 : f32
    %57 = vector.broadcast %cst_19 : f32 to vector<2x128xf32>
    %58 = arith.addf %57, %56 : vector<2x128xf32>
    %59 = arith.divf %57, %58 : vector<2x128xf32>
    %60 = vector.extract_strided_slice %48 {offsets = [0, 128], sizes = [2, 128], strides = [1, 1]} : vector<2x384xf32> to vector<2x128xf32>
    %61 = vector.extract_strided_slice %51 {offsets = [0, 128], sizes = [2, 128], strides = [1, 1]} : vector<2x384xf32> to vector<2x128xf32>
    %62 = arith.addf %60, %61 : vector<2x128xf32>
    %63 = arith.negf %62 : vector<2x128xf32>
    %64 = math.exp %63 : vector<2x128xf32>
    %cst_20 = arith.constant 1.000000e+00 : f32
    %65 = vector.broadcast %cst_20 : f32 to vector<2x128xf32>
    %66 = arith.addf %65, %64 : vector<2x128xf32>
    %67 = arith.divf %65, %66 : vector<2x128xf32>
    %68 = vector.extract_strided_slice %48 {offsets = [0, 256], sizes = [2, 128], strides = [1, 1]} : vector<2x384xf32> to vector<2x128xf32>
    %69 = vector.extract_strided_slice %51 {offsets = [0, 256], sizes = [2, 128], strides = [1, 1]} : vector<2x384xf32> to vector<2x128xf32>
    %70 = arith.mulf %59, %69 : vector<2x128xf32>
    %71 = arith.addf %68, %70 : vector<2x128xf32>
    %72 = math.tanh %71 : vector<2x128xf32>
    %cst_21 = arith.constant 1.000000e+00 : f32
    %73 = vector.broadcast %cst_21 : f32 to vector<2x128xf32>
    %74 = arith.subf %73, %67 : vector<2x128xf32>
    %75 = arith.mulf %74, %72 : vector<2x128xf32>
    %76 = arith.mulf %67, %41 : vector<2x128xf32>
    %77 = arith.addf %75, %76 : vector<2x128xf32>
    %78 = vector.extract_strided_slice %0 {offsets = [0, 1, 0], sizes = [2, 1, 128], strides = [1, 1, 1]} : vector<2x8x128xf32> to vector<2x1x128xf32>
    %79 = vector.shape_cast %78 : vector<2x1x128xf32> to vector<2x128xf32>
    %80 = arith.addf %77, %79 : vector<2x128xf32>
    %81 = vector.shape_cast %80 : vector<2x128xf32> to vector<2x1x128xf32>
    %c0_22 = arith.constant 0 : index
    %c1 = arith.constant 1 : index
    %c0_23 = arith.constant 0 : index
    %82 = vector.load %arg6[%c0_22, %c1, %c0_23] : memref<2x8x128xf32, #tpu.memory_space<vmem>>, vector<2x1x128xf32>
    tpu.vector_store %arg6[%c0_22, %c1, %c0_23], %81 {strides = array<i32>} : memref<2x8x128xf32, #tpu.memory_space<vmem>>, vector<2x1x128xf32>,
    %83 = vector.extract_strided_slice %7 {offsets = [0, 2, 0], sizes = [2, 1, 384], strides = [1, 1, 1]} : vector<2x8x384xf32> to vector<2x1x384xf32>
    %84 = vector.shape_cast %83 : vector<2x1x384xf32> to vector<2x384xf32>
    %cst_24 = arith.constant dense<0.000000e+00> : vector<2x384xf32>
    %85 = tpu.matmul %77, %8, %cst_24 {dimension_numbers = #tpu.dot_dimension_numbers<[1], [0], [0], [1], [0, 0, 1, 1], [], []>} : vector<2x128xf32>, vector<128x384xf32>, vector<2x384xf32> -> vector<2x384xf32>
    %86 = vector.broadcast %9 : vector<1x384xf32> to vector<2x384xf32>
    %87 = arith.addf %85, %86 : vector<2x384xf32>
    %88 = vector.extract_strided_slice %84 {offsets = [0, 0], sizes = [2, 128], strides = [1, 1]} : vector<2x384xf32> to vector<2x128xf32>
    %89 = vector.extract_strided_slice %87 {offsets = [0, 0], sizes = [2, 128], strides = [1, 1]} : vector<2x384xf32> to vector<2x128xf32>
    %90 = arith.addf %88, %89 : vector<2x128xf32>
    %91 = arith.negf %90 : vector<2x128xf32>
    %92 = math.exp %91 : vector<2x128xf32>
    %cst_25 = arith.constant 1.000000e+00 : f32
    %93 = vector.broadcast %cst_25 : f32 to vector<2x128xf32>
    %94 = arith.addf %93, %92 : vector<2x128xf32>
    %95 = arith.divf %93, %94 : vector<2x128xf32>
    %96 = vector.extract_strided_slice %84 {offsets = [0, 128], sizes = [2, 128], strides = [1, 1]} : vector<2x384xf32> to vector<2x128xf32>
    %97 = vector.extract_strided_slice %87 {offsets = [0, 128], sizes = [2, 128], strides = [1, 1]} : vector<2x384xf32> to vector<2x128xf32>
    %98 = arith.addf %96, %97 : vector<2x128xf32>
    %99 = arith.negf %98 : vector<2x128xf32>
    %100 = math.exp %99 : vector<2x128xf32>
    %cst_26 = arith.constant 1.000000e+00 : f32
    %101 = vector.broadcast %cst_26 : f32 to vector<2x128xf32>
    %102 = arith.addf %101, %100 : vector<2x128xf32>
    %103 = arith.divf %101, %102 : vector<2x128xf32>
    %104 = vector.extract_strided_slice %84 {offsets = [0, 256], sizes = [2, 128], strides = [1, 1]} : vector<2x384xf32> to vector<2x128xf32>
    %105 = vector.extract_strided_slice %87 {offsets = [0, 256], sizes = [2, 128], strides = [1, 1]} : vector<2x384xf32> to vector<2x128xf32>
    %106 = arith.mulf %95, %105 : vector<2x128xf32>
    %107 = arith.addf %104, %106 : vector<2x128xf32>
    %108 = math.tanh %107 : vector<2x128xf32>
    %cst_27 = arith.constant 1.000000e+00 : f32
    %109 = vector.broadcast %cst_27 : f32 to vector<2x128xf32>
    %110 = arith.subf %109, %103 : vector<2x128xf32>
    %111 = arith.mulf %110, %108 : vector<2x128xf32>
    %112 = arith.mulf %103, %77 : vector<2x128xf32>
    %113 = arith.addf %111, %112 : vector<2x128xf32>
    %114 = vector.extract_strided_slice %0 {offsets = [0, 2, 0], sizes = [2, 1, 128], strides = [1, 1, 1]} : vector<2x8x128xf32> to vector<2x1x128xf32>
    %115 = vector.shape_cast %114 : vector<2x1x128xf32> to vector<2x128xf32>
    %116 = arith.addf %113, %115 : vector<2x128xf32>
    %117 = vector.shape_cast %116 : vector<2x128xf32> to vector<2x1x128xf32>
    %c0_28 = arith.constant 0 : index
    %c2 = arith.constant 2 : index
    %c0_29 = arith.constant 0 : index
    %118 = vector.load %arg6[%c0_28, %c2, %c0_29] : memref<2x8x128xf32, #tpu.memory_space<vmem>>, vector<2x1x128xf32>
    tpu.vector_store %arg6[%c0_28, %c2, %c0_29], %117 {strides = array<i32>} : memref<2x8x128xf32, #tpu.memory_space<vmem>>, vector<2x1x128xf32>,
    %119 = vector.extract_strided_slice %7 {offsets = [0, 3, 0], sizes = [2, 1, 384], strides = [1, 1, 1]} : vector<2x8x384xf32> to vector<2x1x384xf32>
    %120 = vector.shape_cast %119 : vector<2x1x384xf32> to vector<2x384xf32>
    %cst_30 = arith.constant dense<0.000000e+00> : vector<2x384xf32>
    %121 = tpu.matmul %113, %8, %cst_30 {dimension_numbers = #tpu.dot_dimension_numbers<[1], [0], [0], [1], [0, 0, 1, 1], [], []>} : vector<2x128xf32>, vector<128x384xf32>, vector<2x384xf32> -> vector<2x384xf32>
    %122 = vector.broadcast %9 : vector<1x384xf32> to vector<2x384xf32>
    %123 = arith.addf %121, %122 : vector<2x384xf32>
    %124 = vector.extract_strided_slice %120 {offsets = [0, 0], sizes = [2, 128], strides = [1, 1]} : vector<2x384xf32> to vector<2x128xf32>
    %125 = vector.extract_strided_slice %123 {offsets = [0, 0], sizes = [2, 128], strides = [1, 1]} : vector<2x384xf32> to vector<2x128xf32>
    %126 = arith.addf %124, %125 : vector<2x128xf32>
    %127 = arith.negf %126 : vector<2x128xf32>
    %128 = math.exp %127 : vector<2x128xf32>
    %cst_31 = arith.constant 1.000000e+00 : f32
    %129 = vector.broadcast %cst_31 : f32 to vector<2x128xf32>
    %130 = arith.addf %129, %128 : vector<2x128xf32>
    %131 = arith.divf %129, %130 : vector<2x128xf32>
    %132 = vector.extract_strided_slice %120 {offsets = [0, 128], sizes = [2, 128], strides = [1, 1]} : vector<2x384xf32> to vector<2x128xf32>
    %133 = vector.extract_strided_slice %123 {offsets = [0, 128], sizes = [2, 128], strides = [1, 1]} : vector<2x384xf32> to vector<2x128xf32>
    %134 = arith.addf %132, %133 : vector<2x128xf32>
    %135 = arith.negf %134 : vector<2x128xf32>
    %136 = math.exp %135 : vector<2x128xf32>
    %cst_32 = arith.constant 1.000000e+00 : f32
    %137 = vector.broadcast %cst_32 : f32 to vector<2x128xf32>
    %138 = arith.addf %137, %136 : vector<2x128xf32>
    %139 = arith.divf %137, %138 : vector<2x128xf32>
    %140 = vector.extract_strided_slice %120 {offsets = [0, 256], sizes = [2, 128], strides = [1, 1]} : vector<2x384xf32> to vector<2x128xf32>
    %141 = vector.extract_strided_slice %123 {offsets = [0, 256], sizes = [2, 128], strides = [1, 1]} : vector<2x384xf32> to vector<2x128xf32>
    %142 = arith.mulf %131, %141 : vector<2x128xf32>
    %143 = arith.addf %140, %142 : vector<2x128xf32>
    %144 = math.tanh %143 : vector<2x128xf32>
    %cst_33 = arith.constant 1.000000e+00 : f32
    %145 = vector.broadcast %cst_33 : f32 to vector<2x128xf32>
    %146 = arith.subf %145, %139 : vector<2x128xf32>
    %147 = arith.mulf %146, %144 : vector<2x128xf32>
    %148 = arith.mulf %139, %113 : vector<2x128xf32>
    %149 = arith.addf %147, %148 : vector<2x128xf32>
    %150 = vector.extract_strided_slice %0 {offsets = [0, 3, 0], sizes = [2, 1, 128], strides = [1, 1, 1]} : vector<2x8x128xf32> to vector<2x1x128xf32>
    %151 = vector.shape_cast %150 : vector<2x1x128xf32> to vector<2x128xf32>
    %152 = arith.addf %149, %151 : vector<2x128xf32>
    %153 = vector.shape_cast %152 : vector<2x128xf32> to vector<2x1x128xf32>
    %c0_34 = arith.constant 0 : index
    %c3 = arith.constant 3 : index
    %c0_35 = arith.constant 0 : index
    %154 = vector.load %arg6[%c0_34, %c3, %c0_35] : memref<2x8x128xf32, #tpu.memory_space<vmem>>, vector<2x1x128xf32>
    tpu.vector_store %arg6[%c0_34, %c3, %c0_35], %153 {strides = array<i32>} : memref<2x8x128xf32, #tpu.memory_space<vmem>>, vector<2x1x128xf32>,
    %155 = vector.extract_strided_slice %7 {offsets = [0, 4, 0], sizes = [2, 1, 384], strides = [1, 1, 1]} : vector<2x8x384xf32> to vector<2x1x384xf32>
    %156 = vector.shape_cast %155 : vector<2x1x384xf32> to vector<2x384xf32>
    %cst_36 = arith.constant dense<0.000000e+00> : vector<2x384xf32>
    %157 = tpu.matmul %149, %8, %cst_36 {dimension_numbers = #tpu.dot_dimension_numbers<[1], [0], [0], [1], [0, 0, 1, 1], [], []>} : vector<2x128xf32>, vector<128x384xf32>, vector<2x384xf32> -> vector<2x384xf32>
    %158 = vector.broadcast %9 : vector<1x384xf32> to vector<2x384xf32>
    %159 = arith.addf %157, %158 : vector<2x384xf32>
    %160 = vector.extract_strided_slice %156 {offsets = [0, 0], sizes = [2, 128], strides = [1, 1]} : vector<2x384xf32> to vector<2x128xf32>
    %161 = vector.extract_strided_slice %159 {offsets = [0, 0], sizes = [2, 128], strides = [1, 1]} : vector<2x384xf32> to vector<2x128xf32>
    %162 = arith.addf %160, %161 : vector<2x128xf32>
    %163 = arith.negf %162 : vector<2x128xf32>
    %164 = math.exp %163 : vector<2x128xf32>
    %cst_37 = arith.constant 1.000000e+00 : f32
    %165 = vector.broadcast %cst_37 : f32 to vector<2x128xf32>
    %166 = arith.addf %165, %164 : vector<2x128xf32>
    %167 = arith.divf %165, %166 : vector<2x128xf32>
    %168 = vector.extract_strided_slice %156 {offsets = [0, 128], sizes = [2, 128], strides = [1, 1]} : vector<2x384xf32> to vector<2x128xf32>
    %169 = vector.extract_strided_slice %159 {offsets = [0, 128], sizes = [2, 128], strides = [1, 1]} : vector<2x384xf32> to vector<2x128xf32>
    %170 = arith.addf %168, %169 : vector<2x128xf32>
    %171 = arith.negf %170 : vector<2x128xf32>
    %172 = math.exp %171 : vector<2x128xf32>
    %cst_38 = arith.constant 1.000000e+00 : f32
    %173 = vector.broadcast %cst_38 : f32 to vector<2x128xf32>
    %174 = arith.addf %173, %172 : vector<2x128xf32>
    %175 = arith.divf %173, %174 : vector<2x128xf32>
    %176 = vector.extract_strided_slice %156 {offsets = [0, 256], sizes = [2, 128], strides = [1, 1]} : vector<2x384xf32> to vector<2x128xf32>
    %177 = vector.extract_strided_slice %159 {offsets = [0, 256], sizes = [2, 128], strides = [1, 1]} : vector<2x384xf32> to vector<2x128xf32>
    %178 = arith.mulf %167, %177 : vector<2x128xf32>
    %179 = arith.addf %176, %178 : vector<2x128xf32>
    %180 = math.tanh %179 : vector<2x128xf32>
    %cst_39 = arith.constant 1.000000e+00 : f32
    %181 = vector.broadcast %cst_39 : f32 to vector<2x128xf32>
    %182 = arith.subf %181, %175 : vector<2x128xf32>
    %183 = arith.mulf %182, %180 : vector<2x128xf32>
    %184 = arith.mulf %175, %149 : vector<2x128xf32>
    %185 = arith.addf %183, %184 : vector<2x128xf32>
    %186 = vector.extract_strided_slice %0 {offsets = [0, 4, 0], sizes = [2, 1, 128], strides = [1, 1, 1]} : vector<2x8x128xf32> to vector<2x1x128xf32>
    %187 = vector.shape_cast %186 : vector<2x1x128xf32> to vector<2x128xf32>
    %188 = arith.addf %185, %187 : vector<2x128xf32>
    %189 = vector.shape_cast %188 : vector<2x128xf32> to vector<2x1x128xf32>
    %c0_40 = arith.constant 0 : index
    %c4 = arith.constant 4 : index
    %c0_41 = arith.constant 0 : index
    %190 = vector.load %arg6[%c0_40, %c4, %c0_41] : memref<2x8x128xf32, #tpu.memory_space<vmem>>, vector<2x1x128xf32>
    tpu.vector_store %arg6[%c0_40, %c4, %c0_41], %189 {strides = array<i32>} : memref<2x8x128xf32, #tpu.memory_space<vmem>>, vector<2x1x128xf32>,
    %191 = vector.extract_strided_slice %7 {offsets = [0, 5, 0], sizes = [2, 1, 384], strides = [1, 1, 1]} : vector<2x8x384xf32> to vector<2x1x384xf32>
    %192 = vector.shape_cast %191 : vector<2x1x384xf32> to vector<2x384xf32>
    %cst_42 = arith.constant dense<0.000000e+00> : vector<2x384xf32>
    %193 = tpu.matmul %185, %8, %cst_42 {dimension_numbers = #tpu.dot_dimension_numbers<[1], [0], [0], [1], [0, 0, 1, 1], [], []>} : vector<2x128xf32>, vector<128x384xf32>, vector<2x384xf32> -> vector<2x384xf32>
    %194 = vector.broadcast %9 : vector<1x384xf32> to vector<2x384xf32>
    %195 = arith.addf %193, %194 : vector<2x384xf32>
    %196 = vector.extract_strided_slice %192 {offsets = [0, 0], sizes = [2, 128], strides = [1, 1]} : vector<2x384xf32> to vector<2x128xf32>
    %197 = vector.extract_strided_slice %195 {offsets = [0, 0], sizes = [2, 128], strides = [1, 1]} : vector<2x384xf32> to vector<2x128xf32>
    %198 = arith.addf %196, %197 : vector<2x128xf32>
    %199 = arith.negf %198 : vector<2x128xf32>
    %200 = math.exp %199 : vector<2x128xf32>
    %cst_43 = arith.constant 1.000000e+00 : f32
    %201 = vector.broadcast %cst_43 : f32 to vector<2x128xf32>
    %202 = arith.addf %201, %200 : vector<2x128xf32>
    %203 = arith.divf %201, %202 : vector<2x128xf32>
    %204 = vector.extract_strided_slice %192 {offsets = [0, 128], sizes = [2, 128], strides = [1, 1]} : vector<2x384xf32> to vector<2x128xf32>
    %205 = vector.extract_strided_slice %195 {offsets = [0, 128], sizes = [2, 128], strides = [1, 1]} : vector<2x384xf32> to vector<2x128xf32>
    %206 = arith.addf %204, %205 : vector<2x128xf32>
    %207 = arith.negf %206 : vector<2x128xf32>
    %208 = math.exp %207 : vector<2x128xf32>
    %cst_44 = arith.constant 1.000000e+00 : f32
    %209 = vector.broadcast %cst_44 : f32 to vector<2x128xf32>
    %210 = arith.addf %209, %208 : vector<2x128xf32>
    %211 = arith.divf %209, %210 : vector<2x128xf32>
    %212 = vector.extract_strided_slice %192 {offsets = [0, 256], sizes = [2, 128], strides = [1, 1]} : vector<2x384xf32> to vector<2x128xf32>
    %213 = vector.extract_strided_slice %195 {offsets = [0, 256], sizes = [2, 128], strides = [1, 1]} : vector<2x384xf32> to vector<2x128xf32>
    %214 = arith.mulf %203, %213 : vector<2x128xf32>
    %215 = arith.addf %212, %214 : vector<2x128xf32>
    %216 = math.tanh %215 : vector<2x128xf32>
    %cst_45 = arith.constant 1.000000e+00 : f32
    %217 = vector.broadcast %cst_45 : f32 to vector<2x128xf32>
    %218 = arith.subf %217, %211 : vector<2x128xf32>
    %219 = arith.mulf %218, %216 : vector<2x128xf32>
    %220 = arith.mulf %211, %185 : vector<2x128xf32>
    %221 = arith.addf %219, %220 : vector<2x128xf32>
    %222 = vector.extract_strided_slice %0 {offsets = [0, 5, 0], sizes = [2, 1, 128], strides = [1, 1, 1]} : vector<2x8x128xf32> to vector<2x1x128xf32>
    %223 = vector.shape_cast %222 : vector<2x1x128xf32> to vector<2x128xf32>
    %224 = arith.addf %221, %223 : vector<2x128xf32>
    %225 = vector.shape_cast %224 : vector<2x128xf32> to vector<2x1x128xf32>
    %c0_46 = arith.constant 0 : index
    %c5 = arith.constant 5 : index
    %c0_47 = arith.constant 0 : index
    %226 = vector.load %arg6[%c0_46, %c5, %c0_47] : memref<2x8x128xf32, #tpu.memory_space<vmem>>, vector<2x1x128xf32>
    tpu.vector_store %arg6[%c0_46, %c5, %c0_47], %225 {strides = array<i32>} : memref<2x8x128xf32, #tpu.memory_space<vmem>>, vector<2x1x128xf32>,
    %227 = vector.extract_strided_slice %7 {offsets = [0, 6, 0], sizes = [2, 1, 384], strides = [1, 1, 1]} : vector<2x8x384xf32> to vector<2x1x384xf32>
    %228 = vector.shape_cast %227 : vector<2x1x384xf32> to vector<2x384xf32>
    %cst_48 = arith.constant dense<0.000000e+00> : vector<2x384xf32>
    %229 = tpu.matmul %221, %8, %cst_48 {dimension_numbers = #tpu.dot_dimension_numbers<[1], [0], [0], [1], [0, 0, 1, 1], [], []>} : vector<2x128xf32>, vector<128x384xf32>, vector<2x384xf32> -> vector<2x384xf32>
    %230 = vector.broadcast %9 : vector<1x384xf32> to vector<2x384xf32>
    %231 = arith.addf %229, %230 : vector<2x384xf32>
    %232 = vector.extract_strided_slice %228 {offsets = [0, 0], sizes = [2, 128], strides = [1, 1]} : vector<2x384xf32> to vector<2x128xf32>
    %233 = vector.extract_strided_slice %231 {offsets = [0, 0], sizes = [2, 128], strides = [1, 1]} : vector<2x384xf32> to vector<2x128xf32>
    %234 = arith.addf %232, %233 : vector<2x128xf32>
    %235 = arith.negf %234 : vector<2x128xf32>
    %236 = math.exp %235 : vector<2x128xf32>
    %cst_49 = arith.constant 1.000000e+00 : f32
    %237 = vector.broadcast %cst_49 : f32 to vector<2x128xf32>
    %238 = arith.addf %237, %236 : vector<2x128xf32>
    %239 = arith.divf %237, %238 : vector<2x128xf32>
    %240 = vector.extract_strided_slice %228 {offsets = [0, 128], sizes = [2, 128], strides = [1, 1]} : vector<2x384xf32> to vector<2x128xf32>
    %241 = vector.extract_strided_slice %231 {offsets = [0, 128], sizes = [2, 128], strides = [1, 1]} : vector<2x384xf32> to vector<2x128xf32>
    %242 = arith.addf %240, %241 : vector<2x128xf32>
    %243 = arith.negf %242 : vector<2x128xf32>
    %244 = math.exp %243 : vector<2x128xf32>
    %cst_50 = arith.constant 1.000000e+00 : f32
    %245 = vector.broadcast %cst_50 : f32 to vector<2x128xf32>
    %246 = arith.addf %245, %244 : vector<2x128xf32>
    %247 = arith.divf %245, %246 : vector<2x128xf32>
    %248 = vector.extract_strided_slice %228 {offsets = [0, 256], sizes = [2, 128], strides = [1, 1]} : vector<2x384xf32> to vector<2x128xf32>
    %249 = vector.extract_strided_slice %231 {offsets = [0, 256], sizes = [2, 128], strides = [1, 1]} : vector<2x384xf32> to vector<2x128xf32>
    %250 = arith.mulf %239, %249 : vector<2x128xf32>
    %251 = arith.addf %248, %250 : vector<2x128xf32>
    %252 = math.tanh %251 : vector<2x128xf32>
    %cst_51 = arith.constant 1.000000e+00 : f32
    %253 = vector.broadcast %cst_51 : f32 to vector<2x128xf32>
    %254 = arith.subf %253, %247 : vector<2x128xf32>
    %255 = arith.mulf %254, %252 : vector<2x128xf32>
    %256 = arith.mulf %247, %221 : vector<2x128xf32>
    %257 = arith.addf %255, %256 : vector<2x128xf32>
    %258 = vector.extract_strided_slice %0 {offsets = [0, 6, 0], sizes = [2, 1, 128], strides = [1, 1, 1]} : vector<2x8x128xf32> to vector<2x1x128xf32>
    %259 = vector.shape_cast %258 : vector<2x1x128xf32> to vector<2x128xf32>
    %260 = arith.addf %257, %259 : vector<2x128xf32>
    %261 = vector.shape_cast %260 : vector<2x128xf32> to vector<2x1x128xf32>
    %c0_52 = arith.constant 0 : index
    %c6 = arith.constant 6 : index
    %c0_53 = arith.constant 0 : index
    %262 = vector.load %arg6[%c0_52, %c6, %c0_53] : memref<2x8x128xf32, #tpu.memory_space<vmem>>, vector<2x1x128xf32>
    tpu.vector_store %arg6[%c0_52, %c6, %c0_53], %261 {strides = array<i32>} : memref<2x8x128xf32, #tpu.memory_space<vmem>>, vector<2x1x128xf32>,
    %263 = vector.extract_strided_slice %7 {offsets = [0, 7, 0], sizes = [2, 1, 384], strides = [1, 1, 1]} : vector<2x8x384xf32> to vector<2x1x384xf32>
    %264 = vector.shape_cast %263 : vector<2x1x384xf32> to vector<2x384xf32>
    %cst_54 = arith.constant dense<0.000000e+00> : vector<2x384xf32>
    %265 = tpu.matmul %257, %8, %cst_54 {dimension_numbers = #tpu.dot_dimension_numbers<[1], [0], [0], [1], [0, 0, 1, 1], [], []>} : vector<2x128xf32>, vector<128x384xf32>, vector<2x384xf32> -> vector<2x384xf32>
    %266 = vector.broadcast %9 : vector<1x384xf32> to vector<2x384xf32>
    %267 = arith.addf %265, %266 : vector<2x384xf32>
    %268 = vector.extract_strided_slice %264 {offsets = [0, 0], sizes = [2, 128], strides = [1, 1]} : vector<2x384xf32> to vector<2x128xf32>
    %269 = vector.extract_strided_slice %267 {offsets = [0, 0], sizes = [2, 128], strides = [1, 1]} : vector<2x384xf32> to vector<2x128xf32>
    %270 = arith.addf %268, %269 : vector<2x128xf32>
    %271 = arith.negf %270 : vector<2x128xf32>
    %272 = math.exp %271 : vector<2x128xf32>
    %cst_55 = arith.constant 1.000000e+00 : f32
    %273 = vector.broadcast %cst_55 : f32 to vector<2x128xf32>
    %274 = arith.addf %273, %272 : vector<2x128xf32>
    %275 = arith.divf %273, %274 : vector<2x128xf32>
    %276 = vector.extract_strided_slice %264 {offsets = [0, 128], sizes = [2, 128], strides = [1, 1]} : vector<2x384xf32> to vector<2x128xf32>
    %277 = vector.extract_strided_slice %267 {offsets = [0, 128], sizes = [2, 128], strides = [1, 1]} : vector<2x384xf32> to vector<2x128xf32>
    %278 = arith.addf %276, %277 : vector<2x128xf32>
    %279 = arith.negf %278 : vector<2x128xf32>
    %280 = math.exp %279 : vector<2x128xf32>
    %cst_56 = arith.constant 1.000000e+00 : f32
    %281 = vector.broadcast %cst_56 : f32 to vector<2x128xf32>
    %282 = arith.addf %281, %280 : vector<2x128xf32>
    %283 = arith.divf %281, %282 : vector<2x128xf32>
    %284 = vector.extract_strided_slice %264 {offsets = [0, 256], sizes = [2, 128], strides = [1, 1]} : vector<2x384xf32> to vector<2x128xf32>
    %285 = vector.extract_strided_slice %267 {offsets = [0, 256], sizes = [2, 128], strides = [1, 1]} : vector<2x384xf32> to vector<2x128xf32>
    %286 = arith.mulf %275, %285 : vector<2x128xf32>
    %287 = arith.addf %284, %286 : vector<2x128xf32>
    %288 = math.tanh %287 : vector<2x128xf32>
    %cst_57 = arith.constant 1.000000e+00 : f32
    %289 = vector.broadcast %cst_57 : f32 to vector<2x128xf32>
    %290 = arith.subf %289, %283 : vector<2x128xf32>
    %291 = arith.mulf %290, %288 : vector<2x128xf32>
    %292 = arith.mulf %283, %257 : vector<2x128xf32>
    %293 = arith.addf %291, %292 : vector<2x128xf32>
    %294 = vector.extract_strided_slice %0 {offsets = [0, 7, 0], sizes = [2, 1, 128], strides = [1, 1, 1]} : vector<2x8x128xf32> to vector<2x1x128xf32>
    %295 = vector.shape_cast %294 : vector<2x1x128xf32> to vector<2x128xf32>
    %296 = arith.addf %293, %295 : vector<2x128xf32>
    %297 = vector.shape_cast %296 : vector<2x128xf32> to vector<2x1x128xf32>
    %c0_58 = arith.constant 0 : index
    %c7 = arith.constant 7 : index
    %c0_59 = arith.constant 0 : index
    %298 = vector.load %arg6[%c0_58, %c7, %c0_59] : memref<2x8x128xf32, #tpu.memory_space<vmem>>, vector<2x1x128xf32>
    tpu.vector_store %arg6[%c0_58, %c7, %c0_59], %297 {strides = array<i32>} : memref<2x8x128xf32, #tpu.memory_space<vmem>>, vector<2x1x128xf32>,
    return
  }
  func.func @transform_0(%arg0: i32) -> (i32, i32, i32) {
    %c0_i32 = arith.constant 0 : i32
    %c0_i32_0 = arith.constant 0 : i32
    %c0_i32_1 = arith.constant 0 : i32
    return %arg0, %c0_i32, %c0_i32_0 : i32, i32, i32
  }
  func.func @transform_1(%arg0: i32) -> (i32, i32) {
    %c0_i32 = arith.constant 0 : i32
    %c0_i32_0 = arith.constant 0 : i32
    %c0_i32_1 = arith.constant 0 : i32
    return %c0_i32, %c0_i32_0 : i32, i32
  }
  func.func @transform_2(%arg0: i32) -> (i32, i32) {
    %c0_i32 = arith.constant 0 : i32
    %c0_i32_0 = arith.constant 0 : i32
    %c0_i32_1 = arith.constant 0 : i32
    return %c0_i32, %c0_i32_0 : i32, i32
  }
  func.func @transform_3(%arg0: i32) -> (i32, i32) {
    %c0_i32 = arith.constant 0 : i32
    %c0_i32_0 = arith.constant 0 : i32
    %c0_i32_1 = arith.constant 0 : i32
    return %c0_i32, %c0_i32_0 : i32, i32
  }
  func.func @transform_4(%arg0: i32) -> (i32, i32) {
    %c0_i32 = arith.constant 0 : i32
    %c0_i32_0 = arith.constant 0 : i32
    %c0_i32_1 = arith.constant 0 : i32
    return %c0_i32, %c0_i32_0 : i32, i32
  }
  func.func @transform_5(%arg0: i32) -> (i32, i32, i32) {
    %c0_i32 = arith.constant 0 : i32
    %c0_i32_0 = arith.constant 0 : i32
    %c0_i32_1 = arith.constant 0 : i32
    return %arg0, %c0_i32, %c0_i32_0 : i32, i32, i32
  }
}

module attributes {stable_mosaic.version = 11 : i64} {
  func.func @gru_kernel(%arg0: i32, %arg1: memref<2x8x128xf32, #tpu.memory_space<vmem>>, %arg2: memref<128x384xf32, #tpu.memory_space<vmem>>, %arg3: memref<128x384xf32, #tpu.memory_space<vmem>>, %arg4: memref<1x384xf32, #tpu.memory_space<vmem>>, %arg5: memref<1x384xf32, #tpu.memory_space<vmem>>, %arg6: memref<2x8x128xf32, #tpu.memory_space<vmem>>) attributes {dimension_semantics = [#tpu.dimension_semantics<parallel>], iteration_bounds = array<i64: 1>, scalar_prefetch = 0 : i64, scratch_operands = 0 : i64, tpu.core_type = #tpu.core_type<tc>, window_params = [{transform_indices = @transform_0, window_bounds = array<i64: 2, 8, 128>}, {pipeline_mode = #tpu.pipeline_mode<synchronous>, transform_indices = @transform_1, window_bounds = array<i64: 128, 384>}, {pipeline_mode = #tpu.pipeline_mode<synchronous>, transform_indices = @transform_2, window_bounds = array<i64: 128, 384>}, {pipeline_mode = #tpu.pipeline_mode<synchronous>, transform_indices = @transform_3, window_bounds = array<i64: 1, 384>}, {pipeline_mode = #tpu.pipeline_mode<synchronous>, transform_indices = @transform_4, window_bounds = array<i64: 1, 384>}, {transform_indices = @transform_5, window_bounds = array<i64: 2, 8, 128>}]} {
    %c0 = arith.constant 0 : index
    %c0_0 = arith.constant 0 : index
    %c0_1 = arith.constant 0 : index
    %0 = vector.load %arg1[%c0, %c0_0, %c0_1] : memref<2x8x128xf32, #tpu.memory_space<vmem>>, vector<2x8x128xf32>
    %1 = arith.mulf %0, %0 : vector<2x8x128xf32>
    %cst = arith.constant dense<0.000000e+00> : vector<2x8xf32>
    %2 = vector.multi_reduction <add>, %1, %cst [2] : vector<2x8x128xf32> to vector<2x8xf32>
    %3 = vector.shape_cast %2 : vector<2x8xf32> to vector<2x8x1xf32>
    %cst_2 = arith.constant 9.99999996E-13 : f32
    %4 = vector.broadcast %cst_2 : f32 to vector<2x8x1xf32>
    %5 = arith.addf %3, %4 : vector<2x8x1xf32>
    %6 = math.rsqrt %5 : vector<2x8x1xf32>
    %7 = vector.broadcast %6 : vector<2x8x1xf32> to vector<2x8x128xf32>
    %8 = arith.mulf %0, %7 : vector<2x8x128xf32>
    %9 = vector.shape_cast %8 : vector<2x8x128xf32> to vector<16x128xf32>
    %c0_3 = arith.constant 0 : index
    %c0_4 = arith.constant 0 : index
    %10 = vector.load %arg2[%c0_3, %c0_4] : memref<128x384xf32, #tpu.memory_space<vmem>>, vector<128x384xf32>
    %cst_5 = arith.constant dense<0.000000e+00> : vector<16x384xf32>
    %11 = tpu.matmul %9, %10, %cst_5 {dimension_numbers = #tpu.dot_dimension_numbers<[1], [0], [0], [1], [0, 0, 1, 1], [], []>} : vector<16x128xf32>, vector<128x384xf32>, vector<16x384xf32> -> vector<16x384xf32>
    %c0_6 = arith.constant 0 : index
    %c0_7 = arith.constant 0 : index
    %12 = vector.load %arg4[%c0_6, %c0_7] : memref<1x384xf32, #tpu.memory_space<vmem>>, vector<1x384xf32>
    %13 = vector.broadcast %12 : vector<1x384xf32> to vector<16x384xf32>
    %14 = arith.addf %11, %13 : vector<16x384xf32>
    %15 = vector.shape_cast %14 : vector<16x384xf32> to vector<2x8x384xf32>
    %c0_8 = arith.constant 0 : index
    %c0_9 = arith.constant 0 : index
    %16 = vector.load %arg3[%c0_8, %c0_9] : memref<128x384xf32, #tpu.memory_space<vmem>>, vector<128x384xf32>
    %c0_10 = arith.constant 0 : index
    %c0_11 = arith.constant 0 : index
    %17 = vector.load %arg5[%c0_10, %c0_11] : memref<1x384xf32, #tpu.memory_space<vmem>>, vector<1x384xf32>
    %cst_12 = arith.constant 0.000000e+00 : f32
    %18 = vector.broadcast %cst_12 : f32 to vector<2x128xf32>
    %19 = vector.extract_strided_slice %15 {offsets = [0, 0, 0], sizes = [2, 1, 384], strides = [1, 1, 1]} : vector<2x8x384xf32> to vector<2x1x384xf32>
    %20 = vector.shape_cast %19 : vector<2x1x384xf32> to vector<2x384xf32>
    %cst_13 = arith.constant dense<0.000000e+00> : vector<2x384xf32>
    %21 = tpu.matmul %18, %16, %cst_13 {dimension_numbers = #tpu.dot_dimension_numbers<[1], [0], [0], [1], [0, 0, 1, 1], [], []>} : vector<2x128xf32>, vector<128x384xf32>, vector<2x384xf32> -> vector<2x384xf32>
    %22 = vector.broadcast %17 : vector<1x384xf32> to vector<2x384xf32>
    %23 = arith.addf %21, %22 : vector<2x384xf32>
    %24 = vector.extract_strided_slice %20 {offsets = [0, 0], sizes = [2, 128], strides = [1, 1]} : vector<2x384xf32> to vector<2x128xf32>
    %25 = vector.extract_strided_slice %23 {offsets = [0, 0], sizes = [2, 128], strides = [1, 1]} : vector<2x384xf32> to vector<2x128xf32>
    %26 = arith.addf %24, %25 : vector<2x128xf32>
    %27 = arith.negf %26 : vector<2x128xf32>
    %28 = math.exp %27 : vector<2x128xf32>
    %cst_14 = arith.constant 1.000000e+00 : f32
    %29 = vector.broadcast %cst_14 : f32 to vector<2x128xf32>
    %30 = arith.addf %29, %28 : vector<2x128xf32>
    %31 = arith.divf %29, %30 : vector<2x128xf32>
    %32 = vector.extract_strided_slice %20 {offsets = [0, 128], sizes = [2, 128], strides = [1, 1]} : vector<2x384xf32> to vector<2x128xf32>
    %33 = vector.extract_strided_slice %23 {offsets = [0, 128], sizes = [2, 128], strides = [1, 1]} : vector<2x384xf32> to vector<2x128xf32>
    %34 = arith.addf %32, %33 : vector<2x128xf32>
    %35 = arith.negf %34 : vector<2x128xf32>
    %36 = math.exp %35 : vector<2x128xf32>
    %cst_15 = arith.constant 1.000000e+00 : f32
    %37 = vector.broadcast %cst_15 : f32 to vector<2x128xf32>
    %38 = arith.addf %37, %36 : vector<2x128xf32>
    %39 = arith.divf %37, %38 : vector<2x128xf32>
    %40 = vector.extract_strided_slice %20 {offsets = [0, 256], sizes = [2, 128], strides = [1, 1]} : vector<2x384xf32> to vector<2x128xf32>
    %41 = vector.extract_strided_slice %23 {offsets = [0, 256], sizes = [2, 128], strides = [1, 1]} : vector<2x384xf32> to vector<2x128xf32>
    %42 = arith.mulf %31, %41 : vector<2x128xf32>
    %43 = arith.addf %40, %42 : vector<2x128xf32>
    %44 = math.tanh %43 : vector<2x128xf32>
    %cst_16 = arith.constant 1.000000e+00 : f32
    %45 = vector.broadcast %cst_16 : f32 to vector<2x128xf32>
    %46 = arith.subf %45, %39 : vector<2x128xf32>
    %47 = arith.mulf %46, %44 : vector<2x128xf32>
    %48 = arith.mulf %39, %18 : vector<2x128xf32>
    %49 = arith.addf %47, %48 : vector<2x128xf32>
    %50 = vector.extract_strided_slice %8 {offsets = [0, 0, 0], sizes = [2, 1, 128], strides = [1, 1, 1]} : vector<2x8x128xf32> to vector<2x1x128xf32>
    %51 = vector.shape_cast %50 : vector<2x1x128xf32> to vector<2x128xf32>
    %52 = arith.addf %49, %51 : vector<2x128xf32>
    %53 = vector.shape_cast %52 : vector<2x128xf32> to vector<2x1x128xf32>
    %c0_17 = arith.constant 0 : index
    %c0_18 = arith.constant 0 : index
    %c0_19 = arith.constant 0 : index
    %54 = vector.load %arg6[%c0_17, %c0_18, %c0_19] : memref<2x8x128xf32, #tpu.memory_space<vmem>>, vector<2x1x128xf32>
    tpu.vector_store %arg6[%c0_17, %c0_18, %c0_19], %53 {strides = array<i32>} : memref<2x8x128xf32, #tpu.memory_space<vmem>>, vector<2x1x128xf32>,
    %55 = vector.extract_strided_slice %15 {offsets = [0, 1, 0], sizes = [2, 1, 384], strides = [1, 1, 1]} : vector<2x8x384xf32> to vector<2x1x384xf32>
    %56 = vector.shape_cast %55 : vector<2x1x384xf32> to vector<2x384xf32>
    %cst_20 = arith.constant dense<0.000000e+00> : vector<2x384xf32>
    %57 = tpu.matmul %49, %16, %cst_20 {dimension_numbers = #tpu.dot_dimension_numbers<[1], [0], [0], [1], [0, 0, 1, 1], [], []>} : vector<2x128xf32>, vector<128x384xf32>, vector<2x384xf32> -> vector<2x384xf32>
    %58 = vector.broadcast %17 : vector<1x384xf32> to vector<2x384xf32>
    %59 = arith.addf %57, %58 : vector<2x384xf32>
    %60 = vector.extract_strided_slice %56 {offsets = [0, 0], sizes = [2, 128], strides = [1, 1]} : vector<2x384xf32> to vector<2x128xf32>
    %61 = vector.extract_strided_slice %59 {offsets = [0, 0], sizes = [2, 128], strides = [1, 1]} : vector<2x384xf32> to vector<2x128xf32>
    %62 = arith.addf %60, %61 : vector<2x128xf32>
    %63 = arith.negf %62 : vector<2x128xf32>
    %64 = math.exp %63 : vector<2x128xf32>
    %cst_21 = arith.constant 1.000000e+00 : f32
    %65 = vector.broadcast %cst_21 : f32 to vector<2x128xf32>
    %66 = arith.addf %65, %64 : vector<2x128xf32>
    %67 = arith.divf %65, %66 : vector<2x128xf32>
    %68 = vector.extract_strided_slice %56 {offsets = [0, 128], sizes = [2, 128], strides = [1, 1]} : vector<2x384xf32> to vector<2x128xf32>
    %69 = vector.extract_strided_slice %59 {offsets = [0, 128], sizes = [2, 128], strides = [1, 1]} : vector<2x384xf32> to vector<2x128xf32>
    %70 = arith.addf %68, %69 : vector<2x128xf32>
    %71 = arith.negf %70 : vector<2x128xf32>
    %72 = math.exp %71 : vector<2x128xf32>
    %cst_22 = arith.constant 1.000000e+00 : f32
    %73 = vector.broadcast %cst_22 : f32 to vector<2x128xf32>
    %74 = arith.addf %73, %72 : vector<2x128xf32>
    %75 = arith.divf %73, %74 : vector<2x128xf32>
    %76 = vector.extract_strided_slice %56 {offsets = [0, 256], sizes = [2, 128], strides = [1, 1]} : vector<2x384xf32> to vector<2x128xf32>
    %77 = vector.extract_strided_slice %59 {offsets = [0, 256], sizes = [2, 128], strides = [1, 1]} : vector<2x384xf32> to vector<2x128xf32>
    %78 = arith.mulf %67, %77 : vector<2x128xf32>
    %79 = arith.addf %76, %78 : vector<2x128xf32>
    %80 = math.tanh %79 : vector<2x128xf32>
    %cst_23 = arith.constant 1.000000e+00 : f32
    %81 = vector.broadcast %cst_23 : f32 to vector<2x128xf32>
    %82 = arith.subf %81, %75 : vector<2x128xf32>
    %83 = arith.mulf %82, %80 : vector<2x128xf32>
    %84 = arith.mulf %75, %49 : vector<2x128xf32>
    %85 = arith.addf %83, %84 : vector<2x128xf32>
    %86 = vector.extract_strided_slice %8 {offsets = [0, 1, 0], sizes = [2, 1, 128], strides = [1, 1, 1]} : vector<2x8x128xf32> to vector<2x1x128xf32>
    %87 = vector.shape_cast %86 : vector<2x1x128xf32> to vector<2x128xf32>
    %88 = arith.addf %85, %87 : vector<2x128xf32>
    %89 = vector.shape_cast %88 : vector<2x128xf32> to vector<2x1x128xf32>
    %c0_24 = arith.constant 0 : index
    %c1 = arith.constant 1 : index
    %c0_25 = arith.constant 0 : index
    %90 = vector.load %arg6[%c0_24, %c1, %c0_25] : memref<2x8x128xf32, #tpu.memory_space<vmem>>, vector<2x1x128xf32>
    tpu.vector_store %arg6[%c0_24, %c1, %c0_25], %89 {strides = array<i32>} : memref<2x8x128xf32, #tpu.memory_space<vmem>>, vector<2x1x128xf32>,
    %91 = vector.extract_strided_slice %15 {offsets = [0, 2, 0], sizes = [2, 1, 384], strides = [1, 1, 1]} : vector<2x8x384xf32> to vector<2x1x384xf32>
    %92 = vector.shape_cast %91 : vector<2x1x384xf32> to vector<2x384xf32>
    %cst_26 = arith.constant dense<0.000000e+00> : vector<2x384xf32>
    %93 = tpu.matmul %85, %16, %cst_26 {dimension_numbers = #tpu.dot_dimension_numbers<[1], [0], [0], [1], [0, 0, 1, 1], [], []>} : vector<2x128xf32>, vector<128x384xf32>, vector<2x384xf32> -> vector<2x384xf32>
    %94 = vector.broadcast %17 : vector<1x384xf32> to vector<2x384xf32>
    %95 = arith.addf %93, %94 : vector<2x384xf32>
    %96 = vector.extract_strided_slice %92 {offsets = [0, 0], sizes = [2, 128], strides = [1, 1]} : vector<2x384xf32> to vector<2x128xf32>
    %97 = vector.extract_strided_slice %95 {offsets = [0, 0], sizes = [2, 128], strides = [1, 1]} : vector<2x384xf32> to vector<2x128xf32>
    %98 = arith.addf %96, %97 : vector<2x128xf32>
    %99 = arith.negf %98 : vector<2x128xf32>
    %100 = math.exp %99 : vector<2x128xf32>
    %cst_27 = arith.constant 1.000000e+00 : f32
    %101 = vector.broadcast %cst_27 : f32 to vector<2x128xf32>
    %102 = arith.addf %101, %100 : vector<2x128xf32>
    %103 = arith.divf %101, %102 : vector<2x128xf32>
    %104 = vector.extract_strided_slice %92 {offsets = [0, 128], sizes = [2, 128], strides = [1, 1]} : vector<2x384xf32> to vector<2x128xf32>
    %105 = vector.extract_strided_slice %95 {offsets = [0, 128], sizes = [2, 128], strides = [1, 1]} : vector<2x384xf32> to vector<2x128xf32>
    %106 = arith.addf %104, %105 : vector<2x128xf32>
    %107 = arith.negf %106 : vector<2x128xf32>
    %108 = math.exp %107 : vector<2x128xf32>
    %cst_28 = arith.constant 1.000000e+00 : f32
    %109 = vector.broadcast %cst_28 : f32 to vector<2x128xf32>
    %110 = arith.addf %109, %108 : vector<2x128xf32>
    %111 = arith.divf %109, %110 : vector<2x128xf32>
    %112 = vector.extract_strided_slice %92 {offsets = [0, 256], sizes = [2, 128], strides = [1, 1]} : vector<2x384xf32> to vector<2x128xf32>
    %113 = vector.extract_strided_slice %95 {offsets = [0, 256], sizes = [2, 128], strides = [1, 1]} : vector<2x384xf32> to vector<2x128xf32>
    %114 = arith.mulf %103, %113 : vector<2x128xf32>
    %115 = arith.addf %112, %114 : vector<2x128xf32>
    %116 = math.tanh %115 : vector<2x128xf32>
    %cst_29 = arith.constant 1.000000e+00 : f32
    %117 = vector.broadcast %cst_29 : f32 to vector<2x128xf32>
    %118 = arith.subf %117, %111 : vector<2x128xf32>
    %119 = arith.mulf %118, %116 : vector<2x128xf32>
    %120 = arith.mulf %111, %85 : vector<2x128xf32>
    %121 = arith.addf %119, %120 : vector<2x128xf32>
    %122 = vector.extract_strided_slice %8 {offsets = [0, 2, 0], sizes = [2, 1, 128], strides = [1, 1, 1]} : vector<2x8x128xf32> to vector<2x1x128xf32>
    %123 = vector.shape_cast %122 : vector<2x1x128xf32> to vector<2x128xf32>
    %124 = arith.addf %121, %123 : vector<2x128xf32>
    %125 = vector.shape_cast %124 : vector<2x128xf32> to vector<2x1x128xf32>
    %c0_30 = arith.constant 0 : index
    %c2 = arith.constant 2 : index
    %c0_31 = arith.constant 0 : index
    %126 = vector.load %arg6[%c0_30, %c2, %c0_31] : memref<2x8x128xf32, #tpu.memory_space<vmem>>, vector<2x1x128xf32>
    tpu.vector_store %arg6[%c0_30, %c2, %c0_31], %125 {strides = array<i32>} : memref<2x8x128xf32, #tpu.memory_space<vmem>>, vector<2x1x128xf32>,
    %127 = vector.extract_strided_slice %15 {offsets = [0, 3, 0], sizes = [2, 1, 384], strides = [1, 1, 1]} : vector<2x8x384xf32> to vector<2x1x384xf32>
    %128 = vector.shape_cast %127 : vector<2x1x384xf32> to vector<2x384xf32>
    %cst_32 = arith.constant dense<0.000000e+00> : vector<2x384xf32>
    %129 = tpu.matmul %121, %16, %cst_32 {dimension_numbers = #tpu.dot_dimension_numbers<[1], [0], [0], [1], [0, 0, 1, 1], [], []>} : vector<2x128xf32>, vector<128x384xf32>, vector<2x384xf32> -> vector<2x384xf32>
    %130 = vector.broadcast %17 : vector<1x384xf32> to vector<2x384xf32>
    %131 = arith.addf %129, %130 : vector<2x384xf32>
    %132 = vector.extract_strided_slice %128 {offsets = [0, 0], sizes = [2, 128], strides = [1, 1]} : vector<2x384xf32> to vector<2x128xf32>
    %133 = vector.extract_strided_slice %131 {offsets = [0, 0], sizes = [2, 128], strides = [1, 1]} : vector<2x384xf32> to vector<2x128xf32>
    %134 = arith.addf %132, %133 : vector<2x128xf32>
    %135 = arith.negf %134 : vector<2x128xf32>
    %136 = math.exp %135 : vector<2x128xf32>
    %cst_33 = arith.constant 1.000000e+00 : f32
    %137 = vector.broadcast %cst_33 : f32 to vector<2x128xf32>
    %138 = arith.addf %137, %136 : vector<2x128xf32>
    %139 = arith.divf %137, %138 : vector<2x128xf32>
    %140 = vector.extract_strided_slice %128 {offsets = [0, 128], sizes = [2, 128], strides = [1, 1]} : vector<2x384xf32> to vector<2x128xf32>
    %141 = vector.extract_strided_slice %131 {offsets = [0, 128], sizes = [2, 128], strides = [1, 1]} : vector<2x384xf32> to vector<2x128xf32>
    %142 = arith.addf %140, %141 : vector<2x128xf32>
    %143 = arith.negf %142 : vector<2x128xf32>
    %144 = math.exp %143 : vector<2x128xf32>
    %cst_34 = arith.constant 1.000000e+00 : f32
    %145 = vector.broadcast %cst_34 : f32 to vector<2x128xf32>
    %146 = arith.addf %145, %144 : vector<2x128xf32>
    %147 = arith.divf %145, %146 : vector<2x128xf32>
    %148 = vector.extract_strided_slice %128 {offsets = [0, 256], sizes = [2, 128], strides = [1, 1]} : vector<2x384xf32> to vector<2x128xf32>
    %149 = vector.extract_strided_slice %131 {offsets = [0, 256], sizes = [2, 128], strides = [1, 1]} : vector<2x384xf32> to vector<2x128xf32>
    %150 = arith.mulf %139, %149 : vector<2x128xf32>
    %151 = arith.addf %148, %150 : vector<2x128xf32>
    %152 = math.tanh %151 : vector<2x128xf32>
    %cst_35 = arith.constant 1.000000e+00 : f32
    %153 = vector.broadcast %cst_35 : f32 to vector<2x128xf32>
    %154 = arith.subf %153, %147 : vector<2x128xf32>
    %155 = arith.mulf %154, %152 : vector<2x128xf32>
    %156 = arith.mulf %147, %121 : vector<2x128xf32>
    %157 = arith.addf %155, %156 : vector<2x128xf32>
    %158 = vector.extract_strided_slice %8 {offsets = [0, 3, 0], sizes = [2, 1, 128], strides = [1, 1, 1]} : vector<2x8x128xf32> to vector<2x1x128xf32>
    %159 = vector.shape_cast %158 : vector<2x1x128xf32> to vector<2x128xf32>
    %160 = arith.addf %157, %159 : vector<2x128xf32>
    %161 = vector.shape_cast %160 : vector<2x128xf32> to vector<2x1x128xf32>
    %c0_36 = arith.constant 0 : index
    %c3 = arith.constant 3 : index
    %c0_37 = arith.constant 0 : index
    %162 = vector.load %arg6[%c0_36, %c3, %c0_37] : memref<2x8x128xf32, #tpu.memory_space<vmem>>, vector<2x1x128xf32>
    tpu.vector_store %arg6[%c0_36, %c3, %c0_37], %161 {strides = array<i32>} : memref<2x8x128xf32, #tpu.memory_space<vmem>>, vector<2x1x128xf32>,
    %163 = vector.extract_strided_slice %15 {offsets = [0, 4, 0], sizes = [2, 1, 384], strides = [1, 1, 1]} : vector<2x8x384xf32> to vector<2x1x384xf32>
    %164 = vector.shape_cast %163 : vector<2x1x384xf32> to vector<2x384xf32>
    %cst_38 = arith.constant dense<0.000000e+00> : vector<2x384xf32>
    %165 = tpu.matmul %157, %16, %cst_38 {dimension_numbers = #tpu.dot_dimension_numbers<[1], [0], [0], [1], [0, 0, 1, 1], [], []>} : vector<2x128xf32>, vector<128x384xf32>, vector<2x384xf32> -> vector<2x384xf32>
    %166 = vector.broadcast %17 : vector<1x384xf32> to vector<2x384xf32>
    %167 = arith.addf %165, %166 : vector<2x384xf32>
    %168 = vector.extract_strided_slice %164 {offsets = [0, 0], sizes = [2, 128], strides = [1, 1]} : vector<2x384xf32> to vector<2x128xf32>
    %169 = vector.extract_strided_slice %167 {offsets = [0, 0], sizes = [2, 128], strides = [1, 1]} : vector<2x384xf32> to vector<2x128xf32>
    %170 = arith.addf %168, %169 : vector<2x128xf32>
    %171 = arith.negf %170 : vector<2x128xf32>
    %172 = math.exp %171 : vector<2x128xf32>
    %cst_39 = arith.constant 1.000000e+00 : f32
    %173 = vector.broadcast %cst_39 : f32 to vector<2x128xf32>
    %174 = arith.addf %173, %172 : vector<2x128xf32>
    %175 = arith.divf %173, %174 : vector<2x128xf32>
    %176 = vector.extract_strided_slice %164 {offsets = [0, 128], sizes = [2, 128], strides = [1, 1]} : vector<2x384xf32> to vector<2x128xf32>
    %177 = vector.extract_strided_slice %167 {offsets = [0, 128], sizes = [2, 128], strides = [1, 1]} : vector<2x384xf32> to vector<2x128xf32>
    %178 = arith.addf %176, %177 : vector<2x128xf32>
    %179 = arith.negf %178 : vector<2x128xf32>
    %180 = math.exp %179 : vector<2x128xf32>
    %cst_40 = arith.constant 1.000000e+00 : f32
    %181 = vector.broadcast %cst_40 : f32 to vector<2x128xf32>
    %182 = arith.addf %181, %180 : vector<2x128xf32>
    %183 = arith.divf %181, %182 : vector<2x128xf32>
    %184 = vector.extract_strided_slice %164 {offsets = [0, 256], sizes = [2, 128], strides = [1, 1]} : vector<2x384xf32> to vector<2x128xf32>
    %185 = vector.extract_strided_slice %167 {offsets = [0, 256], sizes = [2, 128], strides = [1, 1]} : vector<2x384xf32> to vector<2x128xf32>
    %186 = arith.mulf %175, %185 : vector<2x128xf32>
    %187 = arith.addf %184, %186 : vector<2x128xf32>
    %188 = math.tanh %187 : vector<2x128xf32>
    %cst_41 = arith.constant 1.000000e+00 : f32
    %189 = vector.broadcast %cst_41 : f32 to vector<2x128xf32>
    %190 = arith.subf %189, %183 : vector<2x128xf32>
    %191 = arith.mulf %190, %188 : vector<2x128xf32>
    %192 = arith.mulf %183, %157 : vector<2x128xf32>
    %193 = arith.addf %191, %192 : vector<2x128xf32>
    %194 = vector.extract_strided_slice %8 {offsets = [0, 4, 0], sizes = [2, 1, 128], strides = [1, 1, 1]} : vector<2x8x128xf32> to vector<2x1x128xf32>
    %195 = vector.shape_cast %194 : vector<2x1x128xf32> to vector<2x128xf32>
    %196 = arith.addf %193, %195 : vector<2x128xf32>
    %197 = vector.shape_cast %196 : vector<2x128xf32> to vector<2x1x128xf32>
    %c0_42 = arith.constant 0 : index
    %c4 = arith.constant 4 : index
    %c0_43 = arith.constant 0 : index
    %198 = vector.load %arg6[%c0_42, %c4, %c0_43] : memref<2x8x128xf32, #tpu.memory_space<vmem>>, vector<2x1x128xf32>
    tpu.vector_store %arg6[%c0_42, %c4, %c0_43], %197 {strides = array<i32>} : memref<2x8x128xf32, #tpu.memory_space<vmem>>, vector<2x1x128xf32>,
    %199 = vector.extract_strided_slice %15 {offsets = [0, 5, 0], sizes = [2, 1, 384], strides = [1, 1, 1]} : vector<2x8x384xf32> to vector<2x1x384xf32>
    %200 = vector.shape_cast %199 : vector<2x1x384xf32> to vector<2x384xf32>
    %cst_44 = arith.constant dense<0.000000e+00> : vector<2x384xf32>
    %201 = tpu.matmul %193, %16, %cst_44 {dimension_numbers = #tpu.dot_dimension_numbers<[1], [0], [0], [1], [0, 0, 1, 1], [], []>} : vector<2x128xf32>, vector<128x384xf32>, vector<2x384xf32> -> vector<2x384xf32>
    %202 = vector.broadcast %17 : vector<1x384xf32> to vector<2x384xf32>
    %203 = arith.addf %201, %202 : vector<2x384xf32>
    %204 = vector.extract_strided_slice %200 {offsets = [0, 0], sizes = [2, 128], strides = [1, 1]} : vector<2x384xf32> to vector<2x128xf32>
    %205 = vector.extract_strided_slice %203 {offsets = [0, 0], sizes = [2, 128], strides = [1, 1]} : vector<2x384xf32> to vector<2x128xf32>
    %206 = arith.addf %204, %205 : vector<2x128xf32>
    %207 = arith.negf %206 : vector<2x128xf32>
    %208 = math.exp %207 : vector<2x128xf32>
    %cst_45 = arith.constant 1.000000e+00 : f32
    %209 = vector.broadcast %cst_45 : f32 to vector<2x128xf32>
    %210 = arith.addf %209, %208 : vector<2x128xf32>
    %211 = arith.divf %209, %210 : vector<2x128xf32>
    %212 = vector.extract_strided_slice %200 {offsets = [0, 128], sizes = [2, 128], strides = [1, 1]} : vector<2x384xf32> to vector<2x128xf32>
    %213 = vector.extract_strided_slice %203 {offsets = [0, 128], sizes = [2, 128], strides = [1, 1]} : vector<2x384xf32> to vector<2x128xf32>
    %214 = arith.addf %212, %213 : vector<2x128xf32>
    %215 = arith.negf %214 : vector<2x128xf32>
    %216 = math.exp %215 : vector<2x128xf32>
    %cst_46 = arith.constant 1.000000e+00 : f32
    %217 = vector.broadcast %cst_46 : f32 to vector<2x128xf32>
    %218 = arith.addf %217, %216 : vector<2x128xf32>
    %219 = arith.divf %217, %218 : vector<2x128xf32>
    %220 = vector.extract_strided_slice %200 {offsets = [0, 256], sizes = [2, 128], strides = [1, 1]} : vector<2x384xf32> to vector<2x128xf32>
    %221 = vector.extract_strided_slice %203 {offsets = [0, 256], sizes = [2, 128], strides = [1, 1]} : vector<2x384xf32> to vector<2x128xf32>
    %222 = arith.mulf %211, %221 : vector<2x128xf32>
    %223 = arith.addf %220, %222 : vector<2x128xf32>
    %224 = math.tanh %223 : vector<2x128xf32>
    %cst_47 = arith.constant 1.000000e+00 : f32
    %225 = vector.broadcast %cst_47 : f32 to vector<2x128xf32>
    %226 = arith.subf %225, %219 : vector<2x128xf32>
    %227 = arith.mulf %226, %224 : vector<2x128xf32>
    %228 = arith.mulf %219, %193 : vector<2x128xf32>
    %229 = arith.addf %227, %228 : vector<2x128xf32>
    %230 = vector.extract_strided_slice %8 {offsets = [0, 5, 0], sizes = [2, 1, 128], strides = [1, 1, 1]} : vector<2x8x128xf32> to vector<2x1x128xf32>
    %231 = vector.shape_cast %230 : vector<2x1x128xf32> to vector<2x128xf32>
    %232 = arith.addf %229, %231 : vector<2x128xf32>
    %233 = vector.shape_cast %232 : vector<2x128xf32> to vector<2x1x128xf32>
    %c0_48 = arith.constant 0 : index
    %c5 = arith.constant 5 : index
    %c0_49 = arith.constant 0 : index
    %234 = vector.load %arg6[%c0_48, %c5, %c0_49] : memref<2x8x128xf32, #tpu.memory_space<vmem>>, vector<2x1x128xf32>
    tpu.vector_store %arg6[%c0_48, %c5, %c0_49], %233 {strides = array<i32>} : memref<2x8x128xf32, #tpu.memory_space<vmem>>, vector<2x1x128xf32>,
    %235 = vector.extract_strided_slice %15 {offsets = [0, 6, 0], sizes = [2, 1, 384], strides = [1, 1, 1]} : vector<2x8x384xf32> to vector<2x1x384xf32>
    %236 = vector.shape_cast %235 : vector<2x1x384xf32> to vector<2x384xf32>
    %cst_50 = arith.constant dense<0.000000e+00> : vector<2x384xf32>
    %237 = tpu.matmul %229, %16, %cst_50 {dimension_numbers = #tpu.dot_dimension_numbers<[1], [0], [0], [1], [0, 0, 1, 1], [], []>} : vector<2x128xf32>, vector<128x384xf32>, vector<2x384xf32> -> vector<2x384xf32>
    %238 = vector.broadcast %17 : vector<1x384xf32> to vector<2x384xf32>
    %239 = arith.addf %237, %238 : vector<2x384xf32>
    %240 = vector.extract_strided_slice %236 {offsets = [0, 0], sizes = [2, 128], strides = [1, 1]} : vector<2x384xf32> to vector<2x128xf32>
    %241 = vector.extract_strided_slice %239 {offsets = [0, 0], sizes = [2, 128], strides = [1, 1]} : vector<2x384xf32> to vector<2x128xf32>
    %242 = arith.addf %240, %241 : vector<2x128xf32>
    %243 = arith.negf %242 : vector<2x128xf32>
    %244 = math.exp %243 : vector<2x128xf32>
    %cst_51 = arith.constant 1.000000e+00 : f32
    %245 = vector.broadcast %cst_51 : f32 to vector<2x128xf32>
    %246 = arith.addf %245, %244 : vector<2x128xf32>
    %247 = arith.divf %245, %246 : vector<2x128xf32>
    %248 = vector.extract_strided_slice %236 {offsets = [0, 128], sizes = [2, 128], strides = [1, 1]} : vector<2x384xf32> to vector<2x128xf32>
    %249 = vector.extract_strided_slice %239 {offsets = [0, 128], sizes = [2, 128], strides = [1, 1]} : vector<2x384xf32> to vector<2x128xf32>
    %250 = arith.addf %248, %249 : vector<2x128xf32>
    %251 = arith.negf %250 : vector<2x128xf32>
    %252 = math.exp %251 : vector<2x128xf32>
    %cst_52 = arith.constant 1.000000e+00 : f32
    %253 = vector.broadcast %cst_52 : f32 to vector<2x128xf32>
    %254 = arith.addf %253, %252 : vector<2x128xf32>
    %255 = arith.divf %253, %254 : vector<2x128xf32>
    %256 = vector.extract_strided_slice %236 {offsets = [0, 256], sizes = [2, 128], strides = [1, 1]} : vector<2x384xf32> to vector<2x128xf32>
    %257 = vector.extract_strided_slice %239 {offsets = [0, 256], sizes = [2, 128], strides = [1, 1]} : vector<2x384xf32> to vector<2x128xf32>
    %258 = arith.mulf %247, %257 : vector<2x128xf32>
    %259 = arith.addf %256, %258 : vector<2x128xf32>
    %260 = math.tanh %259 : vector<2x128xf32>
    %cst_53 = arith.constant 1.000000e+00 : f32
    %261 = vector.broadcast %cst_53 : f32 to vector<2x128xf32>
    %262 = arith.subf %261, %255 : vector<2x128xf32>
    %263 = arith.mulf %262, %260 : vector<2x128xf32>
    %264 = arith.mulf %255, %229 : vector<2x128xf32>
    %265 = arith.addf %263, %264 : vector<2x128xf32>
    %266 = vector.extract_strided_slice %8 {offsets = [0, 6, 0], sizes = [2, 1, 128], strides = [1, 1, 1]} : vector<2x8x128xf32> to vector<2x1x128xf32>
    %267 = vector.shape_cast %266 : vector<2x1x128xf32> to vector<2x128xf32>
    %268 = arith.addf %265, %267 : vector<2x128xf32>
    %269 = vector.shape_cast %268 : vector<2x128xf32> to vector<2x1x128xf32>
    %c0_54 = arith.constant 0 : index
    %c6 = arith.constant 6 : index
    %c0_55 = arith.constant 0 : index
    %270 = vector.load %arg6[%c0_54, %c6, %c0_55] : memref<2x8x128xf32, #tpu.memory_space<vmem>>, vector<2x1x128xf32>
    tpu.vector_store %arg6[%c0_54, %c6, %c0_55], %269 {strides = array<i32>} : memref<2x8x128xf32, #tpu.memory_space<vmem>>, vector<2x1x128xf32>,
    %271 = vector.extract_strided_slice %15 {offsets = [0, 7, 0], sizes = [2, 1, 384], strides = [1, 1, 1]} : vector<2x8x384xf32> to vector<2x1x384xf32>
    %272 = vector.shape_cast %271 : vector<2x1x384xf32> to vector<2x384xf32>
    %cst_56 = arith.constant dense<0.000000e+00> : vector<2x384xf32>
    %273 = tpu.matmul %265, %16, %cst_56 {dimension_numbers = #tpu.dot_dimension_numbers<[1], [0], [0], [1], [0, 0, 1, 1], [], []>} : vector<2x128xf32>, vector<128x384xf32>, vector<2x384xf32> -> vector<2x384xf32>
    %274 = vector.broadcast %17 : vector<1x384xf32> to vector<2x384xf32>
    %275 = arith.addf %273, %274 : vector<2x384xf32>
    %276 = vector.extract_strided_slice %272 {offsets = [0, 0], sizes = [2, 128], strides = [1, 1]} : vector<2x384xf32> to vector<2x128xf32>
    %277 = vector.extract_strided_slice %275 {offsets = [0, 0], sizes = [2, 128], strides = [1, 1]} : vector<2x384xf32> to vector<2x128xf32>
    %278 = arith.addf %276, %277 : vector<2x128xf32>
    %279 = arith.negf %278 : vector<2x128xf32>
    %280 = math.exp %279 : vector<2x128xf32>
    %cst_57 = arith.constant 1.000000e+00 : f32
    %281 = vector.broadcast %cst_57 : f32 to vector<2x128xf32>
    %282 = arith.addf %281, %280 : vector<2x128xf32>
    %283 = arith.divf %281, %282 : vector<2x128xf32>
    %284 = vector.extract_strided_slice %272 {offsets = [0, 128], sizes = [2, 128], strides = [1, 1]} : vector<2x384xf32> to vector<2x128xf32>
    %285 = vector.extract_strided_slice %275 {offsets = [0, 128], sizes = [2, 128], strides = [1, 1]} : vector<2x384xf32> to vector<2x128xf32>
    %286 = arith.addf %284, %285 : vector<2x128xf32>
    %287 = arith.negf %286 : vector<2x128xf32>
    %288 = math.exp %287 : vector<2x128xf32>
    %cst_58 = arith.constant 1.000000e+00 : f32
    %289 = vector.broadcast %cst_58 : f32 to vector<2x128xf32>
    %290 = arith.addf %289, %288 : vector<2x128xf32>
    %291 = arith.divf %289, %290 : vector<2x128xf32>
    %292 = vector.extract_strided_slice %272 {offsets = [0, 256], sizes = [2, 128], strides = [1, 1]} : vector<2x384xf32> to vector<2x128xf32>
    %293 = vector.extract_strided_slice %275 {offsets = [0, 256], sizes = [2, 128], strides = [1, 1]} : vector<2x384xf32> to vector<2x128xf32>
    %294 = arith.mulf %283, %293 : vector<2x128xf32>
    %295 = arith.addf %292, %294 : vector<2x128xf32>
    %296 = math.tanh %295 : vector<2x128xf32>
    %cst_59 = arith.constant 1.000000e+00 : f32
    %297 = vector.broadcast %cst_59 : f32 to vector<2x128xf32>
    %298 = arith.subf %297, %291 : vector<2x128xf32>
    %299 = arith.mulf %298, %296 : vector<2x128xf32>
    %300 = arith.mulf %291, %265 : vector<2x128xf32>
    %301 = arith.addf %299, %300 : vector<2x128xf32>
    %302 = vector.extract_strided_slice %8 {offsets = [0, 7, 0], sizes = [2, 1, 128], strides = [1, 1, 1]} : vector<2x8x128xf32> to vector<2x1x128xf32>
    %303 = vector.shape_cast %302 : vector<2x1x128xf32> to vector<2x128xf32>
    %304 = arith.addf %301, %303 : vector<2x128xf32>
    %305 = vector.shape_cast %304 : vector<2x128xf32> to vector<2x1x128xf32>
    %c0_60 = arith.constant 0 : index
    %c7 = arith.constant 7 : index
    %c0_61 = arith.constant 0 : index
    %306 = vector.load %arg6[%c0_60, %c7, %c0_61] : memref<2x8x128xf32, #tpu.memory_space<vmem>>, vector<2x1x128xf32>
    tpu.vector_store %arg6[%c0_60, %c7, %c0_61], %305 {strides = array<i32>} : memref<2x8x128xf32, #tpu.memory_space<vmem>>, vector<2x1x128xf32>,
    return
  }
  func.func @transform_0(%arg0: i32) -> (i32, i32, i32) {
    %c0_i32 = arith.constant 0 : i32
    %c0_i32_0 = arith.constant 0 : i32
    %c0_i32_1 = arith.constant 0 : i32
    return %arg0, %c0_i32, %c0_i32_0 : i32, i32, i32
  }
  func.func @transform_1(%arg0: i32) -> (i32, i32) {
    %c0_i32 = arith.constant 0 : i32
    %c0_i32_0 = arith.constant 0 : i32
    %c0_i32_1 = arith.constant 0 : i32
    return %c0_i32, %c0_i32_0 : i32, i32
  }
  func.func @transform_2(%arg0: i32) -> (i32, i32) {
    %c0_i32 = arith.constant 0 : i32
    %c0_i32_0 = arith.constant 0 : i32
    %c0_i32_1 = arith.constant 0 : i32
    return %c0_i32, %c0_i32_0 : i32, i32
  }
  func.func @transform_3(%arg0: i32) -> (i32, i32) {
    %c0_i32 = arith.constant 0 : i32
    %c0_i32_0 = arith.constant 0 : i32
    %c0_i32_1 = arith.constant 0 : i32
    return %c0_i32, %c0_i32_0 : i32, i32
  }
  func.func @transform_4(%arg0: i32) -> (i32, i32) {
    %c0_i32 = arith.constant 0 : i32
    %c0_i32_0 = arith.constant 0 : i32
    %c0_i32_1 = arith.constant 0 : i32
    return %c0_i32, %c0_i32_0 : i32, i32
  }
  func.func @transform_5(%arg0: i32) -> (i32, i32, i32) {
    %c0_i32 = arith.constant 0 : i32
    %c0_i32_0 = arith.constant 0 : i32
    %c0_i32_1 = arith.constant 0 : i32
    return %arg0, %c0_i32, %c0_i32_0 : i32, i32, i32
  }
}

module attributes {stable_mosaic.version = 11 : i64} {
  func.func @dcn_predict_kernel(%arg0: i32, %arg1: memref<2x8x128xf32, #tpu.memory_space<vmem>>, %arg2: memref<2x8x128xf32, #tpu.memory_space<vmem>>, %arg3: memref<128x128xf32, #tpu.memory_space<vmem>>, %arg4: memref<128x128xf32, #tpu.memory_space<vmem>>, %arg5: memref<128x128xf32, #tpu.memory_space<vmem>>, %arg6: memref<1x128xf32, #tpu.memory_space<vmem>>, %arg7: memref<128x128xf32, #tpu.memory_space<vmem>>, %arg8: memref<128x128xf32, #tpu.memory_space<vmem>>, %arg9: memref<1x128xf32, #tpu.memory_space<vmem>>, %arg10: memref<128x128xf32, #tpu.memory_space<vmem>>, %arg11: memref<128x128xf32, #tpu.memory_space<vmem>>, %arg12: memref<1x128xf32, #tpu.memory_space<vmem>>, %arg13: memref<128x128xf32, #tpu.memory_space<vmem>>, %arg14: memref<1x128xf32, #tpu.memory_space<vmem>>, %arg15: memref<2x8x128xf32, #tpu.memory_space<vmem>>) attributes {dimension_semantics = [#tpu.dimension_semantics<parallel>], iteration_bounds = array<i64: 1>, scalar_prefetch = 0 : i64, scratch_operands = 0 : i64, tpu.core_type = #tpu.core_type<tc>, window_params = [{transform_indices = @transform_0, window_bounds = array<i64: 2, 8, 128>}, {transform_indices = @transform_1, window_bounds = array<i64: 2, 8, 128>}, {pipeline_mode = #tpu.pipeline_mode<synchronous>, transform_indices = @transform_2, window_bounds = array<i64: 128, 128>}, {pipeline_mode = #tpu.pipeline_mode<synchronous>, transform_indices = @transform_3, window_bounds = array<i64: 128, 128>}, {pipeline_mode = #tpu.pipeline_mode<synchronous>, transform_indices = @transform_4, window_bounds = array<i64: 128, 128>}, {pipeline_mode = #tpu.pipeline_mode<synchronous>, transform_indices = @transform_5, window_bounds = array<i64: 1, 128>}, {pipeline_mode = #tpu.pipeline_mode<synchronous>, transform_indices = @transform_6, window_bounds = array<i64: 128, 128>}, {pipeline_mode = #tpu.pipeline_mode<synchronous>, transform_indices = @transform_7, window_bounds = array<i64: 128, 128>}, {pipeline_mode = #tpu.pipeline_mode<synchronous>, transform_indices = @transform_8, window_bounds = array<i64: 1, 128>}, {pipeline_mode = #tpu.pipeline_mode<synchronous>, transform_indices = @transform_9, window_bounds = array<i64: 128, 128>}, {pipeline_mode = #tpu.pipeline_mode<synchronous>, transform_indices = @transform_10, window_bounds = array<i64: 128, 128>}, {pipeline_mode = #tpu.pipeline_mode<synchronous>, transform_indices = @transform_11, window_bounds = array<i64: 1, 128>}, {pipeline_mode = #tpu.pipeline_mode<synchronous>, transform_indices = @transform_12, window_bounds = array<i64: 128, 128>}, {pipeline_mode = #tpu.pipeline_mode<synchronous>, transform_indices = @transform_13, window_bounds = array<i64: 1, 128>}, {transform_indices = @transform_14, window_bounds = array<i64: 2, 8, 128>}]} {
    %c0 = arith.constant 0 : index
    %c0_0 = arith.constant 0 : index
    %c0_1 = arith.constant 0 : index
    %0 = vector.load %arg1[%c0, %c0_0, %c0_1] : memref<2x8x128xf32, #tpu.memory_space<vmem>>, vector<2x8x128xf32>
    %c0_2 = arith.constant 0 : index
    %c0_3 = arith.constant 0 : index
    %c0_4 = arith.constant 0 : index
    %1 = vector.load %arg2[%c0_2, %c0_3, %c0_4] : memref<2x8x128xf32, #tpu.memory_space<vmem>>, vector<2x8x128xf32>
    %2 = vector.shape_cast %0 : vector<2x8x128xf32> to vector<16x128xf32>
    %3 = vector.shape_cast %1 : vector<2x8x128xf32> to vector<16x128xf32>
    %c0_5 = arith.constant 0 : index
    %c0_6 = arith.constant 0 : index
    %4 = vector.load %arg3[%c0_5, %c0_6] : memref<128x128xf32, #tpu.memory_space<vmem>>, vector<128x128xf32>
    %cst = arith.constant dense<0.000000e+00> : vector<16x128xf32>
    %5 = tpu.matmul %2, %4, %cst {dimension_numbers = #tpu.dot_dimension_numbers<[1], [0], [0], [1], [0, 0, 1, 1], [], []>} : vector<16x128xf32>, vector<128x128xf32>, vector<16x128xf32> -> vector<16x128xf32>
    %6 = vector.shape_cast %5 : vector<16x128xf32> to vector<2x8x128xf32>
    "tpu.trace_start"() <{level = 10 : i32, message = "btd,bsd->bts"}> : () -> ()
    %cst_7 = arith.constant dense<0.000000e+00> : vector<2x8x8xf32>
    %7 = tpu.matmul %6, %1, %cst_7 {dimension_numbers = #tpu.dot_dimension_numbers<[2], [2], [1], [1], [0, 0, 0, 1, 1, 1], [0], [0]>} : vector<2x8x128xf32>, vector<2x8x128xf32>, vector<2x8x8xf32> -> vector<2x8x8xf32>
    "tpu.trace_stop"() : () -> ()
    %8 = math.tanh %7 : vector<2x8x8xf32>
    %cst_8 = arith.constant dense<0xFF800000> : vector<2x8xf32>
    %9 = vector.multi_reduction <maximumf>, %8, %cst_8 [2] : vector<2x8x8xf32> to vector<2x8xf32>
    %10 = vector.shape_cast %9 : vector<2x8xf32> to vector<2x8x1xf32>
    %11 = vector.broadcast %10 : vector<2x8x1xf32> to vector<2x8x8xf32>
    %12 = arith.subf %8, %11 : vector<2x8x8xf32>
    %13 = math.exp %12 : vector<2x8x8xf32>
    %cst_9 = arith.constant dense<0.000000e+00> : vector<2x8xf32>
    %14 = vector.multi_reduction <add>, %13, %cst_9 [2] : vector<2x8x8xf32> to vector<2x8xf32>
    %15 = vector.shape_cast %14 : vector<2x8xf32> to vector<2x8x1xf32>
    %16 = vector.broadcast %15 : vector<2x8x1xf32> to vector<2x8x8xf32>
    %17 = arith.divf %13, %16 : vector<2x8x8xf32>
    %cst_10 = arith.constant dense<0xFF800000> : vector<2x8xf32>
    %18 = vector.multi_reduction <maximumf>, %8, %cst_10 [1] : vector<2x8x8xf32> to vector<2x8xf32>
    %19 = vector.shape_cast %18 : vector<2x8xf32> to vector<2x1x8xf32>
    %20 = vector.broadcast %19 : vector<2x1x8xf32> to vector<2x8x8xf32>
    %21 = arith.subf %8, %20 : vector<2x8x8xf32>
    %22 = math.exp %21 : vector<2x8x8xf32>
    %cst_11 = arith.constant dense<0.000000e+00> : vector<2x8xf32>
    %23 = vector.multi_reduction <add>, %22, %cst_11 [1] : vector<2x8x8xf32> to vector<2x8xf32>
    %24 = vector.shape_cast %23 : vector<2x8xf32> to vector<2x1x8xf32>
    %25 = vector.broadcast %24 : vector<2x1x8xf32> to vector<2x8x8xf32>
    %26 = arith.divf %22, %25 : vector<2x8x8xf32>
    "tpu.trace_start"() <{level = 10 : i32, message = "bts,bsd->btd"}> : () -> ()
    %cst_12 = arith.constant dense<0.000000e+00> : vector<2x8x128xf32>
    %27 = tpu.matmul %17, %1, %cst_12 {dimension_numbers = #tpu.dot_dimension_numbers<[2], [1], [1], [2], [0, 0, 0, 1, 1, 2], [0], [0]>} : vector<2x8x8xf32>, vector<2x8x128xf32>, vector<2x8x128xf32> -> vector<2x8x128xf32>
    "tpu.trace_stop"() : () -> ()
    "tpu.trace_start"() <{level = 10 : i32, message = "bts,btd->bsd"}> : () -> ()
    %cst_13 = arith.constant dense<0.000000e+00> : vector<2x8x128xf32>
    %28 = tpu.matmul %26, %0, %cst_13 {dimension_numbers = #tpu.dot_dimension_numbers<[1], [1], [2], [2], [0, 0, 0, 2, 1, 2], [0], [0]>} : vector<2x8x8xf32>, vector<2x8x128xf32>, vector<2x8x128xf32> -> vector<2x8x128xf32>
    "tpu.trace_stop"() : () -> ()
    %c0_14 = arith.constant 0 : index
    %c0_15 = arith.constant 0 : index
    %29 = vector.load %arg4[%c0_14, %c0_15] : memref<128x128xf32, #tpu.memory_space<vmem>>, vector<128x128xf32>
    %cst_16 = arith.constant dense<0.000000e+00> : vector<16x128xf32>
    %30 = tpu.matmul %2, %29, %cst_16 {dimension_numbers = #tpu.dot_dimension_numbers<[1], [0], [0], [1], [0, 0, 1, 1], [], []>} : vector<16x128xf32>, vector<128x128xf32>, vector<16x128xf32> -> vector<16x128xf32>
    %31 = vector.shape_cast %27 : vector<2x8x128xf32> to vector<16x128xf32>
    %c0_17 = arith.constant 0 : index
    %c0_18 = arith.constant 0 : index
    %32 = vector.load %arg5[%c0_17, %c0_18] : memref<128x128xf32, #tpu.memory_space<vmem>>, vector<128x128xf32>
    %cst_19 = arith.constant dense<0.000000e+00> : vector<16x128xf32>
    %33 = tpu.matmul %31, %32, %cst_19 {dimension_numbers = #tpu.dot_dimension_numbers<[1], [0], [0], [1], [0, 0, 1, 1], [], []>} : vector<16x128xf32>, vector<128x128xf32>, vector<16x128xf32> -> vector<16x128xf32>
    %34 = arith.addf %30, %33 : vector<16x128xf32>
    %c0_20 = arith.constant 0 : index
    %c0_21 = arith.constant 0 : index
    %35 = vector.load %arg6[%c0_20, %c0_21] : memref<1x128xf32, #tpu.memory_space<vmem>>, vector<1x128xf32>
    %36 = vector.broadcast %35 : vector<1x128xf32> to vector<16x128xf32>
    %37 = arith.addf %34, %36 : vector<16x128xf32>
    %38 = math.tanh %37 : vector<16x128xf32>
    %c0_22 = arith.constant 0 : index
    %c0_23 = arith.constant 0 : index
    %39 = vector.load %arg7[%c0_22, %c0_23] : memref<128x128xf32, #tpu.memory_space<vmem>>, vector<128x128xf32>
    %cst_24 = arith.constant dense<0.000000e+00> : vector<16x128xf32>
    %40 = tpu.matmul %3, %39, %cst_24 {dimension_numbers = #tpu.dot_dimension_numbers<[1], [0], [0], [1], [0, 0, 1, 1], [], []>} : vector<16x128xf32>, vector<128x128xf32>, vector<16x128xf32> -> vector<16x128xf32>
    %41 = vector.shape_cast %28 : vector<2x8x128xf32> to vector<16x128xf32>
    %c0_25 = arith.constant 0 : index
    %c0_26 = arith.constant 0 : index
    %42 = vector.load %arg8[%c0_25, %c0_26] : memref<128x128xf32, #tpu.memory_space<vmem>>, vector<128x128xf32>
    %cst_27 = arith.constant dense<0.000000e+00> : vector<16x128xf32>
    %43 = tpu.matmul %41, %42, %cst_27 {dimension_numbers = #tpu.dot_dimension_numbers<[1], [0], [0], [1], [0, 0, 1, 1], [], []>} : vector<16x128xf32>, vector<128x128xf32>, vector<16x128xf32> -> vector<16x128xf32>
    %44 = arith.addf %40, %43 : vector<16x128xf32>
    %c0_28 = arith.constant 0 : index
    %c0_29 = arith.constant 0 : index
    %45 = vector.load %arg9[%c0_28, %c0_29] : memref<1x128xf32, #tpu.memory_space<vmem>>, vector<1x128xf32>
    %46 = vector.broadcast %45 : vector<1x128xf32> to vector<16x128xf32>
    %47 = arith.addf %44, %46 : vector<16x128xf32>
    %48 = math.tanh %47 : vector<16x128xf32>
    %c0_30 = arith.constant 0 : index
    %c0_31 = arith.constant 0 : index
    %49 = vector.load %arg10[%c0_30, %c0_31] : memref<128x128xf32, #tpu.memory_space<vmem>>, vector<128x128xf32>
    %cst_32 = arith.constant dense<0.000000e+00> : vector<16x128xf32>
    %50 = tpu.matmul %38, %49, %cst_32 {dimension_numbers = #tpu.dot_dimension_numbers<[1], [0], [0], [1], [0, 0, 1, 1], [], []>} : vector<16x128xf32>, vector<128x128xf32>, vector<16x128xf32> -> vector<16x128xf32>
    %c0_33 = arith.constant 0 : index
    %c0_34 = arith.constant 0 : index
    %51 = vector.load %arg11[%c0_33, %c0_34] : memref<128x128xf32, #tpu.memory_space<vmem>>, vector<128x128xf32>
    %cst_35 = arith.constant dense<0.000000e+00> : vector<16x128xf32>
    %52 = tpu.matmul %48, %51, %cst_35 {dimension_numbers = #tpu.dot_dimension_numbers<[1], [0], [0], [1], [0, 0, 1, 1], [], []>} : vector<16x128xf32>, vector<128x128xf32>, vector<16x128xf32> -> vector<16x128xf32>
    %53 = arith.addf %50, %52 : vector<16x128xf32>
    %c0_36 = arith.constant 0 : index
    %c0_37 = arith.constant 0 : index
    %54 = vector.load %arg12[%c0_36, %c0_37] : memref<1x128xf32, #tpu.memory_space<vmem>>, vector<1x128xf32>
    %55 = vector.broadcast %54 : vector<1x128xf32> to vector<16x128xf32>
    %56 = arith.addf %53, %55 : vector<16x128xf32>
    %cst_38 = arith.constant 0.000000e+00 : f32
    %57 = vector.broadcast %cst_38 : f32 to vector<16x128xf32>
    %58 = arith.maximumf %56, %57 : vector<16x128xf32>
    %c0_39 = arith.constant 0 : index
    %c0_40 = arith.constant 0 : index
    %59 = vector.load %arg13[%c0_39, %c0_40] : memref<128x128xf32, #tpu.memory_space<vmem>>, vector<128x128xf32>
    %cst_41 = arith.constant dense<0.000000e+00> : vector<16x128xf32>
    %60 = tpu.matmul %58, %59, %cst_41 {dimension_numbers = #tpu.dot_dimension_numbers<[1], [0], [0], [1], [0, 0, 1, 1], [], []>} : vector<16x128xf32>, vector<128x128xf32>, vector<16x128xf32> -> vector<16x128xf32>
    %c0_42 = arith.constant 0 : index
    %c0_43 = arith.constant 0 : index
    %61 = vector.load %arg14[%c0_42, %c0_43] : memref<1x128xf32, #tpu.memory_space<vmem>>, vector<1x128xf32>
    %62 = vector.broadcast %61 : vector<1x128xf32> to vector<16x128xf32>
    %63 = arith.addf %60, %62 : vector<16x128xf32>
    %64 = vector.shape_cast %63 : vector<16x128xf32> to vector<2x8x128xf32>
    %c0_44 = arith.constant 0 : index
    %c0_45 = arith.constant 0 : index
    %c0_46 = arith.constant 0 : index
    %65 = vector.load %arg15[%c0_44, %c0_45, %c0_46] : memref<2x8x128xf32, #tpu.memory_space<vmem>>, vector<2x8x128xf32>
    tpu.vector_store %arg15[%c0_44, %c0_45, %c0_46], %64 {strides = array<i32>} : memref<2x8x128xf32, #tpu.memory_space<vmem>>, vector<2x8x128xf32>,
    return
  }
  func.func @transform_0(%arg0: i32) -> (i32, i32, i32) {
    %c0_i32 = arith.constant 0 : i32
    %c0_i32_0 = arith.constant 0 : i32
    %c0_i32_1 = arith.constant 0 : i32
    return %arg0, %c0_i32, %c0_i32_0 : i32, i32, i32
  }
  func.func @transform_1(%arg0: i32) -> (i32, i32, i32) {
    %c0_i32 = arith.constant 0 : i32
    %c0_i32_0 = arith.constant 0 : i32
    %c0_i32_1 = arith.constant 0 : i32
    return %arg0, %c0_i32, %c0_i32_0 : i32, i32, i32
  }
  func.func @transform_2(%arg0: i32) -> (i32, i32) {
    %c0_i32 = arith.constant 0 : i32
    %c0_i32_0 = arith.constant 0 : i32
    %c0_i32_1 = arith.constant 0 : i32
    return %c0_i32, %c0_i32_0 : i32, i32
  }
  func.func @transform_3(%arg0: i32) -> (i32, i32) {
    %c0_i32 = arith.constant 0 : i32
    %c0_i32_0 = arith.constant 0 : i32
    %c0_i32_1 = arith.constant 0 : i32
    return %c0_i32, %c0_i32_0 : i32, i32
  }
  func.func @transform_4(%arg0: i32) -> (i32, i32) {
    %c0_i32 = arith.constant 0 : i32
    %c0_i32_0 = arith.constant 0 : i32
    %c0_i32_1 = arith.constant 0 : i32
    return %c0_i32, %c0_i32_0 : i32, i32
  }
  func.func @transform_5(%arg0: i32) -> (i32, i32) {
    %c0_i32 = arith.constant 0 : i32
    %c0_i32_0 = arith.constant 0 : i32
    %c0_i32_1 = arith.constant 0 : i32
    return %c0_i32, %c0_i32_0 : i32, i32
  }
  func.func @transform_6(%arg0: i32) -> (i32, i32) {
    %c0_i32 = arith.constant 0 : i32
    %c0_i32_0 = arith.constant 0 : i32
    %c0_i32_1 = arith.constant 0 : i32
    return %c0_i32, %c0_i32_0 : i32, i32
  }
  func.func @transform_7(%arg0: i32) -> (i32, i32) {
    %c0_i32 = arith.constant 0 : i32
    %c0_i32_0 = arith.constant 0 : i32
    %c0_i32_1 = arith.constant 0 : i32
    return %c0_i32, %c0_i32_0 : i32, i32
  }
  func.func @transform_8(%arg0: i32) -> (i32, i32) {
    %c0_i32 = arith.constant 0 : i32
    %c0_i32_0 = arith.constant 0 : i32
    %c0_i32_1 = arith.constant 0 : i32
    return %c0_i32, %c0_i32_0 : i32, i32
  }
  func.func @transform_9(%arg0: i32) -> (i32, i32) {
    %c0_i32 = arith.constant 0 : i32
    %c0_i32_0 = arith.constant 0 : i32
    %c0_i32_1 = arith.constant 0 : i32
    return %c0_i32, %c0_i32_0 : i32, i32
  }
  func.func @transform_10(%arg0: i32) -> (i32, i32) {
    %c0_i32 = arith.constant 0 : i32
    %c0_i32_0 = arith.constant 0 : i32
    %c0_i32_1 = arith.constant 0 : i32
    return %c0_i32, %c0_i32_0 : i32, i32
  }
  func.func @transform_11(%arg0: i32) -> (i32, i32) {
    %c0_i32 = arith.constant 0 : i32
    %c0_i32_0 = arith.constant 0 : i32
    %c0_i32_1 = arith.constant 0 : i32
    return %c0_i32, %c0_i32_0 : i32, i32
  }
  func.func @transform_12(%arg0: i32) -> (i32, i32) {
    %c0_i32 = arith.constant 0 : i32
    %c0_i32_0 = arith.constant 0 : i32
    %c0_i32_1 = arith.constant 0 : i32
    return %c0_i32, %c0_i32_0 : i32, i32
  }
  func.func @transform_13(%arg0: i32) -> (i32, i32) {
    %c0_i32 = arith.constant 0 : i32
    %c0_i32_0 = arith.constant 0 : i32
    %c0_i32_1 = arith.constant 0 : i32
    return %c0_i32, %c0_i32_0 : i32, i32
  }
  func.func @transform_14(%arg0: i32) -> (i32, i32, i32) {
    %c0_i32 = arith.constant 0 : i32
    %c0_i32_0 = arith.constant 0 : i32
    %c0_i32_1 = arith.constant 0 : i32
    return %arg0, %c0_i32, %c0_i32_0 : i32, i32, i32
  }
}

</mosaic_0001>

<bundles_post_ra>
// kernel: dcn_with_rcnn_forward.5
= control target key start
LH: loop header
LB: loop body
LE: loop exit
PB: predicated region body
PF: predicated region fallthrough
CT: control target
= control target key end

     0   :  { %12 = vsyncpa [#allocation3], 0  ;;  %s3990_s0 = inlined_call_operand.hbm [shape: f32[16,16,128], index: 0, kind: input, shape index: {}]   ;;  %s3991_s1 = inlined_call_operand.vmem [shape: f32[16,128], index: 1, kind: input, shape index: {}]   ;;  %s3992_s2 = inlined_call_operand.vmem [shape: f32[128,128], index: 2, kind: input, shape index: {}]   ;;  %s3993_s3 = inlined_call_operand.vmem [shape: f32[1,128], index: 3, kind: input, shape index: {}]   ;;  %s3994_s4 = inlined_call_operand.hbm [shape: f32[128,128], index: 4, kind: input, shape index: {}]   ;;  %s3995_s5 = inlined_call_operand.vmem [shape: f32[1,128], index: 5, kind: input, shape index: {}]   ;;  %s3996_s6 = inlined_call_operand.vmem [shape: f32[128,1], index: 6, kind: input, shape index: {}]   ;;  %s3997_s7 = inlined_call_operand.vmem [shape: f32[16,128], index: 7, kind: output, shape index: {}]  }
   0x1   :  { %s18_s26 = sshll.u32 %s3990_s0, 4  ;;  %s19_s26 = int_to_ptr.hbm [resolvable:$true] %s18_s26 }
   0x2   :  { %13 = vsyncpa [#allocation5], 0  ;;  %s2307_s27 = smov [#allocation2]   ;;  %s37_s8 = sshll.u32 %s3994_s4, 4  ;;  %s38_s8 = int_to_ptr.hbm [resolvable:$true] %s37_s8 }
   0x3   :  { %s20_s28 = sshll.u32 %s2307_s27, 4  ;;  %s2308_s9 = smov 128   ;;  %s21_s28 = int_to_ptr.vmem [resolvable:$true] %s20_s28 }
   0x4   :  { %s2309_s10 = smov 8   ;;  %s2310_s11 = smov [#allocation4]  }
   0x5   :  { %26 = dma.hbm_to_vmem [thread:$0]  %s19_s26, 4096, %s21_s28, [#allocation3], %s2308_s9, %s2308_s9, %s2309_s10  }
   0x6   :  { %s39_s12 = sshll.u32 %s2310_s11, 4  ;;  %s40_s12 = int_to_ptr.vmem [resolvable:$true] %s39_s12 }
   0x7   :  { %45 = dma.hbm_to_vmem [thread:$0]  %s38_s8, 2048, %s40_s12, [#allocation5], %s2308_s9, %s2308_s9, %s2309_s10  }
   0x8   :  { %2303 = dma.done.wait [#allocation3], 4096  }
   0x9   :  { %2304 = vsyncadd [#allocation3], 4294963200 }
   0xa   :  { %2305 = dma.done.wait [#allocation5], 2048  }
   0xb   :  { %2306 = vsyncadd [#allocation5], 4294965248  ;;  %v2358_v0 = vld [vmem:[#allocation2 + $0x88] sm:$0xff]  ;;  %v2360_v1 = vld [vmem:[#allocation2] sm:$0xff] }
   0xc   :  { %v2362_v2 = vld [vmem:[#allocation2 + $0x8] sm:$0xff]  ;;  %v107_v3 = vmul.f32 %v2358_v0, %v2358_v0  ;;  %v90_v4 = vmul.f32 %v2360_v1, %v2360_v1  ;;  %v2370_v6 = vld [vmem:[#allocation2 + $0x90] sm:$0xff]  ;;  %v2372_v7 = vld [vmem:[#allocation2 + $0x98] sm:$0xff] }
   0xd   :  { %v91_v5 = vmul.f32 %v2362_v2, %v2362_v2  ;;  %v2374_v8 = vld [vmem:[#allocation2 + $0xa0] sm:$0xff]  ;;  %v108_v9 = vmul.f32 %v2370_v6, %v2370_v6  ;;  %v109_v10 = vmul.f32 %v2372_v7, %v2372_v7  ;;  %v2382_v12 = vld [vmem:[#allocation2 + $0x10] sm:$0xff]  ;;  %v2384_v13 = vld [vmem:[#allocation2 + $0xa8] sm:$0xff] }
   0xe   :  { %156 = vadd.xlane.f32.xlu0 %v107_v3  ;;  %122 = vadd.xlane.f32.xlu1 %v90_v4  ;;  %v110_v11 = vmul.f32 %v2374_v8, %v2374_v8  ;;  %v2386_v14 = vld [vmem:[#allocation2 + $0x18] sm:$0xff]  ;;  %v92_v15 = vmul.f32 %v2382_v12, %v2382_v12  ;;  %v111_v16 = vmul.f32 %v2384_v13, %v2384_v13  ;;  %v2394_v18 = vld [vmem:[#allocation2 + $0xb0] sm:$0xff]  ;;  %v2396_v19 = vld [vmem:[#allocation2 + $0x20] sm:$0xff] }
   0xf   :  { %124 = vadd.xlane.f32.xlu2 %v91_v5  ;;  %v93_v17 = vmul.f32 %v2386_v14, %v2386_v14  ;;  %v2398_v20 = vld [vmem:[#allocation2 + $0xb8] sm:$0xff]  ;;  %v112_v21 = vmul.f32 %v2394_v18, %v2394_v18  ;;  %v94_v22 = vmul.f32 %v2396_v19, %v2396_v19  ;;  %v2406_v24 = vld [vmem:[#allocation2 + $0x28] sm:$0xff]  ;;  %v2408_v25 = vld [vmem:[#allocation2 + $0xc0] sm:$0xff] }
  0x10   :  { %v113_v23 = vmul.f32 %v2398_v20, %v2398_v20  ;;  %v2410_v26 = vld [vmem:[#allocation2 + $0x30] sm:$0xff]  ;;  %v95_v27 = vmul.f32 %v2406_v24, %v2406_v24  ;;  %v114_v28 = vmul.f32 %v2408_v25, %v2408_v25  ;;  %v2418_v30 = vld [vmem:[#allocation2 + $0xc8] sm:$0xff]  ;;  %v2420_v31 = vld [vmem:[#allocation2 + $0x38] sm:$0xff] }
  0x11   :  { %v96_v29 = vmul.f32 %v2410_v26, %v2410_v26  ;;  %v2422_v32 = vld [vmem:[#allocation2 + $0xd0] sm:$0xff]  ;;  %v115_v33 = vmul.f32 %v2418_v30, %v2418_v30  ;;  %v97_v34 = vmul.f32 %v2420_v31, %v2420_v31  ;;  %v587_v36 = vld [vmem:[%s3992_s2 + $0x78] sm:$0xff]  ;;  %v2433_v37 = vld [vmem:[#allocation2 + $0x40] sm:$0xff] }
  0x12   :  { %v116_v35 = vmul.f32 %v2422_v32, %v2422_v32  ;;  %v2435_v38 = vld [vmem:[#allocation2 + $0xd8] sm:$0xff]  ;;  %592 = vmatpush.msra.mxu0 %v587_v36  ;;  %v586_v39 = vld [vmem:[%s3992_s2 + $0x70] sm:$0xff]  ;;  %v2440_v40 = vld [vmem:[#allocation2 + $0x48] sm:$0xff]  ;;  %1981 = vmatpush.msra.mxu3 %v587_v36  ;;  %v98_v42 = vmul.f32 %v2433_v37, %v2433_v37 }
  0x13   :  { %v585_v41 = vld [vmem:[%s3992_s2 + $0x68] sm:$0xff]  ;;  %v117_v43 = vmul.f32 %v2435_v38, %v2435_v38  ;;  %v584_v44 = vld [vmem:[%s3992_s2 + $0x60] sm:$0xff]  ;;  %v99_v45 = vmul.f32 %v2440_v40, %v2440_v40  ;;  %v583_v46 = vld [vmem:[%s3992_s2 + $0x58] sm:$0xff] }
  0x14   :  { %593 = vmatpush.msra.mxu0 %v586_v39  ;;  %1982 = vmatpush.msra.mxu3 %v586_v39  ;;  %v2457_v47 = vld [vmem:[#allocation2 + $0xe0] sm:$0xff]  ;;  %v2459_v48 = vld [vmem:[#allocation2 + $0x50] sm:$0xff]  ;;  %v87_v49 = vld [vmem:[#allocation2 + $0xe8] sm:$0xff] }
  0x15   :  { %v118_v50 = vmul.f32 %v2457_v47, %v2457_v47  ;;  %v100_v51 = vmul.f32 %v2459_v48, %v2459_v48  ;;  %v119_v52 = vmul.f32 %v87_v49, %v87_v49  ;;  %v2465_v53 = vld [vmem:[#allocation2 + $0x58] sm:$0xff]  ;;  %v88_v54 = vld [vmem:[#allocation2 + $0xf0] sm:$0xff]  ;;  %v70_v55 = vld [vmem:[#allocation2 + $0x60] sm:$0xff] }
  0x16   :  { %158 = vadd.xlane.f32.xlu0 %v108_v9  ;;  %160 = vadd.xlane.f32.xlu1 %v109_v10  ;;  %v101_v56 = vmul.f32 %v2465_v53, %v2465_v53  ;;  %v120_v57 = vmul.f32 %v88_v54, %v88_v54  ;;  %v102_v58 = vmul.f32 %v70_v55, %v70_v55  ;;  %v89_v59 = vld [vmem:[#allocation2 + $0xf8] sm:$0xff]  ;;  %v71_v60 = vld [vmem:[#allocation2 + $0x68] sm:$0xff]  ;;  %v72_v61 = vld [vmem:[#allocation2 + $0x70] sm:$0xff] }
  0x17   :  { %162 = vadd.xlane.f32.xlu2 %v110_v11  ;;  %594 = vmatpush.msra.mxu0 %v585_v41  ;;  %v121_v62 = vmul.f32 %v89_v59, %v89_v59  ;;  %v103_v63 = vmul.f32 %v71_v60, %v71_v60  ;;  %v104_v3 = vmul.f32 %v72_v61, %v72_v61  ;;  %v73_v4 = vld [vmem:[#allocation2 + $0x78] sm:$0xff]  ;;  %v582_v9 = vld [vmem:[%s3992_s2 + $0x50] sm:$0xff]  ;;  %v581_v10 = vld [vmem:[%s3992_s2 + $0x48] sm:$0xff] }
  0x18   :  { %1983 = vmatpush.msra.mxu3 %v585_v41  ;;  %v105_v5 = vmul.f32 %v73_v4, %v73_v4  ;;  %v580_v11 = vld [vmem:[%s3992_s2 + $0x40] sm:$0xff] }
  0x19   :  { %595 = vmatpush.msra.mxu0 %v584_v44 }
  0x1a   :  { %1984 = vmatpush.msra.mxu3 %v584_v44 }
  0x1b   :  { %596 = vmatpush.msra.mxu0 %v583_v46 }
  0x1c   :  { %1985 = vmatpush.msra.mxu3 %v583_v46 }
  0x1d   :  { %597 = vmatpush.msra.mxu0 %v582_v9 }
  0x1e   :  { %126 = vadd.xlane.f32.xlu0 %v92_v15  ;;  %164 = vadd.xlane.f32.xlu1 %v111_v16  ;;  %v74_v15 = vld [vmem:[#allocation2 + $0x80] sm:$0xff] }
  0x1f   :  { %128 = vadd.xlane.f32.xlu2 %v93_v17  ;;  %1986 = vmatpush.msra.mxu3 %v582_v9  ;;  %v106_v16 = vmul.f32 %v74_v15, %v74_v15  ;;  %v579_v17 = vld [vmem:[%s3992_s2 + $0x38] sm:$0xff] }
  0x20   :  { %598 = vmatpush.msra.mxu0 %v581_v10 }
  0x21   :  { %1987 = vmatpush.msra.mxu3 %v581_v10 }
  0x22   :  { %599 = vmatpush.msra.mxu0 %v580_v11 }
  0x23   :  { %1988 = vmatpush.msra.mxu3 %v580_v11  ;;  %v718_v11 = vld [vmem:[#allocation4 + $0x68] sm:$0xff] }
  0x24   :  { %600 = vmatpush.msra.mxu0 %v579_v17 }
  0x25   :  { %1989 = vmatpush.msra.mxu3 %v579_v17 }
  0x26   :  { %166 = vadd.xlane.f32.xlu0 %v112_v21  ;;  %130 = vadd.xlane.f32.xlu1 %v94_v22  ;;  %v578_v21 = vld [vmem:[%s3992_s2 + $0x30] sm:$0xff]  ;;  %v577_v22 = vld [vmem:[%s3992_s2 + $0x28] sm:$0xff] }
  0x27   :  { %168 = vadd.xlane.f32.xlu2 %v113_v23  ;;  %601 = vmatpush.msra.mxu0 %v578_v21  ;;  %v576_v23 = vld [vmem:[%s3992_s2 + $0x20] sm:$0xff] }
  0x28   :  { %1990 = vmatpush.msra.mxu3 %v578_v21 }
  0x29   :  { %602 = vmatpush.msra.mxu0 %v577_v22 }
  0x2a   :  { %1991 = vmatpush.msra.mxu3 %v577_v22 }
  0x2b   :  { %603 = vmatpush.msra.mxu0 %v576_v23 }
  0x2c   :  { %1992 = vmatpush.msra.mxu3 %v576_v23 }
  0x2e   :  { %132 = vadd.xlane.f32.xlu0 %v95_v27  ;;  %170 = vadd.xlane.f32.xlu1 %v114_v28  ;;  %v575_v27 = vld [vmem:[%s3992_s2 + $0x18] sm:$0xff]  ;;  %v574_v28 = vld [vmem:[%s3992_s2 + $0x10] sm:$0xff] }
  0x2f   :  { %134 = vadd.xlane.f32.xlu2 %v96_v29  ;;  %604 = vmatpush.msra.mxu0 %v575_v27  ;;  %v573_v29 = vld [vmem:[%s3992_s2 + $0x8] sm:$0xff] }
  0x30   :  { %1993 = vmatpush.msra.mxu3 %v575_v27 }
  0x31   :  { %605 = vmatpush.msra.mxu0 %v574_v28 }
  0x32   :  { %1994 = vmatpush.msra.mxu3 %v574_v28 }
  0x33   :  { %606 = vmatpush.msra.mxu0 %v573_v29 }
  0x34   :  { %1995 = vmatpush.msra.mxu3 %v573_v29 }
  0x36   :  { %172 = vadd.xlane.f32.xlu0 %v115_v33  ;;  %136 = vadd.xlane.f32.xlu1 %v97_v34  ;;  %v572_v33 = vld [vmem:[%s3992_s2] sm:$0xff] }
  0x37   :  { %174 = vadd.xlane.f32.xlu2 %v116_v35  ;;  %607 = vmatpush.msra.mxu0 %v572_v33 }
  0x38   :  { %1996 = vmatpush.msra.mxu3 %v572_v33  ;;  %v717_v33 = vld [vmem:[#allocation4 + $0x60] sm:$0xff] }
  0x3e   :  { %138 = vadd.xlane.f32.xlu0 %v98_v42  ;;  %176 = vadd.xlane.f32.xlu1 %v117_v43  ;;  %v720_v43 = vld [vmem:[#allocation4 + $0x78] sm:$0xff] }
  0x3f   :  { %140 = vadd.xlane.f32.xlu2 %v99_v45  ;;  %725 = vmatpush.msrb.mxu3 %v720_v43 }
  0x46   :  { %178 = vadd.xlane.f32.xlu0 %v118_v50  ;;  %142 = vadd.xlane.f32.xlu1 %v100_v51 }
  0x47   :  { %180 = vadd.xlane.f32.xlu2 %v119_v52  ;;  %v719_v52 = vld [vmem:[#allocation4 + $0x70] sm:$0xff] }
  0x48   :  { %726 = vmatpush.msrb.mxu3 %v719_v52 }
  0x4a   :  { %727 = vmatpush.msrb.mxu3 %v718_v11 }
  0x4c   :  { %728 = vmatpush.msrb.mxu3 %v717_v33 }
  0x4e   :  { %144 = vadd.xlane.f32.xlu0 %v101_v56  ;;  %182 = vadd.xlane.f32.xlu1 %v120_v57 }
  0x4f   :  { %146 = vadd.xlane.f32.xlu2 %v102_v58 }
  0x56   :  { %184 = vadd.xlane.f32.xlu0 %v121_v62  ;;  %148 = vadd.xlane.f32.xlu1 %v103_v63 }
  0x57   :  { %150 = vadd.xlane.f32.xlu2 %v104_v3 }
  0x5e   :  { %152 = vadd.xlane.f32.xlu0 %v105_v5  ;;  %154 = vadd.xlane.f32.xlu1 %v106_v16 }
  0x81   :  { %v157_v34 = vpop.xlane.xlu0 %156  ;;  %v123_v35 = vpop.xlane.xlu1 %122 }
  0x82   :  { %v203_v36 = vadd.f32 1e-12, %v157_v34  ;;  %v2502_v39 = vadd.f32 1e-12, %v123_v35  ;;  %v125_v41 = vpop.xlane.xlu2 %124 }
  0x83   :  { %v2504_v42 = vadd.f32 1e-12, %v125_v41 }
  0x84   :  { %2023 = vrsqrt.f32 %v203_v36  ;;  %vm394_vm0 = vweird.f32 %v203_v36  ;;  %vm224_vm2 = vweird.f32 %v2502_v39 }
  0x85   :  { %2025 = vrsqrt.f32 %v2502_v39  ;;  %vm234_vm6 = vweird.f32 %v2504_v42 }
  0x86   :  { %2027 = vrsqrt.f32 %v2504_v42 }
  0x89   :  { %v159_v44 = vpop.xlane.xlu0 %158  ;;  %v161_v45 = vpop.xlane.xlu1 %160 }
  0x8a   :  { %v2024_v46 = vpop.eup %2023  ;;  %v2508_v49 = vadd.f32 1e-12, %v159_v44  ;;  %v2510_v50 = vadd.f32 1e-12, %v161_v45  ;;  %v163_v51 = vpop.xlane.xlu2 %162 }
  0x8b   :  { %v2026_v54 = vpop.eup %2025  ;;  %v389_v55 = vmul.f32 %v2024_v46, %v203_v36  ;;  %v2512_v56 = vadd.f32 1e-12, %v163_v51  ;;  %vm395_vm1 = vweird.f32 %v2024_v46 }
  0x8c   :  { %v2514_v57 = vpop.eup %2027  ;;  %v219_v58 = vmul.f32 %v2026_v54, %v2502_v39  ;;  %2029 = vrsqrt.f32 %v2508_v49  ;;  %vm225_vm3 = vweird.f32 %v2026_v54  ;;  %vm396_vm4 = vmor %vm394_vm0, %vm395_vm1  ;;  %vm404_vm9 = vweird.f32 %v2508_v49 }
  0x8d   :  { %v390_v59 = vmul.f32 %v2024_v46, %v389_v55  ;;  %v229_v60 = vmul.f32 %v2514_v57, %v2504_v42  ;;  %2031 = vrsqrt.f32 %v2510_v50  ;;  %vm226_vm5 = vmor %vm224_vm2, %vm225_vm3  ;;  %vm235_vm7 = vweird.f32 %v2514_v57 }
  0x8e   :  { %v220_v61 = vmul.f32 %v2026_v54, %v219_v58  ;;  %2033 = vrsqrt.f32 %v2512_v56  ;;  %vm2577_vm10 = vmor %vm234_vm6, %vm235_vm7  ;;  %vm414_vm12 = vweird.f32 %v2510_v50  ;;  %vm424_vm2 = vweird.f32 %v2512_v56 }
  0x8f   :  { %v391_v62 = vmul.f32 0.5, %v390_v59  ;;  %v230_v63 = vmul.f32 %v2514_v57, %v229_v60 }
  0x90   :  { %v221_v3 = vmul.f32 0.5, %v220_v61 }
  0x91   :  { %v392_v4 = vsub.f32 1.5, %v391_v62  ;;  %v231_v5 = vmul.f32 0.5, %v230_v63  ;;  %v127_v9 = vpop.xlane.xlu0 %126  ;;  %v165_v10 = vpop.xlane.xlu1 %164 }
  0x92   :  { %v2523_v15 = vpop.eup %2029  ;;  %v222_v16 = vsub.f32 1.5, %v221_v3  ;;  %v2525_v17 = vadd.f32 1e-12, %v127_v9  ;;  %v129_v21 = vpop.xlane.xlu2 %128  ;;  %v2531_v27 = vadd.f32 1e-12, %v165_v10  ;;  %v716_v3 = vld [vmem:[#allocation4 + $0x58] sm:$0xff] }
  0x93   :  { %v2527_v22 = vpop.eup %2031  ;;  %v399_v23 = vmul.f32 %v2523_v15, %v2508_v49  ;;  %v2533_v28 = vadd.f32 1e-12, %v129_v21  ;;  %v393_v29 = vmul.f32 %v2024_v46, %v392_v4  ;;  %v232_v41 = vsub.f32 1.5, %v231_v5  ;;  %729 = vmatpush.msrb.mxu3 %v716_v3 }
  0x94   :  { %v2535_v34 = vpop.eup %2033  ;;  %v409_v35 = vmul.f32 %v2527_v22, %v2510_v50  ;;  %2035 = vrsqrt.f32 %v2525_v17  ;;  %v223_v45 = vmul.f32 %v2026_v54, %v222_v16  ;;  %vm405_vm8 = vweird.f32 %v2523_v15 }
  0x95   :  { %v400_v43 = vmul.f32 %v2523_v15, %v399_v23  ;;  %2037 = vrsqrt.f32 %v2533_v28  ;;  %v397_v51 = vsel %vm396_vm4, %v2024_v46, %v393_v29  ;;  %v419_v55 = vmul.f32 %v2535_v34, %v2512_v56  ;;  %vm406_vm11 = vmor %vm404_vm9, %vm405_vm8 }
  0x96   :  { %v410_v44 = vmul.f32 %v2527_v22, %v409_v35  ;;  %2039 = vrsqrt.f32 %v2531_v27  ;;  %v2552_v58 = vmul.f32 %v397_v51, %v2358_v0  ;;  %v227_v59 = vsel %vm226_vm5, %v2026_v54, %v223_v45  ;;  %v715_v51 = vld [vmem:[#allocation4 + $0x50] sm:$0xff] }
  0x97   :  { %v401_v52 = vmul.f32 0.5, %v400_v43  ;;  %v2557_v46 = vmul.f32 %v227_v59, %v2360_v1  ;;  %v233_v54 = vmul.f32 %v2514_v57, %v232_v41  ;;  %v420_v4 = vmul.f32 %v2535_v34, %v419_v55  ;;  %730 = vmatpush.msrb.mxu3 %v715_v51 }
  0x98   :  { %v411_v36 = vmul.f32 0.5, %v410_v44  ;;  %659 = vmatmul.f32.vlgmr.msra.gmra.mxu3 %v2552_v58  ;;  %vm415_vm13 = vweird.f32 %v2527_v22  ;;  %vm244_vm14 = vweird.f32 %v2525_v17  ;;  %vm425_vm3 = vweird.f32 %v2535_v34 }
  0x99   :  { %v402_v60 = vsub.f32 1.5, %v401_v52  ;;  %v167_v61 = vpop.xlane.xlu0 %166  ;;  %v131_v62 = vpop.xlane.xlu1 %130  ;;  %608 = vmatmul.f32.vlgmr.msra.gmra.mxu0 %v2557_v46  ;;  %v237_v29 = vsel %vm2577_vm10, %v2514_v57, %v233_v54  ;;  %v421_v35 = vmul.f32 0.5, %v420_v4  ;;  %vm2624_vm0 = vmor %vm414_vm12, %vm415_vm13  ;;  %vm254_vm4 = vweird.f32 %v2533_v28 }
  0x9a   :  { %v2561_v39 = vpop.eup %2035  ;;  %v2564_v0 = vadd.f32 1e-12, %v131_v62  ;;  %v169_v63 = vpop.xlane.xlu2 %168  ;;  %v2571_v5 = vadd.f32 1e-12, %v167_v61  ;;  %v412_v11 = vsub.f32 1.5, %v411_v36  ;;  %vm2663_vm6 = vmor %vm424_vm2, %vm425_vm3  ;;  %vm434_vm8 = vweird.f32 %v2531_v27 }
  0x9b   :  { %v239_v1 = vmul.f32 %v2561_v39, %v2525_v17  ;;  %v403_v9 = vmul.f32 %v2523_v15, %v402_v60  ;;  %v2582_v10 = vpop.eup %2037  ;;  %vm245_vm15 = vweird.f32 %v2561_v39  ;;  %v422_v61 = vsub.f32 1.5, %v421_v35 }
  0x9c   :  { %v2586_v16 = vpop.eup %2039  ;;  %v249_v42 = vmul.f32 %v2582_v10, %v2533_v28  ;;  %2041 = vrsqrt.f32 %v2564_v0  ;;  %v2617_v62 = vadd.f32 1e-12, %v169_v63  ;;  %vm246_vm1 = vmor %vm244_vm14, %vm245_vm15  ;;  %vm255_vm5 = vweird.f32 %v2582_v10 }
  0x9d   :  { %v240_v21 = vmul.f32 %v2561_v39, %v239_v1  ;;  %v407_v23 = vsel %vm406_vm11, %v2523_v15, %v403_v9  ;;  %2043 = vrsqrt.f32 %v2571_v5  ;;  %v429_v44 = vmul.f32 %v2586_v16, %v2531_v27  ;;  %v714_v9 = vld [vmem:[#allocation4 + $0x48] sm:$0xff]  ;;  %vm2677_vm7 = vmor %vm254_vm4, %vm255_vm5 }
  0x9e   :  { %v2597_v33 = vmul.f32 %v407_v23, %v2370_v6  ;;  %v250_v43 = vmul.f32 %v2582_v10, %v249_v42  ;;  %v413_v15 = vmul.f32 %v2527_v22, %v412_v11  ;;  %v2608_v6 = vmul.f32 %v237_v29, %v2362_v2  ;;  %731 = vmatpush.msrb.mxu3 %v714_v9 }
  0x9f   :  { %v241_v41 = vmul.f32 0.5, %v240_v21  ;;  %v430_v3 = vmul.f32 %v2586_v16, %v429_v44  ;;  %v423_v23 = vmul.f32 %v2535_v34, %v422_v61  ;;  %vm435_vm9 = vweird.f32 %v2586_v16 }
  0xa0   :  { %662 = vmatmul.f32.gmra.mxu3 %v2597_v33  ;;  %v251_v52 = vmul.f32 0.5, %v250_v43  ;;  %v417_v50 = vsel %vm2624_vm0, %v2527_v22, %v413_v15  ;;  %vm264_vm10 = vweird.f32 %v2564_v0  ;;  %vm2713_vm12 = vmor %vm434_vm8, %vm435_vm9  ;;  %vm444_vm14 = vweird.f32 %v2571_v5 }
  0xa1   :  { %v242_v45 = vsub.f32 1.5, %v241_v41  ;;  %v133_v57 = vpop.xlane.xlu0 %132  ;;  %v171_v36 = vpop.xlane.xlu1 %170  ;;  %611 = vmatmul.f32.gmra.mxu0 %v2608_v6  ;;  %v2653_v22 = vmul.f32 %v417_v50, %v2372_v7  ;;  %vm454_vm4 = vweird.f32 %v2617_v62 }
  0xa2   :  { %v2612_v55 = vadd.f32 1e-12, %v133_v57  ;;  %v135_v59 = vpop.xlane.xlu2 %134  ;;  %v2614_v60 = vpop.eup %2041  ;;  %v252_v11 = vsub.f32 1.5, %v251_v52  ;;  %v2673_v15 = vadd.f32 1e-12, %v171_v36  ;;  %v427_v52 = vsel %vm2663_vm6, %v2535_v34, %v423_v23 }
  0xa3   :  { %v243_v2 = vmul.f32 %v2561_v39, %v242_v45  ;;  %v259_v4 = vmul.f32 %v2614_v60, %v2564_v0  ;;  %v2639_v63 = vpop.eup %2043  ;;  %v2642_v49 = vadd.f32 1e-12, %v135_v59  ;;  %v713_v45 = vld [vmem:[#allocation4 + $0x40] sm:$0xff]  ;;  %v2700_v34 = vmul.f32 %v427_v52, %v2374_v8 }
  0xa4   :  { %2045 = vrsqrt.f32 %v2612_v55  ;;  %v439_v42 = vmul.f32 %v2639_v63, %v2571_v5  ;;  %v253_v35 = vmul.f32 %v2582_v10, %v252_v11  ;;  %732 = vmatpush.msrb.mxu3 %v713_v45  ;;  %vm265_vm11 = vweird.f32 %v2614_v60 }
  0xa5   :  { %v247_v1 = vsel %vm246_vm1, %v2561_v39, %v243_v2  ;;  %v260_v21 = vmul.f32 %v2614_v60, %v259_v4  ;;  %2047 = vrsqrt.f32 %v2617_v62  ;;  %v431_v39 = vmul.f32 0.5, %v430_v3  ;;  %4030 = vst [vmem:[#allocation8_spill] sm:$0xff] %v2700_v34  ;;  %vm2725_vm13 = vmor %vm264_vm10, %vm265_vm11 }
  0xa6   :  { %v2650_v17 = vmul.f32 %v247_v1, %v2382_v12  ;;  %2049 = vrsqrt.f32 %v2642_v49  ;;  %v440_v51 = vmul.f32 %v2639_v63, %v439_v42  ;;  %v257_v2 = vsel %vm2677_vm7, %v2582_v10, %v253_v35  ;;  %v712_v42 = vld [vmem:[#allocation4 + $0x38] sm:$0xff] }
  0xa7   :  { %v261_v29 = vmul.f32 0.5, %v260_v21  ;;  %v432_v57 = vsub.f32 1.5, %v431_v39  ;;  %2051 = vrsqrt.f32 %v2673_v15  ;;  %v2707_v10 = vmul.f32 %v257_v2, %v2386_v14  ;;  %733 = vmatpush.msrb.mxu3 %v712_v42 }
  0xa8   :  { %665 = vmatmul.f32.gmra.mxu3 %v2653_v22  ;;  %v441_v3 = vmul.f32 0.5, %v440_v51  ;;  %vm445_vm15 = vweird.f32 %v2639_v63  ;;  %vm274_vm0 = vweird.f32 %v2612_v55  ;;  %vm284_vm6 = vweird.f32 %v2642_v49 }
  0xa9   :  { %v173_v41 = vpop.xlane.xlu0 %172  ;;  %v137_v43 = vpop.xlane.xlu1 %136  ;;  %614 = vmatmul.f32.gmra.mxu0 %v2650_v17  ;;  %v262_v28 = vsub.f32 1.5, %v261_v29  ;;  %v433_v50 = vmul.f32 %v2586_v16, %v432_v57  ;;  %vm2761_vm2 = vmor %vm444_vm14, %vm445_vm15  ;;  %vm464_vm10 = vweird.f32 %v2673_v15 }
  0xaa   :  { %v2667_v7 = vpop.eup %2045  ;;  %v2688_v36 = vadd.f32 1e-12, %v137_v43  ;;  %v175_v21 = vpop.xlane.xlu2 %174  ;;  %v2721_v14 = vadd.f32 1e-12, %v173_v41  ;;  %v442_v23 = vsub.f32 1.5, %v441_v3 }
  0xab   :  { %v269_v44 = vmul.f32 %v2667_v7, %v2612_v55  ;;  %v2685_v59 = vpop.eup %2047  ;;  %v263_v11 = vmul.f32 %v2614_v60, %v262_v28  ;;  %v437_v29 = vsel %vm2713_vm12, %v2586_v16, %v433_v50  ;;  %vm275_vm1 = vweird.f32 %v2667_v7 }
  0xac   :  { %v2695_v54 = vpop.eup %2049  ;;  %v449_v4 = vmul.f32 %v2685_v59, %v2617_v62  ;;  %2053 = vrsqrt.f32 %v2688_v36  ;;  %v2748_v16 = vmul.f32 %v437_v29, %v2384_v13  ;;  %v443_v51 = vmul.f32 %v2639_v63, %v442_v23  ;;  %vm2773_vm3 = vmor %vm274_vm0, %vm275_vm1 }
  0xad   :  { %v270_v61 = vmul.f32 %v2667_v7, %v269_v44  ;;  %v279_v9 = vmul.f32 %v2695_v54, %v2642_v49  ;;  %v2733_v35 = vpop.eup %2051  ;;  %v267_v44 = vsel %vm2725_vm13, %v2614_v60, %v263_v11  ;;  %2055 = vrsqrt.f32 %v2721_v14 }
  0xae   :  { %v450_v12 = vmul.f32 %v2685_v59, %v449_v4  ;;  %4035 = vst [vmem:[#allocation9_spill] sm:$0xff] %v2748_v16  ;;  %v459_v57 = vmul.f32 %v2733_v35, %v2673_v15  ;;  %v2755_v60 = vmul.f32 %v267_v44, %v2396_v19  ;;  %v2769_v19 = vadd.f32 1e-12, %v175_v21  ;;  %v711_v4 = vld [vmem:[#allocation4 + $0x30] sm:$0xff] }
  0xaf   :  { %v271_v1 = vmul.f32 0.5, %v270_v61  ;;  %v280_v43 = vmul.f32 %v2695_v54, %v279_v9  ;;  %734 = vmatpush.msrb.mxu3 %v711_v4  ;;  %vm455_vm5 = vweird.f32 %v2685_v59  ;;  %vm285_vm7 = vweird.f32 %v2695_v54 }
  0xb0   :  { %668 = vmatmul.f32.gmra.mxu3 %v2700_v34  ;;  %v451_v45 = vmul.f32 0.5, %v450_v12  ;;  %4036 = vst [vmem:[#allocation10_spill] sm:$0xff] %v2755_v60  ;;  %v460_v8 = vmul.f32 %v2733_v35, %v459_v57  ;;  %vm2809_vm8 = vmor %vm454_vm4, %vm455_vm5  ;;  %v710_v57 = vld [vmem:[#allocation4 + $0x28] sm:$0xff]  ;;  %vm465_vm11 = vweird.f32 %v2733_v35  ;;  %vm294_vm12 = vweird.f32 %v2688_v36 }
  0xb1   :  { %v139_v39 = vpop.xlane.xlu0 %138  ;;  %617 = vmatmul.f32.gmra.mxu0 %v2707_v10  ;;  %v272_v0 = vsub.f32 1.5, %v271_v1  ;;  %v281_v52 = vmul.f32 0.5, %v280_v43  ;;  %v177_v2 = vpop.xlane.xlu1 %176  ;;  %v447_v1 = vsel %vm2761_vm2, %v2639_v63, %v443_v51  ;;  %vm2821_vm9 = vmor %vm284_vm6, %vm285_vm7  ;;  %735 = vmatpush.msrb.mxu3 %v710_v57  ;;  %vm474_vm0 = vweird.f32 %v2721_v14 }
  0xb2   :  { %v2736_v41 = vadd.f32 1e-12, %v139_v39  ;;  %v2743_v56 = vpop.eup %2053  ;;  %v141_v3 = vpop.xlane.xlu2 %140  ;;  %v452_v50 = vsub.f32 1.5, %v451_v45  ;;  %v2796_v63 = vmul.f32 %v447_v1, %v2394_v18  ;;  %v461_v42 = vmul.f32 0.5, %v460_v8  ;;  %vm2857_vm14 = vmor %vm464_vm10, %vm465_vm11 }
  0xb3   :  { %v289_v28 = vmul.f32 %v2743_v56, %v2688_v36  ;;  %v273_v61 = vmul.f32 %v2667_v7, %v272_v0  ;;  %v2781_v9 = vpop.eup %2055  ;;  %v2784_v11 = vadd.f32 1e-12, %v141_v3  ;;  %v282_v55 = vsub.f32 1.5, %v281_v52 }
  0xb4   :  { %2057 = vrsqrt.f32 %v2736_v41  ;;  %4041 = vst [vmem:[#allocation11_spill] sm:$0xff] %v2796_v63  ;;  %v469_v23 = vmul.f32 %v2781_v9, %v2721_v14  ;;  %v453_v12 = vmul.f32 %v2685_v59, %v452_v50  ;;  %v462_v51 = vsub.f32 1.5, %v461_v42 }
  0xb5   :  { %v290_v21 = vmul.f32 %v2743_v56, %v289_v28  ;;  %v277_v39 = vsel %vm2773_vm3, %v2667_v7, %v273_v61  ;;  %2059 = vrsqrt.f32 %v2769_v19  ;;  %v283_v43 = vmul.f32 %v2695_v54, %v282_v55 }
  0xb6   :  { %v2803_v7 = vmul.f32 %v277_v39, %v2406_v24  ;;  %2061 = vrsqrt.f32 %v2784_v11  ;;  %v2817_v24 = vadd.f32 1e-12, %v177_v2  ;;  %v470_v13 = vmul.f32 %v2781_v9, %v469_v23  ;;  %v709_v23 = vld [vmem:[#allocation4 + $0x20] sm:$0xff] }
  0xb7   :  { %v291_v29 = vmul.f32 0.5, %v290_v21  ;;  %v457_v52 = vsel %vm2809_vm8, %v2685_v59, %v453_v12  ;;  %v287_v3 = vsel %vm2821_vm9, %v2695_v54, %v283_v43  ;;  %vm295_vm13 = vweird.f32 %v2743_v56  ;;  %736 = vmatpush.msrb.mxu3 %v709_v23 }
  0xb8   :  { %671 = vmatmul.f32.gmra.mxu3 %v2748_v16  ;;  %4042 = vst [vmem:[#allocation12_spill] sm:$0xff] %v2803_v7  ;;  %2063 = vrsqrt.f32 %v2817_v24  ;;  %v2844_v59 = vmul.f32 %v457_v52, %v2398_v20  ;;  %v471_v4 = vmul.f32 0.5, %v470_v13  ;;  %v463_v8 = vmul.f32 %v2733_v35, %v462_v51  ;;  %vm2869_vm15 = vmor %vm294_vm12, %vm295_vm13 }
  0xb9   :  { %620 = vmatmul.f32.gmra.mxu0 %v2755_v60  ;;  %v179_v44 = vpop.xlane.xlu0 %178  ;;  %v143_v45 = vpop.xlane.xlu1 %142  ;;  %v292_v49 = vsub.f32 1.5, %v291_v29  ;;  %v2851_v54 = vmul.f32 %v287_v3, %v2410_v26  ;;  %vm475_vm1 = vweird.f32 %v2781_v9  ;;  %vm304_vm2 = vweird.f32 %v2736_v41 }
  0xba   :  { %v2791_v27 = vpop.eup %2057  ;;  %v2832_v61 = vadd.f32 1e-12, %v143_v45  ;;  %4047 = vst [vmem:[#allocation13_spill] sm:$0xff] %v2844_v59  ;;  %v181_v39 = vpop.xlane.xlu2 %180  ;;  %v2865_v26 = vadd.f32 1e-12, %v179_v44  ;;  %v472_v12 = vsub.f32 1.5, %v471_v4  ;;  %v467_v29 = vsel %vm2857_vm14, %v2733_v35, %v463_v8  ;;  %vm2905_vm4 = vmor %vm474_vm0, %vm475_vm1 }
  0xbb   :  { %v299_v0 = vmul.f32 %v2791_v27, %v2736_v41  ;;  %v2829_v28 = vpop.eup %2059  ;;  %4048 = vst [vmem:[#allocation14_spill] sm:$0xff] %v2851_v54  ;;  %v293_v21 = vmul.f32 %v2743_v56, %v292_v49  ;;  %v2892_v35 = vmul.f32 %v467_v29, %v2408_v25  ;;  %vm305_vm3 = vweird.f32 %v2791_v27 }
  0xbc   :  { %v2839_v5 = vpop.eup %2061  ;;  %v479_v50 = vmul.f32 %v2829_v28, %v2769_v19  ;;  %2065 = vrsqrt.f32 %v2832_v61  ;;  %v473_v13 = vmul.f32 %v2781_v9, %v472_v12  ;;  %vm2917_vm5 = vmor %vm304_vm2, %vm305_vm3  ;;  %vm484_vm6 = vweird.f32 %v2769_v19  ;;  %v707_v19 = vld [vmem:[#allocation4 + $0x10] sm:$0xff] }
  0xbd   :  { %v300_v2 = vmul.f32 %v2791_v27, %v299_v0  ;;  %v309_v55 = vmul.f32 %v2839_v5, %v2784_v11  ;;  %v297_v45 = vsel %vm2869_vm15, %v2743_v56, %v293_v21  ;;  %2067 = vrsqrt.f32 %v2865_v26  ;;  %4053 = vst [vmem:[#allocation15_spill] sm:$0xff] %v2892_v35 }
  0xbe   :  { %v480_v18 = vmul.f32 %v2829_v28, %v479_v50  ;;  %v2877_v0 = vpop.eup %2063  ;;  %v2899_v56 = vmul.f32 %v297_v45, %v2420_v31  ;;  %v2913_v31 = vadd.f32 1e-12, %v181_v39  ;;  %v708_v50 = vld [vmem:[#allocation4 + $0x18] sm:$0xff]  ;;  %vm485_vm7 = vweird.f32 %v2829_v28 }
  0xbf   :  { %v301_v1 = vmul.f32 0.5, %v300_v2  ;;  %v310_v44 = vmul.f32 %v2839_v5, %v309_v55  ;;  %v489_v51 = vmul.f32 %v2877_v0, %v2817_v24  ;;  %737 = vmatpush.msrb.mxu3 %v708_v50  ;;  %vm314_vm8 = vweird.f32 %v2784_v11  ;;  %vm2953_vm10 = vmor %vm484_vm6, %vm485_vm7 }
  0xc0   :  { %674 = vmatmul.f32.gmra.mxu3 %v2796_v63  ;;  %v481_v57 = vmul.f32 0.5, %v480_v18  ;;  %4054 = vst [vmem:[#allocation16_spill] sm:$0xff] %v2899_v56  ;;  %vm315_vm9 = vweird.f32 %v2839_v5  ;;  %vm494_vm12 = vweird.f32 %v2817_v24  ;;  %vm495_vm13 = vweird.f32 %v2877_v0  ;;  %v706_v24 = vld [vmem:[#allocation4 + $0x8] sm:$0xff] }
  0xc1   :  { %623 = vmatmul.f32.gmra.mxu0 %v2803_v7  ;;  %v145_v42 = vpop.xlane.xlu0 %144  ;;  %v302_v36 = vsub.f32 1.5, %v301_v1  ;;  %v311_v52 = vmul.f32 0.5, %v310_v44  ;;  %v183_v3 = vpop.xlane.xlu1 %182  ;;  %v490_v20 = vmul.f32 %v2877_v0, %v489_v51  ;;  %v477_v1 = vsel %vm2905_vm4, %v2781_v9, %v473_v13  ;;  %vm2965_vm11 = vmor %vm314_vm8, %vm315_vm9  ;;  %738 = vmatpush.msrb.mxu3 %v707_v19 }
  0xc2   :  { %v2880_v43 = vadd.f32 1e-12, %v145_v42  ;;  %v2887_v62 = vpop.eup %2065  ;;  %v147_v4 = vpop.xlane.xlu2 %146  ;;  %v482_v8 = vsub.f32 1.5, %v481_v57  ;;  %v2940_v9 = vmul.f32 %v477_v1, %v2418_v30  ;;  %vm324_vm14 = vweird.f32 %v2832_v61  ;;  %vm3001_vm0 = vmor %vm494_vm12, %vm495_vm13 }
  0xc3   :  { %v319_v49 = vmul.f32 %v2887_v62, %v2832_v61  ;;  %v303_v2 = vmul.f32 %v2791_v27, %v302_v36  ;;  %v2925_v55 = vpop.eup %2067  ;;  %v2928_v21 = vadd.f32 1e-12, %v147_v4  ;;  %v312_v41 = vsub.f32 1.5, %v311_v52  ;;  %739 = vmatpush.msrb.mxu3 %v706_v24 }
  0xc4   :  { %2069 = vrsqrt.f32 %v2880_v43  ;;  %4059 = vst [vmem:[#allocation17_spill] sm:$0xff] %v2940_v9  ;;  %v491_v23 = vmul.f32 0.5, %v490_v20  ;;  %v499_v12 = vmul.f32 %v2925_v55, %v2865_v26  ;;  %v483_v18 = vmul.f32 %v2829_v28, %v482_v8 }
  0xc5   :  { %v320_v39 = vmul.f32 %v2887_v62, %v319_v49  ;;  %v307_v42 = vsel %vm2917_vm5, %v2791_v27, %v303_v2  ;;  %2071 = vrsqrt.f32 %v2913_v31  ;;  %v313_v44 = vmul.f32 %v2839_v5, %v312_v41 }
  0xc6   :  { %v2947_v27 = vmul.f32 %v307_v42, %v2433_v37  ;;  %2073 = vrsqrt.f32 %v2928_v21  ;;  %v2961_v37 = vadd.f32 1e-12, %v183_v3  ;;  %v492_v51 = vsub.f32 1.5, %v491_v23 }
  0xc7   :  { %v321_v29 = vmul.f32 0.5, %v320_v39  ;;  %v500_v13 = vmul.f32 %v2925_v55, %v499_v12  ;;  %v487_v25 = vsel %vm2953_vm10, %v2829_v28, %v483_v18  ;;  %v317_v3 = vsel %vm2965_vm11, %v2839_v5, %v313_v44 }
  0xc8   :  { %677 = vmatmul.f32.gmra.mxu3 %v2844_v59  ;;  %4060 = vst [vmem:[#allocation18_spill] sm:$0xff] %v2947_v27  ;;  %2075 = vrsqrt.f32 %v2961_v37  ;;  %v2988_v28 = vmul.f32 %v487_v25, %v2422_v32  ;;  %vm325_vm15 = vweird.f32 %v2887_v62  ;;  %v493_v5 = vmul.f32 %v2877_v0, %v492_v51 }
  0xc9   :  { %626 = vmatmul.f32.gmra.mxu0 %v2851_v54  ;;  %v149_v45 = vpop.xlane.xlu1 %148  ;;  %v322_v11 = vsub.f32 1.5, %v321_v29  ;;  %v501_v14 = vmul.f32 0.5, %v500_v13  ;;  %v185_v8 = vpop.xlane.xlu0 %184  ;;  %v2995_v20 = vmul.f32 %v317_v3, %v2440_v40  ;;  %vm3013_vm1 = vmor %vm324_vm14, %vm325_vm15  ;;  %vm504_vm2 = vweird.f32 %v2865_v26  ;;  %v705_v26 = vld [vmem:[#allocation4] sm:$0xff] }
  0xca   :  { %v2935_v15 = vpop.eup %2069  ;;  %v2976_v49 = vadd.f32 1e-12, %v149_v45  ;;  %4065 = vst [vmem:[#allocation19_spill] sm:$0xff] %v2988_v28  ;;  %v151_v42 = vpop.xlane.xlu2 %150  ;;  %v3009_v40 = vadd.f32 1e-12, %v185_v8  ;;  %v497_v30 = vsel %vm3001_vm0, %v2877_v0, %v493_v5  ;;  %vm505_vm3 = vweird.f32 %v2925_v55  ;;  %740 = vmatpush.msrb.mxu3 %v705_v26 }
  0xcb   :  { %v329_v36 = vmul.f32 %v2935_v15, %v2880_v43  ;;  %v2973_v52 = vpop.eup %2071  ;;  %4066 = vst [vmem:[#allocation20_spill] sm:$0xff] %v2995_v20  ;;  %v323_v39 = vmul.f32 %v2887_v62, %v322_v11  ;;  %v502_v12 = vsub.f32 1.5, %v501_v14  ;;  %vm334_vm4 = vweird.f32 %v2880_v43  ;;  %vm3049_vm6 = vmor %vm504_vm2, %vm505_vm3 }
  0xcc   :  { %v2983_v4 = vpop.eup %2073  ;;  %v509_v50 = vmul.f32 %v2973_v52, %v2913_v31  ;;  %2077 = vrsqrt.f32 %v2976_v49  ;;  %v3036_v0 = vmul.f32 %v497_v30, %v2435_v38  ;;  %vm335_vm5 = vweird.f32 %v2935_v15 }
  0xcd   :  { %v330_v2 = vmul.f32 %v2935_v15, %v329_v36  ;;  %v339_v41 = vmul.f32 %v2983_v4, %v2928_v21  ;;  %v3024_v36 = vadd.f32 1e-12, %v151_v42  ;;  %v327_v45 = vsel %vm3013_vm1, %v2887_v62, %v323_v39  ;;  %vm3059_vm7 = vmor %vm334_vm4, %vm335_vm5 }
  0xce   :  { %v510_v18 = vmul.f32 %v2973_v52, %v509_v50  ;;  %v3021_v29 = vpop.eup %2075  ;;  %2079 = vrsqrt.f32 %v3009_v40  ;;  %4071 = vst [vmem:[#allocation21_spill] sm:$0xff] %v3036_v0  ;;  %v503_v13 = vmul.f32 %v2925_v55, %v502_v12  ;;  %v3043_v62 = vmul.f32 %v327_v45, %v2459_v48 }
  0xcf   :  { %v331_v1 = vmul.f32 0.5, %v330_v2  ;;  %v340_v44 = vmul.f32 %v2983_v4, %v339_v41  ;;  %v519_v51 = vmul.f32 %v3021_v29, %v2961_v37  ;;  %2081 = vrsqrt.f32 %v3024_v36 }
  0xd0   :  { %680 = vmatmul.f32.gmra.mxu3 %v2892_v35  ;;  %v511_v19 = vmul.f32 0.5, %v510_v18  ;;  %4072 = vst [vmem:[#allocation22_spill] sm:$0xff] %v3043_v62  ;;  %v507_v8 = vsel %vm3049_vm6, %v2925_v55, %v503_v13  ;;  %vm514_vm8 = vweird.f32 %v2913_v31  ;;  %vm515_vm9 = vweird.f32 %v2973_v52 }
  0xd1   :  { %629 = vmatmul.f32.gmra.mxu0 %v2899_v56  ;;  %v332_v61 = vsub.f32 1.5, %v331_v1  ;;  %v341_v25 = vmul.f32 0.5, %v340_v44  ;;  %v153_v3 = vpop.xlane.xlu0 %152  ;;  %v520_v50 = vmul.f32 %v3021_v29, %v519_v51  ;;  %vm344_vm10 = vweird.f32 %v2928_v21  ;;  %vm3094_vm12 = vmor %vm514_vm8, %vm515_vm9 }
  0xd2   :  { %v3031_v57 = vpop.eup %2077  ;;  %v512_v14 = vsub.f32 1.5, %v511_v19  ;;  %v3070_v32 = vadd.f32 1e-12, %v153_v3  ;;  %v3081_v55 = vmul.f32 %v507_v8, %v2457_v47  ;;  %vm345_vm11 = vweird.f32 %v2983_v4  ;;  %v2248_v3 = vld [vmem:[#allocation2 + $0x60] sm:$0xff] }
  0xd3   :  { %v349_v11 = vmul.f32 %v3031_v57, %v2976_v49  ;;  %v333_v2 = vmul.f32 %v2935_v15, %v332_v61  ;;  %v342_v43 = vsub.f32 1.5, %v341_v25  ;;  %v521_v42 = vmul.f32 0.5, %v520_v50  ;;  %v155_v61 = vpop.xlane.xlu1 %154  ;;  %vm3104_vm13 = vmor %vm344_vm10, %vm345_vm11  ;;  %v2247_v25 = vld [vmem:[#allocation2 + $0xe8] sm:$0xff] }
  0xd4   :  { %v3067_v5 = vpop.eup %2079  ;;  %4077 = vst [vmem:[#allocation23_spill] sm:$0xff] %v3081_v55  ;;  %v513_v24 = vmul.f32 %v2973_v52, %v512_v14  ;;  %2083 = vrsqrt.f32 %v3070_v32  ;;  %vm524_vm14 = vweird.f32 %v2961_v37  ;;  %v3113_v19 = vadd.f32 1e-12, %v155_v61  ;;  %v2251_v61 = vld [vmem:[#allocation2 + $0xf8] sm:$0xff] }
  0xd5   :  { %v350_v1 = vmul.f32 %v3031_v57, %v349_v11  ;;  %v337_v41 = vsel %vm3059_vm7, %v2935_v15, %v333_v2  ;;  %v3077_v39 = vpop.eup %2081  ;;  %v529_v23 = vmul.f32 %v3067_v5, %v3009_v40  ;;  %v343_v30 = vmul.f32 %v2983_v4, %v342_v43 }
  0xd6   :  { %v3088_v12 = vmul.f32 %v337_v41, %v2465_v53  ;;  %v359_v18 = vmul.f32 %v3077_v39, %v3024_v36  ;;  %v522_v31 = vsub.f32 1.5, %v521_v42  ;;  %v517_v45 = vsel %vm3094_vm12, %v2973_v52, %v513_v24  ;;  %v2249_v41 = vld [vmem:[#allocation2 + $0xf0] sm:$0xff]  ;;  %v2250_v24 = vld [vmem:[#allocation2 + $0x68] sm:$0xff] }
  0xd7   :  { %v351_v15 = vmul.f32 0.5, %v350_v1  ;;  %v530_v44 = vmul.f32 %v3067_v5, %v529_v23  ;;  %v347_v21 = vsel %vm3104_vm13, %v2983_v4, %v343_v30  ;;  %vm525_vm15 = vweird.f32 %v3021_v29 }
  0xd8   :  { %683 = vmatmul.f32.gmra.mxu3 %v2940_v9  ;;  %4078 = vst [vmem:[#allocation24_spill] sm:$0xff] %v3088_v12  ;;  %v360_v13 = vmul.f32 %v3077_v39, %v359_v18  ;;  %v3120_v11 = vmul.f32 %v2247_v25, %v517_v45  ;;  %vm354_vm0 = vweird.f32 %v2976_v49  ;;  %vm355_vm1 = vweird.f32 %v3031_v57  ;;  %vm526_vm2 = vmor %vm524_vm14, %vm525_vm15 }
  0xd9   :  { %632 = vmatmul.f32.gmra.mxu0 %v2947_v27  ;;  %v352_v51 = vsub.f32 1.5, %v351_v15  ;;  %v531_v2 = vmul.f32 0.5, %v530_v44  ;;  %v523_v52 = vmul.f32 %v3021_v29, %v522_v31  ;;  %v3125_v48 = vmul.f32 %v2248_v3, %v347_v21  ;;  %vm356_vm3 = vmor %vm354_vm0, %vm355_vm1  ;;  %v2252_v31 = vld [vmem:[#allocation2 + $0x70] sm:$0xff]  ;;  %v2254_v3 = vld [vmem:[#allocation2 + $0x80] sm:$0xff] }
  0xda   :  { %v2084_v38 = vpop.eup %2083  ;;  %4083 = vst [vmem:[#allocation25_spill] sm:$0xff] %v3120_v11  ;;  %2085 = vrsqrt.f32 %v3113_v19  ;;  %v361_v4 = vmul.f32 0.5, %v360_v13  ;;  %vm534_vm4 = vweird.f32 %v3009_v40  ;;  %vm535_vm5 = vweird.f32 %v3067_v5 }
  0xdb   :  { %4084 = vst [vmem:[#allocation26_spill] sm:$0xff] %v3125_v48  ;;  %v369_v26 = vmul.f32 %v2084_v38, %v3070_v32  ;;  %v353_v14 = vmul.f32 %v3031_v57, %v352_v51  ;;  %v532_v49 = vsub.f32 1.5, %v531_v2  ;;  %v527_v50 = vsel %vm526_vm2, %v3021_v29, %v523_v52  ;;  %vm536_vm8 = vmor %vm534_vm4, %vm535_vm5 }
  0xdc   :  { %v362_v8 = vsub.f32 1.5, %v361_v4  ;;  %v3138_v42 = vmul.f32 %v2249_v41, %v527_v50  ;;  %vm364_vm6 = vweird.f32 %v3024_v36  ;;  %vm365_vm7 = vweird.f32 %v3077_v39 }
  0xdd   :  { %v370_v43 = vmul.f32 %v2084_v38, %v369_v26  ;;  %v357_v1 = vsel %vm356_vm3, %v3031_v57, %v353_v14  ;;  %v533_v23 = vmul.f32 %v3067_v5, %v532_v49  ;;  %vm366_vm9 = vmor %vm364_vm6, %vm365_vm7  ;;  %vm374_vm10 = vweird.f32 %v3070_v32  ;;  %v2253_v32 = vld [vmem:[#allocation2 + $0x78] sm:$0xff] }
  0xde   :  { %4085 = vst [vmem:[#allocation27_spill] sm:$0xff] %v3138_v42  ;;  %v3143_v29 = vmul.f32 %v2250_v24, %v357_v1  ;;  %v363_v47 = vmul.f32 %v3077_v39, %v362_v8  ;;  %vm375_vm11 = vweird.f32 %v2084_v38  ;;  %vm384_vm13 = vweird.f32 %v3113_v19 }
  0xdf   :  { %v371_v40 = vmul.f32 0.5, %v370_v43  ;;  %v537_v36 = vsel %vm536_vm8, %v3067_v5, %v533_v23  ;;  %vm376_vm12 = vmor %vm374_vm10, %vm375_vm11  ;;  %vm989_vm0 = vcmask 7168  }
  0xe0   :  { %686 = vmatmul.f32.gmra.mxu3 %v2988_v28  ;;  %v2086_v37 = vpop.eup %2085  ;;  %4086 = vst [vmem:[#allocation28_spill] sm:$0xff] %v3143_v29  ;;  %v367_v30 = vsel %vm366_vm9, %v3077_v39, %v363_v47  ;;  %v3151_v53 = vmul.f32 %v2251_v61, %v537_v36  ;;  %v570_v39 = vld [vmem:[%s3991_s1] sm:$0xff] }
  0xe1   :  { %635 = vmatmul.f32.gmra.mxu0 %v2995_v20  ;;  %v379_v57 = vmul.f32 %v2086_v37, %v3113_v19  ;;  %v372_v15 = vsub.f32 1.5, %v371_v40  ;;  %v3154_v44 = vmul.f32 %v2252_v31, %v367_v30  ;;  %vm385_vm14 = vweird.f32 %v2086_v37  ;;  %v875_v30 = vld [vmem:[%s3996_s6 + $0x78] sm:$0xff]  ;;  %v874_v31 = vld [vmem:[%s3996_s6 + $0x70] sm:$0xff] }
  0xe2   :  { %4087 = vst [vmem:[#allocation29_spill] sm:$0xff] %v3151_v53  ;;  %vm386_vm15 = vmor %vm384_vm13, %vm385_vm14  ;;  %876 = vmatpush.msra.mxu1 %v875_v30  ;;  %1997 = vmatpush.msra.mxu2 %v875_v30 }
  0xe3   :  { %v380_v18 = vmul.f32 %v2086_v37, %v379_v57  ;;  %4088 = vst [vmem:[#allocation30_spill] sm:$0xff] %v3154_v44  ;;  %v373_v51 = vmul.f32 %v2084_v38, %v372_v15 }
  0xe4   :  { %877 = vmatpush.msra.mxu1 %v874_v31  ;;  %1998 = vmatpush.msra.mxu2 %v874_v31  ;;  %v866_v31 = vld [vmem:[%s3996_s6 + $0x30] sm:$0xff] }
  0xe5   :  { %v381_v45 = vmul.f32 0.5, %v380_v18  ;;  %v377_v13 = vsel %vm376_vm12, %v2084_v38, %v373_v51  ;;  %v571_v38 = vld [vmem:[%s3991_s1 + $0x8] sm:$0xff] }
  0xe6   :  { %v3162_v21 = vmul.f32 %v2253_v32, %v377_v13  ;;  %v873_v51 = vld [vmem:[%s3996_s6 + $0x68] sm:$0xff]  ;;  %v871_v13 = vld [vmem:[%s3996_s6 + $0x58] sm:$0xff]  ;;  %v870_v32 = vld [vmem:[%s3996_s6 + $0x50] sm:$0xff] }
  0xe7   :  { %v382_v5 = vsub.f32 1.5, %v381_v45  ;;  %878 = vmatpush.msra.mxu1 %v873_v51  ;;  %1999 = vmatpush.msra.mxu2 %v873_v51 }
  0xe8   :  { %689 = vmatmul.f32.gmra.mxu3 %v3036_v0  ;;  %4089 = vst [vmem:[#allocation31_spill] sm:$0xff] %v3162_v21 }
  0xe9   :  { %638 = vmatmul.f32.gmra.mxu0 %v3043_v62  ;;  %v383_v25 = vmul.f32 %v2086_v37, %v382_v5  ;;  %v872_v5 = vld [vmem:[%s3996_s6 + $0x60] sm:$0xff] }
  0xea   :  { %879 = vmatpush.msra.mxu1 %v872_v5  ;;  %2000 = vmatpush.msra.mxu2 %v872_v5  ;;  %v865_v5 = vld [vmem:[%s3996_s6 + $0x28] sm:$0xff] }
  0xeb   :  { %v387_v2 = vsel %vm386_vm15, %v2086_v37, %v383_v25 }
  0xec   :  { %v3170_v4 = vmul.f32 %v2254_v3, %v387_v2  ;;  %880 = vmatpush.msra.mxu1 %v871_v13  ;;  %2001 = vmatpush.msra.mxu2 %v871_v13  ;;  %v869_v2 = vld [vmem:[%s3996_s6 + $0x48] sm:$0xff]  ;;  %v867_v3 = vld [vmem:[%s3996_s6 + $0x38] sm:$0xff]  ;;  %v864_v13 = vld [vmem:[%s3996_s6 + $0x20] sm:$0xff] }
  0xee   :  { %881 = vmatpush.msra.mxu1 %v870_v32  ;;  %2002 = vmatpush.msra.mxu2 %v870_v32  ;;  %v863_v32 = vld [vmem:[%s3996_s6 + $0x18] sm:$0xff] }
  0xf0   :  { %692 = vmatmul.f32.gmra.mxu3 %v3081_v55  ;;  %882 = vmatpush.msra.mxu1 %v869_v2 }
  0xf1   :  { %641 = vmatmul.f32.gmra.mxu0 %v3088_v12  ;;  %2003 = vmatpush.msra.mxu2 %v869_v2 }
  0xf8   :  { %695 = vmatmul.f32.gmra.mxu3 %v3120_v11 }
  0xf9   :  { %644 = vmatmul.f32.gmra.mxu0 %v3125_v48 }
 0x100   :  { %698 = vmatmul.f32.gmra.mxu3 %v3138_v42 }
 0x101   :  { %647 = vmatmul.f32.gmra.mxu0 %v3143_v29 }
 0x108   :  { %701 = vmatmul.f32.gmra.mxu3 %v3151_v53 }
 0x109   :  { %650 = vmatmul.f32.gmra.mxu0 %v3154_v44 }
 0x110   :  { %741 = vmatmul.f32.vlgmr.msrb.gmra.mxu3 %v570_v39 }
 0x111   :  { %653 = vmatmul.f32.gmra.mxu0 %v3162_v21 }
 0x116   :  { %v3168_v52 = vpop.f32.mrf.mxu0 }
 0x118   :  { %744 = vmatmul.f32.gmra.mxu3 %v571_v38  ;;  %v868_v38 = vld [vmem:[%s3996_s6 + $0x40] sm:$0xff] }
 0x119   :  { %656 = vmatmul.f32.gmra.mxu0 %v3170_v4  ;;  %883 = vmatpush.msra.mxu1 %v868_v38 }
 0x11a   :  { %2004 = vmatpush.msra.mxu2 %v868_v38  ;;  %v862_v38 = vld [vmem:[%s3996_s6 + $0x10] sm:$0xff] }
 0x11b   :  { %v3173_v19 = vpop.f32.mrf.mxu3  ;;  %884 = vmatpush.msra.mxu1 %v867_v3 }
 0x11c   :  { %2005 = vmatpush.msra.mxu2 %v867_v3  ;;  %v861_v3 = vld [vmem:[%s3996_s6 + $0x8] sm:$0xff] }
 0x11d   :  { %885 = vmatpush.msra.mxu1 %v866_v31 }
 0x11e   :  { %v3175_v26 = vpop.f32.mrf.mxu0  ;;  %2006 = vmatpush.msra.mxu2 %v866_v31 }
 0x11f   :  { %886 = vmatpush.msra.mxu1 %v865_v5 }
 0x120   :  { %2007 = vmatpush.msra.mxu2 %v865_v5  ;;  %v860_v5 = vld [vmem:[%s3996_s6] sm:$0xff] }
 0x121   :  { %887 = vmatpush.msra.mxu1 %v864_v13 }
 0x122   :  { %2008 = vmatpush.msra.mxu2 %v864_v13 }
 0x123   :  { %v3177_v14 = vpop.f32.mrf.mxu3  ;;  %888 = vmatpush.msra.mxu1 %v863_v32 }
 0x124   :  { %2009 = vmatpush.msra.mxu2 %v863_v32  ;;  %v2022_v32 = vld [vmem:[%s3995_s5] ss:$0 sm:$0xff] }
 0x125   :  { %889 = vmatpush.msra.mxu1 %v862_v38 }
 0x126   :  { %v3179_v49 = vpop.f32.mrf.mxu0  ;;  %2010 = vmatpush.msra.mxu2 %v862_v38  ;;  %v3277_v38 = vld [vmem:[%s3993_s3] ss:$0 sm:$0xff] }
 0x127   :  { %890 = vmatpush.msra.mxu1 %v861_v3 }
 0x128   :  { %2011 = vmatpush.msra.mxu2 %v861_v3  ;;  %v610_v3 = vadd.f32 %v3277_v38, %v3168_v52 }
 0x129   :  { %891 = vmatpush.msra.mxu1 %v860_v5 }
 0x12a   :  { %2012 = vmatpush.msra.mxu2 %v860_v5 }
 0x12b   :  { %v3181_v50 = vpop.f32.mrf.mxu3 }
 0x12e   :  { %v3183_v8 = vpop.f32.mrf.mxu0 }
 0x133   :  { %v3185_v43 = vpop.f32.mrf.mxu3 }
 0x136   :  { %v3187_v1 = vpop.f32.mrf.mxu0 }
 0x13b   :  { %v3189_v37 = vpop.f32.mrf.mxu3 }
 0x13e   :  { %v3191_v41 = vpop.f32.mrf.mxu0 }
 0x143   :  { %v3193_v23 = vpop.f32.mrf.mxu3 }
 0x146   :  { %v3195_v24 = vpop.f32.mrf.mxu0 }
 0x14b   :  { %v3197_v40 = vpop.f32.mrf.mxu3 }
 0x14e   :  { %v3199_v57 = vpop.f32.mrf.mxu0 }
 0x153   :  { %v3201_v47 = vpop.f32.mrf.mxu3 }
 0x156   :  { %v3203_v36 = vpop.f32.mrf.mxu0 }
 0x15b   :  { %v3205_v15 = vpop.f32.mrf.mxu3 }
 0x15e   :  { %v3207_v18 = vpop.f32.mrf.mxu0 }
 0x163   :  { %v3212_v61 = vpop.f32.mrf.mxu3 }
 0x166   :  { %v3217_v45 = vpop.f32.mrf.mxu0 }
 0x167   :  { %v640_v52 = vadd.f32 %v3277_v38, %v3217_v45 }
 0x16b   :  { %v3228_v39 = vpop.f32.mrf.mxu3 }
 0x16e   :  { %v3233_v25 = vpop.f32.mrf.mxu0 }
 0x173   :  { %v3244_v30 = vpop.f32.mrf.mxu3 }
 0x176   :  { %v3249_v51 = vpop.f32.mrf.mxu0 }
 0x17b   :  { %v3260_v2 = vpop.f32.mrf.mxu3 }
 0x17e   :  { %v648_v31 = vpop.f32.mrf.mxu0 }
 0x183   :  { %v699_v13 = vpop.f32.mrf.mxu3 }
 0x186   :  { %v651_v53 = vpop.f32.mrf.mxu0 }
 0x18b   :  { %v702_v42 = vpop.f32.mrf.mxu3 }
 0x18e   :  { %v654_v55 = vpop.f32.mrf.mxu0 }
 0x18f   :  { %v655_v9 = vadd.f32 %v3277_v38, %v654_v55 }
 0x193   :  { %v742_v11 = vpop.f32.mrf.mxu3 }
 0x194   :  { %v3279_v0 = vadd.f32 %v2022_v32, %v742_v11  ;;  %v613_v11 = vadd.f32 %v3277_v38, %v3175_v26 }
 0x196   :  { %v764_v5 = vperm.slane %v3279_v0, 0  ;;  %v756_v35 = vrot.slane %v3279_v0, 7  ;;  %v754_v28 = vrot.slane %v3279_v0, 5  ;;  %v657_v34 = vpop.f32.mrf.mxu0  ;;  %v755_v48 = vrot.slane %v3279_v0, 6 }
 0x197   :  { %v658_v55 = vadd.f32 %v3277_v38, %v657_v34  ;;  %v661_v34 = vadd.f32 %v3277_v38, %v3173_v19 }
 0x198   :  { %v796_v63 = vadd.f32 %v764_v5, %v610_v3  ;;  %v771_v16 = vperm.slane %v756_v35, 0  ;;  %v769_v21 = vperm.slane %v754_v28, 0  ;;  %v797_v3 = vadd.f32 %v764_v5, %v613_v11 }
 0x199   :  { %v750_v35 = vrot.slane %v3279_v0, 1  ;;  %v646_v5 = vadd.f32 %v3277_v38, %v3249_v51  ;;  %v649_v11 = vadd.f32 %v3277_v38, %v648_v31 }
 0x19a   :  { %2087 = vtanh.f32 %v796_v63  ;;  %v811_v59 = vadd.f32 %v771_v16, %v655_v9  ;;  %v3297_v9 = vadd.f32 %v769_v21, %v640_v52  ;;  %v652_v52 = vadd.f32 %v3277_v38, %v651_v53 }
 0x19b   :  { %v745_v44 = vpop.f32.mrf.mxu3  ;;  %v765_v45 = vperm.slane %v750_v35, 0  ;;  %v694_v53 = vadd.f32 %v3277_v38, %v3244_v30 }
 0x19c   :  { %v3289_v29 = vadd.f32 %v2022_v32, %v745_v44  ;;  %2089 = vtanh.f32 %v811_v59  ;;  %v643_v44 = vadd.f32 %v3277_v38, %v3233_v25  ;;  %v770_v59 = vperm.slane %v755_v48, 0 }
 0x19d   :  { %2091 = vtanh.f32 %v797_v3  ;;  %v616_v25 = vadd.f32 %v3277_v38, %v3179_v49  ;;  %v688_v48 = vadd.f32 %v3277_v38, %v3212_v61  ;;  %v3321_v35 = vadd.f32 %v771_v16, %v652_v52 }
 0x19e   :  { %v772_v63 = vperm.slane %v3289_v29, 0  ;;  %v3301_v20 = vadd.f32 %v769_v21, %v643_v44  ;;  %v691_v21 = vadd.f32 %v3277_v38, %v3228_v39  ;;  %v761_v19 = vrot.slane %v3289_v29, 5 }
 0x19f   :  { %v3318_v51 = vadd.f32 %v770_v59, %v649_v11  ;;  %v798_v31 = vadd.f32 %v765_v45, %v616_v25  ;;  %v762_v3 = vrot.slane %v3289_v29, 6  ;;  %v763_v49 = vrot.slane %v3289_v29, 7 }
 0x1a0   :  { %v2088_v28 = vpop.eup %2087  ;;  %v812_v26 = vadd.f32 %v772_v63, %v658_v55  ;;  %v3316_v55 = vadd.f32 %v770_v59, %v646_v5  ;;  %v697_v61 = vadd.f32 %v3277_v38, %v3260_v2  ;;  %v700_v39 = vadd.f32 %v3277_v38, %v699_v13 }
 0x1a1   :  { %892 = vmatmul.f32.vlgmr.msra.gmra.mxu1 %v2088_v28  ;;  %v777_v28 = vperm.slane %v761_v19, 0  ;;  %v757_v59 = vrot.slane %v3289_v29, 1  ;;  %v779_v5 = vperm.slane %v763_v49, 0  ;;  %v703_v16 = vadd.f32 %v3277_v38, %v702_v42 }
 0x1a2   :  { %v2090_v32 = vpop.eup %2089  ;;  %2093 = vtanh.f32 %v812_v26  ;;  %v813_v26 = vadd.f32 %v772_v63, %v661_v34  ;;  %v619_v34 = vadd.f32 %v3277_v38, %v3183_v8  ;;  %v751_v19 = vrot.slane %v3279_v0, 2 }
 0x1a3   :  { %937 = vmatmul.f32.vlgmr.msra.gmra.mxu2 %v2090_v32  ;;  %v2092_v44 = vpop.eup %2091  ;;  %v778_v32 = vperm.slane %v762_v3, 0  ;;  %v3331_v11 = vadd.f32 %v777_v28, %v688_v48  ;;  %v3333_v25 = vadd.f32 %v777_v28, %v691_v21  ;;  %2095 = vtanh.f32 %v798_v31 }
 0x1a4   :  { %v3339_v13 = vadd.f32 %v779_v5, %v700_v39  ;;  %v3341_v63 = vadd.f32 %v779_v5, %v703_v16  ;;  %2097 = vtanh.f32 %v813_v26  ;;  %v773_v42 = vperm.slane %v757_v59, 0 }
 0x1a5   :  { %v3335_v52 = vadd.f32 %v778_v32, %v694_v53  ;;  %v3337_v2 = vadd.f32 %v778_v32, %v697_v61  ;;  %v664_v48 = vadd.f32 %v3277_v38, %v3177_v14  ;;  %v799_v21 = vadd.f32 %v765_v45, %v619_v34 }
 0x1a6   :  { %v766_v53 = vperm.slane %v751_v19, 0  ;;  %v622_v61 = vadd.f32 %v3277_v38, %v3187_v1  ;;  %v667_v8 = vadd.f32 %v3277_v38, %v3181_v50  ;;  %v758_v45 = vrot.slane %v3289_v29, 2 }
 0x1a7   :  { %v814_v3 = vadd.f32 %v773_v42, %v664_v48  ;;  %2099 = vtanh.f32 %v799_v21  ;;  %v625_v26 = vadd.f32 %v3277_v38, %v3191_v41  ;;  %v670_v1 = vadd.f32 %v3277_v38, %v3185_v43 }
 0x1a8   :  { %v2094_v30 = vpop.eup %2093  ;;  %v800_v39 = vadd.f32 %v766_v53, %v622_v61  ;;  %v815_v14 = vadd.f32 %v773_v42, %v667_v8  ;;  %v774_v59 = vperm.slane %v758_v45, 0  ;;  %v752_v50 = vrot.slane %v3279_v0, 3 }
 0x1a9   :  { %895 = vmatmul.f32.gmra.mxu1 %v2092_v44  ;;  %v2096_v31 = vpop.eup %2095  ;;  %2101 = vtanh.f32 %v814_v3  ;;  %v801_v32 = vadd.f32 %v766_v53, %v625_v26  ;;  %v628_v42 = vadd.f32 %v3277_v38, %v3195_v24  ;;  %v673_v41 = vadd.f32 %v3277_v38, %v3189_v37 }
 0x1aa   :  { %v2098_v49 = vpop.eup %2097  ;;  %2103 = vtanh.f32 %v800_v39  ;;  %v816_v16 = vadd.f32 %v774_v59, %v670_v1  ;;  %v767_v34 = vperm.slane %v752_v50, 0  ;;  %v759_v19 = vrot.slane %v3289_v29, 3 }
 0x1ab   :  { %940 = vmatmul.f32.gmra.mxu2 %v2094_v30  ;;  %2105 = vtanh.f32 %v815_v14  ;;  %v817_v43 = vadd.f32 %v774_v59, %v673_v41  ;;  %v631_v3 = vadd.f32 %v3277_v38, %v3199_v57  ;;  %v676_v24 = vadd.f32 %v3277_v38, %v3193_v23 }
 0x1ac   :  { %2107 = vtanh.f32 %v801_v32  ;;  %v802_v48 = vadd.f32 %v767_v34, %v628_v42  ;;  %v753_v37 = vrot.slane %v3279_v0, 4  ;;  %v634_v14 = vadd.f32 %v3277_v38, %v3203_v36 }
 0x1ad   :  { %v2100_v28 = vpop.eup %2099  ;;  %2109 = vtanh.f32 %v816_v16  ;;  %v803_v53 = vadd.f32 %v767_v34, %v631_v3  ;;  %v679_v57 = vadd.f32 %v3277_v38, %v3197_v40  ;;  %v760_v26 = vrot.slane %v3289_v29, 4 }
 0x1ae   :  { %2111 = vtanh.f32 %v802_v48  ;;  %v637_v59 = vadd.f32 %v3277_v38, %v3207_v18  ;;  %v682_v36 = vadd.f32 %v3277_v38, %v3201_v47  ;;  %v685_v29 = vadd.f32 %v3277_v38, %v3205_v15 }
 0x1af   :  { %v2102_v44 = vpop.eup %2101  ;;  %2113 = vtanh.f32 %v817_v43  ;;  %v776_v1 = vperm.slane %v760_v26, 0 }
 0x1b0   :  { %v2104_v5 = vpop.eup %2103  ;;  %2115 = vtanh.f32 %v803_v53 }
 0x1b1   :  { %898 = vmatmul.f32.gmra.mxu1 %v2096_v31  ;;  %v2106_v30 = vpop.eup %2105  ;;  %v820_v40 = vadd.f32 %v776_v1, %v682_v36 }
 0x1b2   :  { %v2108_v21 = vpop.eup %2107 }
 0x1b3   :  { %943 = vmatmul.f32.gmra.mxu2 %v2098_v49  ;;  %v2110_v31 = vpop.eup %2109  ;;  %v775_v49 = vperm.slane %v759_v19, 0 }
 0x1b4   :  { %v2112_v61 = vpop.eup %2111 }
 0x1b5   :  { %v818_v8 = vadd.f32 %v775_v49, %v676_v24  ;;  %v2114_v39 = vpop.eup %2113  ;;  %v819_v23 = vadd.f32 %v775_v49, %v679_v57 }
 0x1b7   :  { %2117 = vtanh.f32 %v818_v8 }
 0x1b9   :  { %901 = vmatmul.f32.gmra.mxu1 %v2100_v28  ;;  %v768_v28 = vperm.slane %v753_v37, 0 }
 0x1bb   :  { %946 = vmatmul.f32.gmra.mxu2 %v2102_v44  ;;  %v804_v45 = vadd.f32 %v768_v28, %v634_v14  ;;  %v2116_v44 = vpop.eup %2115  ;;  %v805_v32 = vadd.f32 %v768_v28, %v637_v59 }
 0x1bd   :  { %v2118_v0 = vpop.eup %2117  ;;  %2119 = vtanh.f32 %v804_v45 }
 0x1be   :  { %2121 = vtanh.f32 %v819_v23 }
 0x1bf   :  { %2123 = vtanh.f32 %v805_v32 }
 0x1c0   :  { %2125 = vtanh.f32 %v820_v40 }
 0x1c1   :  { %904 = vmatmul.f32.gmra.mxu1 %v2104_v5  ;;  %2127 = vtanh.f32 %v3297_v9 }
 0x1c3   :  { %949 = vmatmul.f32.gmra.mxu2 %v2106_v30  ;;  %v2120_v50 = vpop.eup %2119  ;;  %v821_v30 = vadd.f32 %v776_v1, %v685_v29 }
 0x1c4   :  { %v2122_v5 = vpop.eup %2121 }
 0x1c5   :  { %v2124_v16 = vpop.eup %2123  ;;  %2129 = vtanh.f32 %v821_v30 }
 0x1c6   :  { %v2126_v18 = vpop.eup %2125  ;;  %2131 = vtanh.f32 %v3301_v20 }
 0x1c7   :  { %v2128_v47 = vpop.eup %2127  ;;  %2133 = vtanh.f32 %v3331_v11 }
 0x1c8   :  { %2135 = vtanh.f32 %v3316_v55 }
 0x1c9   :  { %907 = vmatmul.f32.gmra.mxu1 %v2108_v21  ;;  %2137 = vtanh.f32 %v3333_v25 }
 0x1ca   :  { %2139 = vtanh.f32 %v3318_v51 }
 0x1cb   :  { %952 = vmatmul.f32.gmra.mxu2 %v2110_v31  ;;  %v2130_v34 = vpop.eup %2129  ;;  %2141 = vtanh.f32 %v3335_v52 }
 0x1cc   :  { %v2132_v42 = vpop.eup %2131  ;;  %2143 = vtanh.f32 %v3321_v35 }
 0x1cd   :  { %v2134_v41 = vpop.eup %2133  ;;  %2145 = vtanh.f32 %v3337_v2 }
 0x1ce   :  { %v2136_v15 = vpop.eup %2135  ;;  %2147 = vtanh.f32 %v3339_v13 }
 0x1cf   :  { %v2138_v38 = vpop.eup %2137  ;;  %2149 = vtanh.f32 %v3341_v63 }
 0x1d0   :  { %v2140_v20 = vpop.eup %2139 }
 0x1d1   :  { %910 = vmatmul.f32.gmra.mxu1 %v2112_v61  ;;  %v2142_v9 = vpop.eup %2141 }
 0x1d2   :  { %v2144_v55 = vpop.eup %2143 }
 0x1d3   :  { %955 = vmatmul.f32.gmra.mxu2 %v2114_v39  ;;  %v2146_v11 = vpop.eup %2145 }
 0x1d4   :  { %v2148_v25 = vpop.eup %2147 }
 0x1d5   :  { %v2150_v52 = vpop.eup %2149 }
 0x1d9   :  { %913 = vmatmul.f32.gmra.mxu1 %v2116_v44 }
 0x1db   :  { %958 = vmatmul.f32.gmra.mxu2 %v2118_v0 }
 0x1e1   :  { %916 = vmatmul.f32.gmra.mxu1 %v2120_v50 }
 0x1e3   :  { %961 = vmatmul.f32.gmra.mxu2 %v2122_v5 }
 0x1e9   :  { %919 = vmatmul.f32.gmra.mxu1 %v2124_v16 }
 0x1eb   :  { %964 = vmatmul.f32.gmra.mxu2 %v2126_v18 }
 0x1f1   :  { %922 = vmatmul.f32.gmra.mxu1 %v2128_v47 }
 0x1f3   :  { %967 = vmatmul.f32.gmra.mxu2 %v2130_v34 }
 0x1f9   :  { %925 = vmatmul.f32.gmra.mxu1 %v2132_v42 }
 0x1fb   :  { %970 = vmatmul.f32.gmra.mxu2 %v2134_v41 }
 0x201   :  { %928 = vmatmul.f32.gmra.mxu1 %v2136_v15 }
 0x203   :  { %973 = vmatmul.f32.gmra.mxu2 %v2138_v38 }
 0x209   :  { %931 = vmatmul.f32.gmra.mxu1 %v2140_v20 }
 0x20b   :  { %976 = vmatmul.f32.gmra.mxu2 %v2142_v9 }
 0x211   :  { %934 = vmatmul.f32.gmra.mxu1 %v2144_v55 }
 0x213   :  { %979 = vmatmul.f32.gmra.mxu2 %v2146_v11 }
 0x21b   :  { %982 = vmatmul.f32.gmra.mxu2 %v2148_v25 }
 0x21e   :  { %v893_v51 = vpop.f32.mrf.mxu1 }
 0x21f   :  { %v990_v35 = vsel %vm989_vm0, %v893_v51, -inf }
 0x223   :  { %985 = vmatmul.f32.gmra.mxu2 %v2150_v52 }
 0x226   :  { %v896_v48 = vpop.f32.mrf.mxu1  ;;  %v3390_v21 = vpop.f32.mrf.mxu2 }
 0x227   :  { %v991_v2 = vsel %vm989_vm0, %v896_v48, -inf }
 0x228   :  { %v992_v43 = vmax.f32 %v990_v35, %v991_v2 }
 0x22a   :  { %v993_v19 = vrot.slane %v992_v43, 4 }
 0x22c   :  { %v994_v31 = vmax.f32 %v992_v43, %v993_v19 }
 0x22e   :  { %v995_v3 = vrot.slane %v994_v31, 2  ;;  %v899_v13 = vpop.f32.mrf.mxu1  ;;  %v941_v49 = vpop.f32.mrf.mxu2 }
 0x22f   :  { %v999_v28 = vsel %vm989_vm0, %v899_v13, -inf  ;;  %v1062_v14 = vsel %vm989_vm0, %v941_v49, -inf }
 0x230   :  { %v996_v24 = vmax.f32 %v994_v31, %v995_v3 }
 0x232   :  { %v997_v53 = vrot.slane %v996_v24, 1 }
 0x234   :  { %v998_v63 = vmax.f32 %v996_v24, %v997_v53 }
 0x236   :  { %v1134_v37 = vsub.f32 %v893_v51, %v998_v63  ;;  %v1135_v61 = vsub.f32 %v896_v48, %v998_v63  ;;  %v902_v8 = vpop.f32.mrf.mxu1  ;;  %v944_v39 = vpop.f32.mrf.mxu2 }
 0x237   :  { %v1000_v57 = vsel %vm989_vm0, %v902_v8, -inf  ;;  %v1063_v45 = vsel %vm989_vm0, %v944_v39, -inf }
 0x238   :  { %v1166_v44 = vmul.f32 1.442695, %v1134_v37  ;;  %v1168_v23 = vmul.f32 1.442695, %v1135_v61  ;;  %v1001_v26 = vmax.f32 %v999_v28, %v1000_v57  ;;  %v1064_v0 = vmax.f32 %v1062_v14, %v1063_v45 }
 0x23a   :  { %2151 = vpow2.f32 %v1166_v44  ;;  %v1002_v59 = vrot.slane %v1001_v26, 4  ;;  %v1065_v1 = vrot.slane %v1064_v0, 4 }
 0x23b   :  { %2153 = vpow2.f32 %v1168_v23 }
 0x23c   :  { %v1003_v36 = vmax.f32 %v1001_v26, %v1002_v59  ;;  %v1066_v32 = vmax.f32 %v1064_v0, %v1065_v1 }
 0x23e   :  { %v1004_v50 = vrot.slane %v1003_v36, 2  ;;  %v1067_v40 = vrot.slane %v1066_v32, 2  ;;  %v3398_v5 = vpop.f32.mrf.mxu1  ;;  %v3400_v29 = vpop.f32.mrf.mxu2 }
 0x23f   :  { %v1008_v11 = vsel %vm989_vm0, %v3398_v5, -inf  ;;  %v1071_v19 = vsel %vm989_vm0, %v3400_v29, -inf }
 0x240   :  { %v3402_v16 = vpop.eup %2151  ;;  %v1005_v30 = vmax.f32 %v1003_v36, %v1004_v50  ;;  %v1068_v18 = vmax.f32 %v1066_v32, %v1067_v40 }
 0x241   :  { %v3404_v47 = vpop.eup %2153  ;;  %v1230_v34 = vsel %vm989_vm0, %v3402_v16, 0.0 }
 0x242   :  { %v1231_v42 = vsel %vm989_vm0, %v3404_v47, 0.0  ;;  %v1006_v41 = vrot.slane %v1005_v30, 1  ;;  %v1069_v15 = vrot.slane %v1068_v18, 1 }
 0x243   :  { %v1232_v38 = vadd.f32 %v1231_v42, %v1230_v34 }
 0x244   :  { %v1007_v20 = vmax.f32 %v1005_v30, %v1006_v41  ;;  %v1070_v9 = vmax.f32 %v1068_v18, %v1069_v15 }
 0x245   :  { %v1233_v55 = vrot.slane %v1232_v38, 4 }
 0x246   :  { %v1136_v25 = vsub.f32 %v899_v13, %v1007_v20  ;;  %v1137_v51 = vsub.f32 %v902_v8, %v1007_v20  ;;  %v1150_v52 = vsub.f32 %v941_v49, %v1070_v9  ;;  %v1151_v48 = vsub.f32 %v944_v39, %v1070_v9  ;;  %v908_v35 = vpop.f32.mrf.mxu1  ;;  %v3412_v2 = vpop.f32.mrf.mxu2 }
 0x247   :  { %v1234_v43 = vadd.f32 %v1233_v55, %v1232_v38  ;;  %v1009_v31 = vsel %vm989_vm0, %v908_v35, -inf  ;;  %v1072_v3 = vsel %vm989_vm0, %v3412_v2, -inf }
 0x248   :  { %v1170_v24 = vmul.f32 1.442695, %v1136_v25  ;;  %v1172_v53 = vmul.f32 1.442695, %v1137_v51  ;;  %v1198_v63 = vmul.f32 1.442695, %v1150_v52  ;;  %v1010_v37 = vmax.f32 %v1008_v11, %v1009_v31 }
 0x249   :  { %v1235_v13 = vrot.slane %v1234_v43, 2  ;;  %v1200_v61 = vmul.f32 1.442695, %v1151_v48  ;;  %v1073_v49 = vmax.f32 %v1071_v19, %v1072_v3 }
 0x24a   :  { %2155 = vpow2.f32 %v1170_v24  ;;  %v1011_v8 = vrot.slane %v1010_v37, 4 }
 0x24b   :  { %v1236_v39 = vadd.f32 %v1235_v13, %v1234_v43  ;;  %2157 = vpow2.f32 %v1172_v53  ;;  %v1074_v28 = vrot.slane %v1073_v49, 4 }
 0x24c   :  { %2159 = vpow2.f32 %v1198_v63  ;;  %v1012_v14 = vmax.f32 %v1010_v37, %v1011_v8 }
 0x24d   :  { %v1237_v57 = vrot.slane %v1236_v39, 1  ;;  %2161 = vpow2.f32 %v1200_v61  ;;  %v1075_v45 = vmax.f32 %v1073_v49, %v1074_v28 }
 0x24e   :  { %v1013_v44 = vrot.slane %v1012_v14, 2  ;;  %v3419_v23 = vpop.f32.mrf.mxu1  ;;  %v3421_v26 = vpop.f32.mrf.mxu2 }
 0x24f   :  { %v3423_v0 = vadd.f32 %v1237_v57, %v1236_v39  ;;  %v1076_v59 = vrot.slane %v1075_v45, 2  ;;  %v1017_v51 = vsel %vm989_vm0, %v3419_v23, -inf  ;;  %v1080_v43 = vsel %vm989_vm0, %v3421_v26, -inf }
 0x250   :  { %v3425_v1 = vpop.eup %2155  ;;  %v1014_v36 = vmax.f32 %v1012_v14, %v1013_v44 }
 0x251   :  { %v3427_v32 = vpop.eup %2157  ;;  %2163 = vrcp.f32 %v3423_v0  ;;  %v1239_v50 = vsel %vm989_vm0, %v3425_v1, 0.0  ;;  %v1077_v40 = vmax.f32 %v1075_v45, %v1076_v59  ;;  %v1383_v3 = vand.u32 2147483647, %v3423_v0 }
 0x252   :  { %v3432_v30 = vpop.eup %2159  ;;  %v1240_v18 = vsel %vm989_vm0, %v3427_v32, 0.0  ;;  %v1015_v34 = vrot.slane %v1014_v36, 1  ;;  %vm1379_vm2 = vweird.f32 %v3423_v0 }
 0x253   :  { %v3436_v42 = vpop.eup %2161  ;;  %v1241_v41 = vadd.f32 %v1240_v18, %v1239_v50  ;;  %v1302_v15 = vsel %vm989_vm0, %v3432_v30, 0.0  ;;  %v1078_v38 = vrot.slane %v1077_v40, 1  ;;  %v2311_v50 = vmov 0  }
 0x254   :  { %v1303_v20 = vsel %vm989_vm0, %v3436_v42, 0.0  ;;  %v1016_v9 = vmax.f32 %v1014_v36, %v1015_v34  ;;  %2019 = vset.pattern.permute.xlu0 %v2311_v50  ;;  %2018 = vset.pattern.permute.xlu2 %v2311_v50  ;;  %vm3475_vm3 = vcmp.eq.f32.partialorder %v1383_v3, 8.507059e+37 }
 0x255   :  { %v1242_v55 = vrot.slane %v1241_v41, 4  ;;  %v1304_v11 = vadd.f32 %v1303_v20, %v1302_v15  ;;  %v1079_v25 = vmax.f32 %v1077_v40, %v1078_v38  ;;  %2020 = vset.pattern.permute.xlu1 %v2311_v50 }
 0x256   :  { %v1138_v52 = vsub.f32 %v3398_v5, %v1016_v9  ;;  %v1139_v48 = vsub.f32 %v908_v35, %v1016_v9  ;;  %v3447_v19 = vpop.f32.mrf.mxu1  ;;  %v3449_v31 = vpop.f32.mrf.mxu2 }
 0x257   :  { %v3452_v24 = vpop.eup %2163  ;;  %v1243_v53 = vadd.f32 %v1242_v55, %v1241_v41  ;;  %v1305_v63 = vrot.slane %v1304_v11, 4  ;;  %v1152_v37 = vsub.f32 %v3400_v29, %v1079_v25  ;;  %v1153_v13 = vsub.f32 %v3412_v2, %v1079_v25 }
 0x258   :  { %v1174_v61 = vmul.f32 1.442695, %v1138_v52  ;;  %v1176_v5 = vmul.f32 1.442695, %v1139_v48  ;;  %v1018_v35 = vsel %vm989_vm0, %v3447_v19, -inf  ;;  %v1081_v49 = vsel %vm989_vm0, %v3449_v31, -inf }
 0x259   :  { %v1244_v8 = vrot.slane %v1243_v53, 2  ;;  %v1306_v39 = vadd.f32 %v1305_v63, %v1304_v11  ;;  %v1202_v28 = vmul.f32 1.442695, %v1152_v37  ;;  %v1204_v14 = vmul.f32 1.442695, %v1153_v13 }
 0x25a   :  { %2165 = vpow2.f32 %v1174_v61  ;;  %v1019_v57 = vmax.f32 %v1017_v51, %v1018_v35  ;;  %v1082_v45 = vmax.f32 %v1080_v43, %v1081_v49  ;;  %v1375_v29 = vmul.f32 %v3452_v24, %v3423_v0 }
 0x25b   :  { %v1245_v44 = vadd.f32 %v1244_v8, %v1243_v53  ;;  %v1307_v2 = vrot.slane %v1306_v39, 2  ;;  %2167 = vpow2.f32 %v1176_v5  ;;  %v1385_v41 = vand.u32 2147483648, %v3423_v0 }
 0x25c   :  { %2169 = vpow2.f32 %v1202_v28  ;;  %v1020_v59 = vrot.slane %v1019_v57, 4  ;;  %v1083_v36 = vrot.slane %v1082_v45, 4  ;;  %v1376_v40 = vsub.f32 1.0, %v1375_v29 }
 0x25d   :  { %v1246_v18 = vrot.slane %v1245_v44, 1  ;;  %v1308_v34 = vadd.f32 %v1307_v2, %v1306_v39  ;;  %2171 = vpow2.f32 %v1204_v14  ;;  %vm1380_vm1 = vweird.f32 %v3452_v24 }
 0x25e   :  { %v1021_v15 = vmax.f32 %v1019_v57, %v1020_v59  ;;  %v1084_v38 = vmax.f32 %v1082_v45, %v1083_v36  ;;  %v3463_v20 = vpop.f32.mrf.mxu1  ;;  %v3465_v9 = vpop.f32.mrf.mxu2  ;;  %v1377_v55 = vmul.f32 %v3452_v24, %v1376_v40  ;;  %vm1381_vm4 = vmor %vm1379_vm2, %vm1380_vm1  ;;  %v1386_v0 = vor.u32 1.1754944e-38, %v1385_v41 }
 0x25f   :  { %v3469_v11 = vadd.f32 %v1246_v18, %v1245_v44  ;;  %v1309_v25 = vrot.slane %v1308_v34, 1  ;;  %v1026_v14 = vsel %vm989_vm0, %v3463_v20, -inf  ;;  %v1089_v36 = vsel %vm989_vm0, %v3465_v9, -inf }
 0x260   :  { %v3472_v51 = vpop.eup %2165  ;;  %v1022_v52 = vrot.slane %v1021_v15, 2  ;;  %v1085_v48 = vrot.slane %v1084_v38, 2  ;;  %v1378_v43 = vadd.f32 %v3452_v24, %v1377_v55 }
 0x261   :  { %v3479_v63 = vpop.eup %2167  ;;  %2173 = vrcp.f32 %v3469_v11  ;;  %v3482_v37 = vadd.f32 %v1309_v25, %v1308_v34  ;;  %v1248_v13 = vsel %vm989_vm0, %v3472_v51, 0.0  ;;  %vm1395_vm5 = vweird.f32 %v3469_v11 }
 0x262   :  { %v3486_v61 = vpop.eup %2169  ;;  %v1249_v5 = vsel %vm989_vm0, %v3479_v63, 0.0  ;;  %v1023_v3 = vmax.f32 %v1021_v15, %v1022_v52  ;;  %v1086_v35 = vmax.f32 %v1084_v38, %v1085_v48  ;;  %v1382_v49 = vsel %vm1381_vm4, %v3452_v24, %v1378_v43 }
 0x263   :  { %v3491_v8 = vpop.eup %2171  ;;  %v1250_v39 = vadd.f32 %v1249_v5, %v1248_v13  ;;  %v1311_v28 = vsel %vm989_vm0, %v3486_v61, 0.0  ;;  %v1387_v57 = vsel %vm3475_vm3, %v1386_v0, %v1382_v49  ;;  %2175 = vrcp.f32 %v3482_v37 }
 0x264   :  { %v1312_v45 = vsel %vm989_vm0, %v3491_v8, 0.0  ;;  %v1024_v29 = vrot.slane %v1023_v3, 1  ;;  %v1087_v44 = vrot.slane %v1086_v35, 1  ;;  %v1389_v2 = vmul.f32 %v3404_v47, %v1387_v57 }
 0x265   :  { %v1251_v24 = vrot.slane %v1250_v39, 4  ;;  %v1313_v59 = vadd.f32 %v1312_v45, %v1311_v28  ;;  %v1388_v50 = vmul.f32 %v3402_v16, %v1387_v57  ;;  %v1399_v15 = vand.u32 2147483647, %v3469_v11 }
 0x266   :  { %v1025_v40 = vmax.f32 %v1023_v3, %v1024_v29  ;;  %v1088_v18 = vmax.f32 %v1086_v35, %v1087_v44  ;;  %1637 = vperm.xlu0 %2019, %v1389_v2   ;;  %v3506_v34 = vpop.f32.mrf.mxu1  ;;  %v3508_v41 = vpop.f32.mrf.mxu2  ;;  %v1401_v44 = vand.u32 2147483648, %v3469_v11  ;;  %vm1507_vm9 = vweird.f32 %v3482_v37 }
 0x267   :  { %v2174_v38 = vpop.eup %2173  ;;  %v1252_v47 = vadd.f32 %v1251_v24, %v1250_v39  ;;  %v1314_v55 = vrot.slane %v1313_v59, 4  ;;  %1632 = vperm.xlu2 %2018, %v1388_v50   ;;  %v1027_v25 = vsel %vm989_vm0, %v3506_v34, -inf  ;;  %v1090_v16 = vsel %vm989_vm0, %v3508_v41, -inf }
 0x268   :  { %v1140_v52 = vsub.f32 %v3419_v23, %v1025_v40  ;;  %v1141_v48 = vsub.f32 %v3447_v19, %v1025_v40  ;;  %v1154_v43 = vsub.f32 %v3421_v26, %v1088_v18  ;;  %v1155_v53 = vsub.f32 %v3449_v31, %v1088_v18 }
 0x269   :  { %v1253_v13 = vrot.slane %v1252_v47, 2  ;;  %v1315_v0 = vadd.f32 %v1314_v55, %v1313_v59  ;;  %v1028_v5 = vmax.f32 %v1026_v14, %v1027_v25  ;;  %v1091_v3 = vmax.f32 %v1089_v36, %v1090_v16  ;;  %v3521_v19 = vpop.eup %2175 }
 0x26a   :  { %v1178_v35 = vmul.f32 1.442695, %v1140_v52  ;;  %v1180_v49 = vmul.f32 1.442695, %v1141_v48  ;;  %v1206_v39 = vmul.f32 1.442695, %v1154_v43  ;;  %v1391_v28 = vmul.f32 %v2174_v38, %v3469_v11 }
 0x26b   :  { %v1254_v57 = vadd.f32 %v1253_v13, %v1252_v47  ;;  %v1316_v45 = vrot.slane %v1315_v0, 2  ;;  %v1208_v23 = vmul.f32 1.442695, %v1155_v53  ;;  %v1029_v29 = vrot.slane %v1028_v5, 4 }
 0x26c   :  { %2177 = vpow2.f32 %v1178_v35  ;;  %v1092_v26 = vrot.slane %v1091_v3, 4  ;;  %v1392_v31 = vsub.f32 1.0, %v1391_v28  ;;  %vm1396_vm6 = vweird.f32 %v2174_v38 }
 0x26d   :  { %v1255_v2 = vrot.slane %v1254_v57, 1  ;;  %v1317_v24 = vadd.f32 %v1316_v45, %v1315_v0  ;;  %2179 = vpow2.f32 %v1180_v49  ;;  %v1030_v14 = vmax.f32 %v1028_v5, %v1029_v29  ;;  %vm1397_vm8 = vmor %vm1395_vm5, %vm1396_vm6 }
 0x26e   :  { %2181 = vpow2.f32 %v1206_v39  ;;  %v1093_v59 = vmax.f32 %v1091_v3, %v1092_v26  ;;  %v3524_v36 = vpop.f32.mrf.mxu1  ;;  %v3526_v50 = vpop.f32.mrf.mxu2  ;;  %v1393_v40 = vmul.f32 %v2174_v38, %v1392_v31  ;;  %vm1400_vm7 = vcmp.eq.f32.partialorder %v1399_v15, 8.507059e+37 }
 0x26f   :  { %v3528_v18 = vadd.f32 %v1255_v2, %v1254_v57  ;;  %v1318_v47 = vrot.slane %v1317_v24, 1  ;;  %2183 = vpow2.f32 %v1208_v23  ;;  %v1031_v55 = vrot.slane %v1030_v14, 2 }
 0x270   :  { %v1094_v25 = vrot.slane %v1093_v59, 2  ;;  %v1035_v16 = vsel %vm989_vm0, %v3524_v36, -inf  ;;  %v1394_v52 = vadd.f32 %v2174_v38, %v1393_v40  ;;  %v3535_v43 = vsel %vm989_vm0, %v3526_v50, -inf }
 0x271   :  { %2185 = vrcp.f32 %v3528_v18  ;;  %v1032_v48 = vmax.f32 %v1030_v14, %v1031_v55  ;;  %v1402_v53 = vor.u32 1.1754944e-38, %v1401_v44  ;;  %v3541_v0 = vadd.f32 %v1318_v47, %v1317_v24 }
 0x272   :  { %v3539_v13 = vpop.eup %2177  ;;  %v1095_v5 = vmax.f32 %v1093_v59, %v1094_v25  ;;  %v1398_v3 = vsel %vm1397_vm8, %v2174_v38, %v1394_v52  ;;  %v1503_v15 = vmul.f32 %v3521_v19, %v3482_v37  ;;  %vm1508_vm10 = vweird.f32 %v3521_v19 }
 0x273   :  { %v3546_v35 = vpop.eup %2179  ;;  %v1257_v49 = vsel %vm989_vm0, %v3539_v13, 0.0  ;;  %v1033_v39 = vrot.slane %v1032_v48, 1  ;;  %v1403_v11 = vsel %vm1400_vm7, %v1402_v53, %v1398_v3  ;;  %v1511_v59 = vand.u32 2147483647, %v3482_v37  ;;  %vm1509_vm12 = vmor %vm1507_vm9, %vm1508_vm10 }
 0x274   :  { %v3551_v28 = vpop.eup %2181  ;;  %v1258_v57 = vsel %vm989_vm0, %v3546_v35, 0.0  ;;  %v1096_v38 = vrot.slane %v1095_v5, 1  ;;  %v1405_v45 = vmul.f32 %v3427_v32, %v1403_v11  ;;  %v1404_v23 = vmul.f32 %v3425_v1, %v1403_v11 }
 0x275   :  { %v3557_v29 = vpop.eup %2183  ;;  %v1259_v26 = vadd.f32 %v1258_v57, %v1257_v49  ;;  %v1320_v31 = vsel %vm989_vm0, %v3551_v28, 0.0  ;;  %v1034_v44 = vmax.f32 %v1032_v48, %v1033_v39  ;;  %v1504_v2 = vsub.f32 1.0, %v1503_v15 }
 0x276   :  { %v1321_v24 = vsel %vm989_vm0, %v3557_v29, 0.0  ;;  %v1097_v14 = vmax.f32 %v1095_v5, %v1096_v38  ;;  %1647 = vperm.xlu2 %2018, %v1405_v45   ;;  %1642 = vperm.xlu1 %2020, %v1404_v23   ;;  %v1513_v32 = vand.u32 2147483648, %v3482_v37  ;;  %v3565_v40 = vpop.f32.mrf.mxu1  ;;  %v3567_v1 = vpop.f32.mrf.mxu2  ;;  %vm3576_vm11 = vcmp.eq.f32.partialorder %v1511_v59, 8.507059e+37 }
 0x277   :  { %v3569_v47 = vpop.eup %2185  ;;  %v1260_v55 = vrot.slane %v1259_v26, 4  ;;  %v1322_v25 = vadd.f32 %v1321_v24, %v1320_v31  ;;  %v1142_v52 = vsub.f32 %v3463_v20, %v1034_v44  ;;  %v1143_v48 = vsub.f32 %v3506_v34, %v1034_v44 }
 0x278   :  { %v1156_v53 = vsub.f32 %v3465_v9, %v1097_v14  ;;  %v1157_v5 = vsub.f32 %v3508_v41, %v1097_v14  ;;  %v1505_v3 = vmul.f32 %v3521_v19, %v1504_v2  ;;  %v1514_v23 = vor.u32 1.1754944e-38, %v1513_v32 }
 0x279   :  { %v1261_v49 = vadd.f32 %v1260_v55, %v1259_v26  ;;  %v1323_v39 = vrot.slane %v1322_v25, 4  ;;  %v1182_v11 = vmul.f32 1.442695, %v1142_v52  ;;  %v1184_v57 = vmul.f32 1.442695, %v1143_v48 }
 0x27a   :  { %v1210_v38 = vmul.f32 1.442695, %v1156_v53  ;;  %v1212_v45 = vmul.f32 1.442695, %v1157_v5  ;;  %v1506_v20 = vadd.f32 %v3521_v19, %v1505_v3  ;;  %v1036_v9 = vsel %vm989_vm0, %v3565_v40, -inf }
 0x27b   :  { %v1262_v34 = vrot.slane %v1261_v49, 2  ;;  %v1324_v31 = vadd.f32 %v1323_v39, %v1322_v25  ;;  %2187 = vpow2.f32 %v1182_v11  ;;  %v1037_v26 = vmax.f32 %v1035_v16, %v1036_v9 }
 0x27c   :  { %2189 = vpow2.f32 %v1184_v57  ;;  %v1510_v41 = vsel %vm1509_vm12, %v3521_v19, %v1506_v20  ;;  %v1099_v44 = vsel %vm989_vm0, %v3567_v1, -inf  ;;  %vm1411_vm13 = vweird.f32 %v3528_v18 }
 0x27d   :  { %v1263_v2 = vadd.f32 %v1262_v34, %v1261_v49  ;;  %v1325_v24 = vrot.slane %v1324_v31, 2  ;;  %2191 = vpow2.f32 %v1210_v38  ;;  %v1515_v14 = vsel %vm3576_vm11, %v1514_v23, %v1510_v41 }
 0x27e   :  { %2193 = vpow2.f32 %v1212_v45  ;;  %v1517_v37 = vmul.f32 %v3436_v42, %v1515_v14  ;;  %v1038_v59 = vrot.slane %v1037_v26, 4  ;;  %v1100_v32 = vmax.f32 %v3535_v43, %v1099_v44  ;;  %v3594_v55 = vpop.f32.mrf.mxu1  ;;  %v3596_v25 = vpop.f32.mrf.mxu2 }
 0x27f   :  { %2195 = vrcp.f32 %v3541_v0  ;;  %v1264_v19 = vrot.slane %v1263_v2, 1  ;;  %v1326_v16 = vadd.f32 %v1325_v24, %v1324_v31  ;;  %v1516_v52 = vmul.f32 %v3432_v30, %v1515_v14 }
 0x280   :  { %1717 = vperm.xlu0 %2019, %v1517_v37   ;;  %v1039_v48 = vmax.f32 %v1037_v26, %v1038_v59  ;;  %v1101_v53 = vrot.slane %v1100_v32, 4  ;;  %v1044_v5 = vsel %vm989_vm0, %v3594_v55, -inf  ;;  %v1407_v42 = vmul.f32 %v3569_v47, %v3528_v18 }
 0x281   :  { %v3604_v43 = vpop.eup %2187  ;;  %v3606_v3 = vadd.f32 %v1264_v19, %v1263_v2  ;;  %v1327_v15 = vrot.slane %v1326_v16, 1  ;;  %1712 = vperm.xlu1 %2020, %v1516_v52   ;;  %v1107_v49 = vsel %vm989_vm0, %v3596_v25, -inf  ;;  %vm1412_vm14 = vweird.f32 %v3569_v47 }
 0x282   :  { %v3611_v30 = vpop.eup %2189  ;;  %v1266_v39 = vsel %vm989_vm0, %v3604_v43, 0.0  ;;  %v1040_v11 = vrot.slane %v1039_v48, 2  ;;  %v1102_v57 = vmax.f32 %v1100_v32, %v1101_v53  ;;  %v1408_v38 = vsub.f32 1.0, %v1407_v42  ;;  %vm1413_vm1 = vmor %vm1411_vm13, %vm1412_vm14 }
 0x283   :  { %v3615_v45 = vpop.eup %2191  ;;  %2197 = vrcp.f32 %v3606_v3  ;;  %v1267_v20 = vsel %vm989_vm0, %v3611_v30, 0.0  ;;  %v1415_v23 = vand.u32 2147483647, %v3528_v18  ;;  %v3628_v2 = vadd.f32 %v1327_v15, %v1326_v16 }
 0x284   :  { %v3622_v34 = vpop.eup %2193  ;;  %v1268_v31 = vadd.f32 %v1267_v20, %v1266_v39  ;;  %v1329_v9 = vsel %vm989_vm0, %v3615_v45, 0.0  ;;  %v1041_v41 = vmax.f32 %v1039_v48, %v1040_v11  ;;  %v1103_v26 = vrot.slane %v1102_v57, 2 }
 0x285   :  { %v3626_v44 = vpop.eup %2195  ;;  %v1330_v24 = vsel %vm989_vm0, %v3622_v34, 0.0  ;;  %v1409_v14 = vmul.f32 %v3569_v47, %v1408_v38  ;;  %vm3633_vm15 = vcmp.eq.f32.partialorder %v1415_v23, 8.507059e+37  ;;  %v1417_v42 = vand.u32 2147483648, %v3528_v18 }
 0x286   :  { %v1269_v59 = vrot.slane %v1268_v31, 4  ;;  %v1331_v32 = vadd.f32 %v1330_v24, %v1329_v9  ;;  %v1042_v19 = vrot.slane %v1041_v41, 1  ;;  %v1104_v52 = vmax.f32 %v1102_v57, %v1103_v26  ;;  %v3637_v53 = vpop.f32.mrf.mxu1  ;;  %v3639_v48 = vpop.f32.mrf.mxu2 }
 0x287   :  { %v1410_v16 = vadd.f32 %v3569_v47, %v1409_v14  ;;  %v1045_v15 = vsel %vm989_vm0, %v3637_v53, -inf  ;;  %v1108_v39 = vsel %vm989_vm0, %v3639_v48, -inf  ;;  %v1418_v26 = vor.u32 1.1754944e-38, %v1417_v42 }
 0x288   :  { %v1270_v11 = vadd.f32 %v1269_v59, %v1268_v31  ;;  %v1332_v38 = vrot.slane %v1331_v32, 4  ;;  %v1043_v20 = vmax.f32 %v1041_v41, %v1042_v19  ;;  %v1105_v23 = vrot.slane %v1104_v52, 1 }
 0x289   :  { %v3651_v57 = vpop.eup %2197  ;;  %v1414_v9 = vsel %vm1413_vm1, %v3569_v47, %v1410_v16  ;;  %v1046_v24 = vmax.f32 %v1044_v5, %v1045_v15  ;;  %v1109_v14 = vmax.f32 %v1107_v49, %v1108_v39  ;;  %vm1523_vm2 = vweird.f32 %v3541_v0 }
 0x28a   :  { %v1271_v62 = vrot.slane %v1270_v11, 2  ;;  %v1333_v12 = vadd.f32 %v1332_v38, %v1331_v32  ;;  %v1144_v27 = vsub.f32 %v3524_v36, %v1043_v20  ;;  %v1145_v31 = vsub.f32 %v3565_v40, %v1043_v20 }
 0x28b   :  { %v1106_v41 = vmax.f32 %v1104_v52, %v1105_v23  ;;  %v1419_v59 = vsel %vm3633_vm15, %v1418_v26, %v1414_v9  ;;  %v1047_v19 = vrot.slane %v1046_v24, 4  ;;  %v1110_v18 = vrot.slane %v1109_v14, 4 }
 0x28c   :  { %v1272_v54 = vadd.f32 %v1271_v62, %v1270_v11  ;;  %v1334_v56 = vrot.slane %v1333_v12, 2  ;;  %v1186_v60 = vmul.f32 1.442695, %v1144_v27  ;;  %v1188_v7 = vmul.f32 1.442695, %v1145_v31 }
 0x28d   :  { %v1158_v47 = vsub.f32 %v3526_v50, %v1106_v41  ;;  %v1159_v5 = vsub.f32 %v3567_v1, %v1106_v41  ;;  %v1420_v49 = vmul.f32 %v3472_v51, %v1419_v59  ;;  %v1421_v36 = vmul.f32 %v3479_v63, %v1419_v59 }
 0x28e   :  { %v1273_v32 = vrot.slane %v1272_v54, 1  ;;  %v1335_v40 = vadd.f32 %v1334_v56, %v1333_v12  ;;  %2199 = vpow2.f32 %v1186_v60  ;;  %v1048_v52 = vmax.f32 %v1046_v24, %v1047_v19 }
 0x28f   :  { %2201 = vpow2.f32 %v1188_v7  ;;  %v1214_v37 = vmul.f32 1.442695, %v1158_v47  ;;  %v1216_v16 = vmul.f32 1.442695, %v1159_v5  ;;  %1652 = vperm.xlu2 %2018, %v1420_v49   ;;  %1657 = vperm.xlu1 %2020, %v1421_v36   ;;  %v1111_v62 = vmax.f32 %v1109_v14, %v1110_v18  ;;  %v3669_v7 = vpop.f32.mrf.mxu1  ;;  %v3696_v47 = vpop.f32.mrf.mxu2 }
 0x290   :  { %2203 = vrcp.f32 %v3628_v2  ;;  %v3663_v27 = vadd.f32 %v1273_v32, %v1272_v54  ;;  %v1049_v50 = vrot.slane %v1048_v52, 2  ;;  %v1519_v51 = vmul.f32 %v3626_v44, %v3541_v0 }
 0x291   :  { %v1054_v63 = vsel %vm989_vm0, %v3390_v21, -inf  ;;  %v1336_v56 = vrot.slane %v1335_v40, 1  ;;  %2205 = vpow2.f32 %v1214_v37  ;;  %v1112_v60 = vrot.slane %v1111_v62, 2 }
 0x292   :  { %v1050_v12 = vmax.f32 %v1048_v52, %v1049_v50  ;;  %v1520_v1 = vsub.f32 1.0, %v1519_v51  ;;  %vm1524_vm3 = vweird.f32 %v3626_v44  ;;  %2207 = vpow2.f32 %v1216_v16 }
 0x293   :  { %v1113_v54 = vmax.f32 %v1111_v62, %v1112_v60  ;;  %v1527_v42 = vand.u32 2147483647, %v3541_v0  ;;  %v1529_v15 = vand.u32 2147483648, %v3541_v0  ;;  %2209 = vrcp.f32 %v3663_v27  ;;  %vm1525_vm5 = vmor %vm1523_vm2, %vm1524_vm3 }
 0x294   :  { %v3675_v39 = vpop.eup %2199  ;;  %v1051_v11 = vrot.slane %v1050_v12, 1  ;;  %v1521_v38 = vmul.f32 %v3626_v44, %v1520_v1  ;;  %v1053_v20 = vsel %vm989_vm0, %v3669_v7, -inf  ;;  %v3683_v9 = vadd.f32 %v1336_v56, %v1335_v40 }
 0x295   :  { %v3681_v23 = vpop.eup %2201  ;;  %v1275_v26 = vsel %vm989_vm0, %v3675_v39, 0.0  ;;  %v1114_v24 = vrot.slane %v1113_v54, 1  ;;  %vm3687_vm4 = vcmp.eq.f32.partialorder %v1527_v42, 8.507059e+37  ;;  %v1530_v18 = vor.u32 1.1754944e-38, %v1529_v15 }
 0x296   :  { %v3691_v31 = vpop.eup %2203  ;;  %v1276_v41 = vsel %vm989_vm0, %v3681_v23, 0.0  ;;  %v1052_v59 = vmax.f32 %v1050_v12, %v1051_v11  ;;  %v1522_v19 = vadd.f32 %v3626_v44, %v1521_v38  ;;  %v1055_v32 = vmax.f32 %v1053_v20, %v1054_v63 }
 0x297   :  { %v3698_v5 = vpop.eup %2205  ;;  %v1277_v49 = vadd.f32 %v1276_v41, %v1275_v26  ;;  %v1115_v36 = vmax.f32 %v1113_v54, %v1114_v24  ;;  %v1423_v40 = vmul.f32 %v3651_v57, %v3606_v3  ;;  %vm1427_vm6 = vweird.f32 %v3606_v3 }
 0x298   :  { %v1338_v52 = vsel %vm989_vm0, %v3698_v5, 0.0  ;;  %v1146_v37 = vsub.f32 %v3594_v55, %v1052_v59  ;;  %v1147_v16 = vsub.f32 %v3637_v53, %v1052_v59  ;;  %v1526_v62 = vsel %vm1525_vm5, %v3626_v44, %v1522_v19  ;;  %v3711_v50 = vpop.eup %2207 }
 0x299   :  { %v1278_v51 = vrot.slane %v1277_v49, 4  ;;  %v1160_v56 = vsub.f32 %v3596_v25, %v1115_v36  ;;  %v1161_v0 = vsub.f32 %v3639_v48, %v1115_v36  ;;  %v1531_v63 = vsel %vm3687_vm4, %v1530_v18, %v1526_v62  ;;  %v3717_v60 = vpop.eup %2209 }
 0x29a   :  { %v1339_v12 = vsel %vm989_vm0, %v3711_v50, 0.0  ;;  %v1190_v55 = vmul.f32 1.442695, %v1146_v37  ;;  %v1192_v1 = vmul.f32 1.442695, %v1147_v16  ;;  %v1533_v53 = vmul.f32 %v3491_v8, %v1531_v63 }
 0x29b   :  { %v1279_v44 = vadd.f32 %v1278_v51, %v1277_v49  ;;  %v1340_v54 = vadd.f32 %v1339_v12, %v1338_v52  ;;  %v1218_v42 = vmul.f32 1.442695, %v1160_v56  ;;  %v1220_v15 = vmul.f32 1.442695, %v1161_v0  ;;  %v3731_v49 = vpop.f32.mrf.mxu2 }
 0x29c   :  { %2211 = vpow2.f32 %v1190_v55  ;;  %1727 = vperm.xlu1 %2020, %v1533_v53   ;;  %v1532_v25 = vmul.f32 %v3486_v61, %v1531_v63  ;;  %v1056_v48 = vrot.slane %v1055_v32, 4  ;;  %v1424_v11 = vsub.f32 1.0, %v1423_v40 }
 0x29d   :  { %v1280_v38 = vrot.slane %v1279_v44, 2  ;;  %v1341_v20 = vrot.slane %v1340_v54, 4  ;;  %2213 = vpow2.f32 %v1192_v1  ;;  %vm1428_vm7 = vweird.f32 %v3651_v57 }
 0x29e   :  { %2215 = vpow2.f32 %v1218_v42  ;;  %1722 = vperm.xlu2 %2018, %v1532_v25   ;;  %v1057_v26 = vmax.f32 %v1055_v32, %v1056_v48  ;;  %v1425_v8 = vmul.f32 %v3651_v57, %v1424_v11  ;;  %v1431_v41 = vand.u32 2147483647, %v3606_v3  ;;  %vm1429_vm8 = vmor %vm1427_vm6, %vm1428_vm7 }
 0x29f   :  { %v1281_v24 = vadd.f32 %v1280_v38, %v1279_v44  ;;  %v1342_v14 = vadd.f32 %v1341_v20, %v1340_v54  ;;  %2217 = vpow2.f32 %v1220_v15  ;;  %v1433_v19 = vand.u32 2147483648, %v3606_v3 }
 0x2a0   :  { %v1058_v61 = vrot.slane %v1057_v26, 2  ;;  %v1426_v59 = vadd.f32 %v3651_v57, %v1425_v8  ;;  %v1535_v18 = vmul.f32 %v3691_v31, %v3628_v2  ;;  %2219 = vrcp.f32 %v3683_v9 }
 0x2a1   :  { %v1282_v36 = vrot.slane %v1281_v24, 1  ;;  %v1343_v32 = vrot.slane %v1342_v14, 2  ;;  %v1116_v40 = vsel %vm989_vm0, %v3696_v47, -inf  ;;  %v1434_v62 = vor.u32 1.1754944e-38, %v1433_v19 }
 0x2a2   :  { %v3738_v52 = vpop.eup %2211  ;;  %v1059_v37 = vmax.f32 %v1057_v26, %v1058_v61  ;;  %v1430_v16 = vsel %vm1429_vm8, %v3651_v57, %v1426_v59  ;;  %v1536_v51 = vsub.f32 1.0, %v1535_v18  ;;  %vm1432_vm9 = vcmp.eq.f32.partialorder %v1431_v41, 8.507059e+37 }
 0x2a3   :  { %v3741_v56 = vpop.eup %2213  ;;  %v3743_v0 = vadd.f32 %v1282_v36, %v1281_v24  ;;  %v1344_v63 = vadd.f32 %v1343_v32, %v1342_v14  ;;  %v1284_v12 = vsel %vm989_vm0, %v3738_v52, 0.0  ;;  %v1435_v53 = vsel %vm1432_vm9, %v1434_v62, %v1430_v16 }
 0x2a4   :  { %v3747_v55 = vpop.eup %2215  ;;  %v1285_v3 = vsel %vm989_vm0, %v3741_v56, 0.0  ;;  %v1060_v1 = vrot.slane %v1059_v37, 1  ;;  %v1537_v57 = vmul.f32 %v3691_v31, %v1536_v51  ;;  %vm1540_vm10 = vweird.f32 %v3691_v31 }
 0x2a5   :  { %v3752_v44 = vpop.eup %2217  ;;  %v1345_v54 = vrot.slane %v1344_v63, 1  ;;  %v1286_v42 = vadd.f32 %v1285_v3, %v1284_v12  ;;  %v1347_v15 = vsel %vm989_vm0, %v3747_v55, 0.0  ;;  %v1437_v11 = vmul.f32 %v3546_v35, %v1435_v53 }
 0x2a6   :  { %v1348_v25 = vsel %vm989_vm0, %v3752_v44, 0.0  ;;  %v1061_v48 = vmax.f32 %v1059_v37, %v1060_v1  ;;  %v1436_v38 = vmul.f32 %v3539_v13, %v1435_v53  ;;  %v3761_v20 = vpop.eup %2219  ;;  %v1538_v24 = vadd.f32 %v3691_v31, %v1537_v57  ;;  %v3779_v37 = vpop.f32.mrf.mxu2 }
 0x2a7   :  { %v1287_v26 = vrot.slane %v1286_v42, 4  ;;  %v1349_v8 = vadd.f32 %v1348_v25, %v1347_v15  ;;  %vm1539_vm11 = vweird.f32 %v3628_v2  ;;  %1667 = vperm.xlu1 %2020, %v1437_v11   ;;  %v1543_v13 = vand.u32 2147483647, %v3628_v2 }
 0x2a8   :  { %v1148_v14 = vsub.f32 %v3669_v7, %v1061_v48  ;;  %v1149_v41 = vsub.f32 %v3390_v21, %v1061_v48  ;;  %1662 = vperm.xlu2 %2018, %v1436_v38   ;;  %vm3767_vm12 = vmor %vm1539_vm11, %vm1540_vm10  ;;  %v1545_v35 = vand.u32 2147483648, %v3628_v2  ;;  %2221 = vrcp.f32 %v3743_v0 }
 0x2a9   :  { %v1288_v59 = vadd.f32 %v1287_v26, %v1286_v42  ;;  %v1350_v19 = vrot.slane %v1349_v8, 4  ;;  %v1542_v7 = vsel %vm3767_vm12, %v3691_v31, %v1538_v24  ;;  %v3777_v18 = vadd.f32 %v1345_v54, %v1344_v63 }
 0x2aa   :  { %v1194_v21 = vmul.f32 1.442695, %v1148_v14  ;;  %v1196_v36 = vmul.f32 1.442695, %v1149_v41  ;;  %v1546_v32 = vor.u32 1.1754944e-38, %v1545_v35  ;;  %vm1544_vm13 = vcmp.eq.f32.partialorder %v1543_v13, 8.507059e+37 }
 0x2ab   :  { %v1289_v16 = vrot.slane %v1288_v59, 2  ;;  %v1351_v62 = vadd.f32 %v1350_v19, %v1349_v8  ;;  %v1117_v2 = vsel %vm989_vm0, %v3731_v49, -inf  ;;  %v1439_v3 = vmul.f32 %v3717_v60, %v3663_v27 }
 0x2ac   :  { %2223 = vpow2.f32 %v1194_v21  ;;  %v1547_v51 = vsel %vm1544_vm13, %v1546_v32, %v1542_v7  ;;  %v1118_v12 = vmax.f32 %v1116_v40, %v1117_v2  ;;  %vm1444_vm14 = vweird.f32 %v3717_v60 }
 0x2ad   :  { %v1290_v31 = vadd.f32 %v1289_v16, %v1288_v59  ;;  %v1352_v63 = vrot.slane %v1351_v62, 2  ;;  %2225 = vpow2.f32 %v1196_v36  ;;  %v1548_v1 = vmul.f32 %v3551_v28, %v1547_v51 }
 0x2ae   :  { %2227 = vrcp.f32 %v3777_v18  ;;  %v1119_v53 = vrot.slane %v1118_v12, 4  ;;  %v1549_v57 = vmul.f32 %v3557_v29, %v1547_v51  ;;  %v1440_v54 = vsub.f32 1.0, %v1439_v3  ;;  %v3788_v42 = vpop.eup %2221  ;;  %v3819_v16 = vpop.f32.mrf.mxu2 }
 0x2af   :  { %v1291_v15 = vrot.slane %v1290_v31, 1  ;;  %v1353_v25 = vadd.f32 %v1352_v63, %v1351_v62  ;;  %1732 = vperm.xlu0 %2019, %v1548_v1   ;;  %v1447_v40 = vand.u32 2147483647, %v3663_v27  ;;  %v1449_v28 = vand.u32 2147483648, %v3663_v27 }
 0x2b0   :  { %v1120_v48 = vmax.f32 %v1118_v12, %v1119_v53  ;;  %1737 = vperm.xlu2 %2018, %v1549_v57   ;;  %v1441_v11 = vmul.f32 %v3717_v60, %v1440_v54  ;;  %v1551_v38 = vmul.f32 %v3761_v20, %v3683_v9  ;;  %v1125_v8 = vsel %vm989_vm0, %v3779_v37, -inf }
 0x2b1   :  { %v3796_v29 = vadd.f32 %v1291_v15, %v1290_v31  ;;  %v1354_v26 = vrot.slane %v1353_v25, 1  ;;  %vm1443_vm15 = vweird.f32 %v3663_v27  ;;  %vm1448_vm1 = vcmp.eq.f32.partialorder %v1447_v40, 8.507059e+37 }
 0x2b2   :  { %v3801_v24 = vpop.eup %2223  ;;  %v1121_v14 = vrot.slane %v1120_v48, 2  ;;  %v1442_v41 = vadd.f32 %v3717_v60, %v1441_v11  ;;  %v1552_v61 = vsub.f32 1.0, %v1551_v38  ;;  %vm1445_vm2 = vmor %vm1443_vm15, %vm1444_vm14  ;;  %v1450_v19 = vor.u32 1.1754944e-38, %v1449_v28 }
 0x2b3   :  { %v3804_v13 = vpop.eup %2225  ;;  %v3806_v35 = vadd.f32 %v1354_v26, %v1353_v25  ;;  %v1293_v59 = vsel %vm989_vm0, %v3801_v24, 0.0  ;;  %vm1556_vm3 = vweird.f32 %v3761_v20  ;;  %vm1555_vm4 = vweird.f32 %v3683_v9 }
 0x2b4   :  { %v3813_v27 = vpop.eup %2227  ;;  %v1294_v7 = vsel %vm989_vm0, %v3804_v13, 0.0  ;;  %v1122_v21 = vmax.f32 %v1120_v48, %v1121_v14  ;;  %v1446_v36 = vsel %vm1445_vm2, %v3717_v60, %v1442_v41  ;;  %v1553_v32 = vmul.f32 %v3761_v20, %v1552_v61  ;;  %vm3829_vm5 = vmor %vm1555_vm4, %vm1556_vm3 }
 0x2b5   :  { %v1295_v62 = vadd.f32 %v1294_v7, %v1293_v59  ;;  %v1451_v2 = vsel %vm1448_vm1, %v1450_v19, %v1446_v36  ;;  %v1559_v51 = vand.u32 2147483647, %v3683_v9  ;;  %2229 = vrcp.f32 %v3796_v29 }
 0x2b6   :  { %v1123_v12 = vrot.slane %v1122_v21, 1  ;;  %v1453_v3 = vmul.f32 %v3611_v30, %v1451_v2  ;;  %v1452_v31 = vmul.f32 %v3604_v43, %v1451_v2  ;;  %v1554_v63 = vadd.f32 %v3761_v20, %v1553_v32 }
 0x2b7   :  { %v1296_v60 = vrot.slane %v1295_v62, 4  ;;  %v1561_v53 = vand.u32 2147483648, %v3683_v9  ;;  %v1126_v57 = vsel %vm989_vm0, %v3819_v16, -inf  ;;  %2231 = vrcp.f32 %v3806_v35 }
 0x2b8   :  { %v1124_v30 = vmax.f32 %v1122_v21, %v1123_v12  ;;  %1677 = vperm.xlu2 %2018, %v1453_v3   ;;  %1672 = vperm.xlu0 %2019, %v1452_v31   ;;  %v1558_v43 = vsel %vm3829_vm5, %v3761_v20, %v1554_v63  ;;  %v1127_v54 = vmax.f32 %v1125_v8, %v1126_v57  ;;  %vm1560_vm6 = vcmp.eq.f32.partialorder %v1559_v51, 8.507059e+37 }
 0x2b9   :  { %v1297_v15 = vadd.f32 %v1296_v60, %v1295_v62  ;;  %v1562_v25 = vor.u32 1.1754944e-38, %v1561_v53  ;;  %v1455_v40 = vmul.f32 %v3788_v42, %v3743_v0  ;;  %v1463_v28 = vand.u32 2147483647, %v3743_v0 }
 0x2ba   :  { %v1162_v9 = vsub.f32 %v3696_v47, %v1124_v30  ;;  %v1163_v48 = vsub.f32 %v3731_v49, %v1124_v30  ;;  %v1128_v11 = vrot.slane %v1127_v54, 4  ;;  %v1465_v41 = vand.u32 2147483648, %v3743_v0 }
 0x2bb   :  { %v1298_v38 = vrot.slane %v1297_v15, 2  ;;  %v1563_v26 = vsel %vm1560_vm6, %v1562_v25, %v1558_v43  ;;  %v1456_v14 = vsub.f32 1.0, %v1455_v40  ;;  %v3847_v19 = vpop.eup %2229  ;;  %vm1459_vm7 = vweird.f32 %v3743_v0 }
 0x2bc   :  { %v1222_v20 = vmul.f32 1.442695, %v1162_v9  ;;  %v1224_v8 = vmul.f32 1.442695, %v1163_v48  ;;  %v1564_v61 = vmul.f32 %v3615_v45, %v1563_v26  ;;  %v1129_v59 = vmax.f32 %v1127_v54, %v1128_v11 }
 0x2bd   :  { %v1299_v7 = vadd.f32 %v1298_v38, %v1297_v15  ;;  %v1457_v47 = vmul.f32 %v3788_v42, %v1456_v14  ;;  %vm1460_vm8 = vweird.f32 %v3788_v42  ;;  %v3852_v49 = vpop.eup %2231  ;;  %v1565_v36 = vmul.f32 %v3622_v34, %v1563_v26 }
 0x2be   :  { %2233 = vpow2.f32 %v1222_v20  ;;  %1742 = vperm.xlu1 %2020, %v1564_v61   ;;  %v1130_v21 = vrot.slane %v1129_v59, 2  ;;  %v1567_v45 = vmul.f32 %v3813_v27, %v3777_v18  ;;  %vm1464_vm9 = vcmp.eq.f32.partialorder %v1463_v28, 8.507059e+37  ;;  %vm1461_vm10 = vmor %vm1459_vm7, %vm1460_vm8 }
 0x2bf   :  { %v1300_v32 = vrot.slane %v1299_v7, 1  ;;  %2235 = vpow2.f32 %v1224_v8  ;;  %v1458_v62 = vadd.f32 %v3788_v42, %v1457_v47  ;;  %v1466_v0 = vor.u32 1.1754944e-38, %v1465_v41 }
 0x2c0   :  { %v1131_v2 = vmax.f32 %v1129_v59, %v1130_v21  ;;  %1747 = vperm.xlu0 %2019, %v1565_v36   ;;  %v1568_v51 = vsub.f32 1.0, %v1567_v45  ;;  %v1575_v12 = vand.u32 2147483647, %v3777_v18  ;;  %v1577_v34 = vand.u32 2147483648, %v3777_v18 }
 0x2c1   :  { %v3859_v3 = vadd.f32 %v1300_v32, %v1299_v7  ;;  %v1462_v31 = vsel %vm1461_vm10, %v3788_v42, %v1458_v62  ;;  %v1471_v63 = vmul.f32 %v3847_v19, %v3796_v29  ;;  %vm1572_vm11 = vweird.f32 %v3813_v27 }
 0x2c2   :  { %v1132_v60 = vrot.slane %v1131_v2, 1  ;;  %v1467_v1 = vsel %vm1464_vm9, %v1466_v0, %v1462_v31  ;;  %v1569_v53 = vmul.f32 %v3813_v27, %v1568_v51  ;;  %vm1571_vm12 = vweird.f32 %v3777_v18 }
 0x2c3   :  { %2237 = vrcp.f32 %v3859_v3  ;;  %v1468_v57 = vmul.f32 %v3675_v39, %v1467_v1  ;;  %v1469_v43 = vmul.f32 %v3681_v23, %v1467_v1  ;;  %v1472_v15 = vsub.f32 1.0, %v1471_v63  ;;  %vm1573_vm13 = vmor %vm1571_vm12, %vm1572_vm11 }
 0x2c4   :  { %v3870_v30 = vpop.eup %2233  ;;  %v1133_v42 = vmax.f32 %v1131_v2, %v1132_v60  ;;  %v1570_v54 = vadd.f32 %v3813_v27, %v1569_v53  ;;  %vm1576_vm14 = vcmp.eq.f32.partialorder %v1575_v12, 8.507059e+37  ;;  %v1578_v9 = vor.u32 1.1754944e-38, %v1577_v34 }
 0x2c5   :  { %v3874_v25 = vpop.eup %2235  ;;  %v1356_v40 = vsel %vm989_vm0, %v3870_v30, 0.0  ;;  %v1479_v39 = vand.u32 2147483647, %v3796_v29  ;;  %v1473_v26 = vmul.f32 %v3847_v19, %v1472_v15  ;;  %vm1476_vm15 = vweird.f32 %v3847_v19 }
 0x2c6   :  { %v1357_v18 = vsel %vm989_vm0, %v3874_v25, 0.0  ;;  %v1164_v48 = vsub.f32 %v3779_v37, %v1133_v42  ;;  %v1165_v23 = vsub.f32 %v3819_v16, %v1133_v42  ;;  %1682 = vperm.xlu1 %2020, %v1468_v57   ;;  %v1574_v11 = vsel %vm1573_vm13, %v3813_v27, %v1570_v54 }
 0x2c7   :  { %v1358_v28 = vadd.f32 %v1357_v18, %v1356_v40  ;;  %v1579_v38 = vsel %vm1576_vm14, %v1578_v9, %v1574_v11  ;;  %vm1475_vm1 = vweird.f32 %v3796_v29  ;;  %v1474_v16 = vadd.f32 %v3847_v19, %v1473_v26  ;;  %v1633_v26 = vpop.permute.xlu2 %1632 }
 0x2c8   :  { %v1226_v14 = vmul.f32 1.442695, %v1164_v48  ;;  %v1228_v41 = vmul.f32 1.442695, %v1165_v23  ;;  %1687 = vperm.xlu0 %2019, %v1469_v43   ;;  %v1580_v20 = vmul.f32 %v3698_v5, %v1579_v38  ;;  %v1481_v61 = vand.u32 2147483648, %v3796_v29  ;;  %vm1477_vm2 = vmor %vm1475_vm1, %vm1476_vm15 }
 0x2c9   :  { %v2238_v8 = vpop.eup %2237  ;;  %v1359_v37 = vrot.slane %v1358_v28, 4  ;;  %v1583_v27 = vmul.f32 %v3852_v49, %v3806_v35  ;;  %vm1480_vm3 = vcmp.eq.f32.partialorder %v1479_v39, 8.507059e+37  ;;  %v1591_v59 = vand.u32 2147483647, %v3806_v35 }
 0x2ca   :  { %2239 = vpow2.f32 %v1226_v14  ;;  %1752 = vperm.xlu2 %2018, %v1580_v20   ;;  %v1478_v5 = vsel %vm1477_vm2, %v3847_v19, %v1474_v16  ;;  %v1482_v47 = vor.u32 1.1754944e-38, %v1481_v61  ;;  %v1581_v21 = vmul.f32 %v3711_v50, %v1579_v38 }
 0x2cb   :  { %v1360_v7 = vadd.f32 %v1359_v37, %v1358_v28  ;;  %2241 = vpow2.f32 %v1228_v41  ;;  %v1584_v36 = vsub.f32 1.0, %v1583_v27  ;;  %v1593_v45 = vand.u32 2147483648, %v3806_v35 }
 0x2cc   :  { %v1487_v29 = vmul.f32 %v2238_v8, %v3859_v3  ;;  %v1483_v62 = vsel %vm1480_vm3, %v1482_v47, %v1478_v5  ;;  %vm1588_vm4 = vweird.f32 %v3852_v49  ;;  %vm1587_vm5 = vweird.f32 %v3806_v35 }
 0x2cd   :  { %v1361_v32 = vrot.slane %v1360_v7, 2  ;;  %v1484_v2 = vmul.f32 %v3738_v52, %v1483_v62  ;;  %v1585_v0 = vmul.f32 %v3852_v49, %v1584_v36  ;;  %vm3901_vm6 = vcmp.eq.f32.partialorder %v1591_v59, 8.507059e+37  ;;  %vm1589_vm9 = vmor %vm1587_vm5, %vm1588_vm4 }
 0x2ce   :  { %1757 = vperm.xlu1 %2020, %v1581_v21   ;;  %v1488_v50 = vsub.f32 1.0, %v1487_v29  ;;  %v1594_v34 = vor.u32 1.1754944e-38, %v1593_v45  ;;  %vm1491_vm7 = vweird.f32 %v3859_v3  ;;  %vm1492_vm8 = vweird.f32 %v2238_v8 }
 0x2cf   :  { %v1362_v51 = vadd.f32 %v1361_v32, %v1360_v7  ;;  %v1586_v31 = vadd.f32 %v3852_v49, %v1585_v0  ;;  %v1497_v1 = vand.u32 2147483648, %v3859_v3  ;;  %v1485_v57 = vmul.f32 %v3741_v56, %v1483_v62  ;;  %vm1493_vm10 = vmor %vm1491_vm7, %vm1492_vm8 }
 0x2d0   :  { %v3905_v12 = vpop.eup %2239  ;;  %v1489_v35 = vmul.f32 %v2238_v8, %v1488_v50  ;;  %v1495_v43 = vand.u32 2147483647, %v3859_v3  ;;  %v1790_v37 = vmul.f32 %v1633_v26, %v2557_v46  ;;  %v1648_v36 = vpop.permute.xlu2 %1647  ;;  %vm1950_vm4 = vcmask 1041409  }
 0x2d1   :  { %v3909_v52 = vpop.eup %2241  ;;  %v1363_v63 = vrot.slane %v1362_v51, 1  ;;  %v1365_v60 = vsel %vm989_vm0, %v3905_v12, 0.0  ;;  %v1590_v42 = vsel %vm1589_vm9, %v3852_v49, %v1586_v31  ;;  %v1498_v48 = vor.u32 1.1754944e-38, %v1497_v1 }
 0x2d2   :  { %v1366_v53 = vsel %vm989_vm0, %v3909_v52, 0.0  ;;  %1692 = vperm.xlu2 %2018, %v1484_v2   ;;  %v1595_v40 = vsel %vm3901_vm6, %v1594_v34, %v1590_v42  ;;  %v1490_v9 = vadd.f32 %v2238_v8, %v1489_v35  ;;  %vm1496_vm0 = vcmp.eq.f32.partialorder %v1495_v43, 8.507059e+37 }
 0x2d3   :  { %v1364_v54 = vadd.f32 %v1363_v63, %v1362_v51  ;;  %v1367_v15 = vadd.f32 %v1366_v53, %v1365_v60  ;;  %v1596_v39 = vmul.f32 %v3747_v55, %v1595_v40  ;;  %v1597_v11 = vmul.f32 %v3752_v44, %v1595_v40 }
 0x2d4   :  { %v1494_v56 = vsel %vm1493_vm10, %v2238_v8, %v1490_v9  ;;  %v1793_v0 = vmul.f32 %v1648_v36, %v2707_v10  ;;  %vm1952_vm5 = vcmask 1042434   ;;  %vm1954_vm6 = vcmask 1043459  }
 0x2d5   :  { %2243 = vrcp.f32 %v1364_v54  ;;  %v1368_v18 = vrot.slane %v1367_v15, 4  ;;  %1762 = vperm.xlu0 %2019, %v1596_v39   ;;  %v1499_v23 = vsel %vm1496_vm0, %v1498_v48, %v1494_v56  ;;  %v1609_v27 = vand.u32 2147483648, %v1364_v54 }
 0x2d6   :  { %1697 = vperm.xlu1 %2020, %v1485_v57   ;;  %v1500_v55 = vmul.f32 %v3801_v24, %v1499_v23  ;;  %v1501_v44 = vmul.f32 %v3804_v13, %v1499_v23  ;;  %v1607_v5 = vand.u32 2147483647, %v1364_v54  ;;  %vm1603_vm12 = vweird.f32 %v1364_v54 }
 0x2d7   :  { %v1369_v49 = vadd.f32 %v1368_v18, %v1367_v15  ;;  %vm1956_vm7 = vcmask 1044484   ;;  %vm1958_vm8 = vcmask 1045509   ;;  %vm1960_vm9 = vcmask 1046534  }
 0x2d8   :  { %v1638_v28 = vpop.permute.xlu0 %1637  ;;  %vm1608_vm14 = vcmp.eq.f32.partialorder %v1607_v5, 8.507059e+37  ;;  %vm1962_vm10 = vcmask 1047559  }
 0x2d9   :  { %v1370_v38 = vrot.slane %v1369_v49, 2  ;;  %v1791_v41 = vmul.f32 %v1638_v28, %v2608_v6  ;;  %v1610_v6 = vor.u32 1.1754944e-38, %v1609_v27 }
 0x2da   :  { %1767 = vperm.xlu2 %2018, %v1597_v11  }
 0x2db   :  { %v2244_v14 = vpop.eup %2243  ;;  %v1371_v3 = vadd.f32 %v1370_v38, %v1369_v49  ;;  %v1822_v59 = vadd.f32 %v1791_v41, %v1790_v37 }
 0x2dc   :  { %v1599_v20 = vmul.f32 %v2244_v14, %v1364_v54  ;;  %vm1604_vm11 = vweird.f32 %v2244_v14 }
 0x2dd   :  { %v1372_v8 = vrot.slane %v1371_v3, 1  ;;  %1702 = vperm.xlu0 %2019, %v1500_v55   ;;  %vm1605_vm13 = vmor %vm1603_vm12, %vm1604_vm11  ;;  %v1823_v47 = vrot.slane %v1822_v59, 4 }
 0x2de   :  { %v1600_v16 = vsub.f32 1.0, %v1599_v20 }
 0x2df   :  { %v1373_v61 = vadd.f32 %v1372_v8, %v1371_v3  ;;  %v1824_v13 = vadd.f32 %v1823_v47, %v1822_v59 }
 0x2e0   :  { %v1601_v7 = vmul.f32 %v2244_v14, %v1600_v16 }
 0x2e1   :  { %2245 = vrcp.f32 %v1373_v61  ;;  %v1825_v50 = vrot.slane %v1824_v13, 2  ;;  %v1625_v31 = vand.u32 2147483648, %v1373_v61  ;;  %v1623_v60 = vand.u32 2147483647, %v1373_v61 }
 0x2e2   :  { %1707 = vperm.xlu2 %2018, %v1501_v44   ;;  %v1602_v24 = vadd.f32 %v2244_v14, %v1601_v7  ;;  %vm1619_vm1 = vweird.f32 %v1373_v61 }
 0x2e3   :  { %v1626_v1 = vor.u32 1.1754944e-38, %v1625_v31  ;;  %vm1624_vm3 = vcmp.eq.f32.partialorder %v1623_v60, 8.507059e+37  ;;  %v4107_v31 = vld [vmem:[#allocation14_spill] sm:$0xff] }
 0x2e4   :  { %v1606_v21 = vsel %vm1605_vm13, %v2244_v14, %v1602_v24 }
 0x2e5   :  { %v1611_v46 = vsel %vm1608_vm14, %v1610_v6, %v1606_v21 }
 0x2e6   :  { %v1613_v45 = vmul.f32 %v3874_v25, %v1611_v46  ;;  %v1612_v29 = vmul.f32 %v3870_v30, %v1611_v46  ;;  %v1826_v30 = vadd.f32 %v1825_v50, %v1824_v13 }
 0x2e7   :  { %v2246_v32 = vpop.eup %2245 }
 0x2e8   :  { %1777 = vperm.xlu0 %2019, %v1613_v45   ;;  %1772 = vperm.xlu1 %2020, %v1612_v29   ;;  %v1615_v62 = vmul.f32 %v2246_v32, %v1373_v61  ;;  %v1643_v2 = vpop.permute.xlu1 %1642  ;;  %vm1620_vm15 = vweird.f32 %v2246_v32  ;;  %v1827_v15 = vrot.slane %v1826_v30, 1  ;;  %v4104_v29 = vld [vmem:[#allocation12_spill] sm:$0xff] }
 0x2e9   :  { %v1792_v51 = vmul.f32 %v1643_v2, %v2650_v17  ;;  %vm1621_vm2 = vmor %vm1619_vm1, %vm1620_vm15 }
 0x2ea   :  { %v1616_v19 = vsub.f32 1.0, %v1615_v62  ;;  %v1828_v49 = vadd.f32 %v1827_v15, %v1826_v30  ;;  %v4105_v62 = vld [vmem:[#allocation10_spill] sm:$0xff] }
 0x2eb   :  { %v1829_v34 = vadd.f32 %v1793_v0, %v1792_v51  ;;  %v4106_v0 = vld [vmem:[#allocation16_spill] sm:$0xff]  ;;  %v4110_v30 = vld [vmem:[#allocation22_spill] sm:$0xff] }
 0x2ec   :  { %v1617_v63 = vmul.f32 %v2246_v32, %v1616_v19 }
 0x2ed   :  { %v1830_v25 = vrot.slane %v1829_v34, 4 }
 0x2ee   :  { %v1618_v35 = vadd.f32 %v2246_v32, %v1617_v63  ;;  %v4108_v63 = vld [vmem:[#allocation18_spill] sm:$0xff] }
 0x2ef   :  { %v1831_v53 = vadd.f32 %v1830_v25, %v1829_v34  ;;  %v4109_v25 = vld [vmem:[#allocation24_spill] sm:$0xff] }
 0x2f0   :  { %v1622_v57 = vsel %vm1621_vm2, %v2246_v32, %v1618_v35 }
 0x2f1   :  { %v1627_v42 = vsel %vm1624_vm3, %v1626_v1, %v1622_v57  ;;  %v1832_v10 = vrot.slane %v1831_v53, 2 }
 0x2f2   :  { %v1629_v17 = vmul.f32 %v3909_v52, %v1627_v42  ;;  %v1628_v43 = vmul.f32 %v3905_v12, %v1627_v42  ;;  %v1718_v54 = vpop.permute.xlu0 %1717  ;;  %v1653_v52 = vpop.permute.xlu2 %1652 }
 0x2f3   :  { %v1833_v40 = vadd.f32 %v1832_v10, %v1831_v53  ;;  %v1713_v9 = vpop.permute.xlu1 %1712  ;;  %v1807_v39 = vmul.f32 %v1718_v54, %v2552_v58  ;;  %v1794_v2 = vmul.f32 %v1653_v52, %v4105_v62  ;;  %v4111_v53 = vld [vmem:[#allocation20_spill] sm:$0xff]  ;;  %v4112_v52 = vld [vmem:[#allocation26_spill] sm:$0xff]  ;;  %v4118_v62 = vld [vmem:[#allocation9_spill] sm:$0xff] }
 0x2f4   :  { %1787 = vperm.xlu1 %2020, %v1629_v17   ;;  %1782 = vperm.xlu2 %2018, %v1628_v43   ;;  %v1806_v18 = vmul.f32 %v1713_v9, %v3170_v4 }
 0x2f5   :  { %v1834_v56 = vrot.slane %v1833_v40, 1 }
 0x2f6   :  { %v1878_v48 = vadd.f32 %v1807_v39, %v1806_v18 }
 0x2f7   :  { %v1835_v23 = vadd.f32 %v1834_v56, %v1833_v40 }
 0x2f8   :  { %v1879_v28 = vrot.slane %v1878_v48, 4 }
 0x2f9   :  { %v3939_v11 = vsel %vm1950_vm4, %v1835_v23, %v1828_v49 }
 0x2fa   :  { %v1723_v38 = vpop.permute.xlu2 %1722  ;;  %v1880_v26 = vadd.f32 %v1879_v28, %v1878_v48  ;;  %v4113_v28 = vld [vmem:[#allocation28_spill] sm:$0xff] }
 0x2fb   :  { %v1808_v14 = vmul.f32 %v1723_v38, %v2597_v33 }
 0x2fc   :  { %v1881_v3 = vrot.slane %v1880_v26, 2 }
 0x2fe   :  { %v1882_v20 = vadd.f32 %v1881_v3, %v1880_v26 }
 0x300   :  { %v1883_v61 = vrot.slane %v1882_v20, 1 }
 0x301   :  { %v1658_v12 = vpop.permute.xlu1 %1657 }
 0x302   :  { %v1663_v37 = vpop.permute.xlu2 %1662  ;;  %v1884_v44 = vadd.f32 %v1883_v61, %v1882_v20  ;;  %v1795_v32 = vmul.f32 %v1658_v12, %v4104_v29 }
 0x303   :  { %v1796_v34 = vmul.f32 %v1663_v37, %v4107_v31 }
 0x304   :  { %v1836_v50 = vadd.f32 %v1795_v32, %v1794_v2  ;;  %v4117_v32 = vld [vmem:[#allocation13_spill] sm:$0xff] }
 0x306   :  { %v1837_v17 = vrot.slane %v1836_v50, 4 }
 0x308   :  { %v1838_v9 = vadd.f32 %v1837_v17, %v1836_v50  ;;  %v4119_v50 = vld [vmem:[#allocation11_spill] sm:$0xff]  ;;  %v4123_v17 = vld [vmem:[#allocation21_spill] sm:$0xff] }
 0x30a   :  { %v1738_v24 = vpop.permute.xlu2 %1737  ;;  %v1839_v23 = vrot.slane %v1838_v9, 2 }
 0x30b   :  { %v1811_v2 = vmul.f32 %v1738_v24, %v4118_v62 }
 0x30c   :  { %v1840_v3 = vadd.f32 %v1839_v23, %v1838_v9 }
 0x30e   :  { %v1728_v55 = vpop.permute.xlu1 %1727 }
 0x30f   :  { %v1809_v58 = vmul.f32 %v1728_v55, %v2653_v22 }
 0x311   :  { %v1885_v4 = vadd.f32 %v1809_v58, %v1808_v14 }
 0x312   :  { %v1678_v47 = vpop.permute.xlu2 %1677 }
 0x313   :  { %v1886_v41 = vrot.slane %v1885_v4, 4  ;;  %v1799_v57 = vmul.f32 %v1678_v47, %v4111_v53 }
 0x315   :  { %v1887_v8 = vadd.f32 %v1886_v41, %v1885_v4 }
 0x317   :  { %v1888_v16 = vrot.slane %v1887_v8, 2 }
 0x319   :  { %v1889_v27 = vadd.f32 %v1888_v16, %v1887_v8  ;;  %v1668_v33 = vpop.permute.xlu1 %1667 }
 0x31a   :  { %v1797_v51 = vmul.f32 %v1668_v33, %v4106_v0  ;;  %v4115_v33 = vld [vmem:[#allocation30_spill] sm:$0xff] }
 0x31b   :  { %v1890_v59 = vrot.slane %v1889_v27, 1 }
 0x31c   :  { %v1843_v42 = vadd.f32 %v1797_v51, %v1796_v34  ;;  %v4120_v34 = vld [vmem:[#allocation17_spill] sm:$0xff] }
 0x31d   :  { %v1891_v7 = vadd.f32 %v1890_v59, %v1889_v27  ;;  %v1841_v27 = vrot.slane %v1840_v3, 1  ;;  %v4114_v59 = vld [vmem:[#allocation31_spill] sm:$0xff] }
 0x31e   :  { %v1844_v15 = vrot.slane %v1843_v42, 4 }
 0x31f   :  { %v3944_v5 = vsel %vm1950_vm4, %v1891_v7, %v1884_v44 }
 0x320   :  { %v1845_v56 = vadd.f32 %v1844_v15, %v1843_v42 }
 0x321   :  { %v1733_v6 = vpop.permute.xlu0 %1732 }
 0x322   :  { %v1846_v58 = vrot.slane %v1845_v56, 2 }
 0x324   :  { %v1753_v46 = vpop.permute.xlu2 %1752  ;;  %v1847_v16 = vadd.f32 %v1846_v58, %v1845_v56 }
 0x32a   :  { %v1673_v22 = vpop.permute.xlu0 %1672 }
 0x32b   :  { %v1798_v60 = vmul.f32 %v1673_v22, %v4108_v63  ;;  %v4116_v22 = vld [vmem:[#allocation8_spill] sm:$0xff] }
 0x32c   :  { %v1693_v13 = vpop.permute.xlu2 %1692 }
 0x32d   :  { %v1850_v43 = vadd.f32 %v1799_v57, %v1798_v60  ;;  %v1802_v12 = vmul.f32 %v1693_v13, %v4112_v52 }
 0x32f   :  { %v1851_v39 = vrot.slane %v1850_v43, 4 }
 0x330   :  { %v1743_v21 = vpop.permute.xlu1 %1742 }
 0x331   :  { %v1852_v26 = vadd.f32 %v1851_v39, %v1850_v43  ;;  %v1812_v31 = vmul.f32 %v1743_v21, %v4119_v50  ;;  %v4127_v50 = vld [vmem:[#allocation29_spill] sm:$0xff] }
 0x332   :  { %v1748_v36 = vpop.permute.xlu0 %1747 }
 0x333   :  { %v1853_v41 = vrot.slane %v1852_v26, 2  ;;  %v1813_v13 = vmul.f32 %v1748_v36, %v4117_v32 }
 0x334   :  { %v1768_v40 = vpop.permute.xlu2 %1767 }
 0x335   :  { %v1854_v29 = vadd.f32 %v1853_v41, %v1852_v26  ;;  %v1899_v36 = vadd.f32 %v1813_v13, %v1812_v31  ;;  %v1817_v24 = vmul.f32 %v1768_v40, %v4123_v17  ;;  %v4124_v40 = vld [vmem:[#allocation25_spill] sm:$0xff] }
 0x337   :  { %v1855_v42 = vrot.slane %v1854_v29, 1 }
 0x338   :  { %v1683_v45 = vpop.permute.xlu1 %1682 }
 0x339   :  { %v1800_v1 = vmul.f32 %v1683_v45, %v4110_v30  ;;  %v1810_v45 = vmul.f32 %v1733_v6, %v4116_v22  ;;  %v4122_v6 = vld [vmem:[#allocation15_spill] sm:$0xff] }
 0x33a   :  { %v1688_v19 = vpop.permute.xlu0 %1687  ;;  %v1814_v57 = vmul.f32 %v1753_v46, %v4122_v6 }
 0x33b   :  { %v1801_v35 = vmul.f32 %v1688_v19, %v4109_v25  ;;  %v1848_v19 = vrot.slane %v1847_v16, 1  ;;  %v1842_v25 = vadd.f32 %v1841_v27, %v1840_v3  ;;  %v1892_v53 = vadd.f32 %v1811_v2, %v1810_v45 }
 0x33c   :  { %v1708_v20 = vpop.permute.xlu2 %1707 }
 0x33d   :  { %v1857_v54 = vadd.f32 %v1801_v35, %v1800_v1  ;;  %v1805_v44 = vmul.f32 %v1708_v20, %v4114_v59  ;;  %v4121_v35 = vld [vmem:[#allocation19_spill] sm:$0xff]  ;;  %v1849_v15 = vadd.f32 %v1848_v19, %v1847_v16  ;;  %v1893_v56 = vrot.slane %v1892_v53, 4 }
 0x33f   :  { %v1858_v18 = vrot.slane %v1857_v54, 4  ;;  %v1894_v41 = vadd.f32 %v1893_v56, %v1892_v53 }
 0x340   :  { %v1758_v10 = vpop.permute.xlu1 %1757 }
 0x341   :  { %v1859_v55 = vadd.f32 %v1858_v18, %v1857_v54  ;;  %v1815_v63 = vmul.f32 %v1758_v10, %v4120_v34  ;;  %v1953_v10 = vsel %vm1952_vm5, %v1842_v25, %v3939_v11 }
 0x343   :  { %v1860_v8 = vrot.slane %v1859_v55, 2  ;;  %v1906_v9 = vadd.f32 %v1815_v63, %v1814_v57 }
 0x345   :  { %v1861_v0 = vadd.f32 %v1860_v8, %v1859_v55  ;;  %v1955_v55 = vsel %vm1954_vm6, %v1849_v15, %v1953_v10 }
 0x347   :  { %v1763_v48 = vpop.permute.xlu0 %1762  ;;  %v1862_v43 = vrot.slane %v1861_v0, 1 }
 0x348   :  { %v1698_v49 = vpop.permute.xlu1 %1697  ;;  %v1816_v30 = vmul.f32 %v1763_v48, %v4121_v35  ;;  %v1856_v48 = vadd.f32 %v1855_v42, %v1854_v29 }
 0x349   :  { %v1803_v38 = vmul.f32 %v1698_v49, %v4113_v28  ;;  %v1900_v49 = vrot.slane %v1899_v36, 4  ;;  %v1863_v52 = vadd.f32 %v1862_v43, %v1861_v0 }
 0x34a   :  { %v1913_v39 = vadd.f32 %v1817_v24, %v1816_v30  ;;  %v1957_v20 = vsel %vm1956_vm7, %v1856_v48, %v1955_v55 }
 0x34b   :  { %v1864_v14 = vadd.f32 %v1803_v38, %v1802_v12  ;;  %v4125_v38 = vld [vmem:[#allocation23_spill] sm:$0xff]  ;;  %v1901_v8 = vadd.f32 %v1900_v49, %v1899_v36 }
 0x34c   :  { %v1914_v58 = vrot.slane %v1913_v39, 4 }
 0x34d   :  { %v1865_v4 = vrot.slane %v1864_v14, 4  ;;  %v1902_v22 = vrot.slane %v1901_v8, 2 }
 0x34e   :  { %v1783_v29 = vpop.permute.xlu2 %1782 }
 0x34f   :  { %v1866_v37 = vadd.f32 %v1865_v4, %v1864_v14  ;;  %v1703_v61 = vpop.permute.xlu0 %1702  ;;  %v1907_v14 = vrot.slane %v1906_v9, 4  ;;  %v1903_v0 = vadd.f32 %v1902_v22, %v1901_v8 }
 0x350   :  { %v1804_v47 = vmul.f32 %v1703_v61, %v4115_v33  ;;  %v1895_v33 = vrot.slane %v1894_v41, 2 }
 0x351   :  { %v1867_v7 = vrot.slane %v1866_v37, 2  ;;  %v1908_v27 = vadd.f32 %v1907_v14, %v1906_v9  ;;  %v1904_v30 = vrot.slane %v1903_v0, 1 }
 0x352   :  { %v1871_v51 = vadd.f32 %v1805_v44, %v1804_v47  ;;  %v1915_v44 = vadd.f32 %v1914_v58, %v1913_v39  ;;  %v1896_v13 = vadd.f32 %v1895_v33, %v1894_v41 }
 0x353   :  { %v1868_v60 = vadd.f32 %v1867_v7, %v1866_v37  ;;  %v1959_v37 = vsel %vm1958_vm8, %v1863_v52, %v1957_v20  ;;  %v1909_v45 = vrot.slane %v1908_v27, 2  ;;  %v1905_v17 = vadd.f32 %v1904_v30, %v1903_v0 }
 0x354   :  { %v1872_v1 = vrot.slane %v1871_v51, 4  ;;  %v1916_v32 = vrot.slane %v1915_v44, 2  ;;  %v1897_v25 = vrot.slane %v1896_v13, 1 }
 0x355   :  { %v1869_v21 = vrot.slane %v1868_v60, 1  ;;  %v1910_v34 = vadd.f32 %v1909_v45, %v1908_v27 }
 0x356   :  { %v1873_v54 = vadd.f32 %v1872_v1, %v1871_v51  ;;  %v4126_v51 = vld [vmem:[#allocation27_spill] sm:$0xff]  ;;  %v1917_v63 = vadd.f32 %v1916_v32, %v1915_v44  ;;  %v1898_v42 = vadd.f32 %v1897_v25, %v1896_v13 }
 0x357   :  { %v1870_v11 = vadd.f32 %v1869_v21, %v1868_v60  ;;  %v1820_v19 = vmul.f32 %v1783_v29, %v4126_v51  ;;  %v1911_v53 = vrot.slane %v1910_v34, 1 }
 0x358   :  { %v1874_v18 = vrot.slane %v1873_v54, 2  ;;  %v1918_v6 = vrot.slane %v1917_v63, 1  ;;  %v1965_v9 = vsel %vm1952_vm5, %v1898_v42, %v3944_v5 }
 0x359   :  { %v1961_v59 = vsel %vm1960_vm9, %v1870_v11, %v1959_v37  ;;  %v1912_v43 = vadd.f32 %v1911_v53, %v1910_v34  ;;  %v1966_v10 = vsel %vm1954_vm6, %v1905_v17, %v1965_v9 }
 0x35a   :  { %v1778_v46 = vpop.permute.xlu0 %1777  ;;  %v1773_v23 = vpop.permute.xlu1 %1772  ;;  %v1875_v12 = vadd.f32 %v1874_v18, %v1873_v54  ;;  %v1919_v54 = vadd.f32 %v1918_v6, %v1917_v63 }
 0x35b   :  { %v1819_v28 = vmul.f32 %v1778_v46, %v4124_v40  ;;  %v1818_v26 = vmul.f32 %v1773_v23, %v4125_v38  ;;  %v1967_v18 = vsel %vm1956_vm7, %v1912_v43, %v1966_v10 }
 0x35c   :  { %v1876_v3 = vrot.slane %v1875_v12, 1  ;;  %v1968_v56 = vsel %vm1958_vm8, %v1919_v54, %v1967_v18 }
 0x35d   :  { %v1920_v4 = vadd.f32 %v1819_v28, %v1818_v26 }
 0x35e   :  { %v1877_v16 = vadd.f32 %v1876_v3, %v1875_v12 }
 0x35f   :  { %v1921_v61 = vrot.slane %v1920_v4, 4 }
 0x360   :  { %v1963_v7 = vsel %vm1962_vm10, %v1877_v16, %v1961_v59 }
 0x361   :  { %1973 = vst [vmem:[%s3997_s7] sm:$0xff] %v1963_v7  ;;  %v1922_v47 = vadd.f32 %v1921_v61, %v1920_v4 }
 0x363   :  { %v1923_v62 = vrot.slane %v1922_v47, 2 }
 0x365   :  { %v1924_v35 = vadd.f32 %v1923_v62, %v1922_v47 }
 0x366   :  { %v1788_v2 = vpop.permute.xlu1 %1787 }
 0x367   :  { %v1821_v31 = vmul.f32 %v1788_v2, %v4127_v50  ;;  %v1925_v36 = vrot.slane %v1924_v35, 1 }
 0x369   :  { %v1927_v60 = vadd.f32 %v1821_v31, %v1820_v19  ;;  %v1926_v21 = vadd.f32 %v1925_v36, %v1924_v35 }
 0x36b   :  { %v1928_v1 = vrot.slane %v1927_v60, 4  ;;  %v1969_v49 = vsel %vm1960_vm9, %v1926_v21, %v1968_v56 }
 0x36d   :  { %v1929_v57 = vadd.f32 %v1928_v1, %v1927_v60 }
 0x36f   :  { %v1930_v24 = vrot.slane %v1929_v57, 2 }
 0x371   :  { %v1931_v15 = vadd.f32 %v1930_v24, %v1929_v57 }
 0x373   :  { %v1932_v39 = vrot.slane %v1931_v15, 1 }
 0x375   :  { %v1933_v48 = vadd.f32 %v1932_v39, %v1931_v15 }
 0x377   :  { %v1970_v46 = vsel %vm1962_vm10, %v1933_v48, %v1969_v49 }
 0x378   :  { %1974 = vst [vmem:[%s3997_s7 + $0x8] sm:$0xff] %v1970_v46 }
 0x379   :  { %1979 = vsyncpa [#allocation3], 1 }
 0x37a   :  { %1980 = vsyncpa [#allocation5], 1 }

// kernel: dcn_with_rcnn_forward.6
= control target key start
LH: loop header
LB: loop body
LE: loop exit
PB: predicated region body
PF: predicated region fallthrough
CT: control target
= control target key end

     0   :  { %10 = vsyncpa [#allocation3], 0  ;;  %s3019_s0 = inlined_call_operand.vmem [shape: f32[2,8,128], index: 0, kind: input, shape index: {}]   ;;  %s3020_s1 = inlined_call_operand.hbm [shape: f32[128,384], index: 1, kind: input, shape index: {}]   ;;  %s3021_s2 = inlined_call_operand.hbm [shape: f32[128,384], index: 2, kind: input, shape index: {}]   ;;  %s3022_s3 = inlined_call_operand.vmem [shape: f32[1,384], index: 3, kind: input, shape index: {}]   ;;  %s3023_s4 = inlined_call_operand.vmem [shape: f32[1,384], index: 4, kind: input, shape index: {}]   ;;  %s3024_s5 = inlined_call_operand.vmem [shape: f32[2,8,128], index: 5, kind: output, shape index: {}]  }
   0x1   :  { %s18_s20 = sshll.u32 %s3020_s1, 4  ;;  %s19_s20 = int_to_ptr.hbm [resolvable:$true] %s18_s20 }
   0x2   :  { %11 = vsyncpa [#allocation5], 0  ;;  %s1988_s21 = smov [#allocation2]   ;;  %s31_s25 = sshll.u32 %s3021_s2, 4  ;;  %s32_s25 = int_to_ptr.hbm [resolvable:$true] %s31_s25 }
   0x3   :  { %s20_s22 = sshll.u32 %s1988_s21, 4  ;;  %s1989_s26 = smov 384   ;;  %s21_s22 = int_to_ptr.vmem [resolvable:$true] %s20_s22 }
   0x4   :  { %s1990_s27 = smov 24   ;;  %s1991_s28 = smov [#allocation4]  }
   0x5   :  { %26 = dma.hbm_to_vmem [thread:$0]  %s19_s20, 6144, %s21_s22, [#allocation3], %s1989_s26, %s1989_s26, %s1990_s27  }
   0x6   :  { %s33_s29 = sshll.u32 %s1991_s28, 4  ;;  %s34_s29 = int_to_ptr.vmem [resolvable:$true] %s33_s29 }
   0x7   :  { %39 = dma.hbm_to_vmem [thread:$0]  %s32_s25, 6144, %s34_s29, [#allocation5], %s1989_s26, %s1989_s26, %s1990_s27  }
   0x8   :  { %1984 = dma.done.wait [#allocation3], 6144  }
   0x9   :  { %1985 = vsyncadd [#allocation3], 4294961152 }
   0xa   :  { %1986 = dma.done.wait [#allocation5], 6144  }
   0xb   :  { %1987 = vsyncadd [#allocation5], 4294961152  ;;  %v99_v0 = vld [vmem:[#allocation2 + $0x168] sm:$0xff]  ;;  %v96_v2 = vld [vmem:[#allocation2 + $0x150] sm:$0xff]  ;;  %v1992_v60 = vmov 0.0  }
   0xc   :  { %v2029_v1 = vld [vmem:[#allocation4 + $0x168] sm:$0xff]  ;;  %110 = vmatpush.msra.mxu0 %v99_v0  ;;  %v2032_v3 = vld [vmem:[#allocation4 + $0x150] sm:$0xff]  ;;  %v93_v4 = vld [vmem:[#allocation2 + $0x138] sm:$0xff] }
   0xd   :  { %235 = vmatpush.msra.mxu3 %v2029_v1  ;;  %v2034_v5 = vld [vmem:[#allocation4 + $0x138] sm:$0xff]  ;;  %v100_v6 = vld [vmem:[#allocation2 + $0x170] sm:$0xff]  ;;  %v90_v8 = vld [vmem:[#allocation2 + $0x120] sm:$0xff] }
   0xe   :  { %111 = vmatpush.msra.mxu0 %v96_v2  ;;  %v97_v7 = vld [vmem:[#allocation2 + $0x158] sm:$0xff]  ;;  %133 = vmatpush.msra.mxu1 %v100_v6  ;;  %v2037_v9 = vld [vmem:[#allocation4 + $0x120] sm:$0xff]  ;;  %v87_v11 = vld [vmem:[#allocation2 + $0x108] sm:$0xff] }
   0xf   :  { %236 = vmatpush.msra.mxu3 %v2032_v3  ;;  %v94_v10 = vld [vmem:[#allocation2 + $0x140] sm:$0xff]  ;;  %v2040_v12 = vld [vmem:[#allocation4 + $0x108] sm:$0xff]  ;;  %v84_v14 = vld [vmem:[#allocation2 + $0xf0] sm:$0xff] }
  0x10   :  { %112 = vmatpush.msra.mxu0 %v93_v4  ;;  %134 = vmatpush.msra.mxu1 %v97_v7  ;;  %v91_v13 = vld [vmem:[#allocation2 + $0x128] sm:$0xff]  ;;  %v2043_v15 = vld [vmem:[#allocation4 + $0xf0] sm:$0xff]  ;;  %v81_v17 = vld [vmem:[#allocation2 + $0xd8] sm:$0xff] }
  0x11   :  { %237 = vmatpush.msra.mxu3 %v2034_v5  ;;  %v88_v16 = vld [vmem:[#allocation2 + $0x110] sm:$0xff]  ;;  %v2046_v18 = vld [vmem:[#allocation4 + $0xd8] sm:$0xff]  ;;  %v78_v20 = vld [vmem:[#allocation2 + $0xc0] sm:$0xff] }
  0x12   :  { %113 = vmatpush.msra.mxu0 %v90_v8  ;;  %135 = vmatpush.msra.mxu1 %v94_v10  ;;  %v85_v19 = vld [vmem:[#allocation2 + $0xf8] sm:$0xff]  ;;  %v2049_v21 = vld [vmem:[#allocation4 + $0xc0] sm:$0xff]  ;;  %v75_v24 = vld [vmem:[#allocation2 + $0xa8] sm:$0xff] }
  0x13   :  { %238 = vmatpush.msra.mxu3 %v2037_v9  ;;  %v82_v22 = vld [vmem:[#allocation2 + $0xe0] sm:$0xff]  ;;  %v101_v23 = vld [vmem:[#allocation2 + $0x178] sm:$0xff]  ;;  %v2052_v25 = vld [vmem:[#allocation4 + $0xa8] sm:$0xff] }
  0x14   :  { %114 = vmatpush.msra.mxu0 %v87_v11  ;;  %136 = vmatpush.msra.mxu1 %v91_v13  ;;  %v79_v26 = vld [vmem:[#allocation2 + $0xc8] sm:$0xff]  ;;  %v98_v27 = vld [vmem:[#allocation2 + $0x160] sm:$0xff]  ;;  %v72_v28 = vld [vmem:[#allocation2 + $0x90] sm:$0xff] }
  0x15   :  { %239 = vmatpush.msra.mxu3 %v2040_v12  ;;  %156 = vmatpush.msra.mxu2 %v101_v23  ;;  %v2055_v29 = vld [vmem:[#allocation4 + $0x90] sm:$0xff]  ;;  %v95_v30 = vld [vmem:[#allocation2 + $0x148] sm:$0xff]  ;;  %v69_v33 = vld [vmem:[#allocation2 + $0x78] sm:$0xff] }
  0x16   :  { %115 = vmatpush.msra.mxu0 %v84_v14  ;;  %137 = vmatpush.msra.mxu1 %v88_v16  ;;  %v76_v31 = vld [vmem:[#allocation2 + $0xb0] sm:$0xff]  ;;  %v2058_v34 = vld [vmem:[#allocation4 + $0x78] sm:$0xff]  ;;  %v66_v37 = vld [vmem:[#allocation2 + $0x60] sm:$0xff] }
  0x17   :  { %240 = vmatpush.msra.mxu3 %v2043_v15  ;;  %157 = vmatpush.msra.mxu2 %v98_v27  ;;  %v92_v32 = vld [vmem:[#allocation2 + $0x130] sm:$0xff]  ;;  %v73_v35 = vld [vmem:[#allocation2 + $0x98] sm:$0xff]  ;;  %v2061_v38 = vld [vmem:[#allocation4 + $0x60] sm:$0xff] }
  0x18   :  { %116 = vmatpush.msra.mxu0 %v81_v17  ;;  %138 = vmatpush.msra.mxu1 %v85_v19  ;;  %v89_v36 = vld [vmem:[#allocation2 + $0x118] sm:$0xff]  ;;  %v70_v39 = vld [vmem:[#allocation2 + $0x80] sm:$0xff]  ;;  %v63_v41 = vld [vmem:[#allocation2 + $0x48] sm:$0xff] }
  0x19   :  { %241 = vmatpush.msra.mxu3 %v2046_v18  ;;  %158 = vmatpush.msra.mxu2 %v95_v30  ;;  %v86_v40 = vld [vmem:[#allocation2 + $0x100] sm:$0xff]  ;;  %v2064_v42 = vld [vmem:[#allocation4 + $0x48] sm:$0xff]  ;;  %v60_v45 = vld [vmem:[#allocation2 + $0x30] sm:$0xff] }
  0x1a   :  { %117 = vmatpush.msra.mxu0 %v78_v20  ;;  %139 = vmatpush.msra.mxu1 %v82_v22  ;;  %3097 = vst [vmem:[#allocation8_spill] sm:$0xff] %v2064_v42  ;;  %v67_v43 = vld [vmem:[#allocation2 + $0x68] sm:$0xff]  ;;  %v2067_v46 = vld [vmem:[#allocation4 + $0x30] sm:$0xff]  ;;  %v57_v49 = vld [vmem:[#allocation2 + $0x18] sm:$0xff] }
  0x1b   :  { %242 = vmatpush.msra.mxu3 %v2049_v21  ;;  %159 = vmatpush.msra.mxu2 %v92_v32  ;;  %v83_v44 = vld [vmem:[#allocation2 + $0xe8] sm:$0xff]  ;;  %3098 = vst [vmem:[#allocation9_spill] sm:$0xff] %v2067_v46  ;;  %v64_v47 = vld [vmem:[#allocation2 + $0x50] sm:$0xff]  ;;  %v2070_v50 = vld [vmem:[#allocation4 + $0x18] sm:$0xff] }
  0x1c   :  { %118 = vmatpush.msra.mxu0 %v75_v24  ;;  %140 = vmatpush.msra.mxu1 %v79_v26  ;;  %v80_v48 = vld [vmem:[#allocation2 + $0xd0] sm:$0xff]  ;;  %3099 = vst [vmem:[#allocation10_spill] sm:$0xff] %v2070_v50  ;;  %v61_v51 = vld [vmem:[#allocation2 + $0x38] sm:$0xff]  ;;  %v54_v53 = vld [vmem:[#allocation2] sm:$0xff] }
  0x1d   :  { %243 = vmatpush.msra.mxu3 %v2052_v25  ;;  %160 = vmatpush.msra.mxu2 %v89_v36  ;;  %v77_v52 = vld [vmem:[#allocation2 + $0xb8] sm:$0xff]  ;;  %v2073_v54 = vld [vmem:[#allocation4] sm:$0xff]  ;;  %v2076_v55 = vld [vmem:[#allocation4 + $0x170] sm:$0xff] }
  0x1e   :  { %119 = vmatpush.msra.mxu0 %v72_v28  ;;  %141 = vmatpush.msra.mxu1 %v76_v31  ;;  %3100 = vst [vmem:[#allocation11_spill] sm:$0xff] %v2073_v54  ;;  %v2081_v56 = vld [vmem:[%s3019_s0] sm:$0xff]  ;;  %v2084_v58 = vld [vmem:[#allocation4 + $0x158] sm:$0xff]  ;;  %v55_v61 = vld [vmem:[#allocation2 + $0x8] sm:$0xff] }
  0x1f   :  { %244 = vmatpush.msra.mxu3 %v2055_v29  ;;  %161 = vmatpush.msra.mxu2 %v86_v40  ;;  %v58_v57 = vld [vmem:[#allocation2 + $0x20] sm:$0xff]  ;;  %v2091_v63 = vld [vmem:[#allocation4 + $0x178] sm:$0xff]  ;;  %v71_v0 = vld [vmem:[#allocation2 + $0x88] sm:$0xff] }
  0x20   :  { %120 = vmatpush.msra.mxu0 %v69_v33  ;;  %142 = vmatpush.msra.mxu1 %v73_v35  ;;  %v74_v59 = vld [vmem:[#allocation2 + $0xa0] sm:$0xff]  ;;  %v2094_v2 = vld [vmem:[#allocation4 + $0x128] sm:$0xff]  ;;  %v68_v6 = vld [vmem:[#allocation2 + $0x70] sm:$0xff] }
  0x21   :  { %245 = vmatpush.msra.mxu3 %v2058_v34  ;;  %162 = vmatpush.msra.mxu2 %v83_v44  ;;  %v2089_v62 = vld [vmem:[#allocation4 + $0x140] sm:$0xff]  ;;  %v2101_v7 = vld [vmem:[#allocation4 + $0x110] sm:$0xff]  ;;  %v2103_v8 = vld [vmem:[#allocation4 + $0x148] sm:$0xff] }
  0x22   :  { %121 = vmatpush.msra.mxu0 %v66_v37  ;;  %143 = vmatpush.msra.mxu1 %v70_v39  ;;  %v2096_v4 = vld [vmem:[#allocation4 + $0x160] sm:$0xff]  ;;  %v2111_v10 = vld [vmem:[%s3019_s0 + $0x8] sm:$0xff]  ;;  %v65_v11 = vld [vmem:[#allocation2 + $0x58] sm:$0xff] }
  0x23   :  { %246 = vmatpush.msra.mxu3 %v2061_v38  ;;  %163 = vmatpush.msra.mxu2 %v80_v48  ;;  %v2113_v13 = vld [vmem:[#allocation4 + $0xf8] sm:$0xff]  ;;  %v2115_v14 = vld [vmem:[#allocation4 + $0x130] sm:$0xff]  ;;  %v62_v16 = vld [vmem:[#allocation2 + $0x40] sm:$0xff] }
  0x24   :  { %122 = vmatpush.msra.mxu0 %v63_v41  ;;  %144 = vmatpush.msra.mxu1 %v67_v43  ;;  %v2121_v17 = vld [vmem:[#allocation4 + $0xe0] sm:$0xff]  ;;  %v2123_v19 = vld [vmem:[#allocation4 + $0x118] sm:$0xff]  ;;  %v59_v20 = vld [vmem:[#allocation2 + $0x28] sm:$0xff] }
  0x25   :  { %247 = vmatpush.msra.mxu3 %v2064_v42  ;;  %164 = vmatpush.msra.mxu2 %v77_v52  ;;  %v2127_v22 = vld [vmem:[#allocation4 + $0xc8] sm:$0xff]  ;;  %v2129_v23 = vld [vmem:[#allocation4 + $0x100] sm:$0xff]  ;;  %v56_v24 = vld [vmem:[#allocation2 + $0x10] sm:$0xff] }
  0x26   :  { %123 = vmatpush.msra.mxu0 %v60_v45  ;;  %145 = vmatpush.msra.mxu1 %v64_v47  ;;  %v2134_v26 = vld [vmem:[#allocation4 + $0xb0] sm:$0xff]  ;;  %v2136_v27 = vld [vmem:[#allocation4 + $0xe8] sm:$0xff]  ;;  %v2141_v28 = vld [vmem:[#allocation4 + $0x98] sm:$0xff] }
  0x27   :  { %248 = vmatpush.msra.mxu3 %v2067_v46  ;;  %165 = vmatpush.msra.mxu2 %v74_v59  ;;  %v2143_v30 = vld [vmem:[#allocation4 + $0xd0] sm:$0xff]  ;;  %v2148_v31 = vld [vmem:[#allocation4 + $0x80] sm:$0xff]  ;;  %v2150_v32 = vld [vmem:[#allocation4 + $0xb8] sm:$0xff] }
  0x28   :  { %124 = vmatpush.msra.mxu0 %v57_v49  ;;  %146 = vmatpush.msra.mxu1 %v61_v51  ;;  %v2156_v33 = vld [vmem:[#allocation4 + $0x68] sm:$0xff]  ;;  %v2158_v35 = vld [vmem:[#allocation4 + $0xa0] sm:$0xff]  ;;  %v2164_v36 = vld [vmem:[#allocation4 + $0x50] sm:$0xff] }
  0x29   :  { %249 = vmatpush.msra.mxu3 %v2070_v50  ;;  %166 = vmatpush.msra.mxu2 %v71_v0  ;;  %3101 = vst [vmem:[#allocation12_spill] sm:$0xff] %v2156_v33  ;;  %v2166_v37 = vld [vmem:[#allocation4 + $0x88] sm:$0xff]  ;;  %v2172_v39 = vld [vmem:[#allocation4 + $0x38] sm:$0xff]  ;;  %v2174_v40 = vld [vmem:[#allocation4 + $0x70] sm:$0xff] }
  0x2a   :  { %125 = vmatpush.msra.mxu0 %v54_v53  ;;  %147 = vmatpush.msra.mxu1 %v58_v57  ;;  %3102 = vst [vmem:[#allocation13_spill] sm:$0xff] %v2164_v36  ;;  %v2180_v41 = vld [vmem:[#allocation4 + $0x20] sm:$0xff]  ;;  %v2182_v43 = vld [vmem:[#allocation4 + $0x58] sm:$0xff]  ;;  %v2188_v44 = vld [vmem:[#allocation4 + $0x8] sm:$0xff] }
  0x2b   :  { %250 = vmatpush.msra.mxu3 %v2073_v54  ;;  %126 = vmatmul.f32.vlgmr.msra.gmra.mxu0 %v2081_v56  ;;  %3103 = vst [vmem:[#allocation14_spill] sm:$0xff] %v2172_v39  ;;  %v2190_v45 = vld [vmem:[#allocation4 + $0x40] sm:$0xff]  ;;  %v2196_v47 = vld [vmem:[#allocation4 + $0x28] sm:$0xff]  ;;  %v2203_v48 = vld [vmem:[#allocation4 + $0x10] sm:$0xff] }
  0x2c   :  { %251 = vmatmul.f32.vlgmr.msra.gmra.mxu3 %v1992_v60  ;;  %255 = vmatpush.msrb.mxu0 %v2076_v55  ;;  %3104 = vst [vmem:[#allocation15_spill] sm:$0xff] %v2180_v41  ;;  %v2323_v49 = vld [vmem:[%s3022_s3] sm:$0x7] }
  0x2d   :  { %148 = vmatpush.msra.mxu1 %v55_v61  ;;  %431 = vmatpush.msrb.mxu3 %v2076_v55  ;;  %3105 = vst [vmem:[#allocation16_spill] sm:$0xff] %v2182_v43  ;;  %v227_v51 = vld [vmem:[%s3023_s4] sm:$0x7]  ;;  %v104_v52 = vperm.slane %v2323_v49, 0 }
  0x2e   :  { %256 = vmatpush.msrb.mxu0 %v2084_v58  ;;  %149 = vmatmul.f32.vlgmr.msra.gmra.mxu1 %v2081_v56  ;;  %3106 = vst [vmem:[#allocation17_spill] sm:$0xff] %v2188_v44  ;;  %v2329_v57 = vperm.slane %v227_v51, 0 }
  0x2f   :  { %275 = vmatpush.msrb.mxu1 %v2091_v63  ;;  %167 = vmatpush.msra.mxu2 %v68_v6  ;;  %3107 = vst [vmem:[#allocation18_spill] sm:$0xff] %v2190_v45 }
  0x30   :  { %257 = vmatpush.msrb.mxu0 %v2089_v62  ;;  %432 = vmatpush.msrb.mxu3 %v2084_v58  ;;  %3108 = vst [vmem:[#allocation19_spill] sm:$0xff] %v2196_v47 }
  0x31   :  { %276 = vmatpush.msrb.mxu1 %v2096_v4  ;;  %168 = vmatpush.msra.mxu2 %v65_v11  ;;  %3109 = vst [vmem:[#allocation20_spill] sm:$0xff] %v2203_v48 }
  0x32   :  { %258 = vmatpush.msrb.mxu0 %v2094_v2  ;;  %433 = vmatpush.msrb.mxu3 %v2089_v62  ;;  %3110 = vst [vmem:[#allocation21_spill] sm:$0xff] %v2329_v57 }
  0x33   :  { %277 = vmatpush.msrb.mxu1 %v2103_v8  ;;  %129 = vmatmul.f32.gmra.mxu0 %v2111_v10 }
  0x34   :  { %259 = vmatpush.msrb.mxu0 %v2101_v7  ;;  %169 = vmatpush.msra.mxu2 %v62_v16 }
  0x35   :  { %278 = vmatpush.msrb.mxu1 %v2115_v14  ;;  %434 = vmatpush.msrb.mxu3 %v2094_v2 }
  0x36   :  { %260 = vmatpush.msrb.mxu0 %v2113_v13  ;;  %170 = vmatpush.msra.mxu2 %v59_v20 }
  0x37   :  { %279 = vmatpush.msrb.mxu1 %v2123_v19  ;;  %435 = vmatpush.msrb.mxu3 %v2101_v7 }
  0x38   :  { %261 = vmatpush.msrb.mxu0 %v2121_v17  ;;  %152 = vmatmul.f32.gmra.mxu1 %v2111_v10 }
  0x39   :  { %280 = vmatpush.msrb.mxu1 %v2129_v23  ;;  %171 = vmatpush.msra.mxu2 %v56_v24 }
  0x3a   :  { %262 = vmatpush.msrb.mxu0 %v2127_v22  ;;  %172 = vmatmul.f32.vlgmr.msra.gmra.mxu2 %v2081_v56 }
  0x3b   :  { %281 = vmatpush.msrb.mxu1 %v2136_v27  ;;  %411 = vmatpush.msrb.mxu2 %v2029_v1 }
  0x3c   :  { %263 = vmatpush.msrb.mxu0 %v2134_v26  ;;  %436 = vmatpush.msrb.mxu3 %v2113_v13 }
  0x3d   :  { %282 = vmatpush.msrb.mxu1 %v2143_v30  ;;  %412 = vmatpush.msrb.mxu2 %v2032_v3 }
  0x3e   :  { %264 = vmatpush.msrb.mxu0 %v2141_v28  ;;  %437 = vmatpush.msrb.mxu3 %v2121_v17 }
  0x3f   :  { %283 = vmatpush.msrb.mxu1 %v2150_v32  ;;  %413 = vmatpush.msrb.mxu2 %v2034_v5 }
  0x40   :  { %265 = vmatpush.msrb.mxu0 %v2148_v31  ;;  %438 = vmatpush.msrb.mxu3 %v2127_v22 }
  0x41   :  { %284 = vmatpush.msrb.mxu1 %v2158_v35  ;;  %414 = vmatpush.msrb.mxu2 %v2037_v9 }
  0x42   :  { %266 = vmatpush.msrb.mxu0 %v2156_v33  ;;  %175 = vmatmul.f32.gmra.mxu2 %v2111_v10 }
  0x43   :  { %285 = vmatpush.msrb.mxu1 %v2166_v37  ;;  %439 = vmatpush.msrb.mxu3 %v2134_v26 }
  0x44   :  { %267 = vmatpush.msrb.mxu0 %v2164_v36  ;;  %415 = vmatpush.msrb.mxu2 %v2040_v12 }
  0x45   :  { %286 = vmatpush.msrb.mxu1 %v2174_v40  ;;  %440 = vmatpush.msrb.mxu3 %v2141_v28 }
  0x46   :  { %268 = vmatpush.msrb.mxu0 %v2172_v39  ;;  %416 = vmatpush.msrb.mxu2 %v2043_v15 }
  0x47   :  { %287 = vmatpush.msrb.mxu1 %v2182_v43  ;;  %441 = vmatpush.msrb.mxu3 %v2148_v31 }
  0x48   :  { %269 = vmatpush.msrb.mxu0 %v2180_v41  ;;  %417 = vmatpush.msrb.mxu2 %v2046_v18 }
  0x49   :  { %288 = vmatpush.msrb.mxu1 %v2190_v45  ;;  %442 = vmatpush.msrb.mxu3 %v2156_v33 }
  0x4a   :  { %270 = vmatpush.msrb.mxu0 %v2188_v44  ;;  %418 = vmatpush.msrb.mxu2 %v2049_v21 }
  0x4b   :  { %271 = vmatmul.f32.vlgmr.msrb.gmra.mxu0 %v1992_v60  ;;  %289 = vmatpush.msrb.mxu1 %v2196_v47 }
  0x4c   :  { %451 = vmatpush.msra.mxu0 %v2091_v63  ;;  %443 = vmatpush.msrb.mxu3 %v2164_v36 }
  0x4d   :  { %290 = vmatpush.msrb.mxu1 %v2203_v48  ;;  %419 = vmatpush.msrb.mxu2 %v2052_v25 }
  0x4e   :  { %452 = vmatpush.msra.mxu0 %v2096_v4  ;;  %291 = vmatmul.f32.vlgmr.msrb.gmra.mxu1 %v1992_v60 }
  0x4f   :  { %589 = vmatpush.msra.mxu1 %v2029_v1  ;;  %444 = vmatpush.msrb.mxu3 %v2172_v39 }
  0x50   :  { %453 = vmatpush.msra.mxu0 %v2103_v8  ;;  %420 = vmatpush.msrb.mxu2 %v2055_v29 }
  0x51   :  { %590 = vmatpush.msra.mxu1 %v2032_v3  ;;  %445 = vmatpush.msrb.mxu3 %v2180_v41 }
  0x52   :  { %454 = vmatpush.msra.mxu0 %v2115_v14  ;;  %421 = vmatpush.msrb.mxu2 %v2058_v34 }
  0x53   :  { %591 = vmatpush.msra.mxu1 %v2034_v5  ;;  %446 = vmatpush.msrb.mxu3 %v2188_v44 }
  0x54   :  { %455 = vmatpush.msra.mxu0 %v2123_v19  ;;  %422 = vmatpush.msrb.mxu2 %v2061_v38 }
  0x55   :  { %629 = vmatpush.msra.mxu3 %v2091_v63  ;;  %592 = vmatpush.msra.mxu1 %v2037_v9 }
  0x56   :  { %456 = vmatpush.msra.mxu0 %v2129_v23  ;;  %423 = vmatpush.msrb.mxu2 %v2064_v42 }
  0x57   :  { %630 = vmatpush.msra.mxu3 %v2096_v4  ;;  %593 = vmatpush.msra.mxu1 %v2040_v12 }
  0x58   :  { %457 = vmatpush.msra.mxu0 %v2136_v27  ;;  %424 = vmatpush.msrb.mxu2 %v2067_v46 }
  0x59   :  { %631 = vmatpush.msra.mxu3 %v2103_v8  ;;  %594 = vmatpush.msra.mxu1 %v2043_v15 }
  0x5a   :  { %458 = vmatpush.msra.mxu0 %v2143_v30  ;;  %425 = vmatpush.msrb.mxu2 %v2070_v50 }
  0x5b   :  { %632 = vmatpush.msra.mxu3 %v2115_v14  ;;  %595 = vmatpush.msra.mxu1 %v2046_v18 }
  0x5c   :  { %459 = vmatpush.msra.mxu0 %v2150_v32  ;;  %426 = vmatpush.msrb.mxu2 %v2073_v54 }
  0x5d   :  { %633 = vmatpush.msra.mxu3 %v2123_v19  ;;  %596 = vmatpush.msra.mxu1 %v2049_v21 }
  0x5e   :  { %460 = vmatpush.msra.mxu0 %v2158_v35  ;;  %609 = vmatpush.msra.mxu2 %v2076_v55 }
  0x5f   :  { %634 = vmatpush.msra.mxu3 %v2129_v23  ;;  %597 = vmatpush.msra.mxu1 %v2052_v25 }
  0x60   :  { %461 = vmatpush.msra.mxu0 %v2166_v37  ;;  %610 = vmatpush.msra.mxu2 %v2084_v58 }
  0x61   :  { %635 = vmatpush.msra.mxu3 %v2136_v27  ;;  %598 = vmatpush.msra.mxu1 %v2055_v29 }
  0x62   :  { %462 = vmatpush.msra.mxu0 %v2174_v40  ;;  %611 = vmatpush.msra.mxu2 %v2089_v62 }
  0x63   :  { %636 = vmatpush.msra.mxu3 %v2143_v30  ;;  %599 = vmatpush.msra.mxu1 %v2058_v34 }
  0x64   :  { %463 = vmatpush.msra.mxu0 %v2182_v43  ;;  %612 = vmatpush.msra.mxu2 %v2094_v2 }
  0x65   :  { %637 = vmatpush.msra.mxu3 %v2150_v32  ;;  %600 = vmatpush.msra.mxu1 %v2061_v38 }
  0x66   :  { %464 = vmatpush.msra.mxu0 %v2190_v45  ;;  %613 = vmatpush.msra.mxu2 %v2101_v7 }
  0x67   :  { %638 = vmatpush.msra.mxu3 %v2158_v35  ;;  %601 = vmatpush.msra.mxu1 %v2064_v42 }
  0x68   :  { %465 = vmatpush.msra.mxu0 %v2196_v47  ;;  %614 = vmatpush.msra.mxu2 %v2113_v13 }
  0x69   :  { %639 = vmatpush.msra.mxu3 %v2166_v37  ;;  %602 = vmatpush.msra.mxu1 %v2067_v46 }
  0x6a   :  { %466 = vmatpush.msra.mxu0 %v2203_v48  ;;  %615 = vmatpush.msra.mxu2 %v2121_v17 }
  0x6b   :  { %640 = vmatpush.msra.mxu3 %v2174_v40  ;;  %603 = vmatpush.msra.mxu1 %v2070_v50 }
  0x6c   :  { %772 = vmatpush.msrb.mxu0 %v2029_v1  ;;  %616 = vmatpush.msra.mxu2 %v2127_v22 }
  0x6d   :  { %641 = vmatpush.msra.mxu3 %v2182_v43  ;;  %604 = vmatpush.msra.mxu1 %v2073_v54 }
  0x6e   :  { %773 = vmatpush.msrb.mxu0 %v2032_v3  ;;  %617 = vmatpush.msra.mxu2 %v2134_v26 }
  0x6f   :  { %642 = vmatpush.msra.mxu3 %v2190_v45  ;;  %792 = vmatpush.msrb.mxu1 %v2076_v55 }
  0x70   :  { %774 = vmatpush.msrb.mxu0 %v2034_v5  ;;  %618 = vmatpush.msra.mxu2 %v2141_v28 }
  0x71   :  { %643 = vmatpush.msra.mxu3 %v2196_v47  ;;  %793 = vmatpush.msrb.mxu1 %v2084_v58 }
  0x72   :  { %775 = vmatpush.msrb.mxu0 %v2037_v9  ;;  %619 = vmatpush.msra.mxu2 %v2148_v31 }
  0x73   :  { %644 = vmatpush.msra.mxu3 %v2203_v48  ;;  %794 = vmatpush.msrb.mxu1 %v2089_v62 }
  0x74   :  { %776 = vmatpush.msrb.mxu0 %v2040_v12  ;;  %620 = vmatpush.msra.mxu2 %v2156_v33 }
  0x75   :  { %795 = vmatpush.msrb.mxu1 %v2094_v2 }
  0x76   :  { %777 = vmatpush.msrb.mxu0 %v2043_v15  ;;  %621 = vmatpush.msra.mxu2 %v2164_v36 }
  0x77   :  { %796 = vmatpush.msrb.mxu1 %v2101_v7 }
  0x78   :  { %778 = vmatpush.msrb.mxu0 %v2046_v18  ;;  %622 = vmatpush.msra.mxu2 %v2172_v39 }
  0x79   :  { %797 = vmatpush.msrb.mxu1 %v2113_v13 }
  0x7a   :  { %779 = vmatpush.msrb.mxu0 %v2049_v21  ;;  %623 = vmatpush.msra.mxu2 %v2180_v41 }
  0x7b   :  { %798 = vmatpush.msrb.mxu1 %v2121_v17 }
  0x7c   :  { %780 = vmatpush.msrb.mxu0 %v2052_v25  ;;  %624 = vmatpush.msra.mxu2 %v2188_v44 }
  0x7d   :  { %799 = vmatpush.msrb.mxu1 %v2127_v22 }
  0x7e   :  { %781 = vmatpush.msrb.mxu0 %v2055_v29 }
  0x7f   :  { %800 = vmatpush.msrb.mxu1 %v2134_v26 }
  0x80   :  { %782 = vmatpush.msrb.mxu0 %v2058_v34 }
  0x81   :  { %801 = vmatpush.msrb.mxu1 %v2141_v28 }
  0x82   :  { %783 = vmatpush.msrb.mxu0 %v2061_v38 }
  0x83   :  { %802 = vmatpush.msrb.mxu1 %v2148_v31 }
  0x84   :  { %784 = vmatpush.msrb.mxu0 %v2064_v42 }
  0x85   :  { %803 = vmatpush.msrb.mxu1 %v2156_v33 }
  0x86   :  { %785 = vmatpush.msrb.mxu0 %v2067_v46 }
  0x87   :  { %804 = vmatpush.msrb.mxu1 %v2164_v36 }
  0x88   :  { %786 = vmatpush.msrb.mxu0 %v2070_v50 }
  0x89   :  { %805 = vmatpush.msrb.mxu1 %v2172_v39 }
  0x8a   :  { %787 = vmatpush.msrb.mxu0 %v2073_v54 }
  0x8b   :  { %806 = vmatpush.msrb.mxu1 %v2180_v41 }
  0x8d   :  { %807 = vmatpush.msrb.mxu1 %v2188_v44 }
  0xa8   :  { %v127_v53 = vpop.f32.mrf.mxu0 }
  0xa9   :  { %v2331_v59 = vadd.f32 %v127_v53, %v104_v52 }
  0xab   :  { %3111 = vst [vmem:[#allocation22_spill] sm:$0xff] %v2331_v59  ;;  %v150_v41 = vpop.f32.mrf.mxu1 }
  0xaf   :  { %v252_v60 = vpop.f32.mrf.mxu3 }
  0xb0   :  { %v253_v61 = vadd.f32 %v252_v60, %v2329_v57  ;;  %v130_v11 = vpop.f32.mrf.mxu0  ;;  %v105_v57 = vperm.slane %v2323_v49, 1 }
  0xb1   :  { %v2335_v16 = vadd.f32 %v130_v11, %v104_v52 }
  0xb2   :  { %v296_v0 = vrot.slane %v253_v61, 1  ;;  %v299_v6 = vadd.f32 %v253_v61, %v2331_v59  ;;  %v2339_v61 = vperm.slane %v227_v51, 1 }
  0xb3   :  { %3112 = vst [vmem:[#allocation23_spill] sm:$0xff] %v2335_v16 }
  0xb4   :  { %v1687_v20 = vmul.f32 -1.442695, %v299_v6  ;;  %v300_v24 = vadd.f32 %v296_v0, %v2335_v16  ;;  %3113 = vst [vmem:[#allocation24_spill] sm:$0xff] %v2339_v61  ;;  %v2341_v0 = vadd.f32 %v150_v41, %v105_v57 }
  0xb5   :  { %v153_v6 = vpop.f32.mrf.mxu1 }
  0xb6   :  { %1724 = vpow2.f32 %v1687_v20  ;;  %v1688_v44 = vmul.f32 -1.442695, %v300_v24  ;;  %3114 = vst [vmem:[#allocation25_spill] sm:$0xff] %v2341_v0  ;;  %v2343_v20 = vadd.f32 %v153_v6, %v105_v57 }
  0xb8   :  { %1726 = vpow2.f32 %v1688_v44  ;;  %3115 = vst [vmem:[#allocation26_spill] sm:$0xff] %v2343_v20 }
  0xbc   :  { %v1725_v54 = vpop.eup %1724 }
  0xbd   :  { %v307_v48 = vadd.f32 1.0, %v1725_v54  ;;  %v173_v41 = vpop.f32.mrf.mxu2 }
  0xbe   :  { %v1727_v53 = vpop.eup %1726 }
  0xbf   :  { %1728 = vrcp.f32 %v307_v48  ;;  %v308_v50 = vadd.f32 1.0, %v1727_v53  ;;  %vm314_vm0 = vweird.f32 %v307_v48 }
  0xc1   :  { %1730 = vrcp.f32 %v308_v50  ;;  %vm329_vm2 = vweird.f32 %v308_v50  ;;  %v333_v6 = vand.u32 2147483647, %v308_v50 }
  0xc3   :  { %vm334_vm7 = vcmp.eq.f32.partialorder %v333_v6, 8.507059e+37 }
  0xc5   :  { %v1729_v60 = vpop.eup %1728 }
  0xc6   :  { %v310_v52 = vmul.f32 %v1729_v60, %v307_v48  ;;  %vm315_vm1 = vweird.f32 %v1729_v60 }
  0xc7   :  { %v1731_v11 = vpop.eup %1730  ;;  %vm2350_vm4 = vmor %vm314_vm0, %vm315_vm1  ;;  %vm408_vm0 = vcmask 1041409  }
  0xc8   :  { %v272_v59 = vpop.f32.mrf.mxu0  ;;  %v325_v44 = vmul.f32 %v1731_v11, %v308_v50  ;;  %v311_v24 = vsub.f32 1.0, %v310_v52  ;;  %vm330_vm3 = vweird.f32 %v1731_v11  ;;  %v320_v52 = vand.u32 2147483648, %v307_v48 }
  0xc9   :  { %v273_v54 = vadd.f32 %v272_v59, %v2339_v61  ;;  %v318_v59 = vand.u32 2147483647, %v307_v48  ;;  %v335_v61 = vand.u32 2147483648, %v308_v50  ;;  %vm2354_vm5 = vmor %vm329_vm2, %vm330_vm3 }
  0xca   :  { %v326_v47 = vsub.f32 1.0, %v325_v44  ;;  %v312_v45 = vmul.f32 %v1729_v60, %v311_v24  ;;  %v106_v44 = vperm.slane %v2323_v49, 2  ;;  %v176_v49 = vpop.f32.mrf.mxu2 }
  0xcb   :  { %v340_v16 = vrot.slane %v273_v54, 1  ;;  %v343_v53 = vadd.f32 %v273_v54, %v2341_v0  ;;  %v2348_v54 = vperm.slane %v227_v51, 2  ;;  %vm319_vm6 = vcmp.eq.f32.partialorder %v318_v59, 8.507059e+37 }
  0xcc   :  { %v327_v42 = vmul.f32 %v1731_v11, %v326_v47  ;;  %v313_v57 = vadd.f32 %v1729_v60, %v312_v45  ;;  %v292_v47 = vpop.f32.mrf.mxu1  ;;  %v321_v51 = vor.u32 1.1754944e-38, %v320_v52  ;;  %v336_v24 = vor.u32 1.1754944e-38, %v335_v61 }
  0xcd   :  { %v344_v39 = vadd.f32 %v340_v16, %v2343_v20  ;;  %v1689_v46 = vmul.f32 -1.442695, %v343_v53  ;;  %3116 = vst [vmem:[#allocation27_spill] sm:$0xff] %v2348_v54  ;;  %v2364_v33 = vadd.f32 %v173_v41, %v106_v44  ;;  %v2366_v52 = vadd.f32 %v176_v49, %v106_v44 }
  0xce   :  { %v317_v48 = vsel %vm2350_vm4, %v1729_v60, %v313_v57 }
  0xcf   :  { %1732 = vpow2.f32 %v1689_v46  ;;  %v1690_v36 = vmul.f32 -1.442695, %v344_v39  ;;  %v328_v46 = vadd.f32 %v1731_v11, %v327_v42  ;;  %v293_v42 = vadd.f32 %v292_v47, %v2348_v54  ;;  %3121 = vst [vmem:[#allocation28_spill] sm:$0xff] %v2364_v33 }
  0xd0   :  { %v322_v20 = vsel %vm319_vm6, %v321_v51, %v317_v48 }
  0xd1   :  { %1734 = vpow2.f32 %v1690_v36  ;;  %v332_v0 = vsel %vm2354_vm5, %v1731_v11, %v328_v46  ;;  %v387_v60 = vmul.f32 %v322_v20, %v293_v42 }
  0xd2   :  { %v337_v43 = vsel %vm334_vm7, %v336_v24, %v332_v0 }
  0xd3   :  { %v389_v16 = vadd.f32 %v387_v60, %v2364_v33 }
  0xd5   :  { %v1733_v39 = vpop.eup %1732 }
  0xd6   :  { %v351_v45 = vadd.f32 1.0, %v1733_v39  ;;  %v384_v39 = vrot.slane %v293_v42, 1 }
  0xd7   :  { %v1735_v50 = vpop.eup %1734 }
  0xd8   :  { %v352_v53 = vadd.f32 1.0, %v1735_v50  ;;  %1736 = vrcp.f32 %v351_v45  ;;  %v388_v59 = vmul.f32 %v384_v39, %v337_v43  ;;  %v364_v36 = vand.u32 2147483648, %v351_v45 }
  0xd9   :  { %v362_v0 = vand.u32 2147483647, %v351_v45  ;;  %vm358_vm9 = vweird.f32 %v351_v45 }
  0xda   :  { %1738 = vrcp.f32 %v352_v53  ;;  %v390_v11 = vadd.f32 %v388_v59, %v2366_v52  ;;  %v379_v20 = vand.u32 2147483648, %v352_v53  ;;  %v377_v44 = vand.u32 2147483647, %v352_v53 }
  0xdb   :  { %1740 = vtanh.f32 %v389_v16  ;;  %v365_v51 = vor.u32 1.1754944e-38, %v364_v36  ;;  %vm363_vm12 = vcmp.eq.f32.partialorder %v362_v0, 8.507059e+37  ;;  %vm373_vm13 = vweird.f32 %v352_v53  ;;  %v3136_v0 = vld [vmem:[#allocation24_spill] sm:$0xff] }
  0xdc   :  { %1742 = vtanh.f32 %v390_v11  ;;  %v380_v49 = vor.u32 1.1754944e-38, %v379_v20  ;;  %vm378_vm15 = vcmp.eq.f32.partialorder %v377_v44, 8.507059e+37 }
  0xde   :  { %v1737_v57 = vpop.eup %1736 }
  0xdf   :  { %v354_v61 = vmul.f32 %v1737_v57, %v351_v45  ;;  %vm359_vm8 = vweird.f32 %v1737_v57 }
  0xe0   :  { %v1739_v6 = vpop.eup %1738  ;;  %vm360_vm11 = vmor %vm358_vm9, %vm359_vm8 }
  0xe1   :  { %v355_v47 = vsub.f32 1.0, %v354_v61  ;;  %v369_v50 = vmul.f32 %v1739_v6, %v352_v53  ;;  %vm374_vm10 = vweird.f32 %v1739_v6  ;;  %v1741_v61 = vpop.eup %1740 }
  0xe2   :  { %vm375_vm14 = vmor %vm373_vm13, %vm374_vm10 }
  0xe3   :  { %v370_v46 = vsub.f32 1.0, %v369_v50  ;;  %v356_v48 = vmul.f32 %v1737_v57, %v355_v47 }
  0xe5   :  { %v357_v41 = vadd.f32 %v1737_v57, %v356_v48  ;;  %v371_v43 = vmul.f32 %v1739_v6, %v370_v46  ;;  %v1743_v46 = vpop.eup %1742 }
  0xe7   :  { %v361_v24 = vsel %vm360_vm11, %v1737_v57, %v357_v41  ;;  %v372_v42 = vadd.f32 %v1739_v6, %v371_v43  ;;  %v3137_v43 = vld [vmem:[#allocation23_spill] sm:$0xff] }
  0xe8   :  { %v366_v39 = vsel %vm363_vm12, %v365_v51, %v361_v24  ;;  %v3138_v24 = vld [vmem:[#allocation26_spill] sm:$0xff] }
  0xe9   :  { %v376_v60 = vsel %vm375_vm14, %v1739_v6, %v372_v42  ;;  %v393_v59 = vsub.f32 1.0, %v366_v39  ;;  %v397_v50 = vmul.f32 0.0, %v366_v39  ;;  %v3139_v39 = vld [vmem:[#allocation22_spill] sm:$0xff] }
  0xea   :  { %v381_v45 = vsel %vm378_vm15, %v380_v49, %v376_v60 }
  0xeb   :  { %v394_v16 = vsub.f32 1.0, %v381_v45  ;;  %v395_v47 = vmul.f32 %v1741_v61, %v393_v59  ;;  %v398_v33 = vmul.f32 0.0, %v381_v45  ;;  %v3140_v59 = vld [vmem:[#allocation25_spill] sm:$0xff] }
  0xed   :  { %v396_v48 = vmul.f32 %v1743_v46, %v394_v16  ;;  %v2370_v36 = vadd.f32 %v397_v50, %v395_v47 }
  0xef   :  { %v2372_v57 = vadd.f32 %v398_v33, %v396_v48  ;;  %v401_v53 = vadd.f32 %v2370_v36, %v2081_v56 }
  0xf1   :  { %v402_v6 = vadd.f32 %v2372_v57, %v2111_v10  ;;  %403 = vst [vmem:[%s3024_s5] sm:$0x1] %v401_v53  ;;  %v3061_v11 = vrot.slane %v2372_v57, 7 }
  0xf3   :  { %404 = vst [vmem:[%s3024_s5 + $0x8] sm:$0x1] %v402_v6  ;;  %v409_v33 = vsel %vm408_vm0, %v3061_v11, %v2370_v36 }
  0xf4   :  { %427 = vmatmul.f32.vlgmr.msrb.gmra.mxu2 %v409_v33  ;;  %447 = vmatmul.f32.vlgmr.msrb.gmra.mxu3 %v409_v33 }
  0xf5   :  { %467 = vmatmul.f32.vlgmr.msra.gmra.mxu0 %v409_v33  ;;  %812 = vmatpush.msrb.mxu2 %v2091_v63 }
  0xf6   :  { %955 = vmatpush.msrb.mxu3 %v2029_v1  ;;  %975 = vmatpush.msra.mxu0 %v2076_v55  ;;  %v3122_v1 = vld [vmem:[#allocation12_spill] sm:$0xff]  ;;  %v3134_v55 = vld [vmem:[#allocation17_spill] sm:$0xff] }
  0xf7   :  { %813 = vmatpush.msrb.mxu2 %v2096_v4 }
  0xf8   :  { %956 = vmatpush.msrb.mxu3 %v2032_v3  ;;  %976 = vmatpush.msra.mxu0 %v2084_v58  ;;  %v3123_v3 = vld [vmem:[#allocation16_spill] sm:$0xff] }
  0xf9   :  { %814 = vmatpush.msrb.mxu2 %v2103_v8 }
  0xfa   :  { %957 = vmatpush.msrb.mxu3 %v2034_v5  ;;  %977 = vmatpush.msra.mxu0 %v2089_v62  ;;  %v3124_v5 = vld [vmem:[#allocation8_spill] sm:$0xff]  ;;  %v3135_v62 = vld [vmem:[#allocation21_spill] sm:$0xff] }
  0xfb   :  { %815 = vmatpush.msrb.mxu2 %v2115_v14 }
  0xfc   :  { %958 = vmatpush.msrb.mxu3 %v2037_v9  ;;  %978 = vmatpush.msra.mxu0 %v2094_v2  ;;  %v3125_v9 = vld [vmem:[#allocation13_spill] sm:$0xff] }
  0xfd   :  { %816 = vmatpush.msrb.mxu2 %v2123_v19 }
  0xfe   :  { %959 = vmatpush.msrb.mxu3 %v2040_v12  ;;  %979 = vmatpush.msra.mxu0 %v2101_v7  ;;  %v3126_v12 = vld [vmem:[#allocation18_spill] sm:$0xff] }
  0xff   :  { %817 = vmatpush.msrb.mxu2 %v2129_v23 }
 0x100   :  { %960 = vmatpush.msrb.mxu3 %v2043_v15  ;;  %980 = vmatpush.msra.mxu0 %v2113_v13  ;;  %v3127_v15 = vld [vmem:[#allocation9_spill] sm:$0xff] }
 0x101   :  { %818 = vmatpush.msrb.mxu2 %v2136_v27 }
 0x102   :  { %961 = vmatpush.msrb.mxu3 %v2046_v18  ;;  %981 = vmatpush.msra.mxu0 %v2121_v17  ;;  %v3128_v18 = vld [vmem:[#allocation14_spill] sm:$0xff] }
 0x103   :  { %819 = vmatpush.msrb.mxu2 %v2143_v30 }
 0x104   :  { %962 = vmatpush.msrb.mxu3 %v2049_v21  ;;  %982 = vmatpush.msra.mxu0 %v2127_v22  ;;  %v3129_v21 = vld [vmem:[#allocation19_spill] sm:$0xff] }
 0x105   :  { %820 = vmatpush.msrb.mxu2 %v2150_v32 }
 0x106   :  { %963 = vmatpush.msrb.mxu3 %v2052_v25  ;;  %983 = vmatpush.msra.mxu0 %v2134_v26  ;;  %v3130_v25 = vld [vmem:[#allocation10_spill] sm:$0xff] }
 0x107   :  { %821 = vmatpush.msrb.mxu2 %v2158_v35 }
 0x108   :  { %964 = vmatpush.msrb.mxu3 %v2055_v29  ;;  %984 = vmatpush.msra.mxu0 %v2141_v28  ;;  %v3131_v29 = vld [vmem:[#allocation15_spill] sm:$0xff] }
 0x109   :  { %822 = vmatpush.msrb.mxu2 %v2166_v37 }
 0x10a   :  { %965 = vmatpush.msrb.mxu3 %v2058_v34  ;;  %985 = vmatpush.msra.mxu0 %v2148_v31  ;;  %v3132_v34 = vld [vmem:[#allocation20_spill] sm:$0xff] }
 0x10b   :  { %823 = vmatpush.msrb.mxu2 %v2174_v40 }
 0x10c   :  { %966 = vmatpush.msrb.mxu3 %v2061_v38  ;;  %986 = vmatpush.msra.mxu0 %v3122_v1  ;;  %v3133_v38 = vld [vmem:[#allocation11_spill] sm:$0xff] }
 0x10d   :  { %824 = vmatpush.msrb.mxu2 %v3123_v3 }
 0x10e   :  { %967 = vmatpush.msrb.mxu3 %v3124_v5  ;;  %987 = vmatpush.msra.mxu0 %v3125_v9 }
 0x10f   :  { %825 = vmatpush.msrb.mxu2 %v3126_v12 }
 0x110   :  { %968 = vmatpush.msrb.mxu3 %v3127_v15  ;;  %988 = vmatpush.msra.mxu0 %v3128_v18 }
 0x111   :  { %826 = vmatpush.msrb.mxu2 %v3129_v21 }
 0x112   :  { %969 = vmatpush.msrb.mxu3 %v3130_v25  ;;  %989 = vmatpush.msra.mxu0 %v3131_v29 }
 0x113   :  { %827 = vmatpush.msrb.mxu2 %v3132_v34 }
 0x114   :  { %970 = vmatpush.msrb.mxu3 %v3133_v38  ;;  %990 = vmatpush.msra.mxu0 %v3134_v55 }
 0x177   :  { %v428_v56 = vpop.f32.mrf.mxu2  ;;  %v448_v58 = vpop.f32.mrf.mxu3 }
 0x178   :  { %v429_v2 = vadd.f32 %v428_v56, %v3135_v62  ;;  %v449_v20 = vadd.f32 %v448_v58, %v3136_v0  ;;  %v468_v56 = vpop.f32.mrf.mxu0 }
 0x17a   :  { %v472_v41 = vrot.slane %v429_v2, 7  ;;  %v476_v44 = vadd.f32 %v429_v2, %v3137_v43  ;;  %v516_v51 = vrot.slane %v449_v20, 7  ;;  %v520_v42 = vadd.f32 %v449_v20, %v3138_v24 }
 0x17c   :  { %v475_v49 = vadd.f32 %v472_v41, %v3139_v39  ;;  %v1692_v60 = vmul.f32 -1.442695, %v476_v44  ;;  %v519_v61 = vadd.f32 %v516_v51, %v3140_v59  ;;  %v1694_v45 = vmul.f32 -1.442695, %v520_v42 }
 0x17d   :  { %v469_v42 = vadd.f32 %v468_v56, %v2348_v54 }
 0x17e   :  { %v1691_v16 = vmul.f32 -1.442695, %v475_v49  ;;  %1744 = vpow2.f32 %v1692_v60  ;;  %v1693_v47 = vmul.f32 -1.442695, %v519_v61 }
 0x17f   :  { %1746 = vpow2.f32 %v1694_v45  ;;  %v560_v59 = vrot.slane %v469_v42, 7 }
 0x180   :  { %1748 = vpow2.f32 %v1691_v16 }
 0x181   :  { %1750 = vpow2.f32 %v1693_v47 }
 0x184   :  { %v1745_v50 = vpop.eup %1744 }
 0x185   :  { %v1747_v46 = vpop.eup %1746  ;;  %v484_v48 = vadd.f32 1.0, %v1745_v50 }
 0x186   :  { %v1749_v53 = vpop.eup %1748  ;;  %v2443_v6 = vadd.f32 1.0, %v1747_v46 }
 0x187   :  { %v1751_v33 = vpop.eup %1750  ;;  %v483_v5 = vadd.f32 1.0, %v1749_v53  ;;  %1752 = vrcp.f32 %v484_v48  ;;  %v511_v49 = vand.u32 2147483648, %v484_v48  ;;  %v509_v47 = vand.u32 2147483647, %v484_v48 }
 0x188   :  { %v2445_v15 = vadd.f32 1.0, %v1751_v33  ;;  %1754 = vrcp.f32 %v2443_v6  ;;  %vm505_vm2 = vweird.f32 %v484_v48  ;;  %vm549_vm5 = vweird.f32 %v2443_v6 }
 0x189   :  { %1756 = vrcp.f32 %v483_v5  ;;  %v496_v50 = vand.u32 2147483648, %v483_v5  ;;  %v494_v11 = vand.u32 2147483647, %v483_v5  ;;  %vm490_vm6 = vweird.f32 %v483_v5 }
 0x18a   :  { %1758 = vrcp.f32 %v2445_v15  ;;  %vm510_vm7 = vcmp.eq.f32.partialorder %v509_v47, 8.507059e+37  ;;  %vm534_vm13 = vweird.f32 %v2445_v15 }
 0x18b   :  { %vm495_vm10 = vcmp.eq.f32.partialorder %v494_v11, 8.507059e+37 }
 0x18d   :  { %v1753_v25 = vpop.eup %1752 }
 0x18e   :  { %v1755_v38 = vpop.eup %1754  ;;  %v501_v58 = vmul.f32 %v1753_v25, %v484_v48  ;;  %vm506_vm1 = vweird.f32 %v1753_v25 }
 0x18f   :  { %v1757_v2 = vpop.eup %1756  ;;  %v545_v20 = vmul.f32 %v1755_v38, %v2443_v6  ;;  %vm507_vm4 = vmor %vm505_vm2, %vm506_vm1  ;;  %vm550_vm9 = vweird.f32 %v1755_v38 }
 0x190   :  { %v1759_v41 = vpop.eup %1758  ;;  %v486_v44 = vmul.f32 %v1757_v2, %v483_v5  ;;  %v502_v51 = vsub.f32 1.0, %v501_v58  ;;  %vm491_vm3 = vweird.f32 %v1757_v2  ;;  %v512_v58 = vor.u32 1.1754944e-38, %v511_v49  ;;  %vm551_vm12 = vmor %vm549_vm5, %vm550_vm9 }
 0x191   :  { %v530_v60 = vmul.f32 %v1759_v41, %v2445_v15  ;;  %v546_v61 = vsub.f32 1.0, %v545_v20  ;;  %vm492_vm8 = vmor %vm490_vm6, %vm491_vm3  ;;  %vm535_vm11 = vweird.f32 %v1759_v41  ;;  %v553_v49 = vand.u32 2147483647, %v2443_v6 }
 0x192   :  { %v487_v45 = vsub.f32 1.0, %v486_v44  ;;  %v503_v16 = vmul.f32 %v1753_v25, %v502_v51  ;;  %v497_v44 = vor.u32 1.1754944e-38, %v496_v50  ;;  %v540_v5 = vand.u32 2147483648, %v2445_v15  ;;  %vm536_vm14 = vmor %vm534_vm13, %vm535_vm11 }
 0x193   :  { %v531_v46 = vsub.f32 1.0, %v530_v60  ;;  %v547_v53 = vmul.f32 %v1755_v38, %v546_v61  ;;  %v555_v61 = vand.u32 2147483648, %v2443_v6  ;;  %vm554_vm15 = vcmp.eq.f32.partialorder %v553_v49, 8.507059e+37  ;;  %v2495_v49 = vld [vmem:[#allocation4 + $0x150] sm:$0xff] }
 0x194   :  { %v488_v33 = vmul.f32 %v1757_v2, %v487_v45  ;;  %v504_v24 = vadd.f32 %v1753_v25, %v503_v16 }
 0x195   :  { %v532_v56 = vmul.f32 %v1759_v41, %v531_v46  ;;  %v548_v48 = vadd.f32 %v1755_v38, %v547_v53 }
 0x196   :  { %v489_v54 = vadd.f32 %v1757_v2, %v488_v33  ;;  %v508_v20 = vsel %vm507_vm4, %v1753_v25, %v504_v24  ;;  %v556_v25 = vor.u32 1.1754944e-38, %v555_v61  ;;  %v2474_v61 = vld [vmem:[%s3019_s0] sm:$0xff] }
 0x197   :  { %v513_v51 = vsel %vm510_vm7, %v512_v58, %v508_v20  ;;  %v533_v0 = vadd.f32 %v1759_v41, %v532_v56  ;;  %v552_v11 = vsel %vm551_vm12, %v1755_v38, %v548_v48  ;;  %v573_v58 = vrot.slane %v2370_v36, 7 }
 0x198   :  { %v493_v60 = vsel %vm492_vm8, %v1757_v2, %v489_v54  ;;  %v564_v45 = vmul.f32 %v513_v51, %v469_v42  ;;  %v538_v54 = vand.u32 2147483647, %v2445_v15  ;;  %v3141_v2 = vld [vmem:[#allocation28_spill] sm:$0xff]  ;;  %v557_v50 = vsel %vm554_vm15, %v556_v25, %v552_v11  ;;  %v3152_v11 = vld [vmem:[#allocation26_spill] sm:$0xff] }
 0x199   :  { %v498_v16 = vsel %vm495_vm10, %v497_v44, %v493_v60  ;;  %v537_v47 = vsel %vm536_vm14, %v1759_v41, %v533_v0  ;;  %v570_v53 = vsub.f32 1.0, %v557_v50  ;;  %v3142_v15 = vrot.slane %v2372_v57, 7 }
 0x19a   :  { %v563_v46 = vmul.f32 %v560_v59, %v498_v16  ;;  %v566_v24 = vadd.f32 %v564_v45, %v2366_v52  ;;  %v541_v59 = vor.u32 1.1754944e-38, %v540_v5  ;;  %vm539_vm1 = vcmp.eq.f32.partialorder %v538_v54, 8.507059e+37  ;;  %v2488_v45 = vld [vmem:[#allocation4 + $0x168] sm:$0xff]  ;;  %v2491_v16 = vld [vmem:[#allocation4 + $0x170] sm:$0xff]  ;;  %v2505_v5 = vld [vmem:[#allocation4 + $0x140] sm:$0xff] }
 0x19b   :  { %v577_v38 = vmul.f32 %v557_v50, %v3142_v15  ;;  %v2521_v54 = vld [vmem:[#allocation4 + $0xf0] sm:$0xff] }
 0x19c   :  { %v565_v42 = vadd.f32 %v563_v46, %v3141_v2  ;;  %1760 = vtanh.f32 %v566_v24  ;;  %v542_v6 = vsel %vm539_vm1, %v541_v59, %v537_v47  ;;  %v2498_v46 = vld [vmem:[#allocation4 + $0x158] sm:$0xff]  ;;  %v2512_v24 = vld [vmem:[#allocation4 + $0x128] sm:$0xff] }
 0x19d   :  { %v569_v56 = vsub.f32 1.0, %v542_v6  ;;  %v576_v48 = vmul.f32 %v573_v58, %v542_v6 }
 0x19e   :  { %1762 = vtanh.f32 %v565_v42 }
 0x1a2   :  { %v1761_v33 = vpop.eup %1760 }
 0x1a3   :  { %v572_v20 = vmul.f32 %v1761_v33, %v570_v53 }
 0x1a4   :  { %v1763_v44 = vpop.eup %1762 }
 0x1a5   :  { %v571_v51 = vmul.f32 %v1763_v44, %v569_v56  ;;  %v2465_v60 = vadd.f32 %v577_v38, %v572_v20 }
 0x1a7   :  { %v2467_v0 = vadd.f32 %v576_v48, %v571_v51  ;;  %v581_v41 = vadd.f32 %v2465_v60, %v2111_v10  ;;  %v3153_v51 = vld [vmem:[#allocation27_spill] sm:$0xff] }
 0x1a9   :  { %v580_v36 = vadd.f32 %v2474_v61, %v2467_v0  ;;  %583 = vst [vmem:[%s3024_s5 + $0x8] sm:$0x2] %v581_v41  ;;  %v586_v57 = vrot.slane %v2467_v0, 1 }
 0x1ab   :  { %582 = vst [vmem:[%s3024_s5] sm:$0x2] %v580_v36  ;;  %v587_v10 = vsel %vm408_vm0, %v2465_v60, %v586_v57 }
 0x1ac   :  { %605 = vmatmul.f32.vlgmr.msra.gmra.mxu1 %v587_v10  ;;  %625 = vmatmul.f32.vlgmr.msra.gmra.mxu2 %v587_v10 }
 0x1ad   :  { %645 = vmatmul.f32.vlgmr.msra.gmra.mxu3 %v587_v10  ;;  %995 = vmatpush.msra.mxu1 %v2091_v63  ;;  %v2502_v63 = vld [vmem:[#allocation4 + $0x138] sm:$0xff] }
 0x1ae   :  { %1138 = vmatpush.msra.mxu2 %v2488_v45  ;;  %1158 = vmatpush.msra.mxu3 %v2491_v16 }
 0x1af   :  { %996 = vmatpush.msra.mxu1 %v2096_v4  ;;  %v2509_v4 = vld [vmem:[#allocation4 + $0x120] sm:$0xff] }
 0x1b0   :  { %1139 = vmatpush.msra.mxu2 %v2495_v49  ;;  %1159 = vmatpush.msra.mxu3 %v2498_v46 }
 0x1b1   :  { %997 = vmatpush.msra.mxu1 %v2103_v8  ;;  %v2516_v8 = vld [vmem:[#allocation4 + $0x108] sm:$0xff] }
 0x1b2   :  { %1140 = vmatpush.msra.mxu2 %v2502_v63  ;;  %1160 = vmatpush.msra.mxu3 %v2505_v5 }
 0x1b3   :  { %998 = vmatpush.msra.mxu1 %v2115_v14  ;;  %v2526_v14 = vld [vmem:[#allocation4 + $0xd8] sm:$0xff] }
 0x1b4   :  { %1141 = vmatpush.msra.mxu2 %v2509_v4  ;;  %1161 = vmatpush.msra.mxu3 %v2512_v24 }
 0x1b5   :  { %999 = vmatpush.msra.mxu1 %v2123_v19  ;;  %v2531_v19 = vld [vmem:[#allocation4 + $0xc0] sm:$0xff] }
 0x1b6   :  { %1142 = vmatpush.msra.mxu2 %v2516_v8  ;;  %1162 = vmatpush.msra.mxu3 %v2101_v7  ;;  %v2536_v7 = vld [vmem:[#allocation4 + $0xa8] sm:$0xff] }
 0x1b7   :  { %1000 = vmatpush.msra.mxu1 %v2129_v23  ;;  %v2556_v23 = vld [vmem:[#allocation4 + $0x48] sm:$0xff] }
 0x1b8   :  { %1143 = vmatpush.msra.mxu2 %v2521_v54  ;;  %1163 = vmatpush.msra.mxu3 %v2113_v13  ;;  %v2541_v13 = vld [vmem:[#allocation4 + $0x90] sm:$0xff]  ;;  %3146 = vst [vmem:[#allocation13_spill] sm:$0xff] %v2556_v23 }
 0x1b9   :  { %1001 = vmatpush.msra.mxu1 %v2136_v27  ;;  %3143 = vst [vmem:[#allocation12_spill] sm:$0xff] %v2541_v13  ;;  %v2566_v27 = vld [vmem:[#allocation4 + $0x18] sm:$0xff] }
 0x1ba   :  { %1144 = vmatpush.msra.mxu2 %v2526_v14  ;;  %1164 = vmatpush.msra.mxu3 %v2121_v17  ;;  %v2546_v17 = vld [vmem:[#allocation4 + $0x78] sm:$0xff]  ;;  %3148 = vst [vmem:[#allocation9_spill] sm:$0xff] %v2566_v27 }
 0x1bb   :  { %1002 = vmatpush.msra.mxu1 %v2143_v30  ;;  %3144 = vst [vmem:[#allocation16_spill] sm:$0xff] %v2546_v17 }
 0x1bc   :  { %1145 = vmatpush.msra.mxu2 %v2531_v19  ;;  %1165 = vmatpush.msra.mxu3 %v2127_v22  ;;  %v2551_v22 = vld [vmem:[#allocation4 + $0x60] sm:$0xff] }
 0x1bd   :  { %1003 = vmatpush.msra.mxu1 %v2150_v32  ;;  %3145 = vst [vmem:[#allocation8_spill] sm:$0xff] %v2551_v22 }
 0x1be   :  { %1146 = vmatpush.msra.mxu2 %v2536_v7  ;;  %1166 = vmatpush.msra.mxu3 %v2134_v26  ;;  %v2561_v26 = vld [vmem:[#allocation4 + $0x30] sm:$0xff] }
 0x1bf   :  { %1004 = vmatpush.msra.mxu1 %v2158_v35  ;;  %3147 = vst [vmem:[#allocation18_spill] sm:$0xff] %v2561_v26 }
 0x1c0   :  { %1147 = vmatpush.msra.mxu2 %v2541_v13  ;;  %1167 = vmatpush.msra.mxu3 %v2141_v28  ;;  %v2571_v28 = vld [vmem:[#allocation4] sm:$0xff] }
 0x1c1   :  { %1005 = vmatpush.msra.mxu1 %v2166_v37  ;;  %3149 = vst [vmem:[#allocation14_spill] sm:$0xff] %v2571_v28 }
 0x1c2   :  { %1148 = vmatpush.msra.mxu2 %v2546_v17  ;;  %1168 = vmatpush.msra.mxu3 %v2148_v31 }
 0x1c3   :  { %1006 = vmatpush.msra.mxu1 %v2174_v40 }
 0x1c4   :  { %1149 = vmatpush.msra.mxu2 %v2551_v22  ;;  %1169 = vmatpush.msra.mxu3 %v3122_v1 }
 0x1c5   :  { %1007 = vmatpush.msra.mxu1 %v3123_v3 }
 0x1c6   :  { %1150 = vmatpush.msra.mxu2 %v2556_v23  ;;  %1170 = vmatpush.msra.mxu3 %v3125_v9 }
 0x1c7   :  { %1008 = vmatpush.msra.mxu1 %v3126_v12  ;;  %v3150_v12 = vld [vmem:[#allocation24_spill] sm:$0xff] }
 0x1c8   :  { %1151 = vmatpush.msra.mxu2 %v2561_v26  ;;  %1171 = vmatpush.msra.mxu3 %v3128_v18 }
 0x1c9   :  { %1009 = vmatpush.msra.mxu1 %v3129_v21 }
 0x1ca   :  { %1152 = vmatpush.msra.mxu2 %v2566_v27  ;;  %1172 = vmatpush.msra.mxu3 %v3131_v29 }
 0x1cb   :  { %1010 = vmatpush.msra.mxu1 %v3132_v34  ;;  %v3151_v34 = vld [vmem:[#allocation25_spill] sm:$0xff] }
 0x1cc   :  { %1153 = vmatpush.msra.mxu2 %v2571_v28  ;;  %1173 = vmatpush.msra.mxu3 %v3134_v55 }
 0x229   :  { %v606_v30 = vpop.f32.mrf.mxu1 }
 0x22a   :  { %v607_v31 = vadd.f32 %v606_v30, %v3135_v62 }
 0x22c   :  { %v650_v32 = vrot.slane %v607_v31, 6  ;;  %v651_v35 = vrot.slane %v607_v31, 7 }
 0x22e   :  { %v654_v37 = vadd.f32 %v650_v32, %v3139_v39  ;;  %v655_v40 = vadd.f32 %v651_v35, %v3137_v43 }
 0x22f   :  { %v626_v1 = vpop.f32.mrf.mxu2 }
 0x230   :  { %v1695_v3 = vmul.f32 -1.442695, %v654_v37  ;;  %v1696_v9 = vmul.f32 -1.442695, %v655_v40  ;;  %v627_v18 = vadd.f32 %v626_v1, %v3150_v12  ;;  %v646_v20 = vpop.f32.mrf.mxu3 }
 0x231   :  { %v647_v48 = vadd.f32 %v646_v20, %v3153_v51 }
 0x232   :  { %1764 = vpow2.f32 %v1695_v3  ;;  %v695_v21 = vrot.slane %v627_v18, 6  ;;  %v696_v29 = vrot.slane %v627_v18, 7 }
 0x233   :  { %1766 = vpow2.f32 %v1696_v9  ;;  %v740_v40 = vrot.slane %v647_v48, 6  ;;  %v741_v9 = vrot.slane %v647_v48, 7 }
 0x234   :  { %v699_v55 = vadd.f32 %v695_v21, %v3151_v34  ;;  %v700_v25 = vadd.f32 %v696_v29, %v3152_v11 }
 0x236   :  { %v1697_v42 = vmul.f32 -1.442695, %v699_v55  ;;  %v1698_v47 = vmul.f32 -1.442695, %v700_v25 }
 0x238   :  { %v1765_v59 = vpop.eup %1764  ;;  %1768 = vpow2.f32 %v1697_v42 }
 0x239   :  { %v1767_v50 = vpop.eup %1766  ;;  %v662_v6 = vadd.f32 1.0, %v1765_v59  ;;  %1770 = vpow2.f32 %v1698_v47 }
 0x23a   :  { %v663_v53 = vadd.f32 1.0, %v1767_v50 }
 0x23b   :  { %1772 = vrcp.f32 %v662_v6  ;;  %v673_v10 = vand.u32 2147483647, %v662_v6  ;;  %v675_v30 = vand.u32 2147483648, %v662_v6  ;;  %vm669_vm3 = vweird.f32 %v662_v6 }
 0x23c   :  { %1774 = vrcp.f32 %v663_v53  ;;  %v688_v32 = vand.u32 2147483647, %v663_v53  ;;  %v690_v37 = vand.u32 2147483648, %v663_v53  ;;  %vm684_vm6 = vweird.f32 %v663_v53 }
 0x23d   :  { %vm674_vm5 = vcmp.eq.f32.partialorder %v673_v10, 8.507059e+37  ;;  %v676_v25 = vor.u32 1.1754944e-38, %v675_v30 }
 0x23e   :  { %v1769_v33 = vpop.eup %1768  ;;  %vm689_vm8 = vcmp.eq.f32.partialorder %v688_v32, 8.507059e+37 }
 0x23f   :  { %v1771_v58 = vpop.eup %1770  ;;  %v2581_v56 = vadd.f32 1.0, %v1769_v33 }
 0x240   :  { %v2583_v15 = vadd.f32 1.0, %v1771_v58 }
 0x241   :  { %v1773_v38 = vpop.eup %1772  ;;  %1776 = vrcp.f32 %v2581_v56  ;;  %v720_v59 = vand.u32 2147483648, %v2581_v56  ;;  %v718_v48 = vand.u32 2147483647, %v2581_v56  ;;  %vm714_vm12 = vweird.f32 %v2581_v56 }
 0x242   :  { %v1775_v44 = vpop.eup %1774  ;;  %1778 = vrcp.f32 %v2583_v15  ;;  %v665_v41 = vmul.f32 %v1773_v38, %v662_v6  ;;  %vm670_vm2 = vweird.f32 %v1773_v38  ;;  %v691_v6 = vor.u32 1.1754944e-38, %v690_v37 }
 0x243   :  { %v680_v36 = vmul.f32 %v1775_v44, %v663_v53  ;;  %vm685_vm4 = vweird.f32 %v1775_v44  ;;  %vm671_vm7 = vmor %vm669_vm3, %vm670_vm2  ;;  %v735_v10 = vand.u32 2147483648, %v2583_v15  ;;  %vm729_vm14 = vweird.f32 %v2583_v15 }
 0x244   :  { %v666_v57 = vsub.f32 1.0, %v665_v41  ;;  %vm686_vm9 = vmor %vm684_vm6, %vm685_vm4  ;;  %v721_v37 = vor.u32 1.1754944e-38, %v720_v59  ;;  %vm719_vm1 = vcmp.eq.f32.partialorder %v718_v48, 8.507059e+37 }
 0x245   :  { %v681_v31 = vsub.f32 1.0, %v680_v36 }
 0x246   :  { %v667_v35 = vmul.f32 %v1773_v38, %v666_v57 }
 0x247   :  { %v1777_v1 = vpop.eup %1776  ;;  %v682_v3 = vmul.f32 %v1775_v44, %v681_v31  ;;  %v733_v31 = vand.u32 2147483647, %v2583_v15 }
 0x248   :  { %v1779_v18 = vpop.eup %1778  ;;  %v710_v21 = vmul.f32 %v1777_v1, %v2581_v56  ;;  %v668_v29 = vadd.f32 %v1773_v38, %v667_v35  ;;  %vm715_vm10 = vweird.f32 %v1777_v1 }
 0x249   :  { %v725_v55 = vmul.f32 %v1779_v18, %v2583_v15  ;;  %v683_v42 = vadd.f32 %v1775_v44, %v682_v3  ;;  %vm730_vm11 = vweird.f32 %v1779_v18  ;;  %vm716_vm13 = vmor %vm714_vm12, %vm715_vm10  ;;  %v736_v3 = vor.u32 1.1754944e-38, %v735_v10  ;;  %v2638_v10 = vld [vmem:[#allocation4 + $0x130] sm:$0xff] }
 0x24a   :  { %v711_v47 = vsub.f32 1.0, %v710_v21  ;;  %v672_v50 = vsel %vm671_vm7, %v1773_v38, %v668_v29  ;;  %vm731_vm15 = vmor %vm729_vm14, %vm730_vm11  ;;  %vm734_vm2 = vcmp.eq.f32.partialorder %v733_v31, 8.507059e+37  ;;  %v755_v15 = vrot.slane %v2465_v60, 7  ;;  %v2650_v31 = vld [vmem:[#allocation4 + $0x100] sm:$0xff] }
 0x24b   :  { %v726_v33 = vsub.f32 1.0, %v725_v55  ;;  %v677_v58 = vsel %vm674_vm5, %v676_v25, %v672_v50  ;;  %v687_v20 = vsel %vm686_vm9, %v1775_v44, %v683_v42  ;;  %v754_v55 = vrot.slane %v2467_v0, 7  ;;  %v2611_v0 = vld [vmem:[%s3019_s0 + $0x8] sm:$0xff] }
 0x24c   :  { %v712_v41 = vmul.f32 %v1777_v1, %v711_v47  ;;  %v692_v53 = vsel %vm689_vm8, %v691_v6, %v687_v20  ;;  %v744_v36 = vmul.f32 %v740_v40, %v677_v58 }
 0x24d   :  { %v727_v57 = vmul.f32 %v1779_v18, %v726_v33  ;;  %v745_v30 = vmul.f32 %v741_v9, %v692_v53  ;;  %v2623_v53 = vld [vmem:[#allocation4 + $0x178] sm:$0xff] }
 0x24e   :  { %v713_v38 = vadd.f32 %v1777_v1, %v712_v41  ;;  %v746_v32 = vadd.f32 %v744_v36, %v3141_v2  ;;  %v2628_v36 = vld [vmem:[#allocation4 + $0x160] sm:$0xff] }
 0x24f   :  { %v728_v44 = vadd.f32 %v1779_v18, %v727_v57  ;;  %v747_v35 = vadd.f32 %v745_v30, %v2366_v52  ;;  %v2633_v57 = vld [vmem:[#allocation4 + $0x148] sm:$0xff]  ;;  %v2643_v30 = vld [vmem:[#allocation4 + $0x118] sm:$0xff] }
 0x250   :  { %v717_v40 = vsel %vm716_vm13, %v1777_v1, %v713_v38  ;;  %1780 = vtanh.f32 %v746_v32  ;;  %v2647_v38 = vld [vmem:[#allocation4 + $0x110] sm:$0xff]  ;;  %v2654_v32 = vld [vmem:[#allocation4 + $0xf8] sm:$0xff] }
 0x251   :  { %v732_v9 = vsel %vm731_vm15, %v1779_v18, %v728_v44  ;;  %1782 = vtanh.f32 %v747_v35  ;;  %v722_v56 = vsel %vm719_vm1, %v721_v37, %v717_v40  ;;  %v2657_v44 = vld [vmem:[#allocation4 + $0xe8] sm:$0xff]  ;;  %v2661_v35 = vld [vmem:[#allocation4 + $0xe0] sm:$0xff]  ;;  %v2664_v37 = vld [vmem:[#allocation4 + $0xd0] sm:$0xff] }
 0x252   :  { %v737_v21 = vsel %vm734_vm2, %v736_v3, %v732_v9  ;;  %v750_v29 = vsub.f32 1.0, %v722_v56  ;;  %v758_v59 = vmul.f32 %v754_v55, %v722_v56  ;;  %v2668_v40 = vld [vmem:[#allocation4 + $0xc8] sm:$0xff]  ;;  %v2671_v3 = vld [vmem:[#allocation4 + $0xb8] sm:$0xff]  ;;  %v2675_v9 = vld [vmem:[#allocation4 + $0xb0] sm:$0xff] }
 0x253   :  { %v751_v42 = vsub.f32 1.0, %v737_v21  ;;  %v759_v1 = vmul.f32 %v755_v15, %v737_v21  ;;  %v2678_v56 = vld [vmem:[#allocation4 + $0xa0] sm:$0xff]  ;;  %v2682_v21 = vld [vmem:[#allocation4 + $0x98] sm:$0xff]  ;;  %v2696_v15 = vld [vmem:[#allocation4 + $0x68] sm:$0xff] }
 0x254   :  { %3154 = vst [vmem:[#allocation19_spill] sm:$0xff] %v2682_v21  ;;  %v2689_v55 = vld [vmem:[#allocation4 + $0x80] sm:$0xff] }
 0x255   :  { %3156 = vst [vmem:[#allocation15_spill] sm:$0xff] %v2689_v55 }
 0x256   :  { %v1781_v25 = vpop.eup %1780  ;;  %3158 = vst [vmem:[#allocation11_spill] sm:$0xff] %v2696_v15 }
 0x257   :  { %v1783_v47 = vpop.eup %1782  ;;  %v752_v50 = vmul.f32 %v1781_v25, %v750_v29  ;;  %v2685_v29 = vld [vmem:[#allocation4 + $0x88] sm:$0xff]  ;;  %v2692_v25 = vld [vmem:[#allocation4 + $0x70] sm:$0xff] }
 0x258   :  { %v753_v6 = vmul.f32 %v1783_v47, %v751_v42  ;;  %3155 = vst [vmem:[#allocation10_spill] sm:$0xff] %v2685_v29  ;;  %v2699_v42 = vld [vmem:[#allocation4 + $0x58] sm:$0xff]  ;;  %v2703_v47 = vld [vmem:[#allocation4 + $0x50] sm:$0xff] }
 0x259   :  { %v2601_v33 = vadd.f32 %v758_v59, %v752_v50  ;;  %3157 = vst [vmem:[#allocation20_spill] sm:$0xff] %v2692_v25  ;;  %v2706_v50 = vld [vmem:[#allocation4 + $0x40] sm:$0xff]  ;;  %v2710_v59 = vld [vmem:[#allocation4 + $0x38] sm:$0xff] }
 0x25a   :  { %v2603_v58 = vadd.f32 %v759_v1, %v753_v6  ;;  %3159 = vst [vmem:[#allocation17_spill] sm:$0xff] %v2699_v42  ;;  %v2713_v6 = vld [vmem:[#allocation4 + $0x28] sm:$0xff]  ;;  %v2717_v1 = vld [vmem:[#allocation4 + $0x20] sm:$0xff] }
 0x25b   :  { %v762_v18 = vadd.f32 %v2474_v61, %v2601_v33  ;;  %v768_v20 = vrot.slane %v2601_v33, 2  ;;  %3160 = vst [vmem:[#allocation28_spill] sm:$0xff] %v2703_v47 }
 0x25c   :  { %v763_v60 = vadd.f32 %v2611_v0, %v2603_v58  ;;  %v769_v48 = vrot.slane %v2603_v58, 1  ;;  %3161 = vst [vmem:[#allocation29_spill] sm:$0xff] %v2706_v50 }
 0x25d   :  { %764 = vst [vmem:[%s3024_s5] sm:$0x4] %v762_v18  ;;  %v2720_v18 = vld [vmem:[#allocation4 + $0x10] sm:$0xff] }
 0x25e   :  { %765 = vst [vmem:[%s3024_s5 + $0x8] sm:$0x4] %v763_v60  ;;  %v770_v41 = vsel %vm408_vm0, %v769_v48, %v768_v20  ;;  %v2724_v20 = vld [vmem:[#allocation4 + $0x8] sm:$0xff] }
 0x25f   :  { %788 = vmatmul.f32.vlgmr.msrb.gmra.mxu0 %v770_v41  ;;  %808 = vmatmul.f32.vlgmr.msrb.gmra.mxu1 %v770_v41  ;;  %3162 = vst [vmem:[#allocation30_spill] sm:$0xff] %v2710_v59 }
 0x260   :  { %828 = vmatmul.f32.vlgmr.msrb.gmra.mxu2 %v770_v41  ;;  %1178 = vmatpush.msrb.mxu0 %v2623_v53  ;;  %3163 = vst [vmem:[#allocation31_spill] sm:$0xff] %v2713_v6 }
 0x261   :  { %1321 = vmatpush.msrb.mxu1 %v2488_v45  ;;  %1341 = vmatpush.msrb.mxu2 %v2491_v16  ;;  %3164 = vst [vmem:[#allocation32_spill] sm:$0xff] %v2717_v1 }
 0x262   :  { %1179 = vmatpush.msrb.mxu0 %v2628_v36  ;;  %3165 = vst [vmem:[#allocation33_spill] sm:$0xff] %v2720_v18 }
 0x263   :  { %1322 = vmatpush.msrb.mxu1 %v2495_v49  ;;  %1342 = vmatpush.msrb.mxu2 %v2498_v46  ;;  %3166 = vst [vmem:[#allocation34_spill] sm:$0xff] %v2724_v20 }
 0x264   :  { %1180 = vmatpush.msrb.mxu0 %v2633_v57 }
 0x265   :  { %1323 = vmatpush.msrb.mxu1 %v2502_v63  ;;  %1343 = vmatpush.msrb.mxu2 %v2505_v5 }
 0x266   :  { %1181 = vmatpush.msrb.mxu0 %v2638_v10 }
 0x267   :  { %1324 = vmatpush.msrb.mxu1 %v2509_v4  ;;  %1344 = vmatpush.msrb.mxu2 %v2512_v24 }
 0x268   :  { %1182 = vmatpush.msrb.mxu0 %v2643_v30 }
 0x269   :  { %1325 = vmatpush.msrb.mxu1 %v2516_v8  ;;  %1345 = vmatpush.msrb.mxu2 %v2647_v38 }
 0x26a   :  { %1183 = vmatpush.msrb.mxu0 %v2650_v31 }
 0x26b   :  { %1326 = vmatpush.msrb.mxu1 %v2521_v54  ;;  %1346 = vmatpush.msrb.mxu2 %v2654_v32 }
 0x26c   :  { %1184 = vmatpush.msrb.mxu0 %v2657_v44 }
 0x26d   :  { %1327 = vmatpush.msrb.mxu1 %v2526_v14  ;;  %1347 = vmatpush.msrb.mxu2 %v2661_v35 }
 0x26e   :  { %1185 = vmatpush.msrb.mxu0 %v2664_v37 }
 0x26f   :  { %1328 = vmatpush.msrb.mxu1 %v2531_v19  ;;  %1348 = vmatpush.msrb.mxu2 %v2668_v40 }
 0x270   :  { %1186 = vmatpush.msrb.mxu0 %v2671_v3 }
 0x271   :  { %1329 = vmatpush.msrb.mxu1 %v2536_v7  ;;  %1349 = vmatpush.msrb.mxu2 %v2675_v9 }
 0x272   :  { %1187 = vmatpush.msrb.mxu0 %v2678_v56 }
 0x273   :  { %1330 = vmatpush.msrb.mxu1 %v2541_v13  ;;  %1350 = vmatpush.msrb.mxu2 %v2682_v21 }
 0x274   :  { %1188 = vmatpush.msrb.mxu0 %v2685_v29 }
 0x275   :  { %1331 = vmatpush.msrb.mxu1 %v2546_v17  ;;  %1351 = vmatpush.msrb.mxu2 %v2689_v55 }
 0x276   :  { %1189 = vmatpush.msrb.mxu0 %v2692_v25 }
 0x277   :  { %1332 = vmatpush.msrb.mxu1 %v2551_v22  ;;  %1352 = vmatpush.msrb.mxu2 %v2696_v15 }
 0x278   :  { %1190 = vmatpush.msrb.mxu0 %v2699_v42 }
 0x279   :  { %1333 = vmatpush.msrb.mxu1 %v2556_v23  ;;  %1353 = vmatpush.msrb.mxu2 %v2703_v47 }
 0x27a   :  { %1191 = vmatpush.msrb.mxu0 %v2706_v50 }
 0x27b   :  { %1334 = vmatpush.msrb.mxu1 %v2561_v26  ;;  %1354 = vmatpush.msrb.mxu2 %v2710_v59 }
 0x27c   :  { %1192 = vmatpush.msrb.mxu0 %v2713_v6 }
 0x27d   :  { %1335 = vmatpush.msrb.mxu1 %v2566_v27  ;;  %1355 = vmatpush.msrb.mxu2 %v2717_v1 }
 0x27e   :  { %1193 = vmatpush.msrb.mxu0 %v2720_v18 }
 0x27f   :  { %1336 = vmatpush.msrb.mxu1 %v2571_v28  ;;  %1356 = vmatpush.msrb.mxu2 %v2724_v20 }
 0x2dc   :  { %v789_v60 = vpop.f32.mrf.mxu0  ;;  %v809_v48 = vpop.f32.mrf.mxu1 }
 0x2dd   :  { %v790_v41 = vadd.f32 %v789_v60, %v3135_v62  ;;  %v810_v27 = vadd.f32 %v809_v48, %v3150_v12 }
 0x2df   :  { %v833_v6 = vrot.slane %v790_v41, 5  ;;  %v834_v59 = vrot.slane %v790_v41, 6  ;;  %v878_v26 = vrot.slane %v810_v27, 5  ;;  %v879_v1 = vrot.slane %v810_v27, 6 }
 0x2e1   :  { %v837_v50 = vadd.f32 %v833_v6, %v3139_v39  ;;  %v838_v18 = vadd.f32 %v834_v59, %v3137_v43  ;;  %v882_v28 = vadd.f32 %v878_v26, %v3151_v34  ;;  %v883_v47 = vadd.f32 %v879_v1, %v3152_v11 }
 0x2e3   :  { %v1699_v23 = vmul.f32 -1.442695, %v837_v50  ;;  %v1700_v20 = vmul.f32 -1.442695, %v838_v18  ;;  %v1701_v42 = vmul.f32 -1.442695, %v882_v28  ;;  %v829_v28 = vpop.f32.mrf.mxu2 }
 0x2e4   :  { %v1702_v15 = vmul.f32 -1.442695, %v883_v47 }
 0x2e5   :  { %1784 = vpow2.f32 %v1699_v23  ;;  %v830_v23 = vadd.f32 %v829_v28, %v3153_v51 }
 0x2e6   :  { %1786 = vpow2.f32 %v1700_v20 }
 0x2e7   :  { %1788 = vpow2.f32 %v1701_v42  ;;  %v924_v25 = vrot.slane %v830_v23, 6 }
 0x2e8   :  { %1790 = vpow2.f32 %v1702_v15 }
 0x2eb   :  { %v1785_v60 = vpop.eup %1784 }
 0x2ec   :  { %v1787_v48 = vpop.eup %1786  ;;  %v845_v41 = vadd.f32 1.0, %v1785_v60 }
 0x2ed   :  { %v1789_v27 = vpop.eup %1788  ;;  %v846_v62 = vadd.f32 1.0, %v1787_v48 }
 0x2ee   :  { %v1791_v6 = vpop.eup %1790  ;;  %1792 = vrcp.f32 %v845_v41  ;;  %v2733_v59 = vadd.f32 1.0, %v1789_v27  ;;  %v856_v48 = vand.u32 2147483647, %v845_v41  ;;  %v923_v27 = vrot.slane %v830_v23, 5 }
 0x2ef   :  { %1794 = vrcp.f32 %v846_v62  ;;  %v2735_v26 = vadd.f32 1.0, %v1791_v6  ;;  %v858_v43 = vand.u32 2147483648, %v845_v41  ;;  %v871_v11 = vand.u32 2147483647, %v846_v62 }
 0x2f0   :  { %1796 = vrcp.f32 %v2733_v59  ;;  %v873_v28 = vand.u32 2147483648, %v846_v62  ;;  %vm852_vm5 = vweird.f32 %v845_v41  ;;  %vm867_vm6 = vweird.f32 %v846_v62 }
 0x2f1   :  { %1798 = vrcp.f32 %v2735_v26  ;;  %v859_v21 = vor.u32 1.1754944e-38, %v858_v43  ;;  %vm857_vm8 = vcmp.eq.f32.partialorder %v856_v48, 8.507059e+37  ;;  %vm872_vm10 = vcmp.eq.f32.partialorder %v871_v11, 8.507059e+37 }
 0x2f2   :  { %vm897_vm13 = vweird.f32 %v2733_v59  ;;  %v901_v43 = vand.u32 2147483647, %v2733_v59  ;;  %vm912_vm15 = vweird.f32 %v2735_v26  ;;  %v938_v48 = vrot.slane %v2603_v58, 7 }
 0x2f4   :  { %v1793_v15 = vpop.eup %1792  ;;  %vm902_vm2 = vcmp.eq.f32.partialorder %v901_v43, 8.507059e+37 }
 0x2f5   :  { %v1795_v42 = vpop.eup %1794  ;;  %v848_v47 = vmul.f32 %v1793_v15, %v845_v41  ;;  %vm853_vm3 = vweird.f32 %v1793_v15 }
 0x2f6   :  { %v1797_v50 = vpop.eup %1796  ;;  %v863_v1 = vmul.f32 %v1795_v42, %v846_v62  ;;  %vm868_vm4 = vweird.f32 %v1795_v42  ;;  %vm854_vm7 = vmor %vm852_vm5, %vm853_vm3  ;;  %v918_v62 = vand.u32 2147483648, %v2735_v26 }
 0x2f7   :  { %v1799_v18 = vpop.eup %1798  ;;  %v893_v20 = vmul.f32 %v1797_v50, %v2733_v59  ;;  %v849_v60 = vsub.f32 1.0, %v848_v47  ;;  %v903_v47 = vand.u32 2147483648, %v2733_v59  ;;  %vm869_vm9 = vmor %vm867_vm6, %vm868_vm4  ;;  %vm898_vm11 = vweird.f32 %v1797_v50 }
 0x2f8   :  { %v908_v6 = vmul.f32 %v1799_v18, %v2735_v26  ;;  %v864_v39 = vsub.f32 1.0, %v863_v1  ;;  %vm913_vm12 = vweird.f32 %v1799_v18  ;;  %vm899_vm14 = vmor %vm897_vm13, %vm898_vm11 }
 0x2f9   :  { %v894_v34 = vsub.f32 1.0, %v893_v20  ;;  %v850_v12 = vmul.f32 %v1793_v15, %v849_v60  ;;  %v874_v20 = vor.u32 1.1754944e-38, %v873_v28  ;;  %vm914_vm1 = vmor %vm912_vm15, %vm913_vm12 }
 0x2fa   :  { %v909_v51 = vsub.f32 1.0, %v908_v6  ;;  %v865_v22 = vmul.f32 %v1795_v42, %v864_v39 }
 0x2fb   :  { %v895_v55 = vmul.f32 %v1797_v50, %v894_v34  ;;  %v851_v17 = vadd.f32 %v1793_v15, %v850_v12 }
 0x2fc   :  { %v910_v29 = vmul.f32 %v1799_v18, %v909_v51  ;;  %v866_v13 = vadd.f32 %v1795_v42, %v865_v22 }
 0x2fd   :  { %v855_v1 = vsel %vm854_vm7, %v1793_v15, %v851_v17  ;;  %v896_v6 = vadd.f32 %v1797_v50, %v895_v55  ;;  %v916_v17 = vand.u32 2147483647, %v2735_v26  ;;  %v919_v55 = vor.u32 1.1754944e-38, %v918_v62  ;;  %v3187_v62 = vld [vmem:[#allocation24_spill] sm:$0xff] }
 0x2fe   :  { %v860_v60 = vsel %vm857_vm8, %v859_v21, %v855_v1  ;;  %v870_v39 = vsel %vm869_vm9, %v1795_v42, %v866_v13  ;;  %v911_v12 = vadd.f32 %v1799_v18, %v910_v29  ;;  %v904_v21 = vor.u32 1.1754944e-38, %v903_v47 }
 0x2ff   :  { %v875_v34 = vsel %vm872_vm10, %v874_v20, %v870_v39  ;;  %v927_v41 = vmul.f32 %v923_v27, %v860_v60  ;;  %v900_v13 = vsel %vm899_vm14, %v1797_v50, %v896_v6  ;;  %vm917_vm3 = vcmp.eq.f32.partialorder %v916_v17, 8.507059e+37 }
 0x300   :  { %v928_v22 = vmul.f32 %v924_v25, %v875_v34  ;;  %v915_v29 = vsel %vm914_vm1, %v1799_v18, %v911_v12  ;;  %v905_v23 = vsel %vm902_vm2, %v904_v21, %v900_v13  ;;  %v937_v15 = vrot.slane %v2601_v33, 7  ;;  %v3185_v34 = vld [vmem:[#allocation14_spill] sm:$0xff] }
 0x301   :  { %v929_v11 = vadd.f32 %v927_v41, %v3141_v2  ;;  %v920_v25 = vsel %vm917_vm3, %v919_v55, %v915_v29  ;;  %v933_v59 = vsub.f32 1.0, %v905_v23  ;;  %v3186_v12 = vld [vmem:[#allocation34_spill] sm:$0xff] }
 0x302   :  { %v930_v51 = vadd.f32 %v928_v22, %v2366_v52  ;;  %v934_v26 = vsub.f32 1.0, %v920_v25  ;;  %v941_v28 = vmul.f32 %v937_v15, %v905_v23  ;;  %v942_v47 = vmul.f32 %v938_v48, %v920_v25  ;;  %v3190_v25 = vld [vmem:[#allocation21_spill] sm:$0xff] }
 0x303   :  { %1800 = vtanh.f32 %v929_v11  ;;  %v3188_v11 = vld [vmem:[#allocation25_spill] sm:$0xff] }
 0x304   :  { %1802 = vtanh.f32 %v930_v51  ;;  %v3189_v51 = vld [vmem:[#allocation26_spill] sm:$0xff] }
 0x309   :  { %v1801_v42 = vpop.eup %1800 }
 0x30a   :  { %v1803_v27 = vpop.eup %1802  ;;  %v935_v50 = vmul.f32 %v1801_v42, %v933_v59 }
 0x30b   :  { %v936_v1 = vmul.f32 %v1803_v27, %v934_v26  ;;  %v3191_v26 = vld [vmem:[#allocation22_spill] sm:$0xff]  ;;  %v3192_v27 = vld [vmem:[#allocation23_spill] sm:$0xff] }
 0x30c   :  { %v2752_v18 = vadd.f32 %v941_v28, %v935_v50 }
 0x30d   :  { %v2754_v20 = vadd.f32 %v942_v47, %v936_v1 }
 0x30e   :  { %v945_v60 = vadd.f32 %v2474_v61, %v2752_v18  ;;  %v951_v39 = vrot.slane %v2752_v18, 3 }
 0x30f   :  { %v946_v33 = vadd.f32 %v2611_v0, %v2754_v20  ;;  %v952_v6 = vrot.slane %v2754_v20, 2 }
 0x310   :  { %947 = vst [vmem:[%s3024_s5] sm:$0x8] %v945_v60 }
 0x311   :  { %948 = vst [vmem:[%s3024_s5 + $0x8] sm:$0x8] %v946_v33  ;;  %v953_v58 = vsel %vm408_vm0, %v952_v6, %v951_v39 }
 0x312   :  { %971 = vmatmul.f32.vlgmr.msrb.gmra.mxu3 %v953_v58  ;;  %991 = vmatmul.f32.vlgmr.msra.gmra.mxu0 %v953_v58 }
 0x313   :  { %1011 = vmatmul.f32.vlgmr.msra.gmra.mxu1 %v953_v58  ;;  %1361 = vmatpush.msrb.mxu3 %v2623_v53 }
 0x314   :  { %1504 = vmatpush.msra.mxu0 %v2488_v45  ;;  %1524 = vmatpush.msra.mxu1 %v2491_v16  ;;  %v3167_v45 = vld [vmem:[#allocation12_spill] sm:$0xff]  ;;  %v3168_v16 = vld [vmem:[#allocation19_spill] sm:$0xff] }
 0x315   :  { %1362 = vmatpush.msrb.mxu3 %v2628_v36 }
 0x316   :  { %1505 = vmatpush.msra.mxu0 %v2495_v49  ;;  %1525 = vmatpush.msra.mxu1 %v2498_v46  ;;  %v3169_v49 = vld [vmem:[#allocation10_spill] sm:$0xff]  ;;  %v3170_v46 = vld [vmem:[#allocation16_spill] sm:$0xff] }
 0x317   :  { %1363 = vmatpush.msrb.mxu3 %v2633_v57 }
 0x318   :  { %1506 = vmatpush.msra.mxu0 %v2502_v63  ;;  %1526 = vmatpush.msra.mxu1 %v2505_v5  ;;  %v3171_v63 = vld [vmem:[#allocation15_spill] sm:$0xff]  ;;  %v3172_v5 = vld [vmem:[#allocation20_spill] sm:$0xff] }
 0x319   :  { %1364 = vmatpush.msrb.mxu3 %v2638_v10 }
 0x31a   :  { %1507 = vmatpush.msra.mxu0 %v2509_v4  ;;  %1527 = vmatpush.msra.mxu1 %v2512_v24  ;;  %v3173_v4 = vld [vmem:[#allocation8_spill] sm:$0xff]  ;;  %v3174_v24 = vld [vmem:[#allocation11_spill] sm:$0xff] }
 0x31b   :  { %1365 = vmatpush.msrb.mxu3 %v2643_v30 }
 0x31c   :  { %1508 = vmatpush.msra.mxu0 %v2516_v8  ;;  %1528 = vmatpush.msra.mxu1 %v2647_v38  ;;  %v3175_v8 = vld [vmem:[#allocation17_spill] sm:$0xff]  ;;  %v3180_v38 = vld [vmem:[#allocation30_spill] sm:$0xff] }
 0x31d   :  { %1366 = vmatpush.msrb.mxu3 %v2650_v31 }
 0x31e   :  { %1509 = vmatpush.msra.mxu0 %v2521_v54  ;;  %1529 = vmatpush.msra.mxu1 %v2654_v32  ;;  %v3176_v54 = vld [vmem:[#allocation13_spill] sm:$0xff]  ;;  %v3181_v32 = vld [vmem:[#allocation31_spill] sm:$0xff] }
 0x31f   :  { %1367 = vmatpush.msrb.mxu3 %v2657_v44 }
 0x320   :  { %1510 = vmatpush.msra.mxu0 %v2526_v14  ;;  %1530 = vmatpush.msra.mxu1 %v2661_v35  ;;  %v3177_v14 = vld [vmem:[#allocation28_spill] sm:$0xff]  ;;  %v3182_v35 = vld [vmem:[#allocation9_spill] sm:$0xff] }
 0x321   :  { %1368 = vmatpush.msrb.mxu3 %v2664_v37 }
 0x322   :  { %1511 = vmatpush.msra.mxu0 %v2531_v19  ;;  %1531 = vmatpush.msra.mxu1 %v2668_v40  ;;  %v3178_v19 = vld [vmem:[#allocation29_spill] sm:$0xff]  ;;  %v3183_v40 = vld [vmem:[#allocation32_spill] sm:$0xff] }
 0x323   :  { %1369 = vmatpush.msrb.mxu3 %v2671_v3 }
 0x324   :  { %1512 = vmatpush.msra.mxu0 %v2536_v7  ;;  %1532 = vmatpush.msra.mxu1 %v2675_v9  ;;  %v3179_v7 = vld [vmem:[#allocation18_spill] sm:$0xff]  ;;  %v3184_v9 = vld [vmem:[#allocation33_spill] sm:$0xff] }
 0x325   :  { %1370 = vmatpush.msrb.mxu3 %v2678_v56 }
 0x326   :  { %1513 = vmatpush.msra.mxu0 %v3167_v45  ;;  %1533 = vmatpush.msra.mxu1 %v3168_v16 }
 0x327   :  { %1371 = vmatpush.msrb.mxu3 %v3169_v49 }
 0x328   :  { %1514 = vmatpush.msra.mxu0 %v3170_v46  ;;  %1534 = vmatpush.msra.mxu1 %v3171_v63 }
 0x329   :  { %1372 = vmatpush.msrb.mxu3 %v3172_v5 }
 0x32a   :  { %1515 = vmatpush.msra.mxu0 %v3173_v4  ;;  %1535 = vmatpush.msra.mxu1 %v3174_v24 }
 0x32b   :  { %1373 = vmatpush.msrb.mxu3 %v3175_v8 }
 0x32c   :  { %1516 = vmatpush.msra.mxu0 %v3176_v54  ;;  %1536 = vmatpush.msra.mxu1 %v3177_v14 }
 0x32d   :  { %1374 = vmatpush.msrb.mxu3 %v3178_v19 }
 0x32e   :  { %1517 = vmatpush.msra.mxu0 %v3179_v7  ;;  %1537 = vmatpush.msra.mxu1 %v3180_v38 }
 0x32f   :  { %1375 = vmatpush.msrb.mxu3 %v3181_v32 }
 0x330   :  { %1518 = vmatpush.msra.mxu0 %v3182_v35  ;;  %1538 = vmatpush.msra.mxu1 %v3183_v40  ;;  %v3193_v40 = vld [vmem:[#allocation27_spill] sm:$0xff] }
 0x331   :  { %1376 = vmatpush.msrb.mxu3 %v3184_v9 }
 0x332   :  { %1519 = vmatpush.msra.mxu0 %v3185_v34  ;;  %1539 = vmatpush.msra.mxu1 %v3186_v12 }
 0x38f   :  { %v992_v41 = vpop.f32.mrf.mxu0 }
 0x390   :  { %v993_v43 = vadd.f32 %v992_v41, %v3187_v62  ;;  %v1012_v54 = vpop.f32.mrf.mxu1 }
 0x391   :  { %v1013_v34 = vadd.f32 %v1012_v54, %v3193_v40 }
 0x392   :  { %v1061_v22 = vrot.slane %v993_v43, 4  ;;  %v1062_v17 = vrot.slane %v993_v43, 5 }
 0x394   :  { %v1065_v13 = vadd.f32 %v1061_v22, %v3188_v11  ;;  %v1066_v21 = vadd.f32 %v1062_v17, %v3189_v51 }
 0x395   :  { %v972_v29 = vpop.f32.mrf.mxu3 }
 0x396   :  { %v1705_v55 = vmul.f32 -1.442695, %v1065_v13  ;;  %v1706_v23 = vmul.f32 -1.442695, %v1066_v21  ;;  %v973_v59 = vadd.f32 %v972_v29, %v3190_v25 }
 0x398   :  { %1804 = vpow2.f32 %v1705_v55  ;;  %v1016_v15 = vrot.slane %v973_v59, 4  ;;  %v1017_v42 = vrot.slane %v973_v59, 5  ;;  %v1106_v59 = vrot.slane %v1013_v34, 4 }
 0x399   :  { %1806 = vpow2.f32 %v1706_v23 }
 0x39a   :  { %v1020_v48 = vadd.f32 %v1016_v15, %v3191_v26  ;;  %v1021_v50 = vadd.f32 %v1017_v42, %v3192_v27 }
 0x39c   :  { %v1703_v28 = vmul.f32 -1.442695, %v1020_v48  ;;  %v1704_v1 = vmul.f32 -1.442695, %v1021_v50  ;;  %v1107_v48 = vrot.slane %v1013_v34, 5 }
 0x39e   :  { %v1805_v47 = vpop.eup %1804  ;;  %1808 = vpow2.f32 %v1703_v28 }
 0x39f   :  { %v1807_v60 = vpop.eup %1806  ;;  %v2823_v39 = vadd.f32 1.0, %v1805_v47  ;;  %1810 = vpow2.f32 %v1704_v1 }
 0x3a0   :  { %v2825_v33 = vadd.f32 1.0, %v1807_v60 }
 0x3a1   :  { %1812 = vrcp.f32 %v2823_v39  ;;  %v1086_v28 = vand.u32 2147483648, %v2823_v39  ;;  %vm1080_vm14 = vweird.f32 %v2823_v39 }
 0x3a2   :  { %1814 = vrcp.f32 %v2825_v33  ;;  %vm1095_vm15 = vweird.f32 %v2825_v33 }
 0x3a4   :  { %v1809_v6 = vpop.eup %1808 }
 0x3a5   :  { %v1811_v58 = vpop.eup %1810  ;;  %v1028_v45 = vadd.f32 1.0, %v1809_v6 }
 0x3a6   :  { %v1029_v16 = vadd.f32 1.0, %v1811_v58 }
 0x3a7   :  { %1816 = vrcp.f32 %v1028_v45  ;;  %v2829_v46 = vpop.eup %1812  ;;  %v1039_v22 = vand.u32 2147483647, %v1028_v45  ;;  %v1041_v17 = vand.u32 2147483648, %v1028_v45  ;;  %vm1035_vm6 = vweird.f32 %v1028_v45 }
 0x3a8   :  { %1818 = vrcp.f32 %v1029_v16  ;;  %v2831_v63 = vpop.eup %1814  ;;  %v1076_v4 = vmul.f32 %v2829_v46, %v2823_v39  ;;  %v1054_v29 = vand.u32 2147483647, %v1029_v16  ;;  %v1056_v55 = vand.u32 2147483648, %v1029_v16 }
 0x3a9   :  { %v1091_v24 = vmul.f32 %v2831_v63, %v2825_v33  ;;  %v1042_v1 = vor.u32 1.1754944e-38, %v1041_v17  ;;  %vm1050_vm8 = vweird.f32 %v1029_v16  ;;  %vm1040_vm9 = vcmp.eq.f32.partialorder %v1039_v22, 8.507059e+37 }
 0x3aa   :  { %v1077_v35 = vsub.f32 1.0, %v1076_v4  ;;  %vm1055_vm11 = vcmp.eq.f32.partialorder %v1054_v29, 8.507059e+37  ;;  %v1057_v6 = vor.u32 1.1754944e-38, %v1056_v55  ;;  %vm1081_vm12 = vweird.f32 %v2829_v46 }
 0x3ab   :  { %v1092_v41 = vsub.f32 1.0, %v1091_v24  ;;  %vm1096_vm13 = vweird.f32 %v2831_v63  ;;  %vm1082_vm1 = vmor %vm1080_vm14, %vm1081_vm12 }
 0x3ac   :  { %v1078_v23 = vmul.f32 %v2829_v46, %v1077_v35  ;;  %v1084_v35 = vand.u32 2147483647, %v2823_v39  ;;  %vm1097_vm2 = vmor %vm1095_vm15, %vm1096_vm13 }
 0x3ad   :  { %v1817_v14 = vpop.eup %1816  ;;  %v1093_v42 = vmul.f32 %v2831_v63, %v1092_v41 }
 0x3ae   :  { %v1819_v7 = vpop.eup %1818  ;;  %v1031_v38 = vmul.f32 %v1817_v14, %v1028_v45  ;;  %vm1036_vm4 = vweird.f32 %v1817_v14  ;;  %v1079_v24 = vadd.f32 %v2829_v46, %v1078_v23  ;;  %vm1085_vm3 = vcmp.eq.f32.partialorder %v1084_v35, 8.507059e+37 }
 0x3af   :  { %v1046_v12 = vmul.f32 %v1819_v7, %v1029_v16  ;;  %vm1051_vm5 = vweird.f32 %v1819_v7  ;;  %vm1037_vm7 = vmor %vm1035_vm6, %vm1036_vm4  ;;  %v1094_v45 = vadd.f32 %v2831_v63, %v1093_v42  ;;  %v1101_v16 = vand.u32 2147483648, %v2825_v33 }
 0x3b0   :  { %v1032_v43 = vsub.f32 1.0, %v1031_v38  ;;  %vm1052_vm10 = vmor %vm1050_vm8, %vm1051_vm5 }
 0x3b1   :  { %v1047_v13 = vsub.f32 1.0, %v1046_v12  ;;  %v1083_v12 = vsel %vm1082_vm1, %v2829_v46, %v1079_v24  ;;  %v1098_v22 = vsel %vm1097_vm2, %v2831_v63, %v1094_v45  ;;  %v1102_v17 = vor.u32 1.1754944e-38, %v1101_v16 }
 0x3b2   :  { %v1033_v21 = vmul.f32 %v1817_v14, %v1032_v43  ;;  %v1087_v43 = vor.u32 1.1754944e-38, %v1086_v28  ;;  %v1121_v46 = vrot.slane %v2754_v20, 7 }
 0x3b3   :  { %v1048_v15 = vmul.f32 %v1819_v7, %v1047_v13 }
 0x3b4   :  { %v1034_v50 = vadd.f32 %v1817_v14, %v1033_v21  ;;  %v1088_v39 = vsel %vm1085_vm3, %v1087_v43, %v1083_v12 }
 0x3b5   :  { %v1049_v47 = vadd.f32 %v1819_v7, %v1048_v15  ;;  %v1116_v21 = vsub.f32 1.0, %v1088_v39 }
 0x3b6   :  { %v1038_v60 = vsel %vm1037_vm7, %v1817_v14, %v1034_v50 }
 0x3b7   :  { %v1043_v58 = vsel %vm1040_vm9, %v1042_v1, %v1038_v60  ;;  %v1053_v4 = vsel %vm1052_vm10, %v1819_v7, %v1049_v47  ;;  %v1099_v7 = vand.u32 2147483647, %v2825_v33  ;;  %v1120_v33 = vrot.slane %v2752_v18, 7 }
 0x3b8   :  { %v1058_v54 = vsel %vm1055_vm11, %v1057_v6, %v1053_v4  ;;  %v1110_v38 = vmul.f32 %v1106_v59, %v1043_v58 }
 0x3b9   :  { %v1111_v14 = vmul.f32 %v1107_v48, %v1058_v54  ;;  %vm1100_vm4 = vcmp.eq.f32.partialorder %v1099_v7, 8.507059e+37  ;;  %v1124_v15 = vmul.f32 %v1120_v33, %v1088_v39 }
 0x3ba   :  { %v1112_v34 = vadd.f32 %v1110_v38, %v3141_v2  ;;  %v1103_v13 = vsel %vm1100_vm4, %v1102_v17, %v1098_v22 }
 0x3bb   :  { %v1113_v41 = vadd.f32 %v1111_v14, %v2366_v52  ;;  %v1117_v55 = vsub.f32 1.0, %v1103_v13  ;;  %v1125_v48 = vmul.f32 %v1121_v46, %v1103_v13 }
 0x3bc   :  { %1820 = vtanh.f32 %v1112_v34 }
 0x3bd   :  { %1822 = vtanh.f32 %v1113_v41 }
 0x3c2   :  { %v1821_v29 = vpop.eup %1820 }
 0x3c3   :  { %v1823_v23 = vpop.eup %1822  ;;  %v1118_v59 = vmul.f32 %v1821_v29, %v1116_v21 }
 0x3c4   :  { %v1119_v42 = vmul.f32 %v1823_v23, %v1117_v55 }
 0x3c5   :  { %v2856_v63 = vadd.f32 %v1124_v15, %v1118_v59 }
 0x3c6   :  { %v2858_v50 = vadd.f32 %v1125_v48, %v1119_v42 }
 0x3c7   :  { %v1128_v28 = vadd.f32 %v2474_v61, %v2856_v63  ;;  %v1134_v1 = vrot.slane %v2856_v63, 4 }
 0x3c8   :  { %v1129_v18 = vadd.f32 %v2611_v0, %v2858_v50  ;;  %v1135_v47 = vrot.slane %v2858_v50, 3 }
 0x3c9   :  { %1130 = vst [vmem:[%s3024_s5] sm:$0x10] %v1128_v28 }
 0x3ca   :  { %1131 = vst [vmem:[%s3024_s5 + $0x8] sm:$0x10] %v1129_v18  ;;  %v1136_v20 = vsel %vm408_vm0, %v1135_v47, %v1134_v1 }
 0x3cb   :  { %1154 = vmatmul.f32.vlgmr.msra.gmra.mxu2 %v1136_v20  ;;  %1174 = vmatmul.f32.vlgmr.msra.gmra.mxu3 %v1136_v20 }
 0x3cc   :  { %1194 = vmatmul.f32.vlgmr.msrb.gmra.mxu0 %v1136_v20  ;;  %1544 = vmatpush.msra.mxu2 %v2623_v53 }
 0x3ce   :  { %1545 = vmatpush.msra.mxu2 %v2628_v36 }
 0x3d0   :  { %1546 = vmatpush.msra.mxu2 %v2633_v57 }
 0x3d2   :  { %1547 = vmatpush.msra.mxu2 %v2638_v10 }
 0x3d4   :  { %1548 = vmatpush.msra.mxu2 %v2643_v30 }
 0x3d6   :  { %1549 = vmatpush.msra.mxu2 %v2650_v31 }
 0x3d8   :  { %1550 = vmatpush.msra.mxu2 %v2657_v44 }
 0x3da   :  { %1551 = vmatpush.msra.mxu2 %v2664_v37 }
 0x3dc   :  { %1552 = vmatpush.msra.mxu2 %v2671_v3 }
 0x3de   :  { %1553 = vmatpush.msra.mxu2 %v2678_v56 }
 0x3e0   :  { %1554 = vmatpush.msra.mxu2 %v3169_v49 }
 0x3e2   :  { %1555 = vmatpush.msra.mxu2 %v3172_v5 }
 0x3e4   :  { %1556 = vmatpush.msra.mxu2 %v3175_v8 }
 0x3e6   :  { %1557 = vmatpush.msra.mxu2 %v3178_v19 }
 0x3e8   :  { %1558 = vmatpush.msra.mxu2 %v3181_v32 }
 0x3ea   :  { %1559 = vmatpush.msra.mxu2 %v3184_v9 }
 0x449   :  { %v1195_v54 = vpop.f32.mrf.mxu0 }
 0x44a   :  { %v1196_v16 = vadd.f32 %v1195_v54, %v3193_v40 }
 0x44c   :  { %v1289_v12 = vrot.slane %v1196_v16, 3  ;;  %v1290_v39 = vrot.slane %v1196_v16, 4 }
 0x44e   :  { %v1155_v61 = vpop.f32.mrf.mxu2  ;;  %v1175_v53 = vpop.f32.mrf.mxu3 }
 0x44f   :  { %v1156_v36 = vadd.f32 %v1155_v61, %v3190_v25  ;;  %v1176_v57 = vadd.f32 %v1175_v53, %v3187_v62 }
 0x451   :  { %v1199_v10 = vrot.slane %v1156_v36, 3  ;;  %v1200_v30 = vrot.slane %v1156_v36, 4  ;;  %v1244_v31 = vrot.slane %v1176_v57, 3  ;;  %v1245_v44 = vrot.slane %v1176_v57, 4 }
 0x453   :  { %v1203_v37 = vadd.f32 %v1199_v10, %v3191_v26  ;;  %v1204_v3 = vadd.f32 %v1200_v30, %v3192_v27  ;;  %v1248_v56 = vadd.f32 %v1244_v31, %v3188_v11  ;;  %v1249_v49 = vadd.f32 %v1245_v44, %v3189_v51 }
 0x455   :  { %v1707_v5 = vmul.f32 -1.442695, %v1203_v37  ;;  %v1708_v8 = vmul.f32 -1.442695, %v1204_v3  ;;  %v1709_v19 = vmul.f32 -1.442695, %v1248_v56 }
 0x456   :  { %v1710_v32 = vmul.f32 -1.442695, %v1249_v49 }
 0x457   :  { %1824 = vpow2.f32 %v1707_v5 }
 0x458   :  { %1826 = vpow2.f32 %v1708_v8 }
 0x459   :  { %1828 = vpow2.f32 %v1709_v19 }
 0x45a   :  { %1830 = vpow2.f32 %v1710_v32 }
 0x45d   :  { %v1825_v9 = vpop.eup %1824 }
 0x45e   :  { %v1827_v60 = vpop.eup %1826  ;;  %v1211_v6 = vadd.f32 1.0, %v1825_v9 }
 0x45f   :  { %v1829_v58 = vpop.eup %1828  ;;  %v1212_v4 = vadd.f32 1.0, %v1827_v60 }
 0x460   :  { %v1831_v24 = vpop.eup %1830  ;;  %1832 = vrcp.f32 %v1211_v6  ;;  %v2895_v38 = vadd.f32 1.0, %v1829_v58  ;;  %v1222_v43 = vand.u32 2147483647, %v1211_v6  ;;  %v1224_v22 = vand.u32 2147483648, %v1211_v6 }
 0x461   :  { %1834 = vrcp.f32 %v1212_v4  ;;  %v2897_v45 = vadd.f32 1.0, %v1831_v24  ;;  %v1237_v21 = vand.u32 2147483647, %v1212_v4  ;;  %v1239_v33 = vand.u32 2147483648, %v1212_v4 }
 0x462   :  { %1836 = vrcp.f32 %v2895_v38  ;;  %vm1218_vm5 = vweird.f32 %v1211_v6  ;;  %vm1233_vm7 = vweird.f32 %v1212_v4  ;;  %vm1223_vm9 = vcmp.eq.f32.partialorder %v1222_v43, 8.507059e+37  ;;  %v2923_v43 = vld [vmem:[%s3019_s0] sm:$0xff] }
 0x463   :  { %1838 = vrcp.f32 %v2897_v45  ;;  %v1225_v42 = vor.u32 1.1754944e-38, %v1224_v22  ;;  %vm1238_vm11 = vcmp.eq.f32.partialorder %v1237_v21, 8.507059e+37  ;;  %v1240_v1 = vor.u32 1.1754944e-38, %v1239_v33 }
 0x464   :  { %vm1263_vm13 = vweird.f32 %v2895_v38  ;;  %v1269_v61 = vand.u32 2147483648, %v2895_v38  ;;  %v1284_v37 = vand.u32 2147483648, %v2897_v45  ;;  %v1267_v3 = vand.u32 2147483647, %v2895_v38 }
 0x465   :  { %vm1278_vm1 = vweird.f32 %v2897_v45  ;;  %v1282_v49 = vand.u32 2147483647, %v2897_v45  ;;  %v1303_v24 = vrot.slane %v2856_v63, 7 }
 0x466   :  { %v1833_v14 = vpop.eup %1832  ;;  %v1270_v32 = vor.u32 1.1754944e-38, %v1269_v61  ;;  %vm1268_vm4 = vcmp.eq.f32.partialorder %v1267_v3, 8.507059e+37  ;;  %v1285_v60 = vor.u32 1.1754944e-38, %v1284_v37 }
 0x467   :  { %v1835_v35 = vpop.eup %1834  ;;  %v1214_v7 = vmul.f32 %v1833_v14, %v1211_v6  ;;  %vm1219_vm6 = vweird.f32 %v1833_v14 }
 0x468   :  { %v1229_v34 = vmul.f32 %v1835_v35, %v1212_v4  ;;  %v1837_v17 = vpop.eup %1836  ;;  %vm1234_vm8 = vweird.f32 %v1835_v35  ;;  %vm1220_vm10 = vmor %vm1218_vm5, %vm1219_vm6  ;;  %vm1283_vm5 = vcmp.eq.f32.partialorder %v1282_v49, 8.507059e+37 }
 0x469   :  { %v1215_v41 = vsub.f32 1.0, %v1214_v7  ;;  %v1839_v29 = vpop.eup %1838  ;;  %v1259_v46 = vmul.f32 %v1837_v17, %v2895_v38  ;;  %vm1235_vm12 = vmor %vm1233_vm7, %vm1234_vm8  ;;  %vm1264_vm14 = vweird.f32 %v1837_v17 }
 0x46a   :  { %v1230_v13 = vsub.f32 1.0, %v1229_v34  ;;  %v1274_v59 = vmul.f32 %v1839_v29, %v2897_v45  ;;  %vm1279_vm15 = vweird.f32 %v1839_v29  ;;  %vm1265_vm2 = vmor %vm1263_vm13, %vm1264_vm14  ;;  %v1304_v45 = vrot.slane %v2858_v50, 7 }
 0x46b   :  { %v1216_v55 = vmul.f32 %v1833_v14, %v1215_v41  ;;  %v1260_v48 = vsub.f32 1.0, %v1259_v46  ;;  %vm1280_vm3 = vmor %vm1278_vm1, %vm1279_vm15 }
 0x46c   :  { %v1231_v23 = vmul.f32 %v1835_v35, %v1230_v13  ;;  %v1275_v18 = vsub.f32 1.0, %v1274_v59 }
 0x46d   :  { %v1217_v15 = vadd.f32 %v1833_v14, %v1216_v55  ;;  %v1261_v20 = vmul.f32 %v1837_v17, %v1260_v48 }
 0x46e   :  { %v1232_v28 = vadd.f32 %v1835_v35, %v1231_v23  ;;  %v1276_v57 = vmul.f32 %v1839_v29, %v1275_v18 }
 0x46f   :  { %v1221_v47 = vsel %vm1220_vm10, %v1833_v14, %v1217_v15  ;;  %v1262_v31 = vadd.f32 %v1837_v17, %v1261_v20 }
 0x470   :  { %v1226_v53 = vsel %vm1223_vm9, %v1225_v42, %v1221_v47  ;;  %v1236_v36 = vsel %vm1235_vm12, %v1835_v35, %v1232_v28  ;;  %v1277_v56 = vadd.f32 %v1839_v29, %v1276_v57 }
 0x471   :  { %v1241_v10 = vsel %vm1238_vm11, %v1240_v1, %v1236_v36  ;;  %v1293_v30 = vmul.f32 %v1289_v12, %v1226_v53  ;;  %v1266_v8 = vsel %vm1265_vm2, %v1837_v17, %v1262_v31 }
 0x472   :  { %v1294_v44 = vmul.f32 %v1290_v39, %v1241_v10  ;;  %v1281_v9 = vsel %vm1280_vm3, %v1839_v29, %v1277_v56  ;;  %v1271_v6 = vsel %vm1268_vm4, %v1270_v32, %v1266_v8 }
 0x473   :  { %v1295_v5 = vadd.f32 %v1293_v30, %v3141_v2  ;;  %v1286_v58 = vsel %vm1283_vm5, %v1285_v60, %v1281_v9  ;;  %v1299_v4 = vsub.f32 1.0, %v1271_v6  ;;  %v1307_v35 = vmul.f32 %v1303_v24, %v1271_v6 }
 0x474   :  { %v1296_v19 = vadd.f32 %v1294_v44, %v2366_v52  ;;  %v1300_v38 = vsub.f32 1.0, %v1286_v58  ;;  %v1308_v34 = vmul.f32 %v1304_v45, %v1286_v58 }
 0x475   :  { %1840 = vtanh.f32 %v1295_v5 }
 0x476   :  { %1842 = vtanh.f32 %v1296_v19 }
 0x47b   :  { %v1841_v54 = vpop.eup %1840 }
 0x47c   :  { %v1843_v16 = vpop.eup %1842  ;;  %v1301_v14 = vmul.f32 %v1841_v54, %v1299_v4 }
 0x47d   :  { %v1302_v7 = vmul.f32 %v1843_v16, %v1300_v38 }
 0x47e   :  { %v2916_v12 = vadd.f32 %v1307_v35, %v1301_v14 }
 0x47f   :  { %v2918_v41 = vadd.f32 %v1308_v34, %v1302_v7 }
 0x480   :  { %v1311_v63 = vadd.f32 %v2923_v43, %v2916_v12  ;;  %v1317_v22 = vrot.slane %v2916_v12, 5 }
 0x481   :  { %v1312_v50 = vadd.f32 %v2611_v0, %v2918_v41  ;;  %v1318_v17 = vrot.slane %v2918_v41, 4 }
 0x482   :  { %1313 = vst [vmem:[%s3024_s5] sm:$0x20] %v1311_v63 }
 0x483   :  { %1314 = vst [vmem:[%s3024_s5 + $0x8] sm:$0x20] %v1312_v50  ;;  %v1319_v39 = vsel %vm408_vm0, %v1318_v17, %v1317_v22 }
 0x484   :  { %1337 = vmatmul.f32.vlgmr.msrb.gmra.mxu1 %v1319_v39  ;;  %1357 = vmatmul.f32.vlgmr.msrb.gmra.mxu2 %v1319_v39 }
 0x485   :  { %1377 = vmatmul.f32.vlgmr.msrb.gmra.mxu3 %v1319_v39 }
 0x501   :  { %v1338_v13 = vpop.f32.mrf.mxu1 }
 0x502   :  { %v1339_v21 = vadd.f32 %v1338_v13, %v3190_v25 }
 0x504   :  { %v1382_v33 = vrot.slane %v1339_v21, 2  ;;  %v1383_v0 = vrot.slane %v1339_v21, 3 }
 0x506   :  { %v1386_v29 = vadd.f32 %v1382_v33, %v3191_v26  ;;  %v1387_v55 = vadd.f32 %v1383_v0, %v3192_v27 }
 0x507   :  { %v1358_v46 = vpop.f32.mrf.mxu2 }
 0x508   :  { %v1711_v23 = vmul.f32 -1.442695, %v1386_v29  ;;  %v1712_v59 = vmul.f32 -1.442695, %v1387_v55  ;;  %v1359_v15 = vadd.f32 %v1358_v46, %v3187_v62  ;;  %v1378_v31 = vpop.f32.mrf.mxu3 }
 0x509   :  { %v1379_v56 = vadd.f32 %v1378_v31, %v3193_v40 }
 0x50a   :  { %1844 = vpow2.f32 %v1711_v23  ;;  %v1427_v42 = vrot.slane %v1359_v15, 2  ;;  %v1428_v48 = vrot.slane %v1359_v15, 3 }
 0x50b   :  { %1846 = vpow2.f32 %v1712_v59  ;;  %v1472_v4 = vrot.slane %v1379_v56, 2  ;;  %v1473_v38 = vrot.slane %v1379_v56, 3 }
 0x50c   :  { %v1431_v28 = vadd.f32 %v1427_v42, %v3188_v11  ;;  %v1432_v1 = vadd.f32 %v1428_v48, %v3189_v51 }
 0x50e   :  { %v1713_v18 = vmul.f32 -1.442695, %v1431_v28  ;;  %v1714_v47 = vmul.f32 -1.442695, %v1432_v1 }
 0x510   :  { %v1845_v20 = vpop.eup %1844  ;;  %1848 = vpow2.f32 %v1713_v18 }
 0x511   :  { %v1847_v61 = vpop.eup %1846  ;;  %v1394_v53 = vadd.f32 1.0, %v1845_v20  ;;  %1850 = vpow2.f32 %v1714_v47 }
 0x512   :  { %v1395_v36 = vadd.f32 1.0, %v1847_v61 }
 0x513   :  { %1852 = vrcp.f32 %v1394_v53  ;;  %v1405_v19 = vand.u32 2147483647, %v1394_v53  ;;  %v1407_v32 = vand.u32 2147483648, %v1394_v53  ;;  %vm1401_vm7 = vweird.f32 %v1394_v53 }
 0x514   :  { %1854 = vrcp.f32 %v1395_v36  ;;  %v1420_v60 = vand.u32 2147483647, %v1395_v36  ;;  %v1422_v58 = vand.u32 2147483648, %v1395_v36  ;;  %vm1416_vm10 = vweird.f32 %v1395_v36 }
 0x515   :  { %vm1406_vm9 = vcmp.eq.f32.partialorder %v1405_v19, 8.507059e+37  ;;  %v1408_v7 = vor.u32 1.1754944e-38, %v1407_v32 }
 0x516   :  { %v1849_v57 = vpop.eup %1848  ;;  %vm1421_vm12 = vcmp.eq.f32.partialorder %v1420_v60, 8.507059e+37  ;;  %v1423_v17 = vor.u32 1.1754944e-38, %v1422_v58 }
 0x517   :  { %v1851_v10 = vpop.eup %1850  ;;  %v2944_v30 = vadd.f32 1.0, %v1849_v57 }
 0x518   :  { %v2946_v44 = vadd.f32 1.0, %v1851_v10  ;;  %v1486_v10 = vrot.slane %v2916_v12, 7  ;;  %v2974_v12 = vld [vmem:[%s3019_s0 + $0x8] sm:$0xff] }
 0x519   :  { %v1853_v37 = vpop.eup %1852  ;;  %1856 = vrcp.f32 %v2944_v30  ;;  %v1452_v22 = vand.u32 2147483648, %v2944_v30  ;;  %v1450_v33 = vand.u32 2147483647, %v2944_v30  ;;  %vm1446_vm1 = vweird.f32 %v2944_v30 }
 0x51a   :  { %v1855_v3 = vpop.eup %1854  ;;  %1858 = vrcp.f32 %v2946_v44  ;;  %v1397_v49 = vmul.f32 %v1853_v37, %v1394_v53  ;;  %vm1402_vm6 = vweird.f32 %v1853_v37  ;;  %v1467_v23 = vand.u32 2147483648, %v2946_v44 }
 0x51b   :  { %v1412_v5 = vmul.f32 %v1855_v3, %v1395_v36  ;;  %vm1417_vm8 = vweird.f32 %v1855_v3  ;;  %vm1403_vm11 = vmor %vm1401_vm7, %vm1402_vm6  ;;  %v1465_v42 = vand.u32 2147483647, %v2946_v44  ;;  %vm1461_vm3 = vweird.f32 %v2946_v44 }
 0x51c   :  { %v1398_v8 = vsub.f32 1.0, %v1397_v49  ;;  %vm1418_vm13 = vmor %vm1416_vm10, %vm1417_vm8  ;;  %v1453_v18 = vor.u32 1.1754944e-38, %v1452_v22  ;;  %v1468_v20 = vor.u32 1.1754944e-38, %v1467_v23  ;;  %vm1451_vm5 = vcmp.eq.f32.partialorder %v1450_v33, 8.507059e+37 }
 0x51d   :  { %v1413_v9 = vsub.f32 1.0, %v1412_v5  ;;  %vm1466_vm6 = vcmp.eq.f32.partialorder %v1465_v42, 8.507059e+37 }
 0x51e   :  { %v1399_v6 = vmul.f32 %v1853_v37, %v1398_v8 }
 0x51f   :  { %v1857_v24 = vpop.eup %1856  ;;  %v1414_v54 = vmul.f32 %v1855_v3, %v1413_v9 }
 0x520   :  { %v1859_v45 = vpop.eup %1858  ;;  %v1442_v16 = vmul.f32 %v1857_v24, %v2944_v30  ;;  %v1400_v14 = vadd.f32 %v1853_v37, %v1399_v6  ;;  %vm1447_vm14 = vweird.f32 %v1857_v24 }
 0x521   :  { %v1457_v35 = vmul.f32 %v1859_v45, %v2946_v44  ;;  %v1415_v34 = vadd.f32 %v1855_v3, %v1414_v54  ;;  %vm1462_vm15 = vweird.f32 %v1859_v45  ;;  %vm1448_vm2 = vmor %vm1446_vm1, %vm1447_vm14  ;;  %v1487_v44 = vrot.slane %v2918_v41, 7 }
 0x522   :  { %v1443_v63 = vsub.f32 1.0, %v1442_v16  ;;  %v1404_v50 = vsel %vm1403_vm11, %v1853_v37, %v1400_v14  ;;  %vm1463_vm4 = vmor %vm1461_vm3, %vm1462_vm15 }
 0x523   :  { %v1458_v39 = vsub.f32 1.0, %v1457_v35  ;;  %v1409_v13 = vsel %vm1406_vm9, %v1408_v7, %v1404_v50  ;;  %v1419_v21 = vsel %vm1418_vm13, %v1855_v3, %v1415_v34 }
 0x524   :  { %v1444_v0 = vmul.f32 %v1857_v24, %v1443_v63  ;;  %v1424_v29 = vsel %vm1421_vm12, %v1423_v17, %v1419_v21  ;;  %v1476_v55 = vmul.f32 %v1472_v4, %v1409_v13 }
 0x525   :  { %v1459_v46 = vmul.f32 %v1859_v45, %v1458_v39  ;;  %v1477_v59 = vmul.f32 %v1473_v38, %v1424_v29 }
 0x526   :  { %v1445_v15 = vadd.f32 %v1857_v24, %v1444_v0  ;;  %v1478_v48 = vadd.f32 %v1476_v55, %v3141_v2 }
 0x527   :  { %v1460_v28 = vadd.f32 %v1859_v45, %v1459_v46  ;;  %v1479_v1 = vadd.f32 %v1477_v59, %v2366_v52 }
 0x528   :  { %v1449_v47 = vsel %vm1448_vm2, %v1857_v24, %v1445_v15  ;;  %1860 = vtanh.f32 %v1478_v48 }
 0x529   :  { %v1464_v61 = vsel %vm1463_vm4, %v1859_v45, %v1460_v28  ;;  %1862 = vtanh.f32 %v1479_v1  ;;  %v1454_v53 = vsel %vm1451_vm5, %v1453_v18, %v1449_v47 }
 0x52a   :  { %v1469_v36 = vsel %vm1466_vm6, %v1468_v20, %v1464_v61  ;;  %v1482_v57 = vsub.f32 1.0, %v1454_v53  ;;  %v1490_v56 = vmul.f32 %v1486_v10, %v1454_v53 }
 0x52b   :  { %v1483_v31 = vsub.f32 1.0, %v1469_v36  ;;  %v1491_v5 = vmul.f32 %v1487_v44, %v1469_v36 }
 0x52e   :  { %v1861_v30 = vpop.eup %1860 }
 0x52f   :  { %v1863_v37 = vpop.eup %1862  ;;  %v1484_v3 = vmul.f32 %v1861_v30, %v1482_v57 }
 0x530   :  { %v1485_v49 = vmul.f32 %v1863_v37, %v1483_v31 }
 0x531   :  { %v2964_v8 = vadd.f32 %v1490_v56, %v1484_v3 }
 0x532   :  { %v2966_v19 = vadd.f32 %v1491_v5, %v1485_v49 }
 0x533   :  { %v1494_v32 = vadd.f32 %v2923_v43, %v2964_v8  ;;  %v1500_v9 = vrot.slane %v2964_v8, 6 }
 0x534   :  { %v1495_v41 = vadd.f32 %v2974_v12, %v2966_v19  ;;  %v1501_v60 = vrot.slane %v2966_v19, 5 }
 0x535   :  { %1496 = vst [vmem:[%s3024_s5] sm:$0x40] %v1494_v32 }
 0x536   :  { %1497 = vst [vmem:[%s3024_s5 + $0x8] sm:$0x40] %v1495_v41  ;;  %v1502_v6 = vsel %vm408_vm0, %v1501_v60, %v1500_v9 }
 0x537   :  { %1520 = vmatmul.f32.vlgmr.msra.gmra.mxu0 %v1502_v6  ;;  %1540 = vmatmul.f32.vlgmr.msra.gmra.mxu1 %v1502_v6 }
 0x538   :  { %1560 = vmatmul.f32.vlgmr.msra.gmra.mxu2 %v1502_v6 }
 0x5b4   :  { %v1521_v58 = vpop.f32.mrf.mxu0  ;;  %v1541_v4 = vpop.f32.mrf.mxu1 }
 0x5b5   :  { %v1522_v24 = vadd.f32 %v1521_v58, %v3190_v25  ;;  %v1542_v54 = vadd.f32 %v1541_v4, %v3187_v62 }
 0x5b7   :  { %v1565_v38 = vrot.slane %v1522_v24, 1  ;;  %v1566_v45 = vrot.slane %v1522_v24, 2  ;;  %v1610_v16 = vrot.slane %v1542_v54, 1  ;;  %v1611_v14 = vrot.slane %v1542_v54, 2 }
 0x5b9   :  { %v1569_v35 = vadd.f32 %v1565_v38, %v3191_v26  ;;  %v1570_v7 = vadd.f32 %v1566_v45, %v3192_v27  ;;  %v1614_v34 = vadd.f32 %v1610_v16, %v3188_v11  ;;  %v1615_v63 = vadd.f32 %v1611_v14, %v3189_v51 }
 0x5bb   :  { %v1715_v22 = vmul.f32 -1.442695, %v1569_v35  ;;  %v1716_v50 = vmul.f32 -1.442695, %v1570_v7  ;;  %v1717_v17 = vmul.f32 -1.442695, %v1614_v34  ;;  %v1561_v51 = vpop.f32.mrf.mxu2 }
 0x5bc   :  { %v1718_v39 = vmul.f32 -1.442695, %v1615_v63  ;;  %v1562_v0 = vadd.f32 %v1561_v51, %v3193_v40 }
 0x5bd   :  { %1864 = vpow2.f32 %v1715_v22 }
 0x5be   :  { %1866 = vpow2.f32 %v1716_v50  ;;  %v1655_v1 = vrot.slane %v1562_v0, 1  ;;  %v1656_v30 = vrot.slane %v1562_v0, 2 }
 0x5bf   :  { %1868 = vpow2.f32 %v1717_v17  ;;  %v1669_v17 = vrot.slane %v2964_v8, 7 }
 0x5c0   :  { %1870 = vpow2.f32 %v1718_v39 }
 0x5c3   :  { %v1865_v62 = vpop.eup %1864 }
 0x5c4   :  { %v1867_v25 = vpop.eup %1866  ;;  %v1577_v13 = vadd.f32 1.0, %v1865_v62 }
 0x5c5   :  { %v1869_v21 = vpop.eup %1868  ;;  %v1578_v33 = vadd.f32 1.0, %v1867_v25  ;;  %v1670_v25 = vrot.slane %v2966_v19, 7 }
 0x5c6   :  { %v1871_v26 = vpop.eup %1870  ;;  %1872 = vrcp.f32 %v1577_v13  ;;  %v2992_v27 = vadd.f32 1.0, %v1869_v21  ;;  %v1588_v28 = vand.u32 2147483647, %v1577_v13  ;;  %v1590_v47 = vand.u32 2147483648, %v1577_v13 }
 0x5c7   :  { %1874 = vrcp.f32 %v1578_v33  ;;  %v2994_v11 = vadd.f32 1.0, %v1871_v26  ;;  %v1603_v61 = vand.u32 2147483647, %v1578_v33  ;;  %v1605_v40 = vand.u32 2147483648, %v1578_v33 }
 0x5c8   :  { %1876 = vrcp.f32 %v2992_v27  ;;  %vm1584_vm8 = vweird.f32 %v1577_v13  ;;  %vm1599_vm9 = vweird.f32 %v1578_v33  ;;  %v1635_v37 = vand.u32 2147483648, %v2992_v27 }
 0x5c9   :  { %1878 = vrcp.f32 %v2994_v11  ;;  %v1591_v56 = vor.u32 1.1754944e-38, %v1590_v47  ;;  %vm1589_vm11 = vcmp.eq.f32.partialorder %v1588_v28, 8.507059e+37  ;;  %vm1604_vm13 = vcmp.eq.f32.partialorder %v1603_v61, 8.507059e+37 }
 0x5ca   :  { %v1606_v32 = vor.u32 1.1754944e-38, %v1605_v40  ;;  %vm1629_vm1 = vweird.f32 %v2992_v27  ;;  %v1650_v24 = vand.u32 2147483648, %v2994_v11  ;;  %v1633_v54 = vand.u32 2147483647, %v2992_v27 }
 0x5cb   :  { %vm1644_vm3 = vweird.f32 %v2994_v11  ;;  %v1648_v45 = vand.u32 2147483647, %v2994_v11  ;;  %v1636_v7 = vor.u32 1.1754944e-38, %v1635_v37 }
 0x5cc   :  { %v1873_v29 = vpop.eup %1872  ;;  %v1651_v63 = vor.u32 1.1754944e-38, %v1650_v24  ;;  %vm1634_vm5 = vcmp.eq.f32.partialorder %v1633_v54, 8.507059e+37 }
 0x5cd   :  { %v1875_v55 = vpop.eup %1874  ;;  %v1580_v46 = vmul.f32 %v1873_v29, %v1577_v13  ;;  %vm1585_vm0 = vweird.f32 %v1873_v29  ;;  %vm1649_vm6 = vcmp.eq.f32.partialorder %v1648_v45, 8.507059e+37 }
 0x5ce   :  { %v1877_v23 = vpop.eup %1876  ;;  %v1595_v59 = vmul.f32 %v1875_v55, %v1578_v33  ;;  %vm1600_vm7 = vweird.f32 %v1875_v55  ;;  %vm1586_vm10 = vmor %vm1584_vm8, %vm1585_vm0 }
 0x5cf   :  { %v1879_v15 = vpop.eup %1878  ;;  %v1625_v42 = vmul.f32 %v1877_v23, %v2992_v27  ;;  %v1581_v48 = vsub.f32 1.0, %v1580_v46  ;;  %vm1601_vm12 = vmor %vm1599_vm9, %vm1600_vm7  ;;  %vm1630_vm14 = vweird.f32 %v1877_v23 }
 0x5d0   :  { %v1640_v18 = vmul.f32 %v1879_v15, %v2994_v11  ;;  %v1596_v20 = vsub.f32 1.0, %v1595_v59  ;;  %vm1645_vm15 = vweird.f32 %v1879_v15  ;;  %vm1631_vm2 = vmor %vm1629_vm1, %vm1630_vm14 }
 0x5d1   :  { %v1626_v53 = vsub.f32 1.0, %v1625_v42  ;;  %v1582_v36 = vmul.f32 %v1873_v29, %v1581_v48  ;;  %vm1646_vm4 = vmor %vm1644_vm3, %vm1645_vm15 }
 0x5d2   :  { %v1641_v57 = vsub.f32 1.0, %v1640_v18  ;;  %v1597_v10 = vmul.f32 %v1875_v55, %v1596_v20 }
 0x5d3   :  { %v1627_v31 = vmul.f32 %v1877_v23, %v1626_v53  ;;  %v1583_v44 = vadd.f32 %v1873_v29, %v1582_v36 }
 0x5d4   :  { %v1642_v3 = vmul.f32 %v1879_v15, %v1641_v57  ;;  %v1598_v49 = vadd.f32 %v1875_v55, %v1597_v10 }
 0x5d5   :  { %v1587_v5 = vsel %vm1586_vm10, %v1873_v29, %v1583_v44  ;;  %v1628_v60 = vadd.f32 %v1877_v23, %v1627_v31 }
 0x5d6   :  { %v1592_v9 = vsel %vm1589_vm11, %v1591_v56, %v1587_v5  ;;  %v1602_v41 = vsel %vm1601_vm12, %v1875_v55, %v1598_v49  ;;  %v1643_v58 = vadd.f32 %v1879_v15, %v1642_v3 }
 0x5d7   :  { %v1607_v6 = vsel %vm1604_vm13, %v1606_v32, %v1602_v41  ;;  %v1659_v4 = vmul.f32 %v1655_v1, %v1592_v9  ;;  %v1632_v14 = vsel %vm1631_vm2, %v1877_v23, %v1628_v60 }
 0x5d8   :  { %v1660_v38 = vmul.f32 %v1656_v30, %v1607_v6  ;;  %v1647_v34 = vsel %vm1646_vm4, %v1879_v15, %v1643_v58  ;;  %v1637_v22 = vsel %vm1634_vm5, %v1636_v7, %v1632_v14 }
 0x5d9   :  { %v1661_v16 = vadd.f32 %v1659_v4, %v3141_v2  ;;  %v1652_v50 = vsel %vm1649_vm6, %v1651_v63, %v1647_v34  ;;  %v1665_v39 = vsub.f32 1.0, %v1637_v22  ;;  %v1673_v33 = vmul.f32 %v1669_v17, %v1637_v22 }
 0x5da   :  { %v1662_v35 = vadd.f32 %v1660_v38, %v2366_v52  ;;  %v1666_v2 = vsub.f32 1.0, %v1652_v50  ;;  %v1674_v26 = vmul.f32 %v1670_v25, %v1652_v50 }
 0x5db   :  { %1880 = vtanh.f32 %v1661_v16 }
 0x5dc   :  { %1882 = vtanh.f32 %v1662_v35 }
 0x5e1   :  { %v1881_v62 = vpop.eup %1880 }
 0x5e2   :  { %v1883_v13 = vpop.eup %1882  ;;  %v1667_v21 = vmul.f32 %v1881_v62, %v1665_v39 }
 0x5e3   :  { %v1668_v52 = vmul.f32 %v1883_v13, %v1666_v2 }
 0x5e4   :  { %v1675_v27 = vadd.f32 %v1673_v33, %v1667_v21 }
 0x5e5   :  { %v1676_v11 = vadd.f32 %v1674_v26, %v1668_v52 }
 0x5e6   :  { %v1677_v51 = vadd.f32 %v2923_v43, %v1675_v27 }
 0x5e7   :  { %v1678_v0 = vadd.f32 %v2974_v12, %v1676_v11 }
 0x5e8   :  { %1679 = vst [vmem:[%s3024_s5] sm:$0x80] %v1677_v51 }
 0x5e9   :  { %1680 = vst [vmem:[%s3024_s5 + $0x8] sm:$0x80] %v1678_v0 }
 0x5ea   :  { %1685 = vsyncpa [#allocation3], 1 }
 0x5eb   :  { %1686 = vsyncpa [#allocation5], 1 }

// kernel: dcn_with_rcnn_forward.7
= control target key start
LH: loop header
LB: loop body
LE: loop exit
PB: predicated region body
PF: predicated region fallthrough
CT: control target
= control target key end

     0   :  { %19 = vsyncpa [#allocation3], 0  ;;  %s1347_s0 = inlined_call_operand.vmem [shape: f32[2,8,128], index: 0, kind: input, shape index: {}]   ;;  %s1348_s1 = inlined_call_operand.vmem [shape: f32[2,8,128], index: 1, kind: input, shape index: {}]   ;;  %s1349_s2 = inlined_call_operand.hbm [shape: f32[128,128], index: 2, kind: input, shape index: {}]   ;;  %s1350_s3 = inlined_call_operand.hbm [shape: f32[128,128], index: 3, kind: input, shape index: {}]   ;;  %s1351_s4 = inlined_call_operand.hbm [shape: f32[128,128], index: 4, kind: input, shape index: {}]   ;;  %s1352_s5 = inlined_call_operand.vmem [shape: f32[1,128], index: 5, kind: input, shape index: {}]   ;;  %s1353_s6 = inlined_call_operand.hbm [shape: f32[128,128], index: 6, kind: input, shape index: {}]   ;;  %s1354_s7 = inlined_call_operand.hbm [shape: f32[128,128], index: 7, kind: input, shape index: {}]   ;;  %s1355_s8 = inlined_call_operand.vmem [shape: f32[1,128], index: 8, kind: input, shape index: {}]   ;;  %s1356_s9 = inlined_call_operand.hbm [shape: f32[128,128], index: 9, kind: input, shape index: {}]   ;;  %s1357_s10 = inlined_call_operand.hbm [shape: f32[128,128], index: 10, kind: input, shape index: {}]   ;;  %s1358_s11 = inlined_call_operand.vmem [shape: f32[1,128], index: 11, kind: input, shape index: {}]   ;;  %s1359_s12 = inlined_call_operand.hbm [shape: f32[128,128], index: 12, kind: input, shape index: {}]   ;;  %s1360_s13 = inlined_call_operand.vmem [shape: f32[1,128], index: 13, kind: input, shape index: {}]   ;;  %s1361_s14 = inlined_call_operand.hbm [shape: f32[2,8,128], index: 14, kind: output, shape index: {}]  }
   0x1   :  { %20 = vsyncpa [#allocation6], 0 }
   0x2   :  { %21 = vsyncpa [#allocation9], 0 }
   0x3   :  { %22 = vsyncpa [#allocation12], 0 }
   0x4   :  { %23 = vsyncpa [#allocation15], 0 }
   0x5   :  { %24 = vsyncpa [#allocation4], 0  ;;  %s46_s15 = sshll.u32 %s1350_s3, 4  ;;  %s1127_s16 = smov [#allocation5]   ;;  %s47_s15 = int_to_ptr.hbm [resolvable:$true] %s46_s15 }
   0x6   :  { %s48_s17 = sshll.u32 %s1127_s16, 4  ;;  %s74_s20 = sshll.u32 %s1353_s6, 4  ;;  %s49_s17 = int_to_ptr.vmem [resolvable:$true] %s48_s17  ;;  %s75_s20 = int_to_ptr.hbm [resolvable:$true] %s74_s20 }
   0x7   :  { %s1128_s21 = smov 128   ;;  %s1129_s22 = smov 8  }
   0x8   :  { %54 = dma.hbm_to_vmem [thread:$0]  %s47_s15, 2048, %s49_s17, [#allocation6], %s1128_s21, %s1128_s21, %s1129_s22  }
   0x9   :  { %s1130_s23 = smov [#allocation8]   ;;  %s102_s3 = sshll.u32 %s1356_s9, 4  ;;  %s103_s3 = int_to_ptr.hbm [resolvable:$true] %s102_s3 }
   0xa   :  { %s76_s24 = sshll.u32 %s1130_s23, 4  ;;  %s33_s28 = sshll.u32 %s1349_s2, 4  ;;  %s77_s24 = int_to_ptr.vmem [resolvable:$true] %s76_s24  ;;  %s34_s28 = int_to_ptr.hbm [resolvable:$true] %s33_s28 }
   0xb   :  { %82 = dma.hbm_to_vmem [thread:$0]  %s75_s20, 2048, %s77_s24, [#allocation9], %s1128_s21, %s1128_s21, %s1129_s22  }
   0xc   :  { %s1131_s29 = smov [#allocation11]   ;;  %s1132_s15 = smov [#allocation2]  }
   0xd   :  { %s104_s30 = sshll.u32 %s1131_s29, 4  ;;  %s35_s9 = sshll.u32 %s1132_s15, 4  ;;  %s105_s30 = int_to_ptr.vmem [resolvable:$true] %s104_s30  ;;  %s36_s9 = int_to_ptr.vmem [resolvable:$true] %s35_s9 }
   0xe   :  { %110 = dma.hbm_to_vmem [thread:$0]  %s103_s3, 2048, %s105_s30, [#allocation12], %s1128_s21, %s1128_s21, %s1129_s22  }
   0xf   :  { %s59_s18 = sshll.u32 %s1351_s4, 4  ;;  %s87_s20 = sshll.u32 %s1354_s7, 4  ;;  %s60_s18 = int_to_ptr.hbm [resolvable:$true] %s59_s18  ;;  %s88_s20 = int_to_ptr.hbm [resolvable:$true] %s87_s20 }
  0x10   :  { %41 = dma.hbm_to_vmem [thread:$0]  %s34_s28, 2048, %s36_s9, [#allocation3], %s1128_s21, %s1128_s21, %s1129_s22  }
  0x11   :  { %s1133_s23 = smov [#allocation7]   ;;  %s1134_s25 = smov [#allocation10]  }
  0x12   :  { %s61_s24 = sshll.u32 %s1133_s23, 4  ;;  %s89_s4 = sshll.u32 %s1134_s25, 4  ;;  %s62_s24 = int_to_ptr.vmem [resolvable:$true] %s61_s24  ;;  %s90_s4 = int_to_ptr.vmem [resolvable:$true] %s89_s4 }
  0x13   :  { %67 = dma.hbm_to_vmem [thread:$0]  %s60_s18, 2048, %s62_s24, [#allocation6], %s1128_s21, %s1128_s21, %s1129_s22  }
  0x14   :  { %s115_s6 = sshll.u32 %s1357_s10, 4  ;;  %s130_s28 = sshll.u32 %s1359_s12, 4  ;;  %s116_s6 = int_to_ptr.hbm [resolvable:$true] %s115_s6  ;;  %s131_s28 = int_to_ptr.hbm [resolvable:$true] %s130_s28 }
  0x15   :  { %95 = dma.hbm_to_vmem [thread:$0]  %s88_s20, 2048, %s90_s4, [#allocation9], %s1128_s21, %s1128_s21, %s1129_s22  }
  0x16   :  { %s1135_s29 = smov [#allocation13]   ;;  %s1136_s15 = smov [#allocation14]  }
  0x17   :  { %s117_s30 = sshll.u32 %s1135_s29, 4  ;;  %s132_s10 = sshll.u32 %s1136_s15, 4  ;;  %s118_s30 = int_to_ptr.vmem [resolvable:$true] %s117_s30  ;;  %s133_s10 = int_to_ptr.vmem [resolvable:$true] %s132_s10 }
  0x18   :  { %123 = dma.hbm_to_vmem [thread:$0]  %s116_s6, 2048, %s118_s30, [#allocation12], %s1128_s21, %s1128_s21, %s1129_s22  }
  0x19   :  { %138 = dma.hbm_to_vmem [thread:$0]  %s131_s28, 2048, %s133_s10, [#allocation15], %s1128_s21, %s1128_s21, %s1129_s22  }
  0x1a   :  { %1115 = dma.done.wait [#allocation3], 2048  }
  0x1b   :  { %1116 = vsyncadd [#allocation3], 4294965248 }
  0x1c   :  { %1117 = dma.done.wait [#allocation6], 4096  }
  0x1d   :  { %1118 = vsyncadd [#allocation6], 4294963200 }
  0x1e   :  { %1119 = dma.done.wait [#allocation9], 4096  }
  0x1f   :  { %1120 = vsyncadd [#allocation9], 4294963200 }
  0x20   :  { %1121 = dma.done.wait [#allocation12], 4096  }
  0x21   :  { %1122 = vsyncadd [#allocation12], 4294963200 }
  0x22   :  { %1123 = dma.done.wait [#allocation15], 2048  }
  0x23   :  { %1124 = vsyncadd [#allocation15], 4294965248  ;;  %v192_v0 = vld [vmem:[#allocation2 + $0x78] sm:$0xff]  ;;  %v191_v1 = vld [vmem:[#allocation2 + $0x70] sm:$0xff]  ;;  %vm258_vm0 = vcmask 64512   ;;  %s1137_s26 = smov [#allocation16]  }
  0x24   :  { %193 = vmatpush.msra.mxu0 %v192_v0  ;;  %v190_v2 = vld [vmem:[#allocation2 + $0x68] sm:$0xff]  ;;  %v189_v3 = vld [vmem:[#allocation2 + $0x60] sm:$0xff]  ;;  %v188_v4 = vld [vmem:[#allocation2 + $0x58] sm:$0xff]  ;;  %s834_s7 = sshll.u32 %s1361_s14, 4  ;;  %s835_s7 = int_to_ptr.hbm [resolvable:$true] %s834_s7 }
  0x25   :  { %v187_v5 = vld [vmem:[#allocation2 + $0x50] sm:$0xff]  ;;  %v1264_v6 = vld [vmem:[%s1348_s1] sm:$0xff]  ;;  %v186_v8 = vld [vmem:[#allocation2 + $0x48] sm:$0xff] }
  0x26   :  { %194 = vmatpush.msra.mxu0 %v191_v1  ;;  %v1269_v7 = vld [vmem:[%s1347_s0] sm:$0xff]  ;;  %231 = vmatpush.xpose.msra.mxu1 %v1264_v6  ;;  %v184_v10 = vld [vmem:[#allocation2 + $0x38] sm:$0xff]  ;;  %v183_v11 = vld [vmem:[#allocation2 + $0x30] sm:$0xff] }
  0x27   :  { %387 = vmatpush.msra.mxu3 %v1264_v6  ;;  %v185_v9 = vld [vmem:[#allocation2 + $0x40] sm:$0xff]  ;;  %v182_v12 = vld [vmem:[#allocation2 + $0x28] sm:$0xff]  ;;  %v180_v14 = vld [vmem:[#allocation2 + $0x18] sm:$0xff] }
  0x28   :  { %195 = vmatpush.msra.mxu0 %v190_v2  ;;  %v181_v13 = vld [vmem:[#allocation2 + $0x20] sm:$0xff]  ;;  %v179_v15 = vld [vmem:[#allocation2 + $0x10] sm:$0xff]  ;;  %v178_v16 = vld [vmem:[#allocation2 + $0x8] sm:$0xff] }
  0x29   :  { %v177_v17 = vld [vmem:[#allocation2] sm:$0xff]  ;;  %v1278_v18 = vld [vmem:[%s1347_s0 + $0x8] sm:$0xff] }
  0x2a   :  { %196 = vmatpush.msra.mxu0 %v189_v3  ;;  %465 = vmatpush.msrb.mxu1 %v1269_v7  ;;  %v1284_v19 = vld [vmem:[%s1348_s1 + $0x8] sm:$0xff] }
  0x2b   :  { %251 = vmatpush.xpose.msra.mxu2 %v1284_v19  ;;  %410 = vmatpush.msrb.mxu3 %v1284_v19 }
  0x2c   :  { %197 = vmatpush.msra.mxu0 %v188_v4 }
  0x2e   :  { %198 = vmatpush.msra.mxu0 %v187_v5 }
  0x2f   :  { %520 = vmatpush.msrb.mxu2 %v1278_v18 }
  0x30   :  { %199 = vmatpush.msra.mxu0 %v186_v8 }
  0x32   :  { %200 = vmatpush.msra.mxu0 %v185_v9 }
  0x34   :  { %201 = vmatpush.msra.mxu0 %v184_v10 }
  0x36   :  { %202 = vmatpush.msra.mxu0 %v183_v11 }
  0x38   :  { %203 = vmatpush.msra.mxu0 %v182_v12 }
  0x3a   :  { %204 = vmatpush.msra.mxu0 %v181_v13 }
  0x3c   :  { %205 = vmatpush.msra.mxu0 %v180_v14 }
  0x3e   :  { %206 = vmatpush.msra.mxu0 %v179_v15 }
  0x40   :  { %207 = vmatpush.msra.mxu0 %v178_v16 }
  0x42   :  { %208 = vmatpush.msra.mxu0 %v177_v17 }
  0x43   :  { %209 = vmatmul.f32.vlgmr.msra.gmra.mxu0 %v1269_v7 }
  0x4b   :  { %212 = vmatmul.f32.gmra.mxu0 %v1278_v18 }
  0xc0   :  { %v210_v20 = vpop.f32.mrf.mxu0 }
  0xc1   :  { %232 = vmatmul.f32.vlgmr.msra.gmra.mxu1 %v210_v20 }
  0xc8   :  { %v213_v21 = vpop.f32.mrf.mxu0 }
  0xc9   :  { %252 = vmatmul.f32.vlgmr.msra.gmra.mxu2 %v213_v21 }
 0x13e   :  { %v233_v22 = vpop.f32.mrf.mxu1 }
 0x13f   :  { %871 = vtanh.f32 %v233_v22 }
 0x145   :  { %v1289_v23 = vpop.eup %871 }
 0x146   :  { %v259_v24 = vsel %vm258_vm0, %v1289_v23, -inf }
 0x147   :  { %260 = vmax.xlane.f32.xlu0 %v259_v24  ;;  %v307_v25 = vrot.slane %v259_v24, 4 }
 0x149   :  { %v308_v26 = vmax.f32 %v259_v24, %v307_v25 }
 0x14b   :  { %v309_v27 = vrot.slane %v308_v26, 2 }
 0x14c   :  { %v253_v28 = vpop.f32.mrf.mxu2 }
 0x14d   :  { %v310_v29 = vmax.f32 %v308_v26, %v309_v27  ;;  %873 = vtanh.f32 %v253_v28 }
 0x14f   :  { %v311_v30 = vrot.slane %v310_v29, 1 }
 0x151   :  { %v312_v31 = vmax.f32 %v310_v29, %v311_v30 }
 0x153   :  { %v1293_v32 = vpop.eup %873  ;;  %v319_v33 = vsub.f32 %v1289_v23, %v312_v31 }
 0x154   :  { %v262_v34 = vsel %vm258_vm0, %v1293_v32, -inf }
 0x155   :  { %263 = vmax.xlane.f32.xlu0 %v262_v34  ;;  %v313_v35 = vrot.slane %v262_v34, 4  ;;  %v321_v36 = vmul.f32 1.442695, %v319_v33 }
 0x157   :  { %v314_v37 = vmax.f32 %v262_v34, %v313_v35  ;;  %875 = vpow2.f32 %v321_v36  ;;  %v642_v36 = vld [vmem:[#allocation10 + $0x78] sm:$0xff] }
 0x158   :  { %643 = vmatpush.msra.mxu2 %v642_v36  ;;  %v551_v36 = vld [vmem:[#allocation7 + $0x50] sm:$0xff] }
 0x159   :  { %v315_v38 = vrot.slane %v314_v37, 2 }
 0x15b   :  { %v316_v39 = vmax.f32 %v314_v37, %v315_v38  ;;  %v641_v37 = vld [vmem:[#allocation10 + $0x70] sm:$0xff]  ;;  %v640_v38 = vld [vmem:[#allocation10 + $0x68] sm:$0xff] }
 0x15c   :  { %644 = vmatpush.msra.mxu2 %v641_v37  ;;  %v628_v37 = vld [vmem:[#allocation10 + $0x8] sm:$0xff] }
 0x15d   :  { %v876_v40 = vpop.eup %875  ;;  %v317_v41 = vrot.slane %v316_v39, 1 }
 0x15e   :  { %v325_v42 = vsel %vm258_vm0, %v876_v40, 0.0  ;;  %645 = vmatpush.msra.mxu2 %v640_v38 }
 0x15f   :  { %v318_v43 = vmax.f32 %v316_v39, %v317_v41  ;;  %v326_v44 = vrot.slane %v325_v42, 4  ;;  %v625_v39 = vld [vmem:[#allocation8 + $0x70] sm:$0xff]  ;;  %v639_v41 = vld [vmem:[#allocation10 + $0x60] sm:$0xff] }
 0x160   :  { %646 = vmatpush.msra.mxu2 %v639_v41 }
 0x161   :  { %v327_v45 = vadd.f32 %v326_v44, %v325_v42  ;;  %v320_v46 = vsub.f32 %v1293_v32, %v318_v43  ;;  %v540_v42 = vld [vmem:[#allocation5 + $0x78] sm:$0xff]  ;;  %v623_v44 = vld [vmem:[#allocation8 + $0x60] sm:$0xff] }
 0x162   :  { %580 = vmatpush.msra.mxu1 %v540_v42  ;;  %v549_v42 = vld [vmem:[#allocation7 + $0x40] sm:$0xff] }
 0x163   :  { %v328_v47 = vrot.slane %v327_v45, 2  ;;  %v323_v48 = vmul.f32 1.442695, %v320_v46 }
 0x165   :  { %v329_v49 = vadd.f32 %v328_v47, %v327_v45  ;;  %877 = vpow2.f32 %v323_v48  ;;  %v539_v45 = vld [vmem:[#allocation5 + $0x70] sm:$0xff]  ;;  %v638_v47 = vld [vmem:[#allocation10 + $0x58] sm:$0xff] }
 0x166   :  { %581 = vmatpush.msra.mxu1 %v539_v45  ;;  %v622_v48 = vld [vmem:[#allocation8 + $0x58] sm:$0xff]  ;;  %647 = vmatpush.msra.mxu2 %v638_v47  ;;  %v546_v45 = vld [vmem:[#allocation7 + $0x28] sm:$0xff] }
 0x167   :  { %v330_v50 = vrot.slane %v329_v49, 1  ;;  %v544_v47 = vld [vmem:[#allocation7 + $0x18] sm:$0xff] }
 0x169   :  { %v331_v51 = vadd.f32 %v330_v50, %v329_v49  ;;  %v538_v49 = vld [vmem:[#allocation5 + $0x68] sm:$0xff] }
 0x16a   :  { %582 = vmatpush.msra.mxu1 %v538_v49  ;;  %v627_v49 = vld [vmem:[#allocation10] sm:$0xff] }
 0x16b   :  { %v878_v52 = vpop.eup %877  ;;  %879 = vrcp.f32 %v331_v51  ;;  %v350_v61 = vand.u32 2147483648, %v331_v51  ;;  %v348_v0 = vand.u32 2147483647, %v331_v51  ;;  %vm344_vm2 = vweird.f32 %v331_v51 }
 0x16c   :  { %v332_v53 = vsel %vm258_vm0, %v878_v52, 0.0 }
 0x16d   :  { %v333_v54 = vrot.slane %v332_v53, 4  ;;  %v351_v3 = vor.u32 1.1754944e-38, %v350_v61  ;;  %vm349_vm4 = vcmp.eq.f32.partialorder %v348_v0, 8.507059e+37 }
 0x16f   :  { %v334_v55 = vadd.f32 %v333_v54, %v332_v53  ;;  %v621_v54 = vld [vmem:[#allocation8 + $0x50] sm:$0xff] }
 0x171   :  { %v880_v56 = vpop.eup %879  ;;  %v335_v57 = vrot.slane %v334_v55, 2 }
 0x172   :  { %v340_v58 = vmul.f32 %v880_v56, %v331_v51  ;;  %vm345_vm1 = vweird.f32 %v880_v56  ;;  %v637_v51 = vld [vmem:[#allocation10 + $0x50] sm:$0xff] }
 0x173   :  { %v336_v59 = vadd.f32 %v335_v57, %v334_v55  ;;  %vm346_vm3 = vmor %vm344_vm2, %vm345_vm1  ;;  %v636_v57 = vld [vmem:[#allocation10 + $0x48] sm:$0xff]  ;;  %648 = vmatpush.msra.mxu2 %v637_v51 }
 0x174   :  { %v341_v60 = vsub.f32 1.0, %v340_v58  ;;  %v536_v58 = vld [vmem:[#allocation5 + $0x58] sm:$0xff]  ;;  %v530_v51 = vld [vmem:[#allocation5 + $0x28] sm:$0xff] }
 0x175   :  { %v337_v62 = vrot.slane %v336_v59, 1  ;;  %649 = vmatpush.msra.mxu2 %v636_v57  ;;  %v541_v57 = vld [vmem:[#allocation7] sm:$0xff] }
 0x176   :  { %v342_v63 = vmul.f32 %v880_v56, %v341_v60 }
 0x177   :  { %v338_v1 = vadd.f32 %v337_v62, %v336_v59  ;;  %v620_v59 = vld [vmem:[#allocation8 + $0x48] sm:$0xff]  ;;  %v635_v62 = vld [vmem:[#allocation10 + $0x40] sm:$0xff] }
 0x178   :  { %v343_v2 = vadd.f32 %v880_v56, %v342_v63  ;;  %v535_v63 = vld [vmem:[#allocation5 + $0x50] sm:$0xff]  ;;  %650 = vmatpush.msra.mxu2 %v635_v62  ;;  %v525_v62 = vld [vmem:[#allocation5] sm:$0xff] }
 0x179   :  { %881 = vrcp.f32 %v338_v1  ;;  %v365_v12 = vand.u32 2147483648, %v338_v1  ;;  %v363_v14 = vand.u32 2147483647, %v338_v1  ;;  %vm359_vm6 = vweird.f32 %v338_v1 }
 0x17a   :  { %v347_v4 = vsel %vm346_vm3, %v880_v56, %v343_v2 }
 0x17b   :  { %v352_v5 = vsel %vm349_vm4, %v351_v3, %v347_v4  ;;  %v366_v16 = vor.u32 1.1754944e-38, %v365_v12  ;;  %vm364_vm8 = vcmp.eq.f32.partialorder %v363_v14, 8.507059e+37  ;;  %v634_v3 = vld [vmem:[#allocation10 + $0x38] sm:$0xff]  ;;  %v534_v4 = vld [vmem:[#allocation5 + $0x48] sm:$0xff]  ;;  %v617_v12 = vld [vmem:[#allocation8 + $0x30] sm:$0xff] }
 0x17c   :  { %v353_v8 = vmul.f32 %v876_v40, %v352_v5  ;;  %v624_v40 = vld [vmem:[#allocation8 + $0x68] sm:$0xff]  ;;  %651 = vmatpush.msra.mxu2 %v634_v3  ;;  %v555_v14 = vld [vmem:[#allocation7 + $0x70] sm:$0xff] }
 0x17d   :  { %v726_v3 = vld [vmem:[#allocation13 + $0x68] sm:$0xff] }
 0x17e   :  { %415 = vxpose.xlu2.b32.start.end [1/1] (short) (narrow) %v353_v8, 8  ;;  %v618_v8 = vld [vmem:[#allocation8 + $0x38] sm:$0xff] }
 0x17f   :  { %v882_v9 = vpop.eup %881 }
 0x180   :  { %v355_v10 = vmul.f32 %v882_v9, %v338_v1  ;;  %vm360_vm5 = vweird.f32 %v882_v9  ;;  %v619_v1 = vld [vmem:[#allocation8 + $0x40] sm:$0xff] }
 0x181   :  { %vm361_vm7 = vmor %vm359_vm6, %vm360_vm5 }
 0x182   :  { %v356_v11 = vsub.f32 1.0, %v355_v10  ;;  %v556_v10 = vld [vmem:[#allocation7 + $0x78] sm:$0xff] }
 0x184   :  { %v357_v13 = vmul.f32 %v882_v9, %v356_v11  ;;  %v633_v11 = vld [vmem:[#allocation10 + $0x30] sm:$0xff] }
 0x185   :  { %652 = vmatpush.msra.mxu2 %v633_v11  ;;  %v706_v11 = vld [vmem:[#allocation11 + $0x48] sm:$0xff] }
 0x186   :  { %v358_v15 = vadd.f32 %v882_v9, %v357_v13  ;;  %v533_v13 = vld [vmem:[#allocation5 + $0x40] sm:$0xff] }
 0x188   :  { %v362_v17 = vsel %vm361_vm7, %v882_v9, %v358_v15  ;;  %v632_v15 = vld [vmem:[#allocation10 + $0x28] sm:$0xff] }
 0x189   :  { %v367_v20 = vsel %vm364_vm8, %v366_v16, %v362_v17  ;;  %v616_v17 = vld [vmem:[#allocation8 + $0x28] sm:$0xff]  ;;  %653 = vmatpush.msra.mxu2 %v632_v15 }
 0x18a   :  { %v368_v21 = vmul.f32 %v878_v52, %v367_v20  ;;  %v537_v52 = vld [vmem:[#allocation5 + $0x60] sm:$0xff]  ;;  %v532_v20 = vld [vmem:[#allocation5 + $0x38] sm:$0xff] }
 0x18b   :  { %583 = vmatpush.msra.mxu1 %v537_v52  ;;  %v613_v52 = vld [vmem:[#allocation8 + $0x10] sm:$0xff] }
 0x18c   :  { %470 = vxpose.xlu2.b32.start.end [1/1] (short) (narrow) %v368_v21, 8 }
 0x18d   :  { %584 = vmatpush.msra.mxu1 %v536_v58  ;;  %v528_v58 = vld [vmem:[#allocation5 + $0x18] sm:$0xff] }
 0x18f   :  { %585 = vmatpush.msra.mxu1 %v535_v63 }
 0x191   :  { %586 = vmatpush.msra.mxu1 %v534_v4  ;;  %v711_v4 = vld [vmem:[#allocation11 + $0x70] sm:$0xff] }
 0x193   :  { %587 = vmatpush.msra.mxu1 %v533_v13  ;;  %v720_v13 = vld [vmem:[#allocation13 + $0x38] sm:$0xff] }
 0x195   :  { %588 = vmatpush.msra.mxu1 %v532_v20  ;;  %v705_v20 = vld [vmem:[#allocation11 + $0x40] sm:$0xff] }
 0x1ba   :  { %v261_v22 = vpop.xlane.xlu0 %260 }
 0x1bb   :  { %v265_v24 = vsub.f32 %v1289_v23, %v261_v22  ;;  %v554_v22 = vld [vmem:[#allocation7 + $0x68] sm:$0xff] }
 0x1bd   :  { %v267_v25 = vmul.f32 1.442695, %v265_v24  ;;  %v631_v24 = vld [vmem:[#allocation10 + $0x20] sm:$0xff] }
 0x1be   :  { %654 = vmatpush.msra.mxu2 %v631_v24  ;;  %v716_v24 = vld [vmem:[#allocation13 + $0x18] sm:$0xff] }
 0x1bf   :  { %883 = vpow2.f32 %v267_v25  ;;  %v615_v25 = vld [vmem:[#allocation8 + $0x20] sm:$0xff] }
 0x1c5   :  { %v1302_v26 = vpop.eup %883 }
 0x1c6   :  { %v271_v27 = vsel %vm258_vm0, %v1302_v26, 0.0 }
 0x1c7   :  { %272 = vadd.xlane.f32.xlu1 %v271_v27  ;;  %v553_v27 = vld [vmem:[#allocation7 + $0x60] sm:$0xff] }
 0x1c8   :  { %v264_v28 = vpop.xlane.xlu0 %263 }
 0x1c9   :  { %v266_v29 = vsub.f32 %v1293_v32, %v264_v28  ;;  %v626_v32 = vld [vmem:[#allocation8 + $0x78] sm:$0xff] }
 0x1ca   :  { %666 = vmatpush.msrb.mxu0 %v626_v32  ;;  %v630_v28 = vld [vmem:[#allocation10 + $0x18] sm:$0xff] }
 0x1cb   :  { %v269_v30 = vmul.f32 1.442695, %v266_v29  ;;  %655 = vmatpush.msra.mxu2 %v630_v28 }
 0x1cc   :  { %667 = vmatpush.msrb.mxu0 %v625_v39  ;;  %v550_v39 = vld [vmem:[#allocation7 + $0x48] sm:$0xff] }
 0x1cd   :  { %885 = vpow2.f32 %v269_v30 }
 0x1ce   :  { %668 = vmatpush.msrb.mxu0 %v624_v40 }
 0x1d0   :  { %669 = vmatpush.msrb.mxu0 %v623_v44  ;;  %v547_v44 = vld [vmem:[#allocation7 + $0x30] sm:$0xff] }
 0x1d2   :  { %670 = vmatpush.msrb.mxu0 %v622_v48  ;;  %v531_v48 = vld [vmem:[#allocation5 + $0x30] sm:$0xff] }
 0x1d3   :  { %v1307_v31 = vpop.eup %885  ;;  %589 = vmatpush.msra.mxu1 %v531_v48  ;;  %v796_v48 = vld [vmem:[#allocation14 + $0x68] sm:$0xff] }
 0x1d4   :  { %v274_v33 = vsel %vm258_vm0, %v1307_v31, 0.0  ;;  %671 = vmatpush.msrb.mxu0 %v621_v54  ;;  %v529_v54 = vld [vmem:[#allocation5 + $0x20] sm:$0xff] }
 0x1d5   :  { %275 = vadd.xlane.f32.xlu1 %v274_v33  ;;  %590 = vmatpush.msra.mxu1 %v530_v51 }
 0x1d6   :  { %672 = vmatpush.msrb.mxu0 %v620_v59  ;;  %v611_v59 = vld [vmem:[#allocation8] sm:$0xff] }
 0x1d7   :  { %591 = vmatpush.msra.mxu1 %v529_v54  ;;  %v793_v54 = vld [vmem:[#allocation14 + $0x50] sm:$0xff] }
 0x1d8   :  { %673 = vmatpush.msrb.mxu0 %v619_v1  ;;  %v727_v1 = vld [vmem:[#allocation13 + $0x70] sm:$0xff] }
 0x1d9   :  { %592 = vmatpush.msra.mxu1 %v528_v58  ;;  %v790_v58 = vld [vmem:[#allocation14 + $0x38] sm:$0xff] }
 0x1da   :  { %674 = vmatpush.msrb.mxu0 %v618_v8  ;;  %v709_v8 = vld [vmem:[#allocation11 + $0x60] sm:$0xff] }
 0x1dc   :  { %675 = vmatpush.msrb.mxu0 %v617_v12  ;;  %v721_v12 = vld [vmem:[#allocation13 + $0x40] sm:$0xff] }
 0x1de   :  { %676 = vmatpush.msrb.mxu0 %v616_v17  ;;  %v718_v17 = vld [vmem:[#allocation13 + $0x28] sm:$0xff] }
 0x1e0   :  { %677 = vmatpush.msrb.mxu0 %v615_v25  ;;  %v703_v25 = vld [vmem:[#allocation11 + $0x30] sm:$0xff] }
 0x217   :  { %v431_v23 = vpop.trf.xlu2 }
 0x218   :  { %853 = vmatmul.msk.f32.vlgmr.msrb.gmra.mxu1 %vm258_vm0, %v431_v23  ;;  %v552_v23 = vld [vmem:[#allocation7 + $0x58] sm:$0xff] }
 0x225   :  { %v486_v34 = vpop.trf.xlu2 }
 0x226   :  { %854 = vmatmul.msk.f32.vlgmr.msrb.gmra.mxu2 %vm258_vm0, %v486_v34  ;;  %v629_v34 = vld [vmem:[#allocation10 + $0x10] sm:$0xff] }
 0x227   :  { %656 = vmatpush.msra.mxu2 %v629_v34  ;;  %v714_v34 = vld [vmem:[#allocation13 + $0x8] sm:$0xff] }
 0x229   :  { %657 = vmatpush.msra.mxu2 %v628_v37  ;;  %v700_v37 = vld [vmem:[#allocation11 + $0x18] sm:$0xff] }
 0x22b   :  { %658 = vmatpush.msra.mxu2 %v627_v49 }
 0x23a   :  { %v273_v35 = vpop.xlane.xlu1 %272 }
 0x23b   :  { %887 = vrcp.f32 %v273_v35  ;;  %v288_v53 = vand.u32 2147483648, %v273_v35  ;;  %v286_v56 = vand.u32 2147483647, %v273_v35  ;;  %vm282_vm10 = vweird.f32 %v273_v35 }
 0x23d   :  { %v289_v0 = vor.u32 1.1754944e-38, %v288_v53  ;;  %vm287_vm12 = vcmp.eq.f32.partialorder %v286_v56, 8.507059e+37  ;;  %v542_v53 = vld [vmem:[#allocation7 + $0x8] sm:$0xff] }
 0x241   :  { %v888_v43 = vpop.eup %887 }
 0x242   :  { %v278_v46 = vmul.f32 %v888_v43, %v273_v35  ;;  %vm283_vm9 = vweird.f32 %v888_v43 }
 0x243   :  { %vm284_vm11 = vmor %vm282_vm10, %vm283_vm9 }
 0x244   :  { %v279_v50 = vsub.f32 1.0, %v278_v46  ;;  %v545_v46 = vld [vmem:[#allocation7 + $0x20] sm:$0xff] }
 0x246   :  { %v280_v55 = vmul.f32 %v888_v43, %v279_v50  ;;  %v614_v50 = vld [vmem:[#allocation8 + $0x18] sm:$0xff] }
 0x247   :  { %678 = vmatpush.msrb.mxu0 %v614_v50  ;;  %v795_v50 = vld [vmem:[#allocation14 + $0x60] sm:$0xff] }
 0x248   :  { %v1313_v60 = vpop.xlane.xlu1 %275  ;;  %v281_v61 = vadd.f32 %v888_v43, %v280_v55  ;;  %v612_v55 = vld [vmem:[#allocation8 + $0x8] sm:$0xff] }
 0x249   :  { %889 = vrcp.f32 %v1313_v60  ;;  %v303_v29 = vand.u32 2147483648, %v1313_v60  ;;  %v301_v33 = vand.u32 2147483647, %v1313_v60  ;;  %vm297_vm14 = vweird.f32 %v1313_v60  ;;  %679 = vmatpush.msrb.mxu0 %v613_v52  ;;  %v794_v52 = vld [vmem:[#allocation14 + $0x58] sm:$0xff] }
 0x24a   :  { %v285_v2 = vsel %vm284_vm11, %v888_v43, %v281_v61  ;;  %v548_v43 = vld [vmem:[#allocation7 + $0x38] sm:$0xff]  ;;  %v526_v61 = vld [vmem:[#allocation5 + $0x8] sm:$0xff] }
 0x24b   :  { %v290_v5 = vsel %vm287_vm12, %v289_v0, %v285_v2  ;;  %v304_v32 = vor.u32 1.1754944e-38, %v303_v29  ;;  %vm302_vm1 = vcmp.eq.f32.partialorder %v301_v33, 8.507059e+37  ;;  %680 = vmatpush.msrb.mxu0 %v612_v55  ;;  %v728_v0 = vld [vmem:[#allocation13 + $0x78] sm:$0xff]  ;;  %v715_v33 = vld [vmem:[#allocation13 + $0x10] sm:$0xff] }
 0x24c   :  { %v291_v9 = vmul.f32 %v1302_v26, %v290_v5  ;;  %v712_v2 = vld [vmem:[#allocation11 + $0x78] sm:$0xff]  ;;  %v725_v5 = vld [vmem:[#allocation13 + $0x60] sm:$0xff] }
 0x24d   :  { %681 = vmatpush.msrb.mxu0 %v611_v59  ;;  %v789_v59 = vld [vmem:[#allocation14 + $0x30] sm:$0xff] }
 0x24e   :  { %851 = vmatmul.msk.f32.vlgmr.msra.gmra.mxu3 %vm258_vm0, %v291_v9  ;;  %682 = vmatmul.f32.vlgmr.msrb.gmra.mxu0 %v1264_v6  ;;  %v710_v6 = vld [vmem:[#allocation11 + $0x68] sm:$0xff]  ;;  %v708_v9 = vld [vmem:[#allocation11 + $0x58] sm:$0xff] }
 0x24f   :  { %v890_v16 = vpop.eup %889  ;;  %557 = vmatpush.msra.mxu3 %v556_v10  ;;  %v722_v10 = vld [vmem:[#allocation13 + $0x48] sm:$0xff] }
 0x250   :  { %v293_v21 = vmul.f32 %v890_v16, %v1313_v60  ;;  %vm298_vm13 = vweird.f32 %v890_v16  ;;  %v527_v60 = vld [vmem:[#allocation5 + $0x10] sm:$0xff] }
 0x251   :  { %558 = vmatpush.msra.mxu3 %v555_v14  ;;  %vm299_vm15 = vmor %vm297_vm14, %vm298_vm13  ;;  %593 = vmatpush.msra.mxu1 %v527_v60  ;;  %v719_v14 = vld [vmem:[#allocation13 + $0x30] sm:$0xff] }
 0x252   :  { %v294_v26 = vsub.f32 1.0, %v293_v21  ;;  %v717_v21 = vld [vmem:[#allocation13 + $0x20] sm:$0xff] }
 0x253   :  { %559 = vmatpush.msra.mxu3 %v554_v22  ;;  %594 = vmatpush.msra.mxu1 %v526_v61  ;;  %v704_v22 = vld [vmem:[#allocation11 + $0x38] sm:$0xff] }
 0x254   :  { %v295_v30 = vmul.f32 %v890_v16, %v294_v26 }
 0x255   :  { %560 = vmatpush.msra.mxu3 %v553_v27  ;;  %595 = vmatpush.msra.mxu1 %v525_v62  ;;  %v867_v27 = vld [vmem:[%s1355_s8] ss:$0 sm:$0xff]  ;;  %v788_v62 = vld [vmem:[#allocation14 + $0x28] sm:$0xff] }
 0x256   :  { %v296_v35 = vadd.f32 %v890_v16, %v295_v30  ;;  %596 = vmatmul.f32.vlgmr.msra.gmra.mxu1 %v1269_v7  ;;  %685 = vmatmul.f32.gmra.mxu0 %v1284_v19  ;;  %v724_v7 = vld [vmem:[#allocation13 + $0x58] sm:$0xff]  ;;  %v723_v19 = vld [vmem:[#allocation13 + $0x50] sm:$0xff] }
 0x257   :  { %561 = vmatpush.msra.mxu3 %v552_v23  ;;  %752 = vmatpush.msrb.mxu1 %v712_v2  ;;  %v702_v23 = vld [vmem:[#allocation11 + $0x28] sm:$0xff] }
 0x258   :  { %v300_v38 = vsel %vm299_vm15, %v890_v16, %v296_v35  ;;  %v701_v35 = vld [vmem:[#allocation11 + $0x20] sm:$0xff] }
 0x259   :  { %v305_v40 = vsel %vm302_vm1, %v304_v32, %v300_v38  ;;  %562 = vmatpush.msra.mxu3 %v551_v36  ;;  %753 = vmatpush.msrb.mxu1 %v711_v4  ;;  %v713_v36 = vld [vmem:[#allocation13] sm:$0xff]  ;;  %v699_v32 = vld [vmem:[#allocation11 + $0x10] sm:$0xff]  ;;  %v786_v4 = vld [vmem:[#allocation14 + $0x18] sm:$0xff] }
 0x25a   :  { %v306_v41 = vmul.f32 %v1307_v31, %v305_v40  ;;  %v543_v31 = vld [vmem:[#allocation7 + $0x10] sm:$0xff]  ;;  %v698_v40 = vld [vmem:[#allocation11 + $0x8] sm:$0xff] }
 0x25b   :  { %563 = vmatpush.msra.mxu3 %v550_v39  ;;  %754 = vmatpush.msrb.mxu1 %v710_v6  ;;  %v785_v6 = vld [vmem:[#allocation14 + $0x10] sm:$0xff] }
 0x25c   :  { %852 = vmatmul.msk.f32.vlgmr.msrb.gmra.mxu3 %vm258_vm0, %v306_v41 }
 0x25d   :  { %564 = vmatpush.msra.mxu3 %v549_v42  ;;  %755 = vmatpush.msrb.mxu1 %v709_v8  ;;  %v697_v42 = vld [vmem:[#allocation11] sm:$0xff] }
 0x25e   :  { %599 = vmatmul.f32.gmra.mxu1 %v1278_v18  ;;  %v707_v18 = vld [vmem:[#allocation11 + $0x50] sm:$0xff]  ;;  %v783_v8 = vld [vmem:[#allocation14] sm:$0xff] }
 0x25f   :  { %565 = vmatpush.msra.mxu3 %v548_v43  ;;  %756 = vmatpush.msrb.mxu1 %v708_v9  ;;  %v869_v9 = vld [vmem:[%s1358_s11] ss:$0 sm:$0xff]  ;;  %s832_s11 = sshll.u32 %s1137_s26, 4  ;;  %s833_s11 = int_to_ptr.vmem [resolvable:$true] %s832_s11 }
 0x261   :  { %566 = vmatpush.msra.mxu3 %v547_v44  ;;  %757 = vmatpush.msrb.mxu1 %v707_v18 }
 0x263   :  { %567 = vmatpush.msra.mxu3 %v546_v45  ;;  %758 = vmatpush.msrb.mxu1 %v706_v11 }
 0x265   :  { %568 = vmatpush.msra.mxu3 %v545_v46  ;;  %759 = vmatpush.msrb.mxu1 %v705_v20  ;;  %v798_v46 = vld [vmem:[#allocation14 + $0x78] sm:$0xff] }
 0x266   :  { %803 = vmatpush.msrb.mxu2 %v798_v46 }
 0x267   :  { %569 = vmatpush.msra.mxu3 %v544_v47  ;;  %760 = vmatpush.msrb.mxu1 %v704_v22  ;;  %v797_v47 = vld [vmem:[#allocation14 + $0x70] sm:$0xff] }
 0x268   :  { %804 = vmatpush.msrb.mxu2 %v797_v47 }
 0x269   :  { %570 = vmatpush.msra.mxu3 %v543_v31  ;;  %761 = vmatpush.msrb.mxu1 %v703_v25  ;;  %v868_v31 = vld [vmem:[%s1352_s5] ss:$0 sm:$0xff] }
 0x26a   :  { %805 = vmatpush.msrb.mxu2 %v796_v48 }
 0x26b   :  { %571 = vmatpush.msra.mxu3 %v542_v53  ;;  %762 = vmatpush.msrb.mxu1 %v702_v23 }
 0x26c   :  { %806 = vmatpush.msrb.mxu2 %v795_v50 }
 0x26d   :  { %572 = vmatpush.msra.mxu3 %v541_v57  ;;  %763 = vmatpush.msrb.mxu1 %v701_v35  ;;  %v791_v57 = vld [vmem:[#allocation14 + $0x40] sm:$0xff] }
 0x26e   :  { %807 = vmatpush.msrb.mxu2 %v794_v52 }
 0x26f   :  { %729 = vmatpush.msrb.mxu3 %v728_v0  ;;  %764 = vmatpush.msrb.mxu1 %v700_v37  ;;  %v787_v0 = vld [vmem:[#allocation14 + $0x20] sm:$0xff] }
 0x270   :  { %808 = vmatpush.msrb.mxu2 %v793_v54 }
 0x271   :  { %730 = vmatpush.msrb.mxu3 %v727_v1  ;;  %765 = vmatpush.msrb.mxu1 %v699_v32 }
 0x273   :  { %731 = vmatpush.msrb.mxu3 %v726_v3  ;;  %766 = vmatpush.msrb.mxu1 %v698_v40 }
 0x275   :  { %732 = vmatpush.msrb.mxu3 %v725_v5  ;;  %767 = vmatpush.msrb.mxu1 %v697_v42  ;;  %v784_v5 = vld [vmem:[#allocation14 + $0x8] sm:$0xff] }
 0x277   :  { %733 = vmatpush.msrb.mxu3 %v724_v7 }
 0x279   :  { %734 = vmatpush.msrb.mxu3 %v723_v19 }
 0x27b   :  { %735 = vmatpush.msrb.mxu3 %v722_v10 }
 0x27d   :  { %736 = vmatpush.msrb.mxu3 %v721_v12 }
 0x27f   :  { %737 = vmatpush.msrb.mxu3 %v720_v13 }
 0x281   :  { %738 = vmatpush.msrb.mxu3 %v719_v14 }
 0x283   :  { %739 = vmatpush.msrb.mxu3 %v718_v17  ;;  %v870_v17 = vld [vmem:[%s1360_s13] ss:$0 sm:$0xff] }
 0x285   :  { %740 = vmatpush.msrb.mxu3 %v717_v21 }
 0x287   :  { %741 = vmatpush.msrb.mxu3 %v716_v24 }
 0x289   :  { %742 = vmatpush.msrb.mxu3 %v715_v33 }
 0x28b   :  { %743 = vmatpush.msrb.mxu3 %v714_v34 }
 0x28d   :  { %744 = vmatpush.msrb.mxu3 %v713_v36 }
 0x295   :  { %v467_v56 = vpop.f32.mrf.mxu1 }
 0x296   :  { %659 = vmatmul.f32.vlgmr.msra.gmra.mxu2 %v467_v56  ;;  %v792_v56 = vld [vmem:[#allocation14 + $0x48] sm:$0xff] }
 0x297   :  { %809 = vmatpush.msrb.mxu2 %v792_v56 }
 0x299   :  { %810 = vmatpush.msrb.mxu2 %v791_v57 }
 0x29b   :  { %811 = vmatpush.msrb.mxu2 %v790_v58 }
 0x29d   :  { %812 = vmatpush.msrb.mxu2 %v789_v59 }
 0x29f   :  { %813 = vmatpush.msrb.mxu2 %v788_v62 }
 0x2a1   :  { %814 = vmatpush.msrb.mxu2 %v787_v0 }
 0x2a3   :  { %815 = vmatpush.msrb.mxu2 %v786_v4 }
 0x2a5   :  { %816 = vmatpush.msrb.mxu2 %v785_v6 }
 0x2a7   :  { %817 = vmatpush.msrb.mxu2 %v784_v5 }
 0x2a9   :  { %v522_v63 = vpop.f32.mrf.mxu2  ;;  %818 = vmatpush.msrb.mxu2 %v783_v8 }
 0x2aa   :  { %662 = vmatmul.f32.gmra.mxu2 %v522_v63 }
 0x2cb   :  { %v683_v28 = vpop.f32.mrf.mxu0 }
 0x2d1   :  { %v389_v15 = vpop.f32.mrf.mxu3 }
 0x2d2   :  { %573 = vmatmul.f32.vlgmr.msra.gmra.mxu3 %v389_v15 }
 0x2d3   :  { %v686_v39 = vpop.f32.mrf.mxu0  ;;  %v597_v49 = vpop.f32.mrf.mxu1 }
 0x2db   :  { %v600_v61 = vpop.f32.mrf.mxu1 }
 0x2df   :  { %v412_v16 = vpop.f32.mrf.mxu3 }
 0x2e0   :  { %576 = vmatmul.f32.gmra.mxu3 %v412_v16 }
 0x319   :  { %v660_v26 = vpop.f32.mrf.mxu2 }
 0x31a   :  { %v684_v29 = vadd.f32 %v683_v28, %v660_v26 }
 0x31c   :  { %v693_v30 = vadd.f32 %v867_v27, %v684_v29 }
 0x31e   :  { %891 = vtanh.f32 %v693_v30 }
 0x324   :  { %v892_v38 = vpop.eup %891 }
 0x325   :  { %745 = vmatmul.f32.vlgmr.msrb.gmra.mxu3 %v892_v38 }
 0x32d   :  { %v663_v41 = vpop.f32.mrf.mxu2 }
 0x32e   :  { %v687_v43 = vadd.f32 %v686_v39, %v663_v41 }
 0x330   :  { %v694_v44 = vadd.f32 %v867_v27, %v687_v43 }
 0x332   :  { %893 = vtanh.f32 %v694_v44 }
 0x338   :  { %v894_v45 = vpop.eup %893 }
 0x339   :  { %748 = vmatmul.f32.gmra.mxu3 %v894_v45 }
 0x355   :  { %v574_v51 = vpop.f32.mrf.mxu3 }
 0x356   :  { %v598_v53 = vadd.f32 %v597_v49, %v574_v51 }
 0x358   :  { %v607_v55 = vadd.f32 %v868_v31, %v598_v53 }
 0x35a   :  { %895 = vtanh.f32 %v607_v55 }
 0x360   :  { %v896_v60 = vpop.eup %895 }
 0x361   :  { %768 = vmatmul.f32.vlgmr.msrb.gmra.mxu1 %v896_v60 }
 0x363   :  { %v577_v63 = vpop.f32.mrf.mxu3 }
 0x364   :  { %v601_v1 = vadd.f32 %v600_v61, %v577_v63 }
 0x366   :  { %v608_v2 = vadd.f32 %v868_v31, %v601_v1 }
 0x368   :  { %897 = vtanh.f32 %v608_v2 }
 0x36e   :  { %v898_v3 = vpop.eup %897 }
 0x36f   :  { %771 = vmatmul.f32.gmra.mxu1 %v898_v3 }
 0x3a8   :  { %v746_v7 = vpop.f32.mrf.mxu3 }
 0x3bc   :  { %v749_v12 = vpop.f32.mrf.mxu3 }
 0x3de   :  { %v769_v19 = vpop.f32.mrf.mxu1 }
 0x3df   :  { %v770_v18 = vadd.f32 %v769_v19, %v746_v7 }
 0x3e1   :  { %v779_v10 = vadd.f32 %v869_v9, %v770_v18 }
 0x3e3   :  { %v781_v11 = vmax.f32 %v779_v10, 0.0 }
 0x3e5   :  { %819 = vmatmul.f32.vlgmr.msrb.gmra.mxu2 %v781_v11 }
 0x3ec   :  { %v772_v13 = vpop.f32.mrf.mxu1 }
 0x3ed   :  { %v773_v14 = vadd.f32 %v772_v13, %v749_v12 }
 0x3ef   :  { %v780_v15 = vadd.f32 %v869_v9, %v773_v14 }
 0x3f1   :  { %v782_v16 = vmax.f32 %v780_v15, 0.0 }
 0x3f3   :  { %822 = vmatmul.f32.gmra.mxu2 %v782_v16 }
 0x468   :  { %v820_v20 = vpop.f32.mrf.mxu2 }
 0x469   :  { %v821_v21 = vadd.f32 %v870_v17, %v820_v20 }
 0x46b   :  { %826 = vst [vmem:[#allocation16] sm:$0xff] %v821_v21 }
 0x476   :  { %v823_v22 = vpop.f32.mrf.mxu2 }
 0x477   :  { %v824_v24 = vadd.f32 %v870_v17, %v823_v22 }
 0x479   :  { %827 = vst [vmem:[#allocation16 + $0x8] sm:$0xff] %v824_v24 }
 0x47a   :  { %840 = dma.vmem_to_hbm [thread:$0]  %s833_s11, 256, %s835_s7, [#allocation4], %s1128_s21, %s1128_s21, %s1129_s22  }
 0x47b   :  { %1125 = dma.done.wait [#allocation4], 256  }
 0x47c   :  { %1126 = vsyncadd [#allocation4], 4294967040 }
 0x47d   :  { %845 = vsyncpa [#allocation3], 1 }
 0x47e   :  { %846 = vsyncpa [#allocation6], 1 }
 0x47f   :  { %847 = vsyncpa [#allocation9], 1 }
 0x480   :  { %848 = vsyncpa [#allocation12], 1 }
 0x481   :  { %849 = vsyncpa [#allocation15], 1 }
 0x482   :  { %850 = vsyncpa [#allocation4], 1 }

// kernel: dcn_with_rcnn_forward.4
= control target key start
LH: loop header
LB: loop body
LE: loop exit
PB: predicated region body
PF: predicated region fallthrough
CT: control target
= control target key end

     0   :  { %10 = vsyncpa [#allocation3], 0  ;;  %s3112_s0 = inlined_call_operand.hbm [shape: f32[2,8,128], index: 0, kind: input, shape index: {}]   ;;  %s3113_s1 = inlined_call_operand.hbm [shape: f32[128,384], index: 1, kind: input, shape index: {}]   ;;  %s3114_s2 = inlined_call_operand.hbm [shape: f32[128,384], index: 2, kind: input, shape index: {}]   ;;  %s3115_s3 = inlined_call_operand.vmem [shape: f32[1,384], index: 3, kind: input, shape index: {}]   ;;  %s3116_s4 = inlined_call_operand.hbm [shape: f32[1,384], index: 4, kind: input, shape index: {}]   ;;  %s3117_s5 = inlined_call_operand.vmem [shape: f32[2,8,128], index: 5, kind: output, shape index: {}]  }
   0x1   :  { %11 = vsyncpa [#allocation5], 0  ;;  %s30_s20 = sshll.u32 %s3113_s1, 4  ;;  %s31_s20 = int_to_ptr.hbm [resolvable:$true] %s30_s20 }
   0x2   :  { %12 = vsyncpa [#allocation8], 0  ;;  %s2102_s21 = smov [#allocation4]   ;;  %s17_s25 = sshll.u32 %s3112_s0, 4  ;;  %s18_s25 = int_to_ptr.hbm [resolvable:$true] %s17_s25 }
   0x3   :  { %s32_s22 = sshll.u32 %s2102_s21, 4  ;;  %s2103_s26 = smov 384   ;;  %s33_s22 = int_to_ptr.vmem [resolvable:$true] %s32_s22 }
   0x4   :  { %s2104_s27 = smov 24   ;;  %s2105_s28 = smov [#allocation2]  }
   0x5   :  { %38 = dma.hbm_to_vmem [thread:$0]  %s31_s20, 6144, %s33_s22, [#allocation5], %s2103_s26, %s2103_s26, %s2104_s27  }
   0x6   :  { %s19_s29 = sshll.u32 %s2105_s28, 4  ;;  %s2106_s30 = smov 128   ;;  %s20_s29 = int_to_ptr.vmem [resolvable:$true] %s19_s29 }
   0x7   :  { %s2107_s6 = smov 8   ;;  %s43_s8 = sshll.u32 %s3114_s2, 4  ;;  %s44_s8 = int_to_ptr.hbm [resolvable:$true] %s43_s8 }
   0x8   :  { %25 = dma.hbm_to_vmem [thread:$0]  %s18_s25, 256, %s20_s29, [#allocation3], %s2106_s30, %s2106_s30, %s2107_s6  }
   0x9   :  { %s2108_s9 = smov [#allocation6]   ;;  %s59_s12 = sshll.u32 %s3116_s4, 4  ;;  %s60_s12 = int_to_ptr.hbm [resolvable:$true] %s59_s12 }
   0xa   :  { %s45_s10 = sshll.u32 %s2108_s9, 4  ;;  %s2109_s13 = smov [#allocation7]   ;;  %s46_s10 = int_to_ptr.vmem [resolvable:$true] %s45_s10 }
   0xb   :  { %51 = dma.hbm_to_vmem [thread:$0]  %s44_s8, 6144, %s46_s10, [#allocation5], %s2103_s26, %s2103_s26, %s2104_s27  }
   0xc   :  { %s61_s14 = sshll.u32 %s2109_s13, 4  ;;  %s62_s14 = int_to_ptr.vmem [resolvable:$true] %s61_s14 }
   0xd   :  { %64 = dma.hbm_to_vmem [thread:$0]  %s60_s12, 48, %s62_s14, [#allocation8]  }
   0xe   :  { %2096 = dma.done.wait [#allocation3], 256  }
   0xf   :  { %2097 = vsyncadd [#allocation3], 4294967040 }
  0x10   :  { %2098 = dma.done.wait [#allocation5], 12288  }
  0x11   :  { %2099 = vsyncadd [#allocation5], 4294955008 }
  0x12   :  { %2100 = dma.done.wait [#allocation8], 48  }
  0x13   :  { %2101 = vsyncadd [#allocation8], 4294967248  ;;  %v2153_v0 = vld [vmem:[#allocation2] sm:$0xff]  ;;  %v158_v1 = vld [vmem:[#allocation4 + $0x168] sm:$0xff] }
  0x14   :  { %v83_v2 = vmul.f32 %v2153_v0, %v2153_v0  ;;  %169 = vmatpush.msra.mxu0 %v158_v1  ;;  %v155_v3 = vld [vmem:[#allocation4 + $0x150] sm:$0xff]  ;;  %v152_v4 = vld [vmem:[#allocation4 + $0x138] sm:$0xff]  ;;  %v2157_v5 = vld [vmem:[#allocation6 + $0x168] sm:$0xff] }
  0x15   :  { %v2159_v6 = vld [vmem:[#allocation2 + $0x8] sm:$0xff]  ;;  %v2161_v7 = vld [vmem:[#allocation6 + $0x150] sm:$0xff]  ;;  %v149_v8 = vld [vmem:[#allocation4 + $0x120] sm:$0xff]  ;;  %294 = vmatpush.msra.mxu3 %v2157_v5 }
  0x16   :  { %85 = vadd.xlane.f32.xlu0 %v83_v2  ;;  %170 = vmatpush.msra.mxu0 %v155_v3  ;;  %v159_v9 = vld [vmem:[#allocation4 + $0x170] sm:$0xff]  ;;  %v160_v10 = vld [vmem:[#allocation4 + $0x178] sm:$0xff]  ;;  %v146_v13 = vld [vmem:[#allocation4 + $0x108] sm:$0xff]  ;;  %v84_v15 = vmul.f32 %v2159_v6, %v2159_v6 }
  0x17   :  { %v2164_v11 = vld [vmem:[#allocation6 + $0x138] sm:$0xff]  ;;  %192 = vmatpush.msra.mxu1 %v159_v9  ;;  %295 = vmatpush.msra.mxu3 %v2161_v7  ;;  %v157_v14 = vld [vmem:[#allocation4 + $0x160] sm:$0xff]  ;;  %v154_v18 = vld [vmem:[#allocation4 + $0x148] sm:$0xff] }
  0x18   :  { %171 = vmatpush.msra.mxu0 %v152_v4  ;;  %v156_v12 = vld [vmem:[#allocation4 + $0x158] sm:$0xff]  ;;  %215 = vmatpush.msra.mxu2 %v160_v10  ;;  %v2169_v16 = vld [vmem:[#allocation6 + $0x120] sm:$0xff]  ;;  %v143_v19 = vld [vmem:[#allocation4 + $0xf0] sm:$0xff]  ;;  %v2110_v10 = vmov 0.0  }
  0x19   :  { %193 = vmatpush.msra.mxu1 %v156_v12  ;;  %v153_v17 = vld [vmem:[#allocation4 + $0x140] sm:$0xff]  ;;  %296 = vmatpush.msra.mxu3 %v2164_v11  ;;  %v2172_v20 = vld [vmem:[#allocation6 + $0x108] sm:$0xff]  ;;  %v140_v22 = vld [vmem:[#allocation4 + $0xd8] sm:$0xff] }
  0x1a   :  { %172 = vmatpush.msra.mxu0 %v149_v8  ;;  %216 = vmatpush.msra.mxu2 %v157_v14  ;;  %v150_v21 = vld [vmem:[#allocation4 + $0x128] sm:$0xff]  ;;  %v151_v23 = vld [vmem:[#allocation4 + $0x130] sm:$0xff]  ;;  %v137_v26 = vld [vmem:[#allocation4 + $0xc0] sm:$0xff] }
  0x1b   :  { %194 = vmatpush.msra.mxu1 %v153_v17  ;;  %297 = vmatpush.msra.mxu3 %v2169_v16  ;;  %v2175_v24 = vld [vmem:[#allocation6 + $0xf0] sm:$0xff]  ;;  %v148_v27 = vld [vmem:[#allocation4 + $0x118] sm:$0xff]  ;;  %v134_v29 = vld [vmem:[#allocation4 + $0xa8] sm:$0xff] }
  0x1c   :  { %173 = vmatpush.msra.mxu0 %v146_v13  ;;  %217 = vmatpush.msra.mxu2 %v154_v18  ;;  %v147_v25 = vld [vmem:[#allocation4 + $0x110] sm:$0xff]  ;;  %v2178_v28 = vld [vmem:[#allocation6 + $0xd8] sm:$0xff]  ;;  %v2181_v30 = vld [vmem:[#allocation6 + $0xc0] sm:$0xff] }
  0x1d   :  { %298 = vmatpush.msra.mxu3 %v2172_v20  ;;  %195 = vmatpush.msra.mxu1 %v150_v21  ;;  %v131_v31 = vld [vmem:[#allocation4 + $0x90] sm:$0xff]  ;;  %v128_v32 = vld [vmem:[#allocation4 + $0x78] sm:$0xff]  ;;  %v125_v33 = vld [vmem:[#allocation4 + $0x60] sm:$0xff] }
  0x1e   :  { %87 = vadd.xlane.f32.xlu0 %v84_v15  ;;  %174 = vmatpush.msra.mxu0 %v143_v19  ;;  %v122_v34 = vld [vmem:[#allocation4 + $0x48] sm:$0xff]  ;;  %v144_v35 = vld [vmem:[#allocation4 + $0xf8] sm:$0xff]  ;;  %v145_v36 = vld [vmem:[#allocation4 + $0x100] sm:$0xff] }
  0x1f   :  { %218 = vmatpush.msra.mxu2 %v151_v23  ;;  %299 = vmatpush.msra.mxu3 %v2175_v24  ;;  %v2185_v37 = vld [vmem:[#allocation6 + $0xa8] sm:$0xff]  ;;  %v119_v38 = vld [vmem:[#allocation4 + $0x30] sm:$0xff]  ;;  %v141_v39 = vld [vmem:[#allocation4 + $0xe0] sm:$0xff] }
  0x20   :  { %175 = vmatpush.msra.mxu0 %v140_v22  ;;  %196 = vmatpush.msra.mxu1 %v147_v25  ;;  %v142_v40 = vld [vmem:[#allocation4 + $0xe8] sm:$0xff]  ;;  %v2188_v41 = vld [vmem:[#allocation6 + $0x90] sm:$0xff]  ;;  %v116_v42 = vld [vmem:[#allocation4 + $0x18] sm:$0xff] }
  0x21   :  { %219 = vmatpush.msra.mxu2 %v148_v27  ;;  %300 = vmatpush.msra.mxu3 %v2178_v28  ;;  %v138_v43 = vld [vmem:[#allocation4 + $0xc8] sm:$0xff]  ;;  %v139_v44 = vld [vmem:[#allocation4 + $0xd0] sm:$0xff]  ;;  %v2191_v45 = vld [vmem:[#allocation6 + $0x78] sm:$0xff] }
  0x22   :  { %176 = vmatpush.msra.mxu0 %v137_v26  ;;  %197 = vmatpush.msra.mxu1 %v144_v35  ;;  %v113_v46 = vld [vmem:[#allocation4] sm:$0xff]  ;;  %v135_v47 = vld [vmem:[#allocation4 + $0xb0] sm:$0xff]  ;;  %v136_v48 = vld [vmem:[#allocation4 + $0xb8] sm:$0xff] }
  0x23   :  { %301 = vmatpush.msra.mxu3 %v2181_v30  ;;  %220 = vmatpush.msra.mxu2 %v145_v36  ;;  %v2194_v49 = vld [vmem:[#allocation6 + $0x60] sm:$0xff]  ;;  %v2196_v50 = vld [vmem:[#allocation6 + $0x170] sm:$0xff]  ;;  %v132_v51 = vld [vmem:[#allocation4 + $0x98] sm:$0xff] }
  0x24   :  { %177 = vmatpush.msra.mxu0 %v134_v29  ;;  %198 = vmatpush.msra.mxu1 %v141_v39  ;;  %v133_v52 = vld [vmem:[#allocation4 + $0xa0] sm:$0xff]  ;;  %v2200_v53 = vld [vmem:[#allocation6 + $0x48] sm:$0xff]  ;;  %v2202_v54 = vld [vmem:[#allocation6 + $0x158] sm:$0xff] }
  0x25   :  { %302 = vmatpush.msra.mxu3 %v2185_v37  ;;  %221 = vmatpush.msra.mxu2 %v142_v40  ;;  %3185 = vst [vmem:[#allocation12_spill] sm:$0xff] %v2200_v53  ;;  %v129_v55 = vld [vmem:[#allocation4 + $0x80] sm:$0xff]  ;;  %v130_v56 = vld [vmem:[#allocation4 + $0x88] sm:$0xff]  ;;  %v2206_v57 = vld [vmem:[#allocation6 + $0x30] sm:$0xff] }
  0x26   :  { %178 = vmatpush.msra.mxu0 %v131_v31  ;;  %199 = vmatpush.msra.mxu1 %v138_v43  ;;  %3186 = vst [vmem:[#allocation13_spill] sm:$0xff] %v2206_v57  ;;  %v2208_v58 = vld [vmem:[#allocation6 + $0x140] sm:$0xff]  ;;  %v126_v59 = vld [vmem:[#allocation4 + $0x68] sm:$0xff]  ;;  %v127_v60 = vld [vmem:[#allocation4 + $0x70] sm:$0xff] }
  0x27   :  { %303 = vmatpush.msra.mxu3 %v2188_v41  ;;  %222 = vmatpush.msra.mxu2 %v139_v44  ;;  %v2212_v61 = vld [vmem:[#allocation6 + $0x18] sm:$0xff]  ;;  %v2214_v62 = vld [vmem:[#allocation6 + $0x128] sm:$0xff]  ;;  %v123_v63 = vld [vmem:[#allocation4 + $0x50] sm:$0xff] }
  0x28   :  { %179 = vmatpush.msra.mxu0 %v128_v32  ;;  %200 = vmatpush.msra.mxu1 %v135_v47  ;;  %3187 = vst [vmem:[#allocation14_spill] sm:$0xff] %v2212_v61  ;;  %v124_v1 = vld [vmem:[#allocation4 + $0x58] sm:$0xff]  ;;  %v2218_v2 = vld [vmem:[#allocation6] sm:$0xff]  ;;  %v2220_v3 = vld [vmem:[#allocation6 + $0x110] sm:$0xff] }
  0x29   :  { %304 = vmatpush.msra.mxu3 %v2191_v45  ;;  %223 = vmatpush.msra.mxu2 %v136_v48  ;;  %3188 = vst [vmem:[#allocation15_spill] sm:$0xff] %v2218_v2  ;;  %v120_v4 = vld [vmem:[#allocation4 + $0x38] sm:$0xff]  ;;  %v121_v8 = vld [vmem:[#allocation4 + $0x40] sm:$0xff]  ;;  %v118_v13 = vld [vmem:[#allocation4 + $0x28] sm:$0xff] }
  0x2a   :  { %180 = vmatpush.msra.mxu0 %v125_v33  ;;  %201 = vmatpush.msra.mxu1 %v132_v51  ;;  %v2224_v9 = vld [vmem:[#allocation6 + $0xf8] sm:$0xff]  ;;  %v117_v12 = vld [vmem:[#allocation4 + $0x20] sm:$0xff]  ;;  %v114_v15 = vld [vmem:[#allocation4 + $0x8] sm:$0xff] }
  0x2b   :  { %305 = vmatpush.msra.mxu3 %v2194_v49  ;;  %224 = vmatpush.msra.mxu2 %v133_v52  ;;  %v2228_v14 = vld [vmem:[#allocation6 + $0xe0] sm:$0xff]  ;;  %v115_v17 = vld [vmem:[#allocation4 + $0x10] sm:$0xff]  ;;  %v2232_v18 = vld [vmem:[#allocation6 + $0xc8] sm:$0xff] }
  0x2c   :  { %181 = vmatpush.msra.mxu0 %v122_v34  ;;  %202 = vmatpush.msra.mxu1 %v129_v55  ;;  %v2234_v19 = vld [vmem:[#allocation6 + $0x178] sm:$0xff]  ;;  %v2239_v21 = vld [vmem:[#allocation6 + $0xb0] sm:$0xff]  ;;  %v2241_v22 = vld [vmem:[#allocation6 + $0x160] sm:$0xff] }
  0x2d   :  { %306 = vmatpush.msra.mxu3 %v2200_v53  ;;  %225 = vmatpush.msra.mxu2 %v130_v56  ;;  %v2246_v23 = vld [vmem:[#allocation6 + $0x98] sm:$0xff]  ;;  %v2248_v25 = vld [vmem:[#allocation6 + $0x148] sm:$0xff]  ;;  %v2254_v26 = vld [vmem:[#allocation6 + $0x80] sm:$0xff] }
  0x2e   :  { %182 = vmatpush.msra.mxu0 %v119_v38  ;;  %203 = vmatpush.msra.mxu1 %v126_v59  ;;  %v2256_v27 = vld [vmem:[#allocation6 + $0x130] sm:$0xff]  ;;  %v2262_v29 = vld [vmem:[#allocation6 + $0x68] sm:$0xff]  ;;  %v2264_v31 = vld [vmem:[#allocation6 + $0x118] sm:$0xff] }
  0x2f   :  { %307 = vmatpush.msra.mxu3 %v2206_v57  ;;  %226 = vmatpush.msra.mxu2 %v127_v60  ;;  %3189 = vst [vmem:[#allocation16_spill] sm:$0xff] %v2262_v29  ;;  %v2270_v33 = vld [vmem:[#allocation6 + $0x50] sm:$0xff]  ;;  %v2272_v34 = vld [vmem:[#allocation6 + $0x100] sm:$0xff]  ;;  %v2274_v35 = vld [vmem:[#allocation6 + $0x38] sm:$0xff] }
  0x30   :  { %183 = vmatpush.msra.mxu0 %v116_v42  ;;  %204 = vmatpush.msra.mxu1 %v123_v63  ;;  %3190 = vst [vmem:[#allocation17_spill] sm:$0xff] %v2270_v33  ;;  %v2280_v38 = vld [vmem:[#allocation6 + $0xe8] sm:$0xff]  ;;  %v2282_v39 = vld [vmem:[#allocation6 + $0x20] sm:$0xff]  ;;  %v2284_v40 = vld [vmem:[#allocation6 + $0xd0] sm:$0xff] }
  0x31   :  { %308 = vmatpush.msra.mxu3 %v2212_v61  ;;  %227 = vmatpush.msra.mxu2 %v124_v1  ;;  %3191 = vst [vmem:[#allocation18_spill] sm:$0xff] %v2274_v35  ;;  %v2290_v42 = vld [vmem:[#allocation6 + $0x8] sm:$0xff]  ;;  %v2292_v43 = vld [vmem:[#allocation6 + $0xb8] sm:$0xff]  ;;  %v2302_v44 = vld [vmem:[#allocation6 + $0xa0] sm:$0xff] }
  0x32   :  { %184 = vmatpush.msra.mxu0 %v113_v46  ;;  %205 = vmatpush.msra.mxu1 %v120_v4  ;;  %3192 = vst [vmem:[#allocation19_spill] sm:$0xff] %v2282_v39  ;;  %v2304_v47 = vld [vmem:[#allocation6 + $0x88] sm:$0xff]  ;;  %v2309_v55 = vld [vmem:[#allocation6 + $0x70] sm:$0xff]  ;;  %v2314_v59 = vld [vmem:[#allocation6 + $0x58] sm:$0xff] }
  0x33   :  { %309 = vmatpush.msra.mxu3 %v2218_v2  ;;  %228 = vmatpush.msra.mxu2 %v121_v8  ;;  %3193 = vst [vmem:[#allocation20_spill] sm:$0xff] %v2290_v42  ;;  %v2319_v63 = vld [vmem:[#allocation6 + $0x40] sm:$0xff]  ;;  %v2324_v4 = vld [vmem:[#allocation6 + $0x28] sm:$0xff] }
  0x34   :  { %314 = vmatpush.msrb.mxu0 %v2196_v50  ;;  %310 = vmatmul.f32.vlgmr.msra.gmra.mxu3 %v2110_v10  ;;  %3194 = vst [vmem:[#allocation21_spill] sm:$0xff] %v2314_v59 }
  0x35   :  { %206 = vmatpush.msra.mxu1 %v117_v12  ;;  %229 = vmatpush.msra.mxu2 %v118_v13  ;;  %3195 = vst [vmem:[#allocation22_spill] sm:$0xff] %v2319_v63 }
  0x36   :  { %315 = vmatpush.msrb.mxu0 %v2202_v54  ;;  %490 = vmatpush.msrb.mxu3 %v2196_v50  ;;  %3196 = vst [vmem:[#allocation23_spill] sm:$0xff] %v2324_v4 }
  0x37   :  { %207 = vmatpush.msra.mxu1 %v114_v15  ;;  %230 = vmatpush.msra.mxu2 %v115_v17  ;;  %v2329_v15 = vld [vmem:[#allocation6 + $0x10] sm:$0xff] }
  0x38   :  { %316 = vmatpush.msrb.mxu0 %v2208_v58  ;;  %491 = vmatpush.msrb.mxu3 %v2202_v54  ;;  %3197 = vst [vmem:[#allocation24_spill] sm:$0xff] %v2329_v15 }
  0x39   :  { %334 = vmatpush.msrb.mxu1 %v2234_v19  ;;  %470 = vmatpush.msrb.mxu2 %v2157_v5 }
  0x3a   :  { %317 = vmatpush.msrb.mxu0 %v2214_v62  ;;  %492 = vmatpush.msrb.mxu3 %v2208_v58 }
  0x3b   :  { %335 = vmatpush.msrb.mxu1 %v2241_v22  ;;  %471 = vmatpush.msrb.mxu2 %v2161_v7 }
  0x3c   :  { %318 = vmatpush.msrb.mxu0 %v2220_v3  ;;  %493 = vmatpush.msrb.mxu3 %v2214_v62 }
  0x3d   :  { %336 = vmatpush.msrb.mxu1 %v2248_v25  ;;  %472 = vmatpush.msrb.mxu2 %v2164_v11 }
  0x3e   :  { %319 = vmatpush.msrb.mxu0 %v2224_v9  ;;  %494 = vmatpush.msrb.mxu3 %v2220_v3 }
  0x3f   :  { %337 = vmatpush.msrb.mxu1 %v2256_v27  ;;  %473 = vmatpush.msrb.mxu2 %v2169_v16 }
  0x40   :  { %320 = vmatpush.msrb.mxu0 %v2228_v14  ;;  %495 = vmatpush.msrb.mxu3 %v2224_v9 }
  0x41   :  { %338 = vmatpush.msrb.mxu1 %v2264_v31  ;;  %474 = vmatpush.msrb.mxu2 %v2172_v20 }
  0x42   :  { %321 = vmatpush.msrb.mxu0 %v2232_v18  ;;  %496 = vmatpush.msrb.mxu3 %v2228_v14 }
  0x43   :  { %339 = vmatpush.msrb.mxu1 %v2272_v34  ;;  %475 = vmatpush.msrb.mxu2 %v2175_v24 }
  0x44   :  { %322 = vmatpush.msrb.mxu0 %v2239_v21  ;;  %497 = vmatpush.msrb.mxu3 %v2232_v18 }
  0x45   :  { %340 = vmatpush.msrb.mxu1 %v2280_v38  ;;  %476 = vmatpush.msrb.mxu2 %v2178_v28 }
  0x46   :  { %323 = vmatpush.msrb.mxu0 %v2246_v23  ;;  %498 = vmatpush.msrb.mxu3 %v2239_v21 }
  0x47   :  { %341 = vmatpush.msrb.mxu1 %v2284_v40  ;;  %477 = vmatpush.msrb.mxu2 %v2181_v30 }
  0x48   :  { %324 = vmatpush.msrb.mxu0 %v2254_v26  ;;  %499 = vmatpush.msrb.mxu3 %v2246_v23 }
  0x49   :  { %342 = vmatpush.msrb.mxu1 %v2292_v43  ;;  %478 = vmatpush.msrb.mxu2 %v2185_v37 }
  0x4a   :  { %325 = vmatpush.msrb.mxu0 %v2262_v29  ;;  %500 = vmatpush.msrb.mxu3 %v2254_v26 }
  0x4b   :  { %343 = vmatpush.msrb.mxu1 %v2302_v44  ;;  %479 = vmatpush.msrb.mxu2 %v2188_v41 }
  0x4c   :  { %326 = vmatpush.msrb.mxu0 %v2270_v33  ;;  %501 = vmatpush.msrb.mxu3 %v2262_v29 }
  0x4d   :  { %344 = vmatpush.msrb.mxu1 %v2304_v47  ;;  %480 = vmatpush.msrb.mxu2 %v2191_v45 }
  0x4e   :  { %327 = vmatpush.msrb.mxu0 %v2274_v35  ;;  %502 = vmatpush.msrb.mxu3 %v2270_v33 }
  0x4f   :  { %345 = vmatpush.msrb.mxu1 %v2309_v55  ;;  %481 = vmatpush.msrb.mxu2 %v2194_v49 }
  0x50   :  { %328 = vmatpush.msrb.mxu0 %v2282_v39  ;;  %503 = vmatpush.msrb.mxu3 %v2274_v35 }
  0x51   :  { %346 = vmatpush.msrb.mxu1 %v2314_v59  ;;  %482 = vmatpush.msrb.mxu2 %v2200_v53 }
  0x52   :  { %329 = vmatpush.msrb.mxu0 %v2290_v42  ;;  %504 = vmatpush.msrb.mxu3 %v2282_v39 }
  0x53   :  { %347 = vmatpush.msrb.mxu1 %v2319_v63  ;;  %483 = vmatpush.msrb.mxu2 %v2206_v57 }
  0x54   :  { %505 = vmatpush.msrb.mxu3 %v2290_v42 }
  0x55   :  { %348 = vmatpush.msrb.mxu1 %v2324_v4  ;;  %484 = vmatpush.msrb.mxu2 %v2212_v61 }
  0x56   :  { %688 = vmatpush.msra.mxu3 %v2234_v19 }
  0x57   :  { %349 = vmatpush.msrb.mxu1 %v2329_v15  ;;  %485 = vmatpush.msrb.mxu2 %v2218_v2 }
  0x58   :  { %689 = vmatpush.msra.mxu3 %v2241_v22 }
  0x5a   :  { %690 = vmatpush.msra.mxu3 %v2248_v25 }
  0x5c   :  { %691 = vmatpush.msra.mxu3 %v2256_v27 }
  0x5e   :  { %692 = vmatpush.msra.mxu3 %v2264_v31 }
  0x60   :  { %693 = vmatpush.msra.mxu3 %v2272_v34 }
  0x62   :  { %694 = vmatpush.msra.mxu3 %v2280_v38 }
  0x64   :  { %695 = vmatpush.msra.mxu3 %v2284_v40 }
  0x66   :  { %696 = vmatpush.msra.mxu3 %v2292_v43 }
  0x68   :  { %697 = vmatpush.msra.mxu3 %v2302_v44 }
  0x6a   :  { %698 = vmatpush.msra.mxu3 %v2304_v47 }
  0x6c   :  { %699 = vmatpush.msra.mxu3 %v2309_v55 }
  0x6e   :  { %700 = vmatpush.msra.mxu3 %v2314_v59 }
  0x70   :  { %701 = vmatpush.msra.mxu3 %v2319_v63 }
  0x72   :  { %702 = vmatpush.msra.mxu3 %v2324_v4 }
  0x74   :  { %703 = vmatpush.msra.mxu3 %v2329_v15 }
  0x89   :  { %v86_v32 = vpop.xlane.xlu0 %85 }
  0x8a   :  { %v89_v36 = vadd.f32 1e-12, %v86_v32 }
  0x8c   :  { %1788 = vrsqrt.f32 %v89_v36  ;;  %vm97_vm1 = vweird.f32 %v89_v36 }
  0x91   :  { %v88_v46 = vpop.xlane.xlu0 %87 }
  0x92   :  { %v1789_v48 = vpop.eup %1788  ;;  %v90_v51 = vadd.f32 1e-12, %v88_v46 }
  0x93   :  { %v92_v52 = vmul.f32 %v1789_v48, %v89_v36  ;;  %vm98_vm0 = vweird.f32 %v1789_v48 }
  0x94   :  { %1790 = vrsqrt.f32 %v90_v51  ;;  %vm99_vm2 = vmor %vm97_vm1, %vm98_vm0  ;;  %vm107_vm4 = vweird.f32 %v90_v51 }
  0x95   :  { %v93_v56 = vmul.f32 %v1789_v48, %v92_v52 }
  0x97   :  { %v94_v60 = vmul.f32 0.5, %v93_v56 }
  0x99   :  { %v95_v1 = vsub.f32 1.5, %v94_v60 }
  0x9a   :  { %v1791_v8 = vpop.eup %1790 }
  0x9b   :  { %v96_v12 = vmul.f32 %v1789_v48, %v95_v1  ;;  %v102_v13 = vmul.f32 %v1791_v8, %v90_v51  ;;  %vm108_vm3 = vweird.f32 %v1791_v8 }
  0x9c   :  { %vm109_vm5 = vmor %vm107_vm4, %vm108_vm3 }
  0x9d   :  { %v100_v17 = vsel %vm99_vm2, %v1789_v48, %v96_v12  ;;  %v103_v32 = vmul.f32 %v1791_v8, %v102_v13 }
  0x9e   :  { %v2337_v46 = vmul.f32 %v100_v17, %v2153_v0 }
  0x9f   :  { %v104_v36 = vmul.f32 0.5, %v103_v32 }
  0xa0   :  { %185 = vmatmul.f32.vlgmr.msra.gmra.mxu0 %v2337_v46  ;;  %208 = vmatmul.f32.vlgmr.msra.gmra.mxu1 %v2337_v46 }
  0xa1   :  { %v105_v48 = vsub.f32 1.5, %v104_v36  ;;  %231 = vmatmul.f32.vlgmr.msra.gmra.mxu2 %v2337_v46  ;;  %510 = vmatpush.msra.mxu0 %v2234_v19 }
  0xa2   :  { %648 = vmatpush.msra.mxu1 %v2157_v5  ;;  %668 = vmatpush.msra.mxu2 %v2196_v50 }
  0xa3   :  { %v106_v0 = vmul.f32 %v1791_v8, %v105_v48  ;;  %511 = vmatpush.msra.mxu0 %v2241_v22 }
  0xa4   :  { %649 = vmatpush.msra.mxu1 %v2161_v7  ;;  %669 = vmatpush.msra.mxu2 %v2202_v54 }
  0xa5   :  { %v110_v52 = vsel %vm109_vm5, %v1791_v8, %v106_v0  ;;  %512 = vmatpush.msra.mxu0 %v2248_v25 }
  0xa6   :  { %v2355_v56 = vmul.f32 %v110_v52, %v2159_v6  ;;  %650 = vmatpush.msra.mxu1 %v2164_v11  ;;  %670 = vmatpush.msra.mxu2 %v2208_v58  ;;  %v286_v6 = vld [vmem:[#allocation7] sm:$0x7] }
  0xa7   :  { %513 = vmatpush.msra.mxu0 %v2256_v27  ;;  %v2453_v51 = vperm.slane %v286_v6, 0 }
  0xa8   :  { %188 = vmatmul.f32.gmra.mxu0 %v2355_v56  ;;  %211 = vmatmul.f32.gmra.mxu1 %v2355_v56 }
  0xa9   :  { %234 = vmatmul.f32.gmra.mxu2 %v2355_v56  ;;  %514 = vmatpush.msra.mxu0 %v2264_v31  ;;  %3198 = vst [vmem:[#allocation25_spill] sm:$0xff] %v2453_v51 }
  0xaa   :  { %651 = vmatpush.msra.mxu1 %v2169_v16  ;;  %671 = vmatpush.msra.mxu2 %v2214_v62 }
  0xab   :  { %515 = vmatpush.msra.mxu0 %v2272_v34 }
  0xac   :  { %652 = vmatpush.msra.mxu1 %v2172_v20  ;;  %672 = vmatpush.msra.mxu2 %v2220_v3 }
  0xad   :  { %516 = vmatpush.msra.mxu0 %v2280_v38 }
  0xae   :  { %653 = vmatpush.msra.mxu1 %v2175_v24  ;;  %673 = vmatpush.msra.mxu2 %v2224_v9 }
  0xaf   :  { %517 = vmatpush.msra.mxu0 %v2284_v40 }
  0xb0   :  { %330 = vmatmul.f32.vlgmr.msrb.gmra.mxu0 %v2110_v10  ;;  %350 = vmatmul.f32.vlgmr.msrb.gmra.mxu1 %v2110_v10  ;;  %v2451_v10 = vld [vmem:[%s3115_s3] sm:$0x7] }
  0xb1   :  { %518 = vmatpush.msra.mxu0 %v2292_v43  ;;  %654 = vmatpush.msra.mxu1 %v2178_v28  ;;  %v163_v1 = vperm.slane %v2451_v10, 0 }
  0xb2   :  { %674 = vmatpush.msra.mxu2 %v2228_v14 }
  0xb3   :  { %519 = vmatpush.msra.mxu0 %v2302_v44  ;;  %655 = vmatpush.msra.mxu1 %v2181_v30 }
  0xb4   :  { %675 = vmatpush.msra.mxu2 %v2232_v18 }
  0xb5   :  { %520 = vmatpush.msra.mxu0 %v2304_v47  ;;  %656 = vmatpush.msra.mxu1 %v2185_v37 }
  0xb6   :  { %676 = vmatpush.msra.mxu2 %v2239_v21 }
  0xb7   :  { %521 = vmatpush.msra.mxu0 %v2309_v55  ;;  %657 = vmatpush.msra.mxu1 %v2188_v41  ;;  %v311_v60 = vpop.f32.mrf.mxu3 }
  0xb8   :  { %677 = vmatpush.msra.mxu2 %v2246_v23  ;;  %v312_v8 = vadd.f32 %v311_v60, %v2453_v51 }
  0xb9   :  { %522 = vmatpush.msra.mxu0 %v2314_v59  ;;  %658 = vmatpush.msra.mxu1 %v2191_v45 }
  0xba   :  { %678 = vmatpush.msra.mxu2 %v2254_v26  ;;  %v355_v48 = vrot.slane %v312_v8, 1 }
  0xbb   :  { %523 = vmatpush.msra.mxu0 %v2319_v63  ;;  %659 = vmatpush.msra.mxu1 %v2194_v49  ;;  %v165_v63 = vperm.slane %v2451_v10, 2 }
  0xbc   :  { %679 = vmatpush.msra.mxu2 %v2262_v29 }
  0xbd   :  { %524 = vmatpush.msra.mxu0 %v2324_v4  ;;  %660 = vmatpush.msra.mxu1 %v2200_v53 }
  0xbe   :  { %680 = vmatpush.msra.mxu2 %v2270_v33 }
  0xbf   :  { %525 = vmatpush.msra.mxu0 %v2329_v15  ;;  %661 = vmatpush.msra.mxu1 %v2206_v57  ;;  %v164_v15 = vperm.slane %v2451_v10, 1 }
  0xc0   :  { %681 = vmatpush.msra.mxu2 %v2274_v35 }
  0xc1   :  { %662 = vmatpush.msra.mxu1 %v2212_v61  ;;  %831 = vmatpush.msrb.mxu0 %v2157_v5 }
  0xc2   :  { %682 = vmatpush.msra.mxu2 %v2282_v39 }
  0xc3   :  { %663 = vmatpush.msra.mxu1 %v2218_v2  ;;  %832 = vmatpush.msrb.mxu0 %v2161_v7 }
  0xc4   :  { %683 = vmatpush.msra.mxu2 %v2290_v42 }
  0xc5   :  { %851 = vmatpush.msrb.mxu1 %v2196_v50  ;;  %833 = vmatpush.msrb.mxu0 %v2164_v11 }
  0xc7   :  { %852 = vmatpush.msrb.mxu1 %v2202_v54  ;;  %834 = vmatpush.msrb.mxu0 %v2169_v16 }
  0xc9   :  { %853 = vmatpush.msrb.mxu1 %v2208_v58  ;;  %835 = vmatpush.msrb.mxu0 %v2172_v20 }
  0xcb   :  { %854 = vmatpush.msrb.mxu1 %v2214_v62  ;;  %836 = vmatpush.msrb.mxu0 %v2175_v24 }
  0xcd   :  { %855 = vmatpush.msrb.mxu1 %v2220_v3  ;;  %837 = vmatpush.msrb.mxu0 %v2178_v28 }
  0xcf   :  { %856 = vmatpush.msrb.mxu1 %v2224_v9  ;;  %838 = vmatpush.msrb.mxu0 %v2181_v30 }
  0xd1   :  { %857 = vmatpush.msrb.mxu1 %v2228_v14  ;;  %839 = vmatpush.msrb.mxu0 %v2185_v37 }
  0xd3   :  { %858 = vmatpush.msrb.mxu1 %v2232_v18  ;;  %840 = vmatpush.msrb.mxu0 %v2188_v41 }
  0xd5   :  { %859 = vmatpush.msrb.mxu1 %v2239_v21  ;;  %841 = vmatpush.msrb.mxu0 %v2191_v45 }
  0xd7   :  { %860 = vmatpush.msrb.mxu1 %v2246_v23  ;;  %842 = vmatpush.msrb.mxu0 %v2194_v49 }
  0xd9   :  { %861 = vmatpush.msrb.mxu1 %v2254_v26  ;;  %843 = vmatpush.msrb.mxu0 %v2200_v53 }
  0xdb   :  { %862 = vmatpush.msrb.mxu1 %v2262_v29  ;;  %844 = vmatpush.msrb.mxu0 %v2206_v57 }
  0xdd   :  { %863 = vmatpush.msrb.mxu1 %v2270_v33  ;;  %845 = vmatpush.msrb.mxu0 %v2212_v61 }
  0xdf   :  { %864 = vmatpush.msrb.mxu1 %v2274_v35  ;;  %846 = vmatpush.msrb.mxu0 %v2218_v2 }
  0xe1   :  { %865 = vmatpush.msrb.mxu1 %v2282_v39  ;;  %v2464_v39 = vperm.slane %v286_v6, 1 }
  0xe3   :  { %866 = vmatpush.msrb.mxu1 %v2290_v42  ;;  %3201 = vst [vmem:[#allocation28_spill] sm:$0xff] %v2464_v39 }
 0x11d   :  { %v186_v12 = vpop.f32.mrf.mxu0  ;;  %v209_v36 = vpop.f32.mrf.mxu1 }
 0x11e   :  { %v2457_v13 = vadd.f32 %v186_v12, %v163_v1 }
 0x120   :  { %3199 = vst [vmem:[#allocation26_spill] sm:$0xff] %v2457_v13  ;;  %v358_v17 = vadd.f32 %v312_v8, %v2457_v13 }
 0x122   :  { %v1747_v32 = vmul.f32 -1.442695, %v358_v17  ;;  %v2466_v17 = vadd.f32 %v209_v36, %v164_v15 }
 0x124   :  { %1792 = vpow2.f32 %v1747_v32  ;;  %3202 = vst [vmem:[#allocation29_spill] sm:$0xff] %v2466_v17 }
 0x125   :  { %v189_v0 = vpop.f32.mrf.mxu0  ;;  %v212_v12 = vpop.f32.mrf.mxu1 }
 0x126   :  { %v2460_v52 = vadd.f32 %v189_v0, %v163_v1  ;;  %v2469_v32 = vadd.f32 %v212_v12, %v164_v15  ;;  %v232_v15 = vpop.f32.mrf.mxu2  ;;  %v2473_v12 = vperm.slane %v286_v6, 2 }
 0x128   :  { %3200 = vst [vmem:[#allocation27_spill] sm:$0xff] %v2460_v52  ;;  %v359_v42 = vadd.f32 %v355_v48, %v2460_v52 }
 0x129   :  { %3203 = vst [vmem:[#allocation30_spill] sm:$0xff] %v2469_v32 }
 0x12a   :  { %v1793_v2 = vpop.eup %1792  ;;  %v1748_v60 = vmul.f32 -1.442695, %v359_v42  ;;  %3204 = vst [vmem:[#allocation31_spill] sm:$0xff] %v2473_v12 }
 0x12b   :  { %v366_v51 = vadd.f32 1.0, %v1793_v2 }
 0x12c   :  { %1794 = vpow2.f32 %v1748_v60 }
 0x12d   :  { %1796 = vrcp.f32 %v366_v51  ;;  %v331_v13 = vpop.f32.mrf.mxu0  ;;  %vm373_vm7 = vweird.f32 %v366_v51 }
 0x12e   :  { %v332_v8 = vadd.f32 %v331_v13, %v2464_v39  ;;  %v379_v13 = vand.u32 2147483648, %v366_v51  ;;  %v377_v39 = vand.u32 2147483647, %v366_v51 }
 0x130   :  { %v399_v1 = vrot.slane %v332_v8, 1  ;;  %v402_v48 = vadd.f32 %v332_v8, %v2466_v17  ;;  %v351_v17 = vpop.f32.mrf.mxu1  ;;  %vm378_vm9 = vcmp.eq.f32.partialorder %v377_v39, 8.507059e+37 }
 0x132   :  { %v1795_v0 = vpop.eup %1794  ;;  %v403_v52 = vadd.f32 %v399_v1, %v2469_v32  ;;  %v1749_v61 = vmul.f32 -1.442695, %v402_v48 }
 0x133   :  { %v1797_v4 = vpop.eup %1796  ;;  %v367_v42 = vadd.f32 1.0, %v1795_v0  ;;  %v380_v0 = vor.u32 1.1754944e-38, %v379_v13  ;;  %v2477_v13 = vadd.f32 %v232_v15, %v165_v63 }
 0x134   :  { %1798 = vpow2.f32 %v1749_v61  ;;  %v1750_v2 = vmul.f32 -1.442695, %v403_v52  ;;  %v369_v60 = vmul.f32 %v1797_v4, %v366_v51  ;;  %vm374_vm6 = vweird.f32 %v1797_v4 }
 0x135   :  { %1800 = vrcp.f32 %v367_v42  ;;  %vm375_vm8 = vmor %vm373_vm7, %vm374_vm6  ;;  %v394_v33 = vand.u32 2147483648, %v367_v42  ;;  %v392_v51 = vand.u32 2147483647, %v367_v42  ;;  %vm388_vm11 = vweird.f32 %v367_v42 }
 0x136   :  { %1802 = vpow2.f32 %v1750_v2  ;;  %v370_v36 = vsub.f32 1.0, %v369_v60  ;;  %v352_v60 = vadd.f32 %v351_v17, %v2473_v12  ;;  %vm467_vm6 = vcmask 1041409  }
 0x137   :  { %v395_v17 = vor.u32 1.1754944e-38, %v394_v33  ;;  %vm393_vm13 = vcmp.eq.f32.partialorder %v392_v51, 8.507059e+37 }
 0x138   :  { %v371_v35 = vmul.f32 %v1797_v4, %v370_v36 }
 0x13a   :  { %v1799_v8 = vpop.eup %1798  ;;  %v372_v57 = vadd.f32 %v1797_v4, %v371_v35 }
 0x13b   :  { %v1801_v1 = vpop.eup %1800  ;;  %v410_v48 = vadd.f32 1.0, %v1799_v8 }
 0x13c   :  { %v1803_v61 = vpop.eup %1802  ;;  %v376_v52 = vsel %vm375_vm8, %v1797_v4, %v372_v57  ;;  %v384_v32 = vmul.f32 %v1801_v1, %v367_v42  ;;  %vm389_vm10 = vweird.f32 %v1801_v1  ;;  %v443_v57 = vrot.slane %v352_v60, 1 }
 0x13d   :  { %v411_v2 = vadd.f32 1.0, %v1803_v61  ;;  %1804 = vrcp.f32 %v410_v48  ;;  %v381_v36 = vsel %vm378_vm9, %v380_v0, %v376_v52  ;;  %v235_v61 = vpop.f32.mrf.mxu2  ;;  %vm390_vm12 = vmor %vm388_vm11, %vm389_vm10  ;;  %v421_v42 = vand.u32 2147483647, %v410_v48 }
 0x13e   :  { %v385_v6 = vsub.f32 1.0, %v384_v32  ;;  %v446_v8 = vmul.f32 %v381_v36, %v352_v60  ;;  %v423_v60 = vand.u32 2147483648, %v410_v48  ;;  %vm417_vm15 = vweird.f32 %v410_v48 }
 0x13f   :  { %1806 = vrcp.f32 %v411_v2  ;;  %v438_v33 = vand.u32 2147483648, %v411_v2  ;;  %vm422_vm2 = vcmp.eq.f32.partialorder %v421_v42, 8.507059e+37  ;;  %vm432_vm3 = vweird.f32 %v411_v2 }
 0x140   :  { %v386_v35 = vmul.f32 %v1801_v1, %v385_v6  ;;  %v448_v0 = vadd.f32 %v446_v8, %v2477_v13  ;;  %v2480_v6 = vadd.f32 %v235_v61, %v165_v63  ;;  %v424_v63 = vor.u32 1.1754944e-38, %v423_v60 }
 0x142   :  { %v387_v53 = vadd.f32 %v1801_v1, %v386_v35  ;;  %1808 = vtanh.f32 %v448_v0 }
 0x143   :  { %v1805_v4 = vpop.eup %1804 }
 0x144   :  { %v413_v39 = vmul.f32 %v1805_v4, %v410_v48  ;;  %v391_v52 = vsel %vm390_vm12, %v1801_v1, %v387_v53  ;;  %vm418_vm14 = vweird.f32 %v1805_v4  ;;  %v436_v53 = vand.u32 2147483647, %v411_v2 }
 0x145   :  { %v1807_v32 = vpop.eup %1806  ;;  %v396_v10 = vsel %vm393_vm13, %v395_v17, %v391_v52  ;;  %vm419_vm1 = vmor %vm417_vm15, %vm418_vm14  ;;  %v439_v17 = vor.u32 1.1754944e-38, %v438_v33 }
 0x146   :  { %v414_v12 = vsub.f32 1.0, %v413_v39  ;;  %v428_v36 = vmul.f32 %v1807_v32, %v411_v2  ;;  %v447_v35 = vmul.f32 %v443_v57, %v396_v10  ;;  %vm433_vm0 = vweird.f32 %v1807_v32 }
 0x147   :  { %vm434_vm4 = vmor %vm432_vm3, %vm433_vm0  ;;  %vm437_vm5 = vcmp.eq.f32.partialorder %v436_v53, 8.507059e+37  ;;  %v3221_v53 = vld [vmem:[#allocation30_spill] sm:$0xff] }
 0x148   :  { %v429_v59 = vsub.f32 1.0, %v428_v36  ;;  %v449_v15 = vadd.f32 %v447_v35, %v2480_v6  ;;  %v415_v29 = vmul.f32 %v1805_v4, %v414_v12  ;;  %v1809_v52 = vpop.eup %1808 }
 0x14a   :  { %1810 = vtanh.f32 %v449_v15  ;;  %v416_v1 = vadd.f32 %v1805_v4, %v415_v29  ;;  %v430_v51 = vmul.f32 %v1807_v32, %v429_v59 }
 0x14c   :  { %v420_v8 = vsel %vm419_vm1, %v1805_v4, %v416_v1  ;;  %v431_v57 = vadd.f32 %v1807_v32, %v430_v51  ;;  %v3222_v1 = vld [vmem:[#allocation26_spill] sm:$0xff] }
 0x14d   :  { %v425_v61 = vsel %vm422_vm2, %v424_v63, %v420_v8  ;;  %v3223_v8 = vld [vmem:[#allocation29_spill] sm:$0xff] }
 0x14e   :  { %v435_v39 = vsel %vm434_vm4, %v1807_v32, %v431_v57  ;;  %v452_v12 = vsub.f32 1.0, %v425_v61  ;;  %v456_v29 = vmul.f32 0.0, %v425_v61 }
 0x14f   :  { %v440_v48 = vsel %vm437_vm5, %v439_v17, %v435_v39 }
 0x150   :  { %v1811_v10 = vpop.eup %1810  ;;  %v453_v0 = vsub.f32 1.0, %v440_v48  ;;  %v454_v36 = vmul.f32 %v1809_v52, %v452_v12  ;;  %v457_v35 = vmul.f32 0.0, %v440_v48 }
 0x152   :  { %v455_v59 = vmul.f32 %v1811_v10, %v453_v0  ;;  %v2483_v15 = vadd.f32 %v456_v29, %v454_v36 }
 0x154   :  { %v2485_v4 = vadd.f32 %v457_v35, %v455_v59  ;;  %v460_v2 = vadd.f32 %v2483_v15, %v2337_v46 }
 0x156   :  { %v461_v32 = vadd.f32 %v2485_v4, %v2355_v56  ;;  %462 = vst [vmem:[%s3117_s5] sm:$0x1] %v460_v2  ;;  %v466_v42 = vrot.slane %v2485_v4, 7 }
 0x158   :  { %463 = vst [vmem:[%s3117_s5 + $0x8] sm:$0x1] %v461_v32  ;;  %v468_v60 = vsel %vm467_vm6, %v466_v42, %v2483_v15 }
 0x159   :  { %486 = vmatmul.f32.vlgmr.msrb.gmra.mxu2 %v468_v60  ;;  %506 = vmatmul.f32.vlgmr.msrb.gmra.mxu3 %v468_v60 }
 0x15a   :  { %526 = vmatmul.f32.vlgmr.msra.gmra.mxu0 %v468_v60  ;;  %871 = vmatpush.msrb.mxu2 %v2234_v19 }
 0x15b   :  { %1014 = vmatpush.msrb.mxu3 %v2157_v5  ;;  %1034 = vmatpush.msra.mxu0 %v2196_v50  ;;  %v3205_v5 = vld [vmem:[#allocation16_spill] sm:$0xff] }
 0x15c   :  { %872 = vmatpush.msrb.mxu2 %v2241_v22  ;;  %v3217_v50 = vld [vmem:[#allocation20_spill] sm:$0xff] }
 0x15d   :  { %1015 = vmatpush.msrb.mxu3 %v2161_v7  ;;  %1035 = vmatpush.msra.mxu0 %v2202_v54  ;;  %v3206_v7 = vld [vmem:[#allocation21_spill] sm:$0xff] }
 0x15e   :  { %873 = vmatpush.msrb.mxu2 %v2248_v25 }
 0x15f   :  { %1016 = vmatpush.msrb.mxu3 %v2164_v11  ;;  %1036 = vmatpush.msra.mxu0 %v2208_v58  ;;  %v3207_v11 = vld [vmem:[#allocation12_spill] sm:$0xff] }
 0x160   :  { %874 = vmatpush.msrb.mxu2 %v2256_v27 }
 0x161   :  { %1017 = vmatpush.msrb.mxu3 %v2169_v16  ;;  %1037 = vmatpush.msra.mxu0 %v2214_v62  ;;  %v3208_v16 = vld [vmem:[#allocation17_spill] sm:$0xff] }
 0x162   :  { %875 = vmatpush.msrb.mxu2 %v2264_v31  ;;  %v3218_v62 = vld [vmem:[#allocation25_spill] sm:$0xff] }
 0x163   :  { %1018 = vmatpush.msrb.mxu3 %v2172_v20  ;;  %1038 = vmatpush.msra.mxu0 %v2220_v3  ;;  %v3209_v20 = vld [vmem:[#allocation22_spill] sm:$0xff] }
 0x164   :  { %876 = vmatpush.msrb.mxu2 %v2272_v34 }
 0x165   :  { %1019 = vmatpush.msrb.mxu3 %v2175_v24  ;;  %1039 = vmatpush.msra.mxu0 %v2224_v9  ;;  %v3210_v24 = vld [vmem:[#allocation13_spill] sm:$0xff]  ;;  %v3219_v9 = vld [vmem:[#allocation28_spill] sm:$0xff] }
 0x166   :  { %877 = vmatpush.msrb.mxu2 %v2280_v38 }
 0x167   :  { %1020 = vmatpush.msrb.mxu3 %v2178_v28  ;;  %1040 = vmatpush.msra.mxu0 %v2228_v14  ;;  %v3211_v28 = vld [vmem:[#allocation18_spill] sm:$0xff] }
 0x168   :  { %878 = vmatpush.msrb.mxu2 %v2284_v40 }
 0x169   :  { %1021 = vmatpush.msrb.mxu3 %v2181_v30  ;;  %1041 = vmatpush.msra.mxu0 %v2232_v18  ;;  %v3212_v30 = vld [vmem:[#allocation23_spill] sm:$0xff] }
 0x16a   :  { %879 = vmatpush.msrb.mxu2 %v2292_v43 }
 0x16b   :  { %1022 = vmatpush.msrb.mxu3 %v2185_v37  ;;  %1042 = vmatpush.msra.mxu0 %v2239_v21  ;;  %v3213_v37 = vld [vmem:[#allocation14_spill] sm:$0xff]  ;;  %v3220_v21 = vld [vmem:[#allocation27_spill] sm:$0xff] }
 0x16c   :  { %880 = vmatpush.msrb.mxu2 %v2302_v44 }
 0x16d   :  { %1023 = vmatpush.msrb.mxu3 %v2188_v41  ;;  %1043 = vmatpush.msra.mxu0 %v2246_v23  ;;  %v3214_v41 = vld [vmem:[#allocation19_spill] sm:$0xff] }
 0x16e   :  { %881 = vmatpush.msrb.mxu2 %v2304_v47 }
 0x16f   :  { %1024 = vmatpush.msrb.mxu3 %v2191_v45  ;;  %1044 = vmatpush.msra.mxu0 %v2254_v26  ;;  %v3215_v45 = vld [vmem:[#allocation24_spill] sm:$0xff] }
 0x170   :  { %882 = vmatpush.msrb.mxu2 %v2309_v55 }
 0x171   :  { %1025 = vmatpush.msrb.mxu3 %v2194_v49  ;;  %1045 = vmatpush.msra.mxu0 %v3205_v5  ;;  %v3216_v49 = vld [vmem:[#allocation15_spill] sm:$0xff] }
 0x172   :  { %883 = vmatpush.msrb.mxu2 %v3206_v7 }
 0x173   :  { %1026 = vmatpush.msrb.mxu3 %v3207_v11  ;;  %1046 = vmatpush.msra.mxu0 %v3208_v16 }
 0x174   :  { %884 = vmatpush.msrb.mxu2 %v3209_v20 }
 0x175   :  { %1027 = vmatpush.msrb.mxu3 %v3210_v24  ;;  %1047 = vmatpush.msra.mxu0 %v3211_v28 }
 0x176   :  { %885 = vmatpush.msrb.mxu2 %v3212_v30 }
 0x177   :  { %1028 = vmatpush.msrb.mxu3 %v3213_v37  ;;  %1048 = vmatpush.msra.mxu0 %v3214_v41  ;;  %v3224_v37 = vld [vmem:[#allocation31_spill] sm:$0xff] }
 0x178   :  { %886 = vmatpush.msrb.mxu2 %v3215_v45 }
 0x179   :  { %1029 = vmatpush.msrb.mxu3 %v3216_v49  ;;  %1049 = vmatpush.msra.mxu0 %v3217_v50 }
 0x1d7   :  { %v527_v32 = vpop.f32.mrf.mxu0 }
 0x1d8   :  { %v528_v41 = vadd.f32 %v527_v32, %v3224_v37 }
 0x1dc   :  { %v487_v54 = vpop.f32.mrf.mxu2  ;;  %v507_v58 = vpop.f32.mrf.mxu3 }
 0x1dd   :  { %v488_v3 = vadd.f32 %v487_v54, %v3218_v62  ;;  %v508_v14 = vadd.f32 %v507_v58, %v3219_v9 }
 0x1df   :  { %v531_v18 = vrot.slane %v488_v3, 7  ;;  %v535_v23 = vadd.f32 %v488_v3, %v3220_v21  ;;  %v575_v26 = vrot.slane %v508_v14, 7  ;;  %v579_v33 = vadd.f32 %v508_v14, %v3221_v53 }
 0x1e1   :  { %v534_v51 = vadd.f32 %v531_v18, %v3222_v1  ;;  %v1752_v63 = vmul.f32 -1.442695, %v535_v23  ;;  %v578_v57 = vadd.f32 %v575_v26, %v3223_v8  ;;  %v1754_v61 = vmul.f32 -1.442695, %v579_v33 }
 0x1e3   :  { %v1751_v17 = vmul.f32 -1.442695, %v534_v51  ;;  %1812 = vpow2.f32 %v1752_v63  ;;  %v1753_v39 = vmul.f32 -1.442695, %v578_v57  ;;  %v619_v57 = vrot.slane %v528_v41, 7 }
 0x1e4   :  { %1814 = vpow2.f32 %v1754_v61 }
 0x1e5   :  { %1816 = vpow2.f32 %v1751_v17 }
 0x1e6   :  { %1818 = vpow2.f32 %v1753_v39 }
 0x1e9   :  { %v1813_v12 = vpop.eup %1812 }
 0x1ea   :  { %v1815_v52 = vpop.eup %1814  ;;  %v543_v48 = vadd.f32 1.0, %v1813_v12 }
 0x1eb   :  { %v1817_v10 = vpop.eup %1816  ;;  %v2556_v0 = vadd.f32 1.0, %v1815_v52 }
 0x1ec   :  { %v1819_v36 = vpop.eup %1818  ;;  %v542_v29 = vadd.f32 1.0, %v1817_v10  ;;  %1820 = vrcp.f32 %v543_v48  ;;  %v570_v49 = vand.u32 2147483648, %v543_v48  ;;  %v568_v14 = vand.u32 2147483647, %v543_v48 }
 0x1ed   :  { %v2558_v59 = vadd.f32 1.0, %v1819_v36  ;;  %1822 = vrcp.f32 %v2556_v0  ;;  %vm564_vm8 = vweird.f32 %v543_v48  ;;  %vm608_vm11 = vweird.f32 %v2556_v0 }
 0x1ee   :  { %1824 = vrcp.f32 %v542_v29  ;;  %v555_v18 = vand.u32 2147483648, %v542_v29  ;;  %v553_v51 = vand.u32 2147483647, %v542_v29  ;;  %v571_v61 = vor.u32 1.1754944e-38, %v570_v49 }
 0x1ef   :  { %1826 = vrcp.f32 %v2558_v59  ;;  %vm549_vm12 = vweird.f32 %v542_v29  ;;  %vm569_vm13 = vcmp.eq.f32.partialorder %v568_v14, 8.507059e+37  ;;  %v614_v32 = vand.u32 2147483648, %v2556_v0 }
 0x1f0   :  { %v556_v52 = vor.u32 1.1754944e-38, %v555_v18  ;;  %vm554_vm0 = vcmp.eq.f32.partialorder %v553_v51, 8.507059e+37  ;;  %vm593_vm3 = vweird.f32 %v2558_v59 }
 0x1f2   :  { %v1821_v35 = vpop.eup %1820 }
 0x1f3   :  { %v1823_v2 = vpop.eup %1822  ;;  %v560_v60 = vmul.f32 %v1821_v35, %v543_v48  ;;  %vm565_vm7 = vweird.f32 %v1821_v35 }
 0x1f4   :  { %v1825_v5 = vpop.eup %1824  ;;  %v604_v11 = vmul.f32 %v1823_v2, %v2556_v0  ;;  %vm566_vm10 = vmor %vm564_vm8, %vm565_vm7  ;;  %vm609_vm15 = vweird.f32 %v1823_v2 }
 0x1f5   :  { %v1827_v16 = vpop.eup %1826  ;;  %v545_v24 = vmul.f32 %v1825_v5, %v542_v29  ;;  %v561_v28 = vsub.f32 1.0, %v560_v60  ;;  %vm550_vm9 = vweird.f32 %v1825_v5  ;;  %v599_v29 = vand.u32 2147483648, %v2558_v59  ;;  %vm610_vm2 = vmor %vm608_vm11, %vm609_vm15 }
 0x1f6   :  { %v589_v50 = vmul.f32 %v1827_v16, %v2558_v59  ;;  %v605_v54 = vsub.f32 1.0, %v604_v11  ;;  %vm551_vm14 = vmor %vm549_vm12, %vm550_vm9  ;;  %vm594_vm1 = vweird.f32 %v1827_v16 }
 0x1f7   :  { %v546_v58 = vsub.f32 1.0, %v545_v24  ;;  %v562_v3 = vmul.f32 %v1821_v35, %v561_v28  ;;  %v612_v28 = vand.u32 2147483647, %v2556_v0  ;;  %vm595_vm4 = vmor %vm593_vm3, %vm594_vm1 }
 0x1f8   :  { %v590_v23 = vsub.f32 1.0, %v589_v50  ;;  %v606_v26 = vmul.f32 %v1823_v2, %v605_v54 }
 0x1f9   :  { %v547_v33 = vmul.f32 %v1825_v5, %v546_v58  ;;  %v563_v63 = vadd.f32 %v1821_v35, %v562_v3  ;;  %vm613_vm5 = vcmp.eq.f32.partialorder %v612_v28, 8.507059e+37  ;;  %v600_v3 = vor.u32 1.1754944e-38, %v599_v29  ;;  %v2655_v28 = vld [vmem:[#allocation6 + $0xb0] sm:$0xff]  ;;  %v2669_v29 = vld [vmem:[#allocation6 + $0x80] sm:$0xff] }
 0x1fa   :  { %v591_v17 = vmul.f32 %v1827_v16, %v590_v23  ;;  %v607_v48 = vadd.f32 %v1823_v2, %v606_v26  ;;  %v632_v26 = vrot.slane %v2483_v15, 7  ;;  %3228 = vst [vmem:[#allocation17_spill] sm:$0xff] %v2669_v29 }
 0x1fb   :  { %v548_v39 = vadd.f32 %v1825_v5, %v547_v33  ;;  %v567_v12 = vsel %vm566_vm10, %v1821_v35, %v563_v63 }
 0x1fc   :  { %v572_v10 = vsel %vm569_vm13, %v571_v61, %v567_v12  ;;  %v592_v24 = vadd.f32 %v1827_v16, %v591_v17  ;;  %v611_v50 = vsel %vm610_vm2, %v1823_v2, %v607_v48  ;;  %v2599_v12 = vld [vmem:[#allocation6 + $0x170] sm:$0xff]  ;;  %v2613_v48 = vld [vmem:[#allocation6 + $0x140] sm:$0xff] }
 0x1fd   :  { %v552_v36 = vsel %vm551_vm14, %v1825_v5, %v548_v39  ;;  %v623_v60 = vmul.f32 %v572_v10, %v528_v41  ;;  %v597_v5 = vand.u32 2147483647, %v2558_v59  ;;  %v615_v41 = vor.u32 1.1754944e-38, %v614_v32  ;;  %v2606_v10 = vld [vmem:[#allocation6 + $0x158] sm:$0xff]  ;;  %v2627_v32 = vld [vmem:[#allocation6 + $0x110] sm:$0xff] }
 0x1fe   :  { %v557_v11 = vsel %vm554_vm0, %v556_v52, %v552_v36  ;;  %v596_v58 = vsel %vm595_vm4, %v1827_v16, %v592_v24  ;;  %v2603_v52 = vld [vmem:[#allocation6 + $0x150] sm:$0xff]  ;;  %v2620_v36 = vld [vmem:[#allocation6 + $0x128] sm:$0xff] }
 0x1ff   :  { %v622_v49 = vmul.f32 %v619_v57, %v557_v11  ;;  %v625_v35 = vadd.f32 %v623_v60, %v2480_v6  ;;  %v616_v14 = vsel %vm613_vm5, %v615_v41, %v611_v50  ;;  %vm598_vm7 = vcmp.eq.f32.partialorder %v597_v5, 8.507059e+37  ;;  %v2634_v60 = vld [vmem:[#allocation6 + $0xf8] sm:$0xff]  ;;  %v2641_v11 = vld [vmem:[#allocation6 + $0xe0] sm:$0xff]  ;;  %v2648_v24 = vld [vmem:[#allocation6 + $0xc8] sm:$0xff] }
 0x200   :  { %v601_v0 = vsel %vm598_vm7, %v600_v3, %v596_v58  ;;  %v629_v18 = vsub.f32 1.0, %v616_v14  ;;  %v636_v59 = vmul.f32 %v616_v14, %v466_v42  ;;  %v2596_v42 = vld [vmem:[#allocation6 + $0x168] sm:$0xff]  ;;  %v2683_v5 = vld [vmem:[#allocation6 + $0x50] sm:$0xff]  ;;  %v2690_v50 = vld [vmem:[#allocation6 + $0x38] sm:$0xff] }
 0x201   :  { %v624_v54 = vadd.f32 %v622_v49, %v2477_v13  ;;  %1828 = vtanh.f32 %v625_v35  ;;  %v628_v33 = vsub.f32 1.0, %v601_v0  ;;  %v635_v57 = vmul.f32 %v632_v26, %v601_v0  ;;  %v2662_v49 = vld [vmem:[#allocation6 + $0x98] sm:$0xff]  ;;  %v2676_v35 = vld [vmem:[#allocation6 + $0x68] sm:$0xff]  ;;  %3232 = vst [vmem:[#allocation23_spill] sm:$0xff] %v2683_v5  ;;  %v2697_v41 = vld [vmem:[#allocation6 + $0x20] sm:$0xff] }
 0x202   :  { %3226 = vst [vmem:[#allocation21_spill] sm:$0xff] %v2662_v49 }
 0x203   :  { %1830 = vtanh.f32 %v624_v54  ;;  %3230 = vst [vmem:[#allocation13_spill] sm:$0xff] %v2676_v35  ;;  %v2704_v54 = vld [vmem:[#allocation6 + $0x8] sm:$0xff] }
 0x204   :  { %3234 = vst [vmem:[#allocation19_spill] sm:$0xff] %v2690_v50 }
 0x205   :  { %3236 = vst [vmem:[#allocation15_spill] sm:$0xff] %v2697_v41 }
 0x206   :  { %3238 = vst [vmem:[#allocation32_spill] sm:$0xff] %v2704_v54 }
 0x207   :  { %v1829_v23 = vpop.eup %1828 }
 0x208   :  { %v631_v51 = vmul.f32 %v1829_v23, %v629_v18 }
 0x209   :  { %v1831_v2 = vpop.eup %1830 }
 0x20a   :  { %v630_v63 = vmul.f32 %v1831_v2, %v628_v33  ;;  %v2578_v61 = vadd.f32 %v636_v59, %v631_v51 }
 0x20c   :  { %v2580_v16 = vadd.f32 %v635_v57, %v630_v63  ;;  %v640_v17 = vadd.f32 %v2578_v61, %v2355_v56 }
 0x20e   :  { %v639_v39 = vadd.f32 %v2580_v16, %v2337_v46  ;;  %642 = vst [vmem:[%s3117_s5 + $0x8] sm:$0x2] %v640_v17  ;;  %v645_v15 = vrot.slane %v2580_v16, 1 }
 0x210   :  { %641 = vst [vmem:[%s3117_s5] sm:$0x2] %v639_v39  ;;  %v646_v4 = vsel %vm467_vm6, %v2578_v61, %v645_v15 }
 0x211   :  { %664 = vmatmul.f32.vlgmr.msra.gmra.mxu1 %v646_v4  ;;  %684 = vmatmul.f32.vlgmr.msra.gmra.mxu2 %v646_v4 }
 0x212   :  { %704 = vmatmul.f32.vlgmr.msra.gmra.mxu3 %v646_v4  ;;  %1054 = vmatpush.msra.mxu1 %v2234_v19  ;;  %v2610_v19 = vld [vmem:[#allocation6 + $0x138] sm:$0xff] }
 0x213   :  { %1197 = vmatpush.msra.mxu2 %v2596_v42  ;;  %1217 = vmatpush.msra.mxu3 %v2599_v12 }
 0x214   :  { %1055 = vmatpush.msra.mxu1 %v2241_v22  ;;  %v2617_v22 = vld [vmem:[#allocation6 + $0x120] sm:$0xff] }
 0x215   :  { %1198 = vmatpush.msra.mxu2 %v2603_v52  ;;  %1218 = vmatpush.msra.mxu3 %v2606_v10 }
 0x216   :  { %1056 = vmatpush.msra.mxu1 %v2248_v25  ;;  %v2624_v25 = vld [vmem:[#allocation6 + $0x108] sm:$0xff] }
 0x217   :  { %1199 = vmatpush.msra.mxu2 %v2610_v19  ;;  %1219 = vmatpush.msra.mxu3 %v2613_v48 }
 0x218   :  { %1057 = vmatpush.msra.mxu1 %v2256_v27  ;;  %v2631_v27 = vld [vmem:[#allocation6 + $0xf0] sm:$0xff] }
 0x219   :  { %1200 = vmatpush.msra.mxu2 %v2617_v22  ;;  %1220 = vmatpush.msra.mxu3 %v2620_v36 }
 0x21a   :  { %1058 = vmatpush.msra.mxu1 %v2264_v31  ;;  %v2638_v31 = vld [vmem:[#allocation6 + $0xd8] sm:$0xff] }
 0x21b   :  { %1201 = vmatpush.msra.mxu2 %v2624_v25  ;;  %1221 = vmatpush.msra.mxu3 %v2627_v32 }
 0x21c   :  { %1059 = vmatpush.msra.mxu1 %v2272_v34  ;;  %v2645_v34 = vld [vmem:[#allocation6 + $0xc0] sm:$0xff] }
 0x21d   :  { %1202 = vmatpush.msra.mxu2 %v2631_v27  ;;  %1222 = vmatpush.msra.mxu3 %v2634_v60 }
 0x21e   :  { %1060 = vmatpush.msra.mxu1 %v2280_v38  ;;  %v2652_v38 = vld [vmem:[#allocation6 + $0xa8] sm:$0xff] }
 0x21f   :  { %1203 = vmatpush.msra.mxu2 %v2638_v31  ;;  %1223 = vmatpush.msra.mxu3 %v2641_v11 }
 0x220   :  { %1061 = vmatpush.msra.mxu1 %v2284_v40  ;;  %v2659_v40 = vld [vmem:[#allocation6 + $0x90] sm:$0xff] }
 0x221   :  { %1204 = vmatpush.msra.mxu2 %v2645_v34  ;;  %1224 = vmatpush.msra.mxu3 %v2648_v24  ;;  %3225 = vst [vmem:[#allocation16_spill] sm:$0xff] %v2659_v40 }
 0x222   :  { %1062 = vmatpush.msra.mxu1 %v2292_v43  ;;  %v2666_v43 = vld [vmem:[#allocation6 + $0x78] sm:$0xff] }
 0x223   :  { %1205 = vmatpush.msra.mxu2 %v2652_v38  ;;  %1225 = vmatpush.msra.mxu3 %v2655_v28  ;;  %3227 = vst [vmem:[#allocation12_spill] sm:$0xff] %v2666_v43 }
 0x224   :  { %1063 = vmatpush.msra.mxu1 %v2302_v44  ;;  %v2673_v44 = vld [vmem:[#allocation6 + $0x60] sm:$0xff] }
 0x225   :  { %1206 = vmatpush.msra.mxu2 %v2659_v40  ;;  %1226 = vmatpush.msra.mxu3 %v2662_v49  ;;  %3229 = vst [vmem:[#allocation22_spill] sm:$0xff] %v2673_v44 }
 0x226   :  { %1064 = vmatpush.msra.mxu1 %v2304_v47  ;;  %v2680_v47 = vld [vmem:[#allocation6 + $0x48] sm:$0xff] }
 0x227   :  { %1207 = vmatpush.msra.mxu2 %v2666_v43  ;;  %1227 = vmatpush.msra.mxu3 %v2669_v29  ;;  %3231 = vst [vmem:[#allocation18_spill] sm:$0xff] %v2680_v47 }
 0x228   :  { %1065 = vmatpush.msra.mxu1 %v2309_v55  ;;  %v2687_v55 = vld [vmem:[#allocation6 + $0x30] sm:$0xff] }
 0x229   :  { %1208 = vmatpush.msra.mxu2 %v2673_v44  ;;  %1228 = vmatpush.msra.mxu3 %v2676_v35  ;;  %3233 = vst [vmem:[#allocation14_spill] sm:$0xff] %v2687_v55 }
 0x22a   :  { %1066 = vmatpush.msra.mxu1 %v3206_v7  ;;  %v2694_v7 = vld [vmem:[#allocation6 + $0x18] sm:$0xff] }
 0x22b   :  { %1209 = vmatpush.msra.mxu2 %v2680_v47  ;;  %1229 = vmatpush.msra.mxu3 %v2683_v5  ;;  %3235 = vst [vmem:[#allocation24_spill] sm:$0xff] %v2694_v7 }
 0x22c   :  { %1067 = vmatpush.msra.mxu1 %v3209_v20  ;;  %v2701_v20 = vld [vmem:[#allocation6] sm:$0xff] }
 0x22d   :  { %1210 = vmatpush.msra.mxu2 %v2687_v55  ;;  %1230 = vmatpush.msra.mxu3 %v2690_v50  ;;  %3237 = vst [vmem:[#allocation20_spill] sm:$0xff] %v2701_v20 }
 0x22e   :  { %1068 = vmatpush.msra.mxu1 %v3212_v30 }
 0x22f   :  { %1211 = vmatpush.msra.mxu2 %v2694_v7  ;;  %1231 = vmatpush.msra.mxu3 %v2697_v41 }
 0x230   :  { %1069 = vmatpush.msra.mxu1 %v3215_v45 }
 0x231   :  { %1212 = vmatpush.msra.mxu2 %v2701_v20  ;;  %1232 = vmatpush.msra.mxu3 %v2704_v54 }
 0x28e   :  { %v665_v58 = vpop.f32.mrf.mxu1 }
 0x28f   :  { %v666_v30 = vadd.f32 %v665_v58, %v3218_v62 }
 0x291   :  { %v709_v3 = vrot.slane %v666_v30, 6  ;;  %v710_v14 = vrot.slane %v666_v30, 7 }
 0x293   :  { %v713_v0 = vadd.f32 %v709_v3, %v3222_v1  ;;  %v714_v18 = vadd.f32 %v710_v14, %v3220_v21 }
 0x294   :  { %v685_v23 = vpop.f32.mrf.mxu2 }
 0x295   :  { %v1755_v26 = vmul.f32 -1.442695, %v713_v0  ;;  %v1756_v45 = vmul.f32 -1.442695, %v714_v18  ;;  %v686_v33 = vadd.f32 %v685_v23, %v3219_v9  ;;  %v705_v0 = vpop.f32.mrf.mxu3 }
 0x297   :  { %1832 = vpow2.f32 %v1755_v26  ;;  %v754_v51 = vrot.slane %v686_v33, 6  ;;  %v755_v59 = vrot.slane %v686_v33, 7 }
 0x298   :  { %1834 = vpow2.f32 %v1756_v45  ;;  %v706_v45 = vadd.f32 %v705_v0, %v3224_v37 }
 0x299   :  { %v758_v2 = vadd.f32 %v754_v51, %v3223_v8  ;;  %v759_v63 = vadd.f32 %v755_v59, %v3221_v53 }
 0x29a   :  { %v800_v8 = vrot.slane %v706_v45, 7 }
 0x29b   :  { %v1757_v57 = vmul.f32 -1.442695, %v758_v2  ;;  %v1758_v17 = vmul.f32 -1.442695, %v759_v63 }
 0x29d   :  { %v1833_v39 = vpop.eup %1832  ;;  %1836 = vpow2.f32 %v1757_v57 }
 0x29e   :  { %v1835_v15 = vpop.eup %1834  ;;  %v721_v4 = vadd.f32 1.0, %v1833_v39  ;;  %1838 = vpow2.f32 %v1758_v17 }
 0x29f   :  { %v722_v58 = vadd.f32 1.0, %v1835_v15 }
 0x2a0   :  { %1840 = vrcp.f32 %v721_v4  ;;  %v732_v2 = vand.u32 2147483647, %v721_v4  ;;  %v734_v63 = vand.u32 2147483648, %v721_v4  ;;  %vm728_vm9 = vweird.f32 %v721_v4 }
 0x2a1   :  { %1842 = vrcp.f32 %v722_v58  ;;  %v747_v17 = vand.u32 2147483647, %v722_v58  ;;  %v749_v15 = vand.u32 2147483648, %v722_v58  ;;  %vm743_vm12 = vweird.f32 %v722_v58 }
 0x2a2   :  { %vm733_vm11 = vcmp.eq.f32.partialorder %v732_v2, 8.507059e+37 }
 0x2a3   :  { %v1837_v30 = vpop.eup %1836  ;;  %vm748_vm14 = vcmp.eq.f32.partialorder %v747_v17, 8.507059e+37 }
 0x2a4   :  { %v1839_v3 = vpop.eup %1838  ;;  %v2713_v14 = vadd.f32 1.0, %v1837_v30  ;;  %v799_v30 = vrot.slane %v706_v45, 6 }
 0x2a5   :  { %v2715_v18 = vadd.f32 1.0, %v1839_v3 }
 0x2a6   :  { %v1841_v23 = vpop.eup %1840  ;;  %1844 = vrcp.f32 %v2713_v14  ;;  %v779_v9 = vand.u32 2147483648, %v2713_v14  ;;  %vm773_vm2 = vweird.f32 %v2713_v14 }
 0x2a7   :  { %v1843_v26 = vpop.eup %1842  ;;  %1846 = vrcp.f32 %v2715_v18  ;;  %v724_v33 = vmul.f32 %v1841_v23, %v721_v4  ;;  %vm729_vm8 = vweird.f32 %v1841_v23  ;;  %v750_v4 = vor.u32 1.1754944e-38, %v749_v15 }
 0x2a8   :  { %v739_v51 = vmul.f32 %v1843_v26, %v722_v58  ;;  %vm744_vm10 = vweird.f32 %v1843_v26  ;;  %vm730_vm13 = vmor %vm728_vm9, %vm729_vm8  ;;  %vm788_vm4 = vweird.f32 %v2715_v18 }
 0x2a9   :  { %v725_v59 = vsub.f32 1.0, %v724_v33  ;;  %vm745_vm15 = vmor %vm743_vm12, %vm744_vm10 }
 0x2aa   :  { %v740_v57 = vsub.f32 1.0, %v739_v51  ;;  %v735_v51 = vor.u32 1.1754944e-38, %v734_v63  ;;  %v792_v63 = vand.u32 2147483647, %v2715_v18 }
 0x2ab   :  { %v726_v39 = vmul.f32 %v1841_v23, %v725_v59 }
 0x2ac   :  { %v1845_v3 = vpop.eup %1844  ;;  %v741_v53 = vmul.f32 %v1843_v26, %v740_v57  ;;  %vm793_vm8 = vcmp.eq.f32.partialorder %v792_v63, 8.507059e+37  ;;  %v2770_v63 = vld [vmem:[#allocation6 + $0x118] sm:$0xff] }
 0x2ad   :  { %v1847_v21 = vpop.eup %1846  ;;  %v769_v1 = vmul.f32 %v1845_v3, %v2713_v14  ;;  %v727_v0 = vadd.f32 %v1841_v23, %v726_v39  ;;  %v777_v39 = vand.u32 2147483647, %v2713_v14  ;;  %vm774_vm0 = vweird.f32 %v1845_v3 }
 0x2ae   :  { %v784_v33 = vmul.f32 %v1847_v21, %v2715_v18  ;;  %v742_v37 = vadd.f32 %v1843_v26, %v741_v53  ;;  %vm789_vm1 = vweird.f32 %v1847_v21  ;;  %v794_v53 = vand.u32 2147483648, %v2715_v18  ;;  %vm775_vm3 = vmor %vm773_vm2, %vm774_vm0 }
 0x2af   :  { %v770_v59 = vsub.f32 1.0, %v769_v1  ;;  %v731_v62 = vsel %vm730_vm13, %v1841_v23, %v727_v0  ;;  %vm790_vm5 = vmor %vm788_vm4, %vm789_vm1  ;;  %vm778_vm7 = vcmp.eq.f32.partialorder %v777_v39, 8.507059e+37  ;;  %v814_v18 = vrot.slane %v2578_v61, 7 }
 0x2b0   :  { %v785_v45 = vsub.f32 1.0, %v784_v33  ;;  %v736_v57 = vsel %vm733_vm11, %v735_v51, %v731_v62  ;;  %v746_v54 = vsel %vm745_vm15, %v1843_v26, %v742_v37  ;;  %v795_v15 = vor.u32 1.1754944e-38, %v794_v53  ;;  %v2755_v53 = vld [vmem:[#allocation6 + $0x160] sm:$0xff] }
 0x2b1   :  { %v771_v2 = vmul.f32 %v1845_v3, %v770_v59  ;;  %v751_v58 = vsel %vm748_vm14, %v750_v4, %v746_v54  ;;  %v803_v20 = vmul.f32 %v799_v30, %v736_v57  ;;  %v780_v54 = vor.u32 1.1754944e-38, %v779_v9 }
 0x2b2   :  { %v786_v41 = vmul.f32 %v1847_v21, %v785_v45  ;;  %v804_v1 = vmul.f32 %v800_v8, %v751_v58  ;;  %v2750_v58 = vld [vmem:[#allocation6 + $0x178] sm:$0xff] }
 0x2b3   :  { %v772_v23 = vadd.f32 %v1845_v3, %v771_v2  ;;  %v805_v17 = vadd.f32 %v803_v20, %v2477_v13  ;;  %v813_v20 = vrot.slane %v2580_v16, 7 }
 0x2b4   :  { %v787_v62 = vadd.f32 %v1847_v21, %v786_v41  ;;  %v806_v37 = vadd.f32 %v804_v1, %v2480_v6  ;;  %v2760_v1 = vld [vmem:[#allocation6 + $0x148] sm:$0xff] }
 0x2b5   :  { %v776_v26 = vsel %vm775_vm3, %v1845_v3, %v772_v23  ;;  %1848 = vtanh.f32 %v805_v17  ;;  %v2765_v23 = vld [vmem:[#allocation6 + $0x130] sm:$0xff]  ;;  %v2775_v17 = vld [vmem:[#allocation6 + $0x100] sm:$0xff] }
 0x2b6   :  { %v791_v8 = vsel %vm790_vm5, %v1847_v21, %v787_v62  ;;  %1850 = vtanh.f32 %v806_v37  ;;  %v781_v14 = vsel %vm778_vm7, %v780_v54, %v776_v26  ;;  %v2780_v62 = vld [vmem:[#allocation6 + $0xe8] sm:$0xff]  ;;  %v2785_v37 = vld [vmem:[#allocation6 + $0xd0] sm:$0xff]  ;;  %v2790_v54 = vld [vmem:[#allocation6 + $0xb8] sm:$0xff] }
 0x2b7   :  { %v796_v30 = vsel %vm793_vm8, %v795_v15, %v791_v8  ;;  %v809_v0 = vsub.f32 1.0, %v781_v14  ;;  %v817_v9 = vmul.f32 %v813_v20, %v781_v14  ;;  %v2795_v26 = vld [vmem:[#allocation6 + $0xa0] sm:$0xff]  ;;  %v2800_v15 = vld [vmem:[#allocation6 + $0x88] sm:$0xff]  ;;  %v2805_v8 = vld [vmem:[#allocation6 + $0x70] sm:$0xff] }
 0x2b8   :  { %v810_v41 = vsub.f32 1.0, %v796_v30  ;;  %v818_v3 = vmul.f32 %v814_v18, %v796_v30  ;;  %3239 = vst [vmem:[#allocation33_spill] sm:$0xff] %v2800_v15  ;;  %v2810_v14 = vld [vmem:[#allocation6 + $0x58] sm:$0xff]  ;;  %v2815_v30 = vld [vmem:[#allocation6 + $0x40] sm:$0xff] }
 0x2b9   :  { %3240 = vst [vmem:[#allocation34_spill] sm:$0xff] %v2805_v8  ;;  %v3244_v20 = vld [vmem:[#allocation15_spill] sm:$0xff]  ;;  %v3246_v18 = vld [vmem:[#allocation20_spill] sm:$0xff] }
 0x2ba   :  { %3241 = vst [vmem:[#allocation35_spill] sm:$0xff] %v2810_v14 }
 0x2bb   :  { %v1849_v33 = vpop.eup %1848  ;;  %3242 = vst [vmem:[#allocation36_spill] sm:$0xff] %v2815_v30 }
 0x2bc   :  { %v1851_v51 = vpop.eup %1850  ;;  %v811_v59 = vmul.f32 %v1849_v33, %v809_v0  ;;  %v2820_v0 = vld [vmem:[#allocation6 + $0x28] sm:$0xff]  ;;  %v2825_v33 = vld [vmem:[#allocation6 + $0x10] sm:$0xff] }
 0x2bd   :  { %v812_v4 = vmul.f32 %v1851_v51, %v810_v41  ;;  %3243 = vst [vmem:[#allocation37_spill] sm:$0xff] %v2820_v0  ;;  %v3247_v41 = vld [vmem:[#allocation32_spill] sm:$0xff] }
 0x2be   :  { %v2733_v45 = vadd.f32 %v817_v9, %v811_v59  ;;  %3245 = vst [vmem:[#allocation38_spill] sm:$0xff] %v2825_v33  ;;  %v3248_v9 = vld [vmem:[#allocation25_spill] sm:$0xff] }
 0x2bf   :  { %v2735_v57 = vadd.f32 %v818_v3, %v812_v4  ;;  %v3249_v3 = vld [vmem:[#allocation28_spill] sm:$0xff] }
 0x2c0   :  { %v821_v21 = vadd.f32 %v2733_v45, %v2337_v46  ;;  %v827_v39 = vrot.slane %v2733_v45, 2 }
 0x2c1   :  { %v822_v16 = vadd.f32 %v2735_v57, %v2355_v56  ;;  %v828_v61 = vrot.slane %v2735_v57, 1 }
 0x2c2   :  { %823 = vst [vmem:[%s3117_s5] sm:$0x4] %v821_v21 }
 0x2c3   :  { %824 = vst [vmem:[%s3117_s5 + $0x8] sm:$0x4] %v822_v16  ;;  %v829_v2 = vsel %vm467_vm6, %v828_v61, %v827_v39 }
 0x2c4   :  { %847 = vmatmul.f32.vlgmr.msrb.gmra.mxu0 %v829_v2  ;;  %867 = vmatmul.f32.vlgmr.msrb.gmra.mxu1 %v829_v2 }
 0x2c5   :  { %887 = vmatmul.f32.vlgmr.msrb.gmra.mxu2 %v829_v2  ;;  %1237 = vmatpush.msrb.mxu0 %v2750_v58 }
 0x2c6   :  { %1380 = vmatpush.msrb.mxu1 %v2596_v42  ;;  %1400 = vmatpush.msrb.mxu2 %v2599_v12 }
 0x2c7   :  { %1238 = vmatpush.msrb.mxu0 %v2755_v53 }
 0x2c8   :  { %1381 = vmatpush.msrb.mxu1 %v2603_v52  ;;  %1401 = vmatpush.msrb.mxu2 %v2606_v10 }
 0x2c9   :  { %1239 = vmatpush.msrb.mxu0 %v2760_v1 }
 0x2ca   :  { %1382 = vmatpush.msrb.mxu1 %v2610_v19  ;;  %1402 = vmatpush.msrb.mxu2 %v2613_v48 }
 0x2cb   :  { %1240 = vmatpush.msrb.mxu0 %v2765_v23 }
 0x2cc   :  { %1383 = vmatpush.msrb.mxu1 %v2617_v22  ;;  %1403 = vmatpush.msrb.mxu2 %v2620_v36 }
 0x2cd   :  { %1241 = vmatpush.msrb.mxu0 %v2770_v63 }
 0x2ce   :  { %1384 = vmatpush.msrb.mxu1 %v2624_v25  ;;  %1404 = vmatpush.msrb.mxu2 %v2627_v32 }
 0x2cf   :  { %1242 = vmatpush.msrb.mxu0 %v2775_v17 }
 0x2d0   :  { %1385 = vmatpush.msrb.mxu1 %v2631_v27  ;;  %1405 = vmatpush.msrb.mxu2 %v2634_v60 }
 0x2d1   :  { %1243 = vmatpush.msrb.mxu0 %v2780_v62 }
 0x2d2   :  { %1386 = vmatpush.msrb.mxu1 %v2638_v31  ;;  %1406 = vmatpush.msrb.mxu2 %v2641_v11 }
 0x2d3   :  { %1244 = vmatpush.msrb.mxu0 %v2785_v37 }
 0x2d4   :  { %1387 = vmatpush.msrb.mxu1 %v2645_v34  ;;  %1407 = vmatpush.msrb.mxu2 %v2648_v24 }
 0x2d5   :  { %1245 = vmatpush.msrb.mxu0 %v2790_v54 }
 0x2d6   :  { %1388 = vmatpush.msrb.mxu1 %v2652_v38  ;;  %1408 = vmatpush.msrb.mxu2 %v2655_v28 }
 0x2d7   :  { %1246 = vmatpush.msrb.mxu0 %v2795_v26 }
 0x2d8   :  { %1389 = vmatpush.msrb.mxu1 %v2659_v40  ;;  %1409 = vmatpush.msrb.mxu2 %v2662_v49 }
 0x2d9   :  { %1247 = vmatpush.msrb.mxu0 %v2800_v15 }
 0x2da   :  { %1390 = vmatpush.msrb.mxu1 %v2666_v43  ;;  %1410 = vmatpush.msrb.mxu2 %v2669_v29 }
 0x2db   :  { %1248 = vmatpush.msrb.mxu0 %v2805_v8 }
 0x2dc   :  { %1391 = vmatpush.msrb.mxu1 %v2673_v44  ;;  %1411 = vmatpush.msrb.mxu2 %v2676_v35 }
 0x2dd   :  { %1249 = vmatpush.msrb.mxu0 %v2810_v14 }
 0x2de   :  { %1392 = vmatpush.msrb.mxu1 %v2680_v47  ;;  %1412 = vmatpush.msrb.mxu2 %v2683_v5 }
 0x2df   :  { %1250 = vmatpush.msrb.mxu0 %v2815_v30  ;;  %v3253_v30 = vld [vmem:[#allocation30_spill] sm:$0xff] }
 0x2e0   :  { %1393 = vmatpush.msrb.mxu1 %v2687_v55  ;;  %1413 = vmatpush.msrb.mxu2 %v2690_v50  ;;  %v3252_v55 = vld [vmem:[#allocation29_spill] sm:$0xff] }
 0x2e1   :  { %1251 = vmatpush.msrb.mxu0 %v2820_v0  ;;  %v3251_v0 = vld [vmem:[#allocation27_spill] sm:$0xff] }
 0x2e2   :  { %1394 = vmatpush.msrb.mxu1 %v2694_v7  ;;  %1414 = vmatpush.msrb.mxu2 %v3244_v20  ;;  %v3250_v7 = vld [vmem:[#allocation26_spill] sm:$0xff] }
 0x2e3   :  { %1252 = vmatpush.msrb.mxu0 %v2825_v33 }
 0x2e4   :  { %1395 = vmatpush.msrb.mxu1 %v3246_v18  ;;  %1415 = vmatpush.msrb.mxu2 %v3247_v41 }
 0x341   :  { %v848_v51 = vpop.f32.mrf.mxu0  ;;  %v868_v59 = vpop.f32.mrf.mxu1 }
 0x342   :  { %v849_v4 = vadd.f32 %v848_v51, %v3248_v9  ;;  %v869_v21 = vadd.f32 %v868_v59, %v3249_v3 }
 0x344   :  { %v892_v39 = vrot.slane %v849_v4, 5  ;;  %v893_v16 = vrot.slane %v849_v4, 6  ;;  %v937_v61 = vrot.slane %v869_v21, 5  ;;  %v938_v2 = vrot.slane %v869_v21, 6 }
 0x346   :  { %v896_v20 = vadd.f32 %v892_v39, %v3250_v7  ;;  %v897_v50 = vadd.f32 %v893_v16, %v3251_v0  ;;  %v941_v33 = vadd.f32 %v937_v61, %v3252_v55  ;;  %v942_v18 = vadd.f32 %v938_v2, %v3253_v30 }
 0x348   :  { %v1759_v5 = vmul.f32 -1.442695, %v896_v20  ;;  %v1760_v41 = vmul.f32 -1.442695, %v897_v50  ;;  %v1761_v47 = vmul.f32 -1.442695, %v941_v33  ;;  %v888_v50 = vpop.f32.mrf.mxu2 }
 0x349   :  { %v1762_v14 = vmul.f32 -1.442695, %v942_v18 }
 0x34a   :  { %1852 = vpow2.f32 %v1759_v5  ;;  %v3254_v5 = vld [vmem:[#allocation31_spill] sm:$0xff] }
 0x34b   :  { %1854 = vpow2.f32 %v1760_v41 }
 0x34c   :  { %1856 = vpow2.f32 %v1761_v47  ;;  %v889_v47 = vadd.f32 %v888_v50, %v3254_v5 }
 0x34d   :  { %1858 = vpow2.f32 %v1762_v14 }
 0x34e   :  { %v982_v0 = vrot.slane %v889_v47, 5  ;;  %v983_v8 = vrot.slane %v889_v47, 6  ;;  %v996_v47 = vrot.slane %v2733_v45, 7 }
 0x350   :  { %v1853_v51 = vpop.eup %1852 }
 0x351   :  { %v1855_v59 = vpop.eup %1854  ;;  %v904_v4 = vadd.f32 1.0, %v1853_v51 }
 0x352   :  { %v1857_v21 = vpop.eup %1856  ;;  %v905_v9 = vadd.f32 1.0, %v1855_v59 }
 0x353   :  { %v1859_v39 = vpop.eup %1858  ;;  %1860 = vrcp.f32 %v904_v4  ;;  %v2836_v16 = vadd.f32 1.0, %v1857_v21  ;;  %v915_v21 = vand.u32 2147483647, %v904_v4  ;;  %v917_v7 = vand.u32 2147483648, %v904_v4 }
 0x354   :  { %1862 = vrcp.f32 %v905_v9  ;;  %v2838_v61 = vadd.f32 1.0, %v1859_v39  ;;  %v930_v55 = vand.u32 2147483647, %v905_v9  ;;  %v932_v50 = vand.u32 2147483648, %v905_v9 }
 0x355   :  { %1864 = vrcp.f32 %v2836_v16  ;;  %vm911_vm11 = vweird.f32 %v904_v4  ;;  %vm926_vm12 = vweird.f32 %v905_v9  ;;  %v918_v49 = vor.u32 1.1754944e-38, %v917_v7 }
 0x356   :  { %1866 = vrcp.f32 %v2838_v61  ;;  %vm916_vm14 = vcmp.eq.f32.partialorder %v915_v21, 8.507059e+37  ;;  %vm931_vm0 = vcmp.eq.f32.partialorder %v930_v55, 8.507059e+37  ;;  %vm956_vm3 = vweird.f32 %v2836_v16 }
 0x357   :  { %v960_v7 = vand.u32 2147483647, %v2836_v16  ;;  %vm971_vm5 = vweird.f32 %v2838_v61 }
 0x359   :  { %v1861_v14 = vpop.eup %1860  ;;  %vm961_vm8 = vcmp.eq.f32.partialorder %v960_v7, 8.507059e+37 }
 0x35a   :  { %v1863_v20 = vpop.eup %1862  ;;  %v907_v33 = vmul.f32 %v1861_v14, %v904_v4  ;;  %vm912_vm9 = vweird.f32 %v1861_v14 }
 0x35b   :  { %v1865_v18 = vpop.eup %1864  ;;  %v922_v41 = vmul.f32 %v1863_v20, %v905_v9  ;;  %vm927_vm10 = vweird.f32 %v1863_v20  ;;  %vm913_vm13 = vmor %vm911_vm11, %vm912_vm9  ;;  %v977_v9 = vand.u32 2147483648, %v2838_v61 }
 0x35c   :  { %v1867_v2 = vpop.eup %1866  ;;  %v952_v51 = vmul.f32 %v1865_v18, %v2836_v16  ;;  %v908_v59 = vsub.f32 1.0, %v907_v33  ;;  %v962_v33 = vand.u32 2147483648, %v2836_v16  ;;  %vm928_vm15 = vmor %vm926_vm12, %vm927_vm10  ;;  %vm957_vm1 = vweird.f32 %v1865_v18 }
 0x35d   :  { %v967_v39 = vmul.f32 %v1867_v2, %v2838_v61  ;;  %v923_v30 = vsub.f32 1.0, %v922_v41  ;;  %vm972_vm2 = vweird.f32 %v1867_v2  ;;  %vm958_vm4 = vmor %vm956_vm3, %vm957_vm1 }
 0x35e   :  { %v953_v3 = vsub.f32 1.0, %v952_v51  ;;  %v909_v35 = vmul.f32 %v1861_v14, %v908_v59  ;;  %v933_v51 = vor.u32 1.1754944e-38, %v932_v50  ;;  %vm973_vm7 = vmor %vm971_vm5, %vm972_vm2  ;;  %v963_v55 = vor.u32 1.1754944e-38, %v962_v33 }
 0x35f   :  { %v968_v5 = vsub.f32 1.0, %v967_v39  ;;  %v924_v44 = vmul.f32 %v1863_v20, %v923_v30 }
 0x360   :  { %v954_v29 = vmul.f32 %v1865_v18, %v953_v3  ;;  %v910_v43 = vadd.f32 %v1861_v14, %v909_v35 }
 0x361   :  { %v969_v15 = vmul.f32 %v1867_v2, %v968_v5  ;;  %v925_v40 = vadd.f32 %v1863_v20, %v924_v44 }
 0x362   :  { %v914_v41 = vsel %vm913_vm13, %v1861_v14, %v910_v43  ;;  %v955_v39 = vadd.f32 %v1865_v18, %v954_v29  ;;  %v975_v43 = vand.u32 2147483647, %v2838_v61 }
 0x363   :  { %v919_v59 = vsel %vm916_vm14, %v918_v49, %v914_v41  ;;  %v929_v30 = vsel %vm928_vm15, %v1863_v20, %v925_v40  ;;  %v970_v35 = vadd.f32 %v1867_v2, %v969_v15  ;;  %v997_v20 = vrot.slane %v2735_v57, 7 }
 0x364   :  { %v934_v3 = vsel %vm931_vm0, %v933_v51, %v929_v30  ;;  %v986_v4 = vmul.f32 %v982_v0, %v919_v59  ;;  %v959_v40 = vsel %vm958_vm4, %v1865_v18, %v955_v39  ;;  %v978_v0 = vor.u32 1.1754944e-38, %v977_v9  ;;  %v3275_v9 = vld [vmem:[#allocation28_spill] sm:$0xff] }
 0x365   :  { %v987_v44 = vmul.f32 %v983_v8, %v934_v3  ;;  %v974_v15 = vsel %vm973_vm7, %v1867_v2, %v970_v35  ;;  %v964_v5 = vsel %vm961_vm8, %v963_v55, %v959_v40  ;;  %vm976_vm9 = vcmp.eq.f32.partialorder %v975_v43, 8.507059e+37  ;;  %v3273_v3 = vld [vmem:[#allocation20_spill] sm:$0xff] }
 0x366   :  { %v988_v49 = vadd.f32 %v986_v4, %v2477_v13  ;;  %v979_v8 = vsel %vm976_vm9, %v978_v0, %v974_v15  ;;  %v992_v16 = vsub.f32 1.0, %v964_v5  ;;  %v1000_v50 = vmul.f32 %v996_v47, %v964_v5  ;;  %v3274_v35 = vld [vmem:[#allocation32_spill] sm:$0xff] }
 0x367   :  { %v989_v29 = vadd.f32 %v987_v44, %v2480_v6  ;;  %v993_v61 = vsub.f32 1.0, %v979_v8  ;;  %v1001_v33 = vmul.f32 %v997_v20, %v979_v8  ;;  %v3278_v8 = vld [vmem:[#allocation25_spill] sm:$0xff] }
 0x368   :  { %1868 = vtanh.f32 %v988_v49  ;;  %v3276_v49 = vld [vmem:[#allocation29_spill] sm:$0xff] }
 0x369   :  { %1870 = vtanh.f32 %v989_v29  ;;  %v3277_v29 = vld [vmem:[#allocation30_spill] sm:$0xff] }
 0x36e   :  { %v1869_v14 = vpop.eup %1868 }
 0x36f   :  { %v1871_v21 = vpop.eup %1870  ;;  %v994_v18 = vmul.f32 %v1869_v14, %v992_v16 }
 0x370   :  { %v995_v41 = vmul.f32 %v1871_v21, %v993_v61  ;;  %v3279_v61 = vld [vmem:[#allocation26_spill] sm:$0xff]  ;;  %v3280_v21 = vld [vmem:[#allocation27_spill] sm:$0xff] }
 0x371   :  { %v2855_v2 = vadd.f32 %v1000_v50, %v994_v18 }
 0x372   :  { %v2857_v51 = vadd.f32 %v1001_v33, %v995_v41 }
 0x373   :  { %v1004_v59 = vadd.f32 %v2855_v2, %v2337_v46  ;;  %v1010_v30 = vrot.slane %v2855_v2, 3 }
 0x374   :  { %v1005_v45 = vadd.f32 %v2857_v51, %v2355_v56  ;;  %v1011_v39 = vrot.slane %v2857_v51, 2 }
 0x375   :  { %1006 = vst [vmem:[%s3117_s5] sm:$0x8] %v1004_v59 }
 0x376   :  { %1007 = vst [vmem:[%s3117_s5 + $0x8] sm:$0x8] %v1005_v45  ;;  %v1012_v57 = vsel %vm467_vm6, %v1011_v39, %v1010_v30 }
 0x377   :  { %1030 = vmatmul.f32.vlgmr.msrb.gmra.mxu3 %v1012_v57  ;;  %1050 = vmatmul.f32.vlgmr.msra.gmra.mxu0 %v1012_v57 }
 0x378   :  { %1070 = vmatmul.f32.vlgmr.msra.gmra.mxu1 %v1012_v57  ;;  %1420 = vmatpush.msrb.mxu3 %v2750_v58 }
 0x379   :  { %1563 = vmatpush.msra.mxu0 %v2596_v42  ;;  %1583 = vmatpush.msra.mxu1 %v2599_v12  ;;  %v3255_v42 = vld [vmem:[#allocation16_spill] sm:$0xff]  ;;  %v3256_v12 = vld [vmem:[#allocation21_spill] sm:$0xff] }
 0x37a   :  { %1421 = vmatpush.msrb.mxu3 %v2755_v53 }
 0x37b   :  { %1564 = vmatpush.msra.mxu0 %v2603_v52  ;;  %1584 = vmatpush.msra.mxu1 %v2606_v10  ;;  %v3257_v52 = vld [vmem:[#allocation33_spill] sm:$0xff]  ;;  %v3258_v10 = vld [vmem:[#allocation12_spill] sm:$0xff] }
 0x37c   :  { %1422 = vmatpush.msrb.mxu3 %v2760_v1 }
 0x37d   :  { %1565 = vmatpush.msra.mxu0 %v2610_v19  ;;  %1585 = vmatpush.msra.mxu1 %v2613_v48  ;;  %v3259_v19 = vld [vmem:[#allocation17_spill] sm:$0xff]  ;;  %v3260_v48 = vld [vmem:[#allocation34_spill] sm:$0xff] }
 0x37e   :  { %1423 = vmatpush.msrb.mxu3 %v2765_v23 }
 0x37f   :  { %1566 = vmatpush.msra.mxu0 %v2617_v22  ;;  %1586 = vmatpush.msra.mxu1 %v2620_v36  ;;  %v3261_v22 = vld [vmem:[#allocation22_spill] sm:$0xff]  ;;  %v3262_v36 = vld [vmem:[#allocation13_spill] sm:$0xff] }
 0x380   :  { %1424 = vmatpush.msrb.mxu3 %v2770_v63 }
 0x381   :  { %1567 = vmatpush.msra.mxu0 %v2624_v25  ;;  %1587 = vmatpush.msra.mxu1 %v2627_v32  ;;  %v3263_v25 = vld [vmem:[#allocation35_spill] sm:$0xff]  ;;  %v3264_v32 = vld [vmem:[#allocation18_spill] sm:$0xff] }
 0x382   :  { %1425 = vmatpush.msrb.mxu3 %v2775_v17 }
 0x383   :  { %1568 = vmatpush.msra.mxu0 %v2631_v27  ;;  %1588 = vmatpush.msra.mxu1 %v2634_v60  ;;  %v3265_v27 = vld [vmem:[#allocation23_spill] sm:$0xff]  ;;  %v3266_v60 = vld [vmem:[#allocation36_spill] sm:$0xff] }
 0x384   :  { %1426 = vmatpush.msrb.mxu3 %v2780_v62 }
 0x385   :  { %1569 = vmatpush.msra.mxu0 %v2638_v31  ;;  %1589 = vmatpush.msra.mxu1 %v2641_v11  ;;  %v3267_v31 = vld [vmem:[#allocation14_spill] sm:$0xff]  ;;  %v3268_v11 = vld [vmem:[#allocation19_spill] sm:$0xff] }
 0x386   :  { %1427 = vmatpush.msrb.mxu3 %v2785_v37 }
 0x387   :  { %1570 = vmatpush.msra.mxu0 %v2645_v34  ;;  %1590 = vmatpush.msra.mxu1 %v2648_v24  ;;  %v3269_v34 = vld [vmem:[#allocation37_spill] sm:$0xff]  ;;  %v3270_v24 = vld [vmem:[#allocation24_spill] sm:$0xff] }
 0x388   :  { %1428 = vmatpush.msrb.mxu3 %v2790_v54 }
 0x389   :  { %1571 = vmatpush.msra.mxu0 %v2652_v38  ;;  %1591 = vmatpush.msra.mxu1 %v2655_v28  ;;  %v3271_v38 = vld [vmem:[#allocation15_spill] sm:$0xff]  ;;  %v3272_v28 = vld [vmem:[#allocation38_spill] sm:$0xff] }
 0x38a   :  { %1429 = vmatpush.msrb.mxu3 %v2795_v26 }
 0x38b   :  { %1572 = vmatpush.msra.mxu0 %v3255_v42  ;;  %1592 = vmatpush.msra.mxu1 %v3256_v12 }
 0x38c   :  { %1430 = vmatpush.msrb.mxu3 %v3257_v52 }
 0x38d   :  { %1573 = vmatpush.msra.mxu0 %v3258_v10  ;;  %1593 = vmatpush.msra.mxu1 %v3259_v19 }
 0x38e   :  { %1431 = vmatpush.msrb.mxu3 %v3260_v48 }
 0x38f   :  { %1574 = vmatpush.msra.mxu0 %v3261_v22  ;;  %1594 = vmatpush.msra.mxu1 %v3262_v36 }
 0x390   :  { %1432 = vmatpush.msrb.mxu3 %v3263_v25 }
 0x391   :  { %1575 = vmatpush.msra.mxu0 %v3264_v32  ;;  %1595 = vmatpush.msra.mxu1 %v3265_v27 }
 0x392   :  { %1433 = vmatpush.msrb.mxu3 %v3266_v60 }
 0x393   :  { %1576 = vmatpush.msra.mxu0 %v3267_v31  ;;  %1596 = vmatpush.msra.mxu1 %v3268_v11 }
 0x394   :  { %1434 = vmatpush.msrb.mxu3 %v3269_v34 }
 0x395   :  { %1577 = vmatpush.msra.mxu0 %v3270_v24  ;;  %1597 = vmatpush.msra.mxu1 %v3271_v38  ;;  %v3281_v38 = vld [vmem:[#allocation31_spill] sm:$0xff] }
 0x396   :  { %1435 = vmatpush.msrb.mxu3 %v3272_v28 }
 0x397   :  { %1578 = vmatpush.msra.mxu0 %v3273_v3  ;;  %1598 = vmatpush.msra.mxu1 %v3274_v35 }
 0x3f4   :  { %v1051_v4 = vpop.f32.mrf.mxu0 }
 0x3f5   :  { %v1052_v7 = vadd.f32 %v1051_v4, %v3275_v9  ;;  %v1071_v32 = vpop.f32.mrf.mxu1 }
 0x3f6   :  { %v1072_v3 = vadd.f32 %v1071_v32, %v3281_v38 }
 0x3f7   :  { %v1120_v44 = vrot.slane %v1052_v7, 4  ;;  %v1121_v43 = vrot.slane %v1052_v7, 5 }
 0x3f9   :  { %v1124_v40 = vadd.f32 %v1120_v44, %v3276_v49  ;;  %v1125_v55 = vadd.f32 %v1121_v43, %v3277_v29 }
 0x3fa   :  { %v1031_v15 = vpop.f32.mrf.mxu3 }
 0x3fb   :  { %v1765_v0 = vmul.f32 -1.442695, %v1124_v40  ;;  %v1766_v5 = vmul.f32 -1.442695, %v1125_v55  ;;  %v1032_v16 = vadd.f32 %v1031_v15, %v3278_v8 }
 0x3fd   :  { %1872 = vpow2.f32 %v1765_v0  ;;  %v1075_v47 = vrot.slane %v1032_v16, 4  ;;  %v1076_v14 = vrot.slane %v1032_v16, 5  ;;  %v1165_v16 = vrot.slane %v1072_v3, 4 }
 0x3fe   :  { %1874 = vpow2.f32 %v1766_v5 }
 0x3ff   :  { %v1079_v20 = vadd.f32 %v1075_v47, %v3279_v61  ;;  %v1080_v18 = vadd.f32 %v1076_v14, %v3280_v21 }
 0x401   :  { %v1763_v50 = vmul.f32 -1.442695, %v1079_v20  ;;  %v1764_v41 = vmul.f32 -1.442695, %v1080_v18  ;;  %v1166_v20 = vrot.slane %v1072_v3, 5 }
 0x403   :  { %v1873_v33 = vpop.eup %1872  ;;  %1876 = vpow2.f32 %v1763_v50 }
 0x404   :  { %v1875_v59 = vpop.eup %1874  ;;  %v2926_v30 = vadd.f32 1.0, %v1873_v33  ;;  %1878 = vpow2.f32 %v1764_v41 }
 0x405   :  { %v2928_v45 = vadd.f32 1.0, %v1875_v59 }
 0x406   :  { %1880 = vrcp.f32 %v2926_v30  ;;  %v1145_v50 = vand.u32 2147483648, %v2926_v30  ;;  %vm1139_vm4 = vweird.f32 %v2926_v30 }
 0x407   :  { %1882 = vrcp.f32 %v2928_v45  ;;  %vm1154_vm5 = vweird.f32 %v2928_v45 }
 0x409   :  { %v1877_v39 = vpop.eup %1876 }
 0x40a   :  { %v1879_v57 = vpop.eup %1878  ;;  %v1087_v42 = vadd.f32 1.0, %v1877_v39 }
 0x40b   :  { %v1088_v12 = vadd.f32 1.0, %v1879_v57 }
 0x40c   :  { %1884 = vrcp.f32 %v1087_v42  ;;  %v2932_v10 = vpop.eup %1880  ;;  %v1098_v44 = vand.u32 2147483647, %v1087_v42  ;;  %v1100_v43 = vand.u32 2147483648, %v1087_v42  ;;  %vm1094_vm12 = vweird.f32 %v1087_v42 }
 0x40d   :  { %1886 = vrcp.f32 %v1088_v12  ;;  %v2934_v19 = vpop.eup %1882  ;;  %v1135_v22 = vmul.f32 %v2932_v10, %v2926_v30  ;;  %v1113_v15 = vand.u32 2147483647, %v1088_v12  ;;  %v1115_v0 = vand.u32 2147483648, %v1088_v12 }
 0x40e   :  { %v1150_v36 = vmul.f32 %v2934_v19, %v2928_v45  ;;  %v1101_v41 = vor.u32 1.1754944e-38, %v1100_v43  ;;  %vm1109_vm14 = vweird.f32 %v1088_v12  ;;  %vm1099_vm15 = vcmp.eq.f32.partialorder %v1098_v44, 8.507059e+37 }
 0x40f   :  { %v1136_v24 = vsub.f32 1.0, %v1135_v22  ;;  %vm1114_vm1 = vcmp.eq.f32.partialorder %v1113_v15, 8.507059e+37  ;;  %v1116_v39 = vor.u32 1.1754944e-38, %v1115_v0  ;;  %vm1140_vm2 = vweird.f32 %v2932_v10 }
 0x410   :  { %v1151_v4 = vsub.f32 1.0, %v1150_v36  ;;  %vm1155_vm3 = vweird.f32 %v2934_v19  ;;  %vm1141_vm7 = vmor %vm1139_vm4, %vm1140_vm2 }
 0x411   :  { %v1137_v5 = vmul.f32 %v2932_v10, %v1136_v24  ;;  %v1143_v24 = vand.u32 2147483647, %v2926_v30  ;;  %vm1156_vm8 = vmor %vm1154_vm5, %vm1155_vm3 }
 0x412   :  { %v1885_v27 = vpop.eup %1884  ;;  %v1152_v14 = vmul.f32 %v2934_v19, %v1151_v4 }
 0x413   :  { %v1887_v31 = vpop.eup %1886  ;;  %v1090_v11 = vmul.f32 %v1885_v27, %v1087_v42  ;;  %vm1095_vm10 = vweird.f32 %v1885_v27  ;;  %v1138_v36 = vadd.f32 %v2932_v10, %v1137_v5  ;;  %vm1144_vm9 = vcmp.eq.f32.partialorder %v1143_v24, 8.507059e+37 }
 0x414   :  { %v1105_v35 = vmul.f32 %v1887_v31, %v1088_v12  ;;  %vm1110_vm11 = vweird.f32 %v1887_v31  ;;  %vm1096_vm13 = vmor %vm1094_vm12, %vm1095_vm10  ;;  %v1153_v42 = vadd.f32 %v2934_v19, %v1152_v14  ;;  %v1160_v12 = vand.u32 2147483648, %v2928_v45 }
 0x415   :  { %v1091_v7 = vsub.f32 1.0, %v1090_v11  ;;  %vm1111_vm0 = vmor %vm1109_vm14, %vm1110_vm11 }
 0x416   :  { %v1106_v40 = vsub.f32 1.0, %v1105_v35  ;;  %v1142_v35 = vsel %vm1141_vm7, %v2932_v10, %v1138_v36  ;;  %v1157_v44 = vsel %vm1156_vm8, %v2934_v19, %v1153_v42  ;;  %v1161_v43 = vor.u32 1.1754944e-38, %v1160_v12 }
 0x417   :  { %v1092_v55 = vmul.f32 %v1885_v27, %v1091_v7  ;;  %v1146_v7 = vor.u32 1.1754944e-38, %v1145_v50  ;;  %v1180_v10 = vrot.slane %v2857_v51, 7 }
 0x418   :  { %v1107_v47 = vmul.f32 %v1887_v31, %v1106_v40 }
 0x419   :  { %v1093_v18 = vadd.f32 %v1885_v27, %v1092_v55  ;;  %v1147_v30 = vsel %vm1144_vm9, %v1146_v7, %v1142_v35 }
 0x41a   :  { %v1108_v33 = vadd.f32 %v1887_v31, %v1107_v47  ;;  %v1175_v55 = vsub.f32 1.0, %v1147_v30 }
 0x41b   :  { %v1097_v59 = vsel %vm1096_vm13, %v1885_v27, %v1093_v18 }
 0x41c   :  { %v1102_v57 = vsel %vm1099_vm15, %v1101_v41, %v1097_v59  ;;  %v1112_v22 = vsel %vm1111_vm0, %v1887_v31, %v1108_v33  ;;  %v1158_v31 = vand.u32 2147483647, %v2928_v45  ;;  %v1179_v45 = vrot.slane %v2855_v2, 7 }
 0x41d   :  { %v1117_v32 = vsel %vm1114_vm1, %v1116_v39, %v1112_v22  ;;  %v1169_v11 = vmul.f32 %v1165_v16, %v1102_v57 }
 0x41e   :  { %v1170_v27 = vmul.f32 %v1166_v20, %v1117_v32  ;;  %vm1159_vm10 = vcmp.eq.f32.partialorder %v1158_v31, 8.507059e+37  ;;  %v1183_v47 = vmul.f32 %v1179_v45, %v1147_v30 }
 0x41f   :  { %v1171_v3 = vadd.f32 %v1169_v11, %v2477_v13  ;;  %v1162_v40 = vsel %vm1159_vm10, %v1161_v43, %v1157_v44 }
 0x420   :  { %v1172_v4 = vadd.f32 %v1170_v27, %v2480_v6  ;;  %v1176_v0 = vsub.f32 1.0, %v1162_v40  ;;  %v1184_v20 = vmul.f32 %v1180_v10, %v1162_v40 }
 0x421   :  { %1888 = vtanh.f32 %v1171_v3 }
 0x422   :  { %1890 = vtanh.f32 %v1172_v4 }
 0x427   :  { %v1889_v15 = vpop.eup %1888 }
 0x428   :  { %v1891_v5 = vpop.eup %1890  ;;  %v1177_v16 = vmul.f32 %v1889_v15, %v1175_v55 }
 0x429   :  { %v1178_v14 = vmul.f32 %v1891_v5, %v1176_v0 }
 0x42a   :  { %v2959_v19 = vadd.f32 %v1183_v47, %v1177_v16 }
 0x42b   :  { %v2961_v18 = vadd.f32 %v1184_v20, %v1178_v14 }
 0x42c   :  { %v1187_v50 = vadd.f32 %v2959_v19, %v2337_v46  ;;  %v1193_v41 = vrot.slane %v2959_v19, 4 }
 0x42d   :  { %v1188_v2 = vadd.f32 %v2961_v18, %v2355_v56  ;;  %v1194_v33 = vrot.slane %v2961_v18, 3 }
 0x42e   :  { %1189 = vst [vmem:[%s3117_s5] sm:$0x10] %v1187_v50 }
 0x42f   :  { %1190 = vst [vmem:[%s3117_s5 + $0x8] sm:$0x10] %v1188_v2  ;;  %v1195_v51 = vsel %vm467_vm6, %v1194_v33, %v1193_v41 }
 0x430   :  { %1213 = vmatmul.f32.vlgmr.msra.gmra.mxu2 %v1195_v51  ;;  %1233 = vmatmul.f32.vlgmr.msra.gmra.mxu3 %v1195_v51 }
 0x431   :  { %1253 = vmatmul.f32.vlgmr.msrb.gmra.mxu0 %v1195_v51  ;;  %1603 = vmatpush.msra.mxu2 %v2750_v58 }
 0x433   :  { %1604 = vmatpush.msra.mxu2 %v2755_v53 }
 0x435   :  { %1605 = vmatpush.msra.mxu2 %v2760_v1 }
 0x437   :  { %1606 = vmatpush.msra.mxu2 %v2765_v23 }
 0x439   :  { %1607 = vmatpush.msra.mxu2 %v2770_v63 }
 0x43b   :  { %1608 = vmatpush.msra.mxu2 %v2775_v17 }
 0x43d   :  { %1609 = vmatpush.msra.mxu2 %v2780_v62 }
 0x43f   :  { %1610 = vmatpush.msra.mxu2 %v2785_v37 }
 0x441   :  { %1611 = vmatpush.msra.mxu2 %v2790_v54 }
 0x443   :  { %1612 = vmatpush.msra.mxu2 %v2795_v26 }
 0x445   :  { %1613 = vmatpush.msra.mxu2 %v3257_v52 }
 0x447   :  { %1614 = vmatpush.msra.mxu2 %v3260_v48 }
 0x449   :  { %1615 = vmatpush.msra.mxu2 %v3263_v25 }
 0x44b   :  { %1616 = vmatpush.msra.mxu2 %v3266_v60 }
 0x44d   :  { %1617 = vmatpush.msra.mxu2 %v3269_v34 }
 0x44f   :  { %1618 = vmatpush.msra.mxu2 %v3272_v28 }
 0x4ae   :  { %v1254_v11 = vpop.f32.mrf.mxu0 }
 0x4af   :  { %v1255_v27 = vadd.f32 %v1254_v11, %v3281_v38  ;;  %v1362_v11 = vrot.slane %v2959_v19, 7 }
 0x4b1   :  { %v1348_v4 = vrot.slane %v1255_v27, 3  ;;  %v1349_v40 = vrot.slane %v1255_v27, 4  ;;  %v1363_v27 = vrot.slane %v2961_v18, 7 }
 0x4b3   :  { %v1214_v58 = vpop.f32.mrf.mxu2  ;;  %v1234_v53 = vpop.f32.mrf.mxu3 }
 0x4b4   :  { %v1215_v1 = vadd.f32 %v1214_v58, %v3278_v8  ;;  %v1235_v23 = vadd.f32 %v1234_v53, %v3275_v9 }
 0x4b6   :  { %v1258_v63 = vrot.slane %v1215_v1, 3  ;;  %v1259_v17 = vrot.slane %v1215_v1, 4  ;;  %v1303_v62 = vrot.slane %v1235_v23, 3  ;;  %v1304_v37 = vrot.slane %v1235_v23, 4 }
 0x4b8   :  { %v1262_v54 = vadd.f32 %v1258_v63, %v3279_v61  ;;  %v1263_v26 = vadd.f32 %v1259_v17, %v3280_v21  ;;  %v1307_v52 = vadd.f32 %v1303_v62, %v3276_v49  ;;  %v1308_v48 = vadd.f32 %v1304_v37, %v3277_v29 }
 0x4ba   :  { %v1767_v25 = vmul.f32 -1.442695, %v1262_v54  ;;  %v1768_v60 = vmul.f32 -1.442695, %v1263_v26  ;;  %v1769_v34 = vmul.f32 -1.442695, %v1307_v52 }
 0x4bb   :  { %v1770_v28 = vmul.f32 -1.442695, %v1308_v48 }
 0x4bc   :  { %1892 = vpow2.f32 %v1767_v25 }
 0x4bd   :  { %1894 = vpow2.f32 %v1768_v60 }
 0x4be   :  { %1896 = vpow2.f32 %v1769_v34 }
 0x4bf   :  { %1898 = vpow2.f32 %v1770_v28 }
 0x4c2   :  { %v1893_v59 = vpop.eup %1892 }
 0x4c3   :  { %v1895_v39 = vpop.eup %1894  ;;  %v1270_v57 = vadd.f32 1.0, %v1893_v59 }
 0x4c4   :  { %v1897_v22 = vpop.eup %1896  ;;  %v1271_v36 = vadd.f32 1.0, %v1895_v39 }
 0x4c5   :  { %v1899_v32 = vpop.eup %1898  ;;  %1900 = vrcp.f32 %v1270_v57  ;;  %v2998_v42 = vadd.f32 1.0, %v1897_v22  ;;  %v1281_v44 = vand.u32 2147483647, %v1270_v57  ;;  %v1283_v43 = vand.u32 2147483648, %v1270_v57 }
 0x4c6   :  { %1902 = vrcp.f32 %v1271_v36  ;;  %v3000_v12 = vadd.f32 1.0, %v1899_v32  ;;  %v1296_v45 = vand.u32 2147483647, %v1271_v36  ;;  %v1298_v15 = vand.u32 2147483648, %v1271_v36 }
 0x4c7   :  { %1904 = vrcp.f32 %v2998_v42  ;;  %vm1277_vm11 = vweird.f32 %v1270_v57  ;;  %vm1292_vm13 = vweird.f32 %v1271_v36  ;;  %vm1282_vm15 = vcmp.eq.f32.partialorder %v1281_v44, 8.507059e+37 }
 0x4c8   :  { %1906 = vrcp.f32 %v3000_v12  ;;  %v1284_v20 = vor.u32 1.1754944e-38, %v1283_v43  ;;  %vm1297_vm1 = vcmp.eq.f32.partialorder %v1296_v45, 8.507059e+37  ;;  %v1299_v2 = vor.u32 1.1754944e-38, %v1298_v15 }
 0x4c9   :  { %vm1322_vm3 = vweird.f32 %v2998_v42  ;;  %v1328_v53 = vand.u32 2147483648, %v2998_v42  ;;  %v1343_v26 = vand.u32 2147483648, %v3000_v12  ;;  %v1326_v52 = vand.u32 2147483647, %v2998_v42 }
 0x4ca   :  { %vm1337_vm7 = vweird.f32 %v3000_v12  ;;  %v1341_v25 = vand.u32 2147483647, %v3000_v12 }
 0x4cb   :  { %v1901_v24 = vpop.eup %1900  ;;  %v1329_v59 = vor.u32 1.1754944e-38, %v1328_v53  ;;  %vm1327_vm10 = vcmp.eq.f32.partialorder %v1326_v52, 8.507059e+37 }
 0x4cc   :  { %v1903_v31 = vpop.eup %1902  ;;  %v1273_v3 = vmul.f32 %v1901_v24, %v1270_v57  ;;  %vm1278_vm12 = vweird.f32 %v1901_v24  ;;  %v1344_v57 = vor.u32 1.1754944e-38, %v1343_v26 }
 0x4cd   :  { %v1288_v35 = vmul.f32 %v1903_v31, %v1271_v36  ;;  %v1905_v30 = vpop.eup %1904  ;;  %vm1293_vm14 = vweird.f32 %v1903_v31  ;;  %vm1279_vm0 = vmor %vm1277_vm11, %vm1278_vm12  ;;  %vm1342_vm11 = vcmp.eq.f32.partialorder %v1341_v25, 8.507059e+37 }
 0x4ce   :  { %v1274_v7 = vsub.f32 1.0, %v1273_v3  ;;  %v1907_v0 = vpop.eup %1906  ;;  %v1318_v5 = vmul.f32 %v1905_v30, %v2998_v42  ;;  %vm1294_vm2 = vmor %vm1292_vm13, %vm1293_vm14  ;;  %vm1323_vm4 = vweird.f32 %v1905_v30 }
 0x4cf   :  { %v1289_v55 = vsub.f32 1.0, %v1288_v35  ;;  %v1333_v47 = vmul.f32 %v1907_v0, %v3000_v12  ;;  %vm1338_vm5 = vweird.f32 %v1907_v0  ;;  %vm1324_vm8 = vmor %vm1322_vm3, %vm1323_vm4 }
 0x4d0   :  { %v1275_v10 = vmul.f32 %v1901_v24, %v1274_v7  ;;  %v1319_v50 = vsub.f32 1.0, %v1318_v5  ;;  %vm1339_vm9 = vmor %vm1337_vm7, %vm1338_vm5 }
 0x4d1   :  { %v1290_v16 = vmul.f32 %v1903_v31, %v1289_v55  ;;  %v1334_v33 = vsub.f32 1.0, %v1333_v47 }
 0x4d2   :  { %v1276_v14 = vadd.f32 %v1901_v24, %v1275_v10  ;;  %v1320_v58 = vmul.f32 %v1905_v30, %v1319_v50 }
 0x4d3   :  { %v1291_v41 = vadd.f32 %v1903_v31, %v1290_v16  ;;  %v1335_v63 = vmul.f32 %v1907_v0, %v1334_v33 }
 0x4d4   :  { %v1280_v51 = vsel %vm1279_vm0, %v1901_v24, %v1276_v14  ;;  %v1321_v37 = vadd.f32 %v1905_v30, %v1320_v58 }
 0x4d5   :  { %v1285_v1 = vsel %vm1282_vm15, %v1284_v20, %v1280_v51  ;;  %v1295_v23 = vsel %vm1294_vm2, %v1903_v31, %v1291_v41  ;;  %v1336_v48 = vadd.f32 %v1907_v0, %v1335_v63 }
 0x4d6   :  { %v1300_v17 = vsel %vm1297_vm1, %v1299_v2, %v1295_v23  ;;  %v1352_v62 = vmul.f32 %v1348_v4, %v1285_v1  ;;  %v1325_v34 = vsel %vm1324_vm8, %v1905_v30, %v1321_v37 }
 0x4d7   :  { %v1353_v54 = vmul.f32 %v1349_v40, %v1300_v17  ;;  %v1340_v39 = vsel %vm1339_vm9, %v1907_v0, %v1336_v48  ;;  %v1330_v22 = vsel %vm1327_vm10, %v1329_v59, %v1325_v34 }
 0x4d8   :  { %v1354_v60 = vadd.f32 %v1352_v62, %v2477_v13  ;;  %v1345_v36 = vsel %vm1342_vm11, %v1344_v57, %v1340_v39  ;;  %v1358_v32 = vsub.f32 1.0, %v1330_v22  ;;  %v1366_v3 = vmul.f32 %v1362_v11, %v1330_v22 }
 0x4d9   :  { %v1355_v28 = vadd.f32 %v1353_v54, %v2480_v6  ;;  %v1359_v12 = vsub.f32 1.0, %v1345_v36  ;;  %v1367_v4 = vmul.f32 %v1363_v27, %v1345_v36 }
 0x4da   :  { %1908 = vtanh.f32 %v1354_v60 }
 0x4db   :  { %1910 = vtanh.f32 %v1355_v28 }
 0x4e0   :  { %v1909_v42 = vpop.eup %1908 }
 0x4e1   :  { %v1911_v24 = vpop.eup %1910  ;;  %v1360_v31 = vmul.f32 %v1909_v42, %v1358_v32 }
 0x4e2   :  { %v1361_v35 = vmul.f32 %v1911_v24, %v1359_v12 }
 0x4e3   :  { %v3019_v7 = vadd.f32 %v1366_v3, %v1360_v31 }
 0x4e4   :  { %v3021_v44 = vadd.f32 %v1367_v4, %v1361_v35 }
 0x4e5   :  { %v1370_v43 = vadd.f32 %v3019_v7, %v2337_v46  ;;  %v1376_v30 = vrot.slane %v3019_v7, 5 }
 0x4e6   :  { %v1371_v19 = vadd.f32 %v3021_v44, %v2355_v56  ;;  %v1377_v40 = vrot.slane %v3021_v44, 4 }
 0x4e7   :  { %1372 = vst [vmem:[%s3117_s5] sm:$0x20] %v1370_v43 }
 0x4e8   :  { %1373 = vst [vmem:[%s3117_s5 + $0x8] sm:$0x20] %v1371_v19  ;;  %v1378_v18 = vsel %vm467_vm6, %v1377_v40, %v1376_v30 }
 0x4e9   :  { %1396 = vmatmul.f32.vlgmr.msrb.gmra.mxu1 %v1378_v18  ;;  %1416 = vmatmul.f32.vlgmr.msrb.gmra.mxu2 %v1378_v18 }
 0x4ea   :  { %1436 = vmatmul.f32.vlgmr.msrb.gmra.mxu3 %v1378_v18 }
 0x566   :  { %v1397_v55 = vpop.f32.mrf.mxu1 }
 0x567   :  { %v1398_v45 = vadd.f32 %v1397_v55, %v3278_v8 }
 0x569   :  { %v1441_v15 = vrot.slane %v1398_v45, 2  ;;  %v1442_v0 = vrot.slane %v1398_v45, 3 }
 0x56b   :  { %v1445_v10 = vadd.f32 %v1441_v15, %v3279_v61  ;;  %v1446_v5 = vadd.f32 %v1442_v0, %v3280_v21 }
 0x56c   :  { %v1417_v16 = vpop.f32.mrf.mxu2 }
 0x56d   :  { %v1771_v47 = vmul.f32 -1.442695, %v1445_v10  ;;  %v1772_v14 = vmul.f32 -1.442695, %v1446_v5  ;;  %v1418_v20 = vadd.f32 %v1417_v16, %v3275_v9  ;;  %v1437_v54 = vpop.f32.mrf.mxu3 }
 0x56e   :  { %v1438_v25 = vadd.f32 %v1437_v54, %v3281_v38 }
 0x56f   :  { %1912 = vpow2.f32 %v1771_v47  ;;  %v1486_v50 = vrot.slane %v1418_v20, 2  ;;  %v1487_v41 = vrot.slane %v1418_v20, 3 }
 0x570   :  { %1914 = vpow2.f32 %v1772_v14  ;;  %v1531_v11 = vrot.slane %v1438_v25, 2  ;;  %v1532_v27 = vrot.slane %v1438_v25, 3 }
 0x571   :  { %v1490_v2 = vadd.f32 %v1486_v50, %v3276_v49  ;;  %v1491_v33 = vadd.f32 %v1487_v41, %v3277_v29 }
 0x573   :  { %v1773_v51 = vmul.f32 -1.442695, %v1490_v2  ;;  %v1774_v58 = vmul.f32 -1.442695, %v1491_v33 }
 0x575   :  { %v1913_v53 = vpop.eup %1912  ;;  %1916 = vpow2.f32 %v1773_v51 }
 0x576   :  { %v1915_v1 = vpop.eup %1914  ;;  %v1453_v23 = vadd.f32 1.0, %v1913_v53  ;;  %1918 = vpow2.f32 %v1774_v58 }
 0x577   :  { %v1454_v63 = vadd.f32 1.0, %v1915_v1 }
 0x578   :  { %1920 = vrcp.f32 %v1453_v23  ;;  %v1464_v59 = vand.u32 2147483647, %v1453_v23  ;;  %v1466_v39 = vand.u32 2147483648, %v1453_v23  ;;  %vm1460_vm13 = vweird.f32 %v1453_v23 }
 0x579   :  { %1922 = vrcp.f32 %v1454_v63  ;;  %v1479_v22 = vand.u32 2147483647, %v1454_v63  ;;  %v1481_v32 = vand.u32 2147483648, %v1454_v63  ;;  %vm1475_vm0 = vweird.f32 %v1454_v63 }
 0x57a   :  { %vm1465_vm15 = vcmp.eq.f32.partialorder %v1464_v59, 8.507059e+37  ;;  %v1467_v4 = vor.u32 1.1754944e-38, %v1466_v39 }
 0x57b   :  { %v1917_v17 = vpop.eup %1916  ;;  %vm1480_vm2 = vcmp.eq.f32.partialorder %v1479_v22, 8.507059e+37  ;;  %v1482_v18 = vor.u32 1.1754944e-38, %v1481_v32 }
 0x57c   :  { %v1919_v62 = vpop.eup %1918  ;;  %v3042_v37 = vadd.f32 1.0, %v1917_v17 }
 0x57d   :  { %v3044_v26 = vadd.f32 1.0, %v1919_v62 }
 0x57e   :  { %v1921_v52 = vpop.eup %1920  ;;  %1924 = vrcp.f32 %v3042_v37  ;;  %v1511_v19 = vand.u32 2147483648, %v3042_v37  ;;  %v1509_v0 = vand.u32 2147483647, %v3042_v37  ;;  %vm1505_vm7 = vweird.f32 %v3042_v37 }
 0x57f   :  { %v1923_v48 = vpop.eup %1922  ;;  %1926 = vrcp.f32 %v3044_v26  ;;  %v1456_v60 = vmul.f32 %v1921_v52, %v1453_v23  ;;  %vm1461_vm12 = vweird.f32 %v1921_v52  ;;  %v1526_v14 = vand.u32 2147483648, %v3044_v26 }
 0x580   :  { %v1471_v34 = vmul.f32 %v1923_v48, %v1454_v63  ;;  %vm1476_vm14 = vweird.f32 %v1923_v48  ;;  %vm1462_vm1 = vmor %vm1460_vm13, %vm1461_vm12  ;;  %v1524_v41 = vand.u32 2147483647, %v3044_v26  ;;  %vm1520_vm9 = vweird.f32 %v3044_v26 }
 0x581   :  { %v1457_v28 = vsub.f32 1.0, %v1456_v60  ;;  %vm1477_vm3 = vmor %vm1475_vm0, %vm1476_vm14  ;;  %v1512_v58 = vor.u32 1.1754944e-38, %v1511_v19  ;;  %v1527_v1 = vor.u32 1.1754944e-38, %v1526_v14  ;;  %vm1510_vm11 = vcmp.eq.f32.partialorder %v1509_v0, 8.507059e+37 }
 0x582   :  { %v1472_v57 = vsub.f32 1.0, %v1471_v34  ;;  %vm1525_vm12 = vcmp.eq.f32.partialorder %v1524_v41, 8.507059e+37 }
 0x583   :  { %v1458_v36 = vmul.f32 %v1921_v52, %v1457_v28 }
 0x584   :  { %v1925_v42 = vpop.eup %1924  ;;  %v1473_v12 = vmul.f32 %v1923_v48, %v1472_v57 }
 0x585   :  { %v1927_v24 = vpop.eup %1926  ;;  %v1501_v31 = vmul.f32 %v1925_v42, %v3042_v37  ;;  %v1459_v3 = vadd.f32 %v1921_v52, %v1458_v36  ;;  %vm1506_vm4 = vweird.f32 %v1925_v42  ;;  %v1545_v37 = vrot.slane %v3019_v7, 7 }
 0x586   :  { %v1516_v35 = vmul.f32 %v1927_v24, %v3044_v26  ;;  %v1474_v43 = vadd.f32 %v1923_v48, %v1473_v12  ;;  %vm1521_vm5 = vweird.f32 %v1927_v24  ;;  %vm1507_vm8 = vmor %vm1505_vm7, %vm1506_vm4  ;;  %v1546_v26 = vrot.slane %v3021_v44, 7 }
 0x587   :  { %v1502_v30 = vsub.f32 1.0, %v1501_v31  ;;  %v1463_v40 = vsel %vm1462_vm1, %v1921_v52, %v1459_v3  ;;  %vm1522_vm10 = vmor %vm1520_vm9, %vm1521_vm5 }
 0x588   :  { %v1517_v55 = vsub.f32 1.0, %v1516_v35  ;;  %v1468_v45 = vsel %vm1465_vm15, %v1467_v4, %v1463_v40  ;;  %v1478_v15 = vsel %vm1477_vm3, %v1923_v48, %v1474_v43 }
 0x589   :  { %v1503_v10 = vmul.f32 %v1925_v42, %v1502_v30  ;;  %v1483_v5 = vsel %vm1480_vm2, %v1482_v18, %v1478_v15  ;;  %v1535_v16 = vmul.f32 %v1531_v11, %v1468_v45 }
 0x58a   :  { %v1518_v47 = vmul.f32 %v1927_v24, %v1517_v55  ;;  %v1536_v20 = vmul.f32 %v1532_v27, %v1483_v5 }
 0x58b   :  { %v1504_v50 = vadd.f32 %v1925_v42, %v1503_v10  ;;  %v1537_v2 = vadd.f32 %v1535_v16, %v2477_v13 }
 0x58c   :  { %v1519_v33 = vadd.f32 %v1927_v24, %v1518_v47  ;;  %v1538_v51 = vadd.f32 %v1536_v20, %v2480_v6 }
 0x58d   :  { %v1508_v53 = vsel %vm1507_vm8, %v1925_v42, %v1504_v50  ;;  %1928 = vtanh.f32 %v1537_v2 }
 0x58e   :  { %v1523_v23 = vsel %vm1522_vm10, %v1927_v24, %v1519_v33  ;;  %1930 = vtanh.f32 %v1538_v51  ;;  %v1513_v63 = vsel %vm1510_vm11, %v1512_v58, %v1508_v53 }
 0x58f   :  { %v1528_v17 = vsel %vm1525_vm12, %v1527_v1, %v1523_v23  ;;  %v1541_v62 = vsub.f32 1.0, %v1513_v63  ;;  %v1549_v60 = vmul.f32 %v1545_v37, %v1513_v63 }
 0x590   :  { %v1542_v52 = vsub.f32 1.0, %v1528_v17  ;;  %v1550_v28 = vmul.f32 %v1546_v26, %v1528_v17 }
 0x593   :  { %v1929_v54 = vpop.eup %1928 }
 0x594   :  { %v1931_v48 = vpop.eup %1930  ;;  %v1543_v25 = vmul.f32 %v1929_v54, %v1541_v62 }
 0x595   :  { %v1544_v34 = vmul.f32 %v1931_v48, %v1542_v52 }
 0x596   :  { %v3062_v59 = vadd.f32 %v1549_v60, %v1543_v25 }
 0x597   :  { %v3064_v39 = vadd.f32 %v1550_v28, %v1544_v34 }
 0x598   :  { %v1553_v57 = vadd.f32 %v3062_v59, %v2337_v46  ;;  %v1559_v22 = vrot.slane %v3062_v59, 6 }
 0x599   :  { %v1554_v7 = vadd.f32 %v3064_v39, %v2355_v56  ;;  %v1560_v36 = vrot.slane %v3064_v39, 5 }
 0x59a   :  { %1555 = vst [vmem:[%s3117_s5] sm:$0x40] %v1553_v57 }
 0x59b   :  { %1556 = vst [vmem:[%s3117_s5 + $0x8] sm:$0x40] %v1554_v7  ;;  %v1561_v44 = vsel %vm467_vm6, %v1560_v36, %v1559_v22 }
 0x59c   :  { %1579 = vmatmul.f32.vlgmr.msra.gmra.mxu0 %v1561_v44  ;;  %1599 = vmatmul.f32.vlgmr.msra.gmra.mxu1 %v1561_v44 }
 0x59d   :  { %1619 = vmatmul.f32.vlgmr.msra.gmra.mxu2 %v1561_v44 }
 0x619   :  { %v1580_v32 = vpop.f32.mrf.mxu0  ;;  %v1600_v11 = vpop.f32.mrf.mxu1 }
 0x61a   :  { %v1581_v42 = vadd.f32 %v1580_v32, %v3278_v8  ;;  %v1601_v12 = vadd.f32 %v1600_v11, %v3275_v9 }
 0x61c   :  { %v1624_v27 = vrot.slane %v1581_v42, 1  ;;  %v1625_v24 = vrot.slane %v1581_v42, 2  ;;  %v1669_v31 = vrot.slane %v1601_v12, 1  ;;  %v1670_v3 = vrot.slane %v1601_v12, 2 }
 0x61e   :  { %v1628_v35 = vadd.f32 %v1624_v27, %v3279_v61  ;;  %v1629_v4 = vadd.f32 %v1625_v24, %v3280_v21  ;;  %v1673_v43 = vadd.f32 %v1669_v31, %v3276_v49  ;;  %v1674_v30 = vadd.f32 %v1670_v3, %v3277_v29 }
 0x620   :  { %v1775_v19 = vmul.f32 -1.442695, %v1628_v35  ;;  %v1776_v40 = vmul.f32 -1.442695, %v1629_v4  ;;  %v1777_v18 = vmul.f32 -1.442695, %v1673_v43  ;;  %v1620_v29 = vpop.f32.mrf.mxu2 }
 0x621   :  { %v1778_v55 = vmul.f32 -1.442695, %v1674_v30  ;;  %v1621_v10 = vadd.f32 %v1620_v29, %v3281_v38 }
 0x622   :  { %1932 = vpow2.f32 %v1775_v19 }
 0x623   :  { %1934 = vpow2.f32 %v1776_v40  ;;  %v1714_v51 = vrot.slane %v1621_v10, 1  ;;  %v1715_v54 = vrot.slane %v1621_v10, 2 }
 0x624   :  { %1936 = vpow2.f32 %v1777_v18  ;;  %v1728_v18 = vrot.slane %v3062_v59, 7 }
 0x625   :  { %1938 = vpow2.f32 %v1778_v55 }
 0x628   :  { %v1933_v9 = vpop.eup %1932 }
 0x629   :  { %v1935_v8 = vpop.eup %1934  ;;  %v1636_v45 = vadd.f32 1.0, %v1933_v9 }
 0x62a   :  { %v1937_v15 = vpop.eup %1936  ;;  %v1637_v0 = vadd.f32 1.0, %v1935_v8  ;;  %v1729_v8 = vrot.slane %v3064_v39, 7 }
 0x62b   :  { %v1939_v61 = vpop.eup %1938  ;;  %1940 = vrcp.f32 %v1636_v45  ;;  %v3085_v21 = vadd.f32 1.0, %v1937_v15  ;;  %v1647_v33 = vand.u32 2147483647, %v1636_v45  ;;  %v1649_v53 = vand.u32 2147483648, %v1636_v45 }
 0x62c   :  { %1942 = vrcp.f32 %v1637_v0  ;;  %v3087_v49 = vadd.f32 1.0, %v1939_v61  ;;  %v1662_v23 = vand.u32 2147483647, %v1637_v0  ;;  %v1664_v38 = vand.u32 2147483648, %v1637_v0 }
 0x62d   :  { %1944 = vrcp.f32 %v3085_v21  ;;  %vm1643_vm14 = vweird.f32 %v1636_v45  ;;  %vm1658_vm15 = vweird.f32 %v1637_v0  ;;  %v1694_v48 = vand.u32 2147483648, %v3085_v21 }
 0x62e   :  { %1946 = vrcp.f32 %v3087_v49  ;;  %v1650_v60 = vor.u32 1.1754944e-38, %v1649_v53  ;;  %vm1648_vm1 = vcmp.eq.f32.partialorder %v1647_v33, 8.507059e+37  ;;  %vm1663_vm3 = vcmp.eq.f32.partialorder %v1662_v23, 8.507059e+37 }
 0x62f   :  { %v1665_v57 = vor.u32 1.1754944e-38, %v1664_v38  ;;  %vm1688_vm7 = vweird.f32 %v3085_v21  ;;  %v1709_v42 = vand.u32 2147483648, %v3087_v49  ;;  %v1692_v12 = vand.u32 2147483647, %v3085_v21 }
 0x630   :  { %vm1703_vm9 = vweird.f32 %v3087_v49  ;;  %v1707_v24 = vand.u32 2147483647, %v3087_v49  ;;  %v1695_v4 = vor.u32 1.1754944e-38, %v1694_v48 }
 0x631   :  { %v1941_v5 = vpop.eup %1940  ;;  %v1710_v30 = vor.u32 1.1754944e-38, %v1709_v42  ;;  %vm1693_vm11 = vcmp.eq.f32.partialorder %v1692_v12, 8.507059e+37 }
 0x632   :  { %v1943_v16 = vpop.eup %1942  ;;  %v1639_v47 = vmul.f32 %v1941_v5, %v1636_v45  ;;  %vm1644_vm6 = vweird.f32 %v1941_v5  ;;  %vm1708_vm12 = vcmp.eq.f32.partialorder %v1707_v24, 8.507059e+37 }
 0x633   :  { %v1945_v14 = vpop.eup %1944  ;;  %v1654_v20 = vmul.f32 %v1943_v16, %v1637_v0  ;;  %vm1659_vm13 = vweird.f32 %v1943_v16  ;;  %vm1645_vm0 = vmor %vm1643_vm14, %vm1644_vm6 }
 0x634   :  { %v1947_v50 = vpop.eup %1946  ;;  %v1684_v41 = vmul.f32 %v1945_v14, %v3085_v21  ;;  %v1640_v2 = vsub.f32 1.0, %v1639_v47  ;;  %vm1660_vm2 = vmor %vm1658_vm15, %vm1659_vm13  ;;  %vm1689_vm4 = vweird.f32 %v1945_v14 }
 0x635   :  { %v1699_v58 = vmul.f32 %v1947_v50, %v3087_v49  ;;  %v1655_v1 = vsub.f32 1.0, %v1654_v20  ;;  %vm1704_vm5 = vweird.f32 %v1947_v50  ;;  %vm1690_vm8 = vmor %vm1688_vm7, %vm1689_vm4 }
 0x636   :  { %v1685_v63 = vsub.f32 1.0, %v1684_v41  ;;  %v1641_v17 = vmul.f32 %v1941_v5, %v1640_v2  ;;  %vm1705_vm10 = vmor %vm1703_vm9, %vm1704_vm5 }
 0x637   :  { %v1700_v62 = vsub.f32 1.0, %v1699_v58  ;;  %v1656_v37 = vmul.f32 %v1943_v16, %v1655_v1 }
 0x638   :  { %v1686_v52 = vmul.f32 %v1945_v14, %v1685_v63  ;;  %v1642_v26 = vadd.f32 %v1941_v5, %v1641_v17 }
 0x639   :  { %v1701_v25 = vmul.f32 %v1947_v50, %v1700_v62  ;;  %v1657_v34 = vadd.f32 %v1943_v16, %v1656_v37 }
 0x63a   :  { %v1646_v28 = vsel %vm1645_vm0, %v1941_v5, %v1642_v26  ;;  %v1687_v36 = vadd.f32 %v1945_v14, %v1686_v52 }
 0x63b   :  { %v1651_v22 = vsel %vm1648_vm1, %v1650_v60, %v1646_v28  ;;  %v1661_v7 = vsel %vm1660_vm2, %v1943_v16, %v1657_v34  ;;  %v1702_v32 = vadd.f32 %v1947_v50, %v1701_v25 }
 0x63c   :  { %v1666_v44 = vsel %vm1663_vm3, %v1665_v57, %v1661_v7  ;;  %v1718_v11 = vmul.f32 %v1714_v51, %v1651_v22  ;;  %v1691_v3 = vsel %vm1690_vm8, %v1945_v14, %v1687_v36 }
 0x63d   :  { %v1719_v27 = vmul.f32 %v1715_v54, %v1666_v44  ;;  %v1706_v43 = vsel %vm1705_vm10, %v1947_v50, %v1702_v32  ;;  %v1696_v19 = vsel %vm1693_vm11, %v1695_v4, %v1691_v3 }
 0x63e   :  { %v1720_v31 = vadd.f32 %v1718_v11, %v2477_v13  ;;  %v1711_v40 = vsel %vm1708_vm12, %v1710_v30, %v1706_v43  ;;  %v1724_v55 = vsub.f32 1.0, %v1696_v19  ;;  %v1732_v0 = vmul.f32 %v1728_v18, %v1696_v19 }
 0x63f   :  { %v1721_v35 = vadd.f32 %v1719_v27, %v2480_v6  ;;  %v1725_v13 = vsub.f32 1.0, %v1711_v40  ;;  %v1733_v61 = vmul.f32 %v1729_v8, %v1711_v40 }
 0x640   :  { %1948 = vtanh.f32 %v1720_v31 }
 0x641   :  { %1950 = vtanh.f32 %v1721_v35 }
 0x646   :  { %v1949_v9 = vpop.eup %1948 }
 0x647   :  { %v1951_v45 = vpop.eup %1950  ;;  %v1726_v15 = vmul.f32 %v1949_v9, %v1724_v55 }
 0x648   :  { %v1727_v6 = vmul.f32 %v1951_v45, %v1725_v13 }
 0x649   :  { %v1734_v21 = vadd.f32 %v1732_v0, %v1726_v15 }
 0x64a   :  { %v1735_v49 = vadd.f32 %v1733_v61, %v1727_v6 }
 0x64b   :  { %v1736_v29 = vadd.f32 %v1734_v21, %v2337_v46 }
 0x64c   :  { %v1737_v10 = vadd.f32 %v1735_v49, %v2355_v56 }
 0x64d   :  { %1738 = vst [vmem:[%s3117_s5] sm:$0x80] %v1736_v29 }
 0x64e   :  { %1739 = vst [vmem:[%s3117_s5 + $0x8] sm:$0x80] %v1737_v10 }
 0x64f   :  { %1744 = vsyncpa [#allocation3], 1 }
 0x650   :  { %1745 = vsyncpa [#allocation5], 1 }
 0x651   :  { %1746 = vsyncpa [#allocation8], 1 }

</bundles_post_ra>
